<compile_context>
chip_gen: v7x
topology: tpu7x:2x2x1
jax: 0.10.0
libtpu: 0.0.40
codegen_flags: <defaults>
</compile_context>

<pallas_src>
import jax
import jax.numpy as jnp
import numpy as np
from jax import lax
from jax.experimental import pallas as pl
from jax.experimental.pallas import tpu as pltpu

POS = 625                 # 25*25 pooled positions
POS_PAD = 640             # padded to 5*128 lanes
NPOOL = 4                 # 2x2 pool offsets
C_OUT = 32                # conv channels
KP = C_OUT * POS_PAD      # 20480 fc1 input features (padded, multiple of 128)
N1 = 256                  # fc1 width
NCLS = 2                  # classes


def _detect_nsplit():
    # Split fc1 columns across TensorCores only where there are 2 TCs (v7x).
    try:
        kind = jax.devices()[0].device_kind.lower()
    except Exception:
        return 1
    return 2 if "v7" in kind else 1


NSPLIT = _detect_nsplit()


def _pick_batch_block(B, cap=8):
    # >=2 grid steps whenever B>=2 so the 'parallel' batch axis can use both
    # TensorCores on v7x; block capped so patch tiles stay small in VMEM.
    target = max(1, min(cap, B // 2)) if B >= 2 else 1
    bb = target
    while B % bb:
        bb -= 1
    return max(bb, 1)


# -----------------------------------------------------------------------------
# Kernel 1: conv(1->32, 3x3, pad=1) + maxpool(2,2) + bias + ReLU.
# patches_ref: (bb, 9, 2560) f32   wc_ref: (32, 9) f32   bc_ref: (32, 1) f32
# out_ref:     (bb, 32, 640) bf16  channel-major, lane-dense pooled activations
# -----------------------------------------------------------------------------
def _conv_pool_kernel(patches_ref, wc_ref, bc_ref, out_ref):
    wc = wc_ref[...]                         # (32, 9)
    bc = bc_ref[...]                         # (32, 1)

    def body(i, carry):
        c = jnp.dot(wc, patches_ref[i],
                    preferred_element_type=jnp.float32)               # (32, 2560)
        r = jnp.maximum(
            jnp.maximum(c[:, 0 * POS_PAD:1 * POS_PAD], c[:, 1 * POS_PAD:2 * POS_PAD]),
            jnp.maximum(c[:, 2 * POS_PAD:3 * POS_PAD], c[:, 3 * POS_PAD:4 * POS_PAD]))
        out_ref[i] = jnp.maximum(r + bc, 0.0).astype(out_ref.dtype)   # bias+ReLU once, post-max
        return carry

    lax.fori_loop(0, patches_ref.shape[0], body, 0, unroll=True)


def conv_relu_pool(patches, wc, bc):
    B = patches.shape[0]
    bb = _pick_batch_block(B)
    cost = pl.CostEstimate(
        flops=2 * B * C_OUT * 9 * NPOOL * POS_PAD,
        transcendentals=0,
        bytes_accessed=4 * B * 9 * NPOOL * POS_PAD + 2 * B * C_OUT * POS_PAD + 4 * C_OUT * 10,
    )
    return pl.pallas_call(
        _conv_pool_kernel,
        out_shape=jax.ShapeDtypeStruct((B, C_OUT, POS_PAD), jnp.bfloat16),
        grid_spec=pltpu.PrefetchScalarGridSpec(
            num_scalar_prefetch=0,
            grid=(B // bb,),
            in_specs=[
                pl.BlockSpec((bb, 9, NPOOL * POS_PAD), lambda b: (b, 0, 0)),
                pl.BlockSpec((C_OUT, 9), lambda b: (0, 0)),
                pl.BlockSpec((C_OUT, 1), lambda b: (0, 0)),
            ],
            out_specs=pl.BlockSpec((bb, C_OUT, POS_PAD), lambda b: (b, 0, 0)),
        ),
        compiler_params=pltpu.CompilerParams(dimension_semantics=("parallel",)),
        cost_estimate=cost,
    )(patches, wc, bc)


# -----------------------------------------------------------------------------
# Kernel 2a (NSPLIT=1, v5e/v6e): fc1 K-tiled accumulate + fused bias/ReLU/fc2/
# bias/softmax epilogue on the last K step.  Grid = (K tiles,), 'arbitrary'.
# x_ref:(B,tk) bf16  w1_ref:(1,tk,256) bf16  b1_ref:(1,1,256) f32
# w2_ref:(1,256,2) f32  b2_ref:(1,2) f32  out_ref:(B,2) f32  acc_ref: VMEM (B,256) f32
# -----------------------------------------------------------------------------
def _fc_softmax_kernel(x_ref, w1_ref, b1_ref, w2_ref, b2_ref, out_ref, acc_ref):
    k = pl.program_id(0)

    @pl.when(k == 0)
    def _():
        acc_ref[...] = jnp.zeros_like(acc_ref)

    acc_ref[...] += jnp.dot(x_ref[...], w1_ref[0],
                            preferred_element_type=jnp.float32)

    @pl.when(k == pl.num_programs(0) - 1)
    def _():
        h = jnp.maximum(acc_ref[...] + b1_ref[0], 0.0)                     # (B, 256)
        logits = jnp.dot(h, w2_ref[0],
                         preferred_element_type=jnp.float32) + b2_ref[...]  # (B, 2)
        m = jnp.max(logits, axis=-1, keepdims=True)
        e = jnp.exp(logits - m)
        out_ref[...] = e / jnp.sum(e, axis=-1, keepdims=True)


def fc_softmax_fused(x, w1, b1, w2, b2, *, tk=10240):
    B = x.shape[0]
    nh = w1.shape[2]
    assert x.shape[1] == KP and KP % tk == 0 and w1.shape[0] == 1 and nh == N1
    # TODO(synk): add a batch (M) grid axis before scaling B so the x tile and
    # acc scratch stop growing with B (irrelevant at B=2).
    cost = pl.CostEstimate(
        flops=2 * B * KP * N1 + 2 * B * N1 * NCLS,
        transcendentals=B * NCLS,
        bytes_accessed=2 * KP * N1 + 2 * B * KP + 4 * (N1 + N1 * NCLS + NCLS + B * NCLS),
    )
    return pl.pallas_call(
        _fc_softmax_kernel,
        out_shape=jax.ShapeDtypeStruct((B, NCLS), jnp.float32),
        grid_spec=pltpu.PrefetchScalarGridSpec(
            num_scalar_prefetch=0,
            grid=(KP // tk,),
            in_specs=[
                pl.BlockSpec((B, tk), lambda k: (0, k)),
                pl.BlockSpec((1, tk, nh), lambda k: (0, k, 0)),
                pl.BlockSpec((1, 1, nh), lambda k: (0, 0, 0)),
                pl.BlockSpec((1, nh, NCLS), lambda k: (0, 0, 0)),
                pl.BlockSpec((1, NCLS), lambda k: (0, 0)),
            ],
            out_specs=pl.BlockSpec((B, NCLS), lambda k: (0, 0)),
            scratch_shapes=[pltpu.VMEM((B, nh), jnp.float32)],
        ),
        compiler_params=pltpu.CompilerParams(dimension_semantics=("arbitrary",)),
        cost_estimate=cost,
    )(x, w1, b1, w2, b2)


# -----------------------------------------------------------------------------
# Kernel 2b (NSPLIT=2, v7x): each 'parallel' N-half (one TensorCore each)
# streams its contiguous (KP, 128) bf16 fc1 half and emits partial fc2 logits.
# -----------------------------------------------------------------------------
def _fc_partial_kernel(x_ref, w1_ref, b1_ref, w2_ref, out_ref, acc_ref):
    k = pl.program_id(1)

    @pl.when(k == 0)
    def _():
        acc_ref[...] = jnp.zeros_like(acc_ref)

    acc_ref[...] += jnp.dot(x_ref[...], w1_ref[0],
                            preferred_element_type=jnp.float32)

    @pl.when(k == pl.num_programs(1) - 1)
    def _():
        h = jnp.maximum(acc_ref[...] + b1_ref[0], 0.0)                  # (B, 128)
        out_ref[0] = jnp.dot(h, w2_ref[0],
                             preferred_element_type=jnp.float32)        # (B, 2) partial


def fc_partial_logits(x, w1, b1, w2, *, tk=20480):
    B = x.shape[0]
    nsplit, _, nh = w1.shape
    assert x.shape[1] == KP and KP % tk == 0
    cost = pl.CostEstimate(
        flops=2 * B * KP * N1 + 2 * B * N1 * NCLS,
        transcendentals=0,
        bytes_accessed=2 * KP * N1 + nsplit * 2 * B * KP
                       + 4 * (N1 + N1 * NCLS + nsplit * B * NCLS),
    )
    return pl.pallas_call(
        _fc_partial_kernel,
        out_shape=jax.ShapeDtypeStruct((nsplit, B, NCLS), jnp.float32),
        grid_spec=pltpu.PrefetchScalarGridSpec(
            num_scalar_prefetch=0,
            grid=(nsplit, KP // tk),
            in_specs=[
                pl.BlockSpec((B, tk), lambda n, k: (0, k)),
                pl.BlockSpec((1, tk, nh), lambda n, k: (n, k, 0)),
                pl.BlockSpec((1, 1, nh), lambda n, k: (n, 0, 0)),
                pl.BlockSpec((1, nh, NCLS), lambda n, k: (n, 0, 0)),
            ],
            out_specs=pl.BlockSpec((1, B, NCLS), lambda n, k: (n, 0, 0)),
            scratch_shapes=[pltpu.VMEM((B, nh), jnp.float32)],
        ),
        compiler_params=pltpu.CompilerParams(
            dimension_semantics=("parallel", "arbitrary")),
        cost_estimate=cost,
    )(x, w1, b1, w2)


# -----------------------------------------------------------------------------
# One-time weight re-layout + bf16 cast (hoisted out of the per-call forward).
# -----------------------------------------------------------------------------
def prepare_params(conv_w, conv_b, fc1_w, fc1_b, fc2_w, fc2_b, nsplit=NSPLIT):
    nh = N1 // nsplit
    wc = conv_w.reshape(C_OUT, 9).astype(jnp.float32)                  # (32, 9)
    bc = conv_b.reshape(C_OUT, 1).astype(jnp.float32)                  # (32, 1)
    # fc1: (256, 20000) -> (256, 32, 625) -> zero-pad positions to 640 ->
    # (256, 20480) -> T -> pack contiguous per N-half -> (nsplit, 20480, nh) bf16.
    # Zero columns kill the padded pooled positions (exact in bf16).
    w1 = fc1_w.reshape(N1, C_OUT, POS).astype(jnp.float32)
    w1 = jnp.pad(w1, ((0, 0), (0, 0), (0, POS_PAD - POS)))
    w1 = w1.reshape(N1, KP).T                                          # (20480, 256)
    w1 = w1.reshape(KP, nsplit, nh).transpose(1, 0, 2)                 # (nsplit, 20480, nh)
    w1 = w1.astype(jnp.bfloat16)
    b1 = fc1_b.astype(jnp.float32).reshape(nsplit, 1, nh)
    w2 = fc2_w.T.astype(jnp.float32).reshape(nsplit, nh, NCLS)
    b2 = fc2_b.reshape(1, NCLS).astype(jnp.float32)
    return wc, bc, w1, b1, w2, b2


# -----------------------------------------------------------------------------
# Full forward pass: glue (pad + im2col + reshape) in XLA, hot path in Pallas.
# -----------------------------------------------------------------------------
@jax.jit
def shallow_cnn_forward(x, params):
    wc, bc, w1, b1, w2, b2 = params
    B = x.shape[0]
    assert x.shape[1:] == (1, 50, 50)

    # TODO(synk): im2col stays in XLA glue; its traffic (~90 KB/sample) is
    # negligible next to the ~10 MiB bf16 fc1 weight stream the kernels target.
    xp = jnp.pad(x[:, 0].astype(jnp.float32), ((0, 0), (1, 1), (1, 1)))   # (B, 52, 52)
    taps = jnp.stack([xp[:, dy:dy + 50, dx:dx + 50]
                      for dy in range(3) for dx in range(3)], axis=1)     # (B, 9, 50, 50)
    t = taps.reshape(B, 9, 25, 2, 25, 2)              # [b, tap, i, p, j, q]
    t = t.transpose(0, 1, 3, 5, 2, 4)                 # [b, tap, p, q, i, j]
    t = t.reshape(B, 9, NPOOL, POS)
    t = jnp.pad(t, ((0, 0), (0, 0), (0, 0), (0, POS_PAD - POS)))
    patches = t.reshape(B, 9, NPOOL * POS_PAD)        # (B, 9, 2560)

    pooled = conv_relu_pool(patches, wc, bc)          # (B, 32, 640) bf16, channel-major
    x_fc = pooled.reshape(B, KP)                      # plain reshape, no transpose

    if w1.shape[0] == 1:
        # Single TensorCore: fully fused fc1+fc2+softmax epilogue in-kernel.
        return fc_softmax_fused(x_fc, w1, b1, w2, b2)
    # Dual TensorCore (v7x): one fc1 half per core, tiny head in plain jnp.
    partial = fc_partial_logits(x_fc, w1, b1, w2)     # (2, B, 2)
    logits = jnp.sum(partial, axis=0) + b2
    return jax.nn.softmax(logits, axis=-1)


# -----------------------------------------------------------------------------
# Pure-JAX reference (mirrors the PyTorch forward) for a correctness check.
# -----------------------------------------------------------------------------
def reference_forward(x, conv_w, conv_b, fc1_w, fc1_b, fc2_w, fc2_b):
    y = jax.lax.conv_general_dilated(
        x, conv_w, window_strides=(1, 1), padding=((1, 1), (1, 1)),
        dimension_numbers=("NCHW", "OIHW", "NCHW"))
    y = jax.nn.relu(y + conv_b[None, :, None, None])
    y = jax.lax.reduce_window(y, -jnp.inf, jax.lax.max,
                              (1, 1, 2, 2), (1, 1, 2, 2), "VALID")
    y = y.reshape(y.shape[0], -1)
    y = jax.nn.relu(y @ fc1_w.T + fc1_b)
    y = y @ fc2_w.T + fc2_b
    return jax.nn.softmax(y, axis=1)


if __name__ == "__main__":
    key = jax.random.PRNGKey(0)
    ks = jax.random.split(key, 7)
    B = 2

    # fc1 expects 32*25*25 features -> input spatial must be 50x50 (NCHW).
    x = jax.random.normal(ks[0], (B, 1, 50, 50), jnp.float32)

    conv_w = jax.random.normal(ks[1], (32, 1, 3, 3), jnp.float32) * 0.1
    conv_b = jax.random.normal(ks[2], (32,), jnp.float32) * 0.1
    fc1_w = jax.random.normal(ks[3], (256, 32 * 25 * 25), jnp.float32) * 0.01
    fc1_b = jax.random.normal(ks[4], (256,), jnp.float32) * 0.01
    fc2_w = jax.random.normal(ks[5], (2, 256), jnp.float32) * 0.05
    fc2_b = jax.random.normal(ks[6], (2,), jnp.float32) * 0.05

    # Weight re-layout + bf16 cast done ONCE at load time.
    params = jax.block_until_ready(
        prepare_params(conv_w, conv_b, fc1_w, fc1_b, fc2_w, fc2_b))

    probs = shallow_cnn_forward(x, params)
    probs = jax.block_until_ready(probs)

    ref = reference_forward(x, conv_w, conv_b, fc1_w, fc1_b, fc2_w, fc2_b)
    ref = jax.block_until_ready(ref)

    np.testing.assert_allclose(np.asarray(probs), np.asarray(ref),
                               rtol=0.0, atol=1e-2)
    assert probs.shape == (B, 2)
    print("KERNEL_OK")
</pallas_src>

<mosaic_0001>
module attributes {stable_mosaic.version = 11 : i64} {
  func.func @_conv_pool_kernel(%arg0: i32, %arg1: memref<1x9x2560xf32, #tpu.memory_space<vmem>>, %arg2: memref<32x9xf32, #tpu.memory_space<vmem>>, %arg3: memref<32x1xf32, #tpu.memory_space<vmem>>, %arg4: memref<1x32x640xbf16, #tpu.memory_space<vmem>>) attributes {dimension_semantics = [#tpu.dimension_semantics<parallel>], iteration_bounds = array<i64: 2>, scalar_prefetch = 0 : i64, scratch_operands = 0 : i64, tpu.core_type = #tpu.core_type<tc>, window_params = [{transform_indices = @transform_0, window_bounds = array<i64: 1, 9, 2560>}, {pipeline_mode = #tpu.pipeline_mode<synchronous>, transform_indices = @transform_1, window_bounds = array<i64: 32, 9>}, {pipeline_mode = #tpu.pipeline_mode<synchronous>, transform_indices = @transform_2, window_bounds = array<i64: 32, 1>}, {transform_indices = @transform_3, window_bounds = array<i64: 1, 32, 640>}]} {
    %c0 = arith.constant 0 : index
    %c0_0 = arith.constant 0 : index
    %0 = vector.load %arg2[%c0, %c0_0] : memref<32x9xf32, #tpu.memory_space<vmem>>, vector<32x9xf32>
    %c0_1 = arith.constant 0 : index
    %c0_2 = arith.constant 0 : index
    %1 = vector.load %arg3[%c0_1, %c0_2] : memref<32x1xf32, #tpu.memory_space<vmem>>, vector<32x1xf32>
    %c0_i32 = arith.constant 0 : i32
    %2 = arith.index_cast %c0_i32 : i32 to index
    %c0_3 = arith.constant 0 : index
    %c0_4 = arith.constant 0 : index
    %3 = vector.load %arg1[%2, %c0_3, %c0_4] : memref<1x9x2560xf32, #tpu.memory_space<vmem>>, vector<1x9x2560xf32>
    %4 = vector.shape_cast %3 : vector<1x9x2560xf32> to vector<9x2560xf32>
    %cst = arith.constant dense<0.000000e+00> : vector<32x2560xf32>
    %5 = tpu.matmul %0, %4, %cst {dimension_numbers = #tpu.dot_dimension_numbers<[1], [0], [0], [1], [0, 0, 1, 1], [], []>} : vector<32x9xf32>, vector<9x2560xf32>, vector<32x2560xf32> -> vector<32x2560xf32>
    %6 = vector.extract_strided_slice %5 {offsets = [0, 0], sizes = [32, 640], strides = [1, 1]} : vector<32x2560xf32> to vector<32x640xf32>
    %7 = vector.extract_strided_slice %5 {offsets = [0, 640], sizes = [32, 640], strides = [1, 1]} : vector<32x2560xf32> to vector<32x640xf32>
    %8 = arith.maximumf %6, %7 : vector<32x640xf32>
    %9 = vector.extract_strided_slice %5 {offsets = [0, 1280], sizes = [32, 640], strides = [1, 1]} : vector<32x2560xf32> to vector<32x640xf32>
    %10 = vector.extract_strided_slice %5 {offsets = [0, 1920], sizes = [32, 640], strides = [1, 1]} : vector<32x2560xf32> to vector<32x640xf32>
    %11 = arith.maximumf %9, %10 : vector<32x640xf32>
    %12 = arith.maximumf %8, %11 : vector<32x640xf32>
    %13 = vector.broadcast %1 : vector<32x1xf32> to vector<32x640xf32>
    %14 = arith.addf %12, %13 : vector<32x640xf32>
    %cst_5 = arith.constant 0.000000e+00 : f32
    %15 = vector.broadcast %cst_5 : f32 to vector<32x640xf32>
    %16 = arith.maximumf %14, %15 : vector<32x640xf32>
    %17 = arith.truncf %16 : vector<32x640xf32> to vector<32x640xbf16>
    %18 = arith.index_cast %c0_i32 : i32 to index
    %c0_6 = arith.constant 0 : index
    %c0_7 = arith.constant 0 : index
    %19 = vector.load %arg4[%18, %c0_6, %c0_7] : memref<1x32x640xbf16, #tpu.memory_space<vmem>>, vector<1x32x640xbf16>
    %20 = vector.shape_cast %19 : vector<1x32x640xbf16> to vector<32x640xbf16>
    %21 = vector.shape_cast %17 : vector<32x640xbf16> to vector<1x32x640xbf16>
    tpu.vector_store %arg4[%18, %c0_6, %c0_7], %21 {strides = array<i32>} : memref<1x32x640xbf16, #tpu.memory_space<vmem>>, vector<1x32x640xbf16>,
    %c1_i32 = arith.constant 1 : i32
    return
  }
  func.func @transform_0(%arg0: i32) -> (i32, i32, i32) {
    %c0_i32 = arith.constant 0 : i32
    %c0_i32_0 = arith.constant 0 : i32
    %c0_i32_1 = arith.constant 0 : i32
    return %arg0, %c0_i32, %c0_i32_0 : i32, i32, i32
  }
  func.func @transform_1(%arg0: i32) -> (i32, i32) {
    %c0_i32 = arith.constant 0 : i32
    %c0_i32_0 = arith.constant 0 : i32
    %c0_i32_1 = arith.constant 0 : i32
    return %c0_i32, %c0_i32_0 : i32, i32
  }
  func.func @transform_2(%arg0: i32) -> (i32, i32) {
    %c0_i32 = arith.constant 0 : i32
    %c0_i32_0 = arith.constant 0 : i32
    %c0_i32_1 = arith.constant 0 : i32
    return %c0_i32, %c0_i32_0 : i32, i32
  }
  func.func @transform_3(%arg0: i32) -> (i32, i32, i32) {
    %c0_i32 = arith.constant 0 : i32
    %c0_i32_0 = arith.constant 0 : i32
    %c0_i32_1 = arith.constant 0 : i32
    return %arg0, %c0_i32, %c0_i32_0 : i32, i32, i32
  }
}

module attributes {stable_mosaic.version = 11 : i64} {
  func.func @_fc_softmax_kernel(%arg0: i32, %arg1: memref<2x10240xbf16, #tpu.memory_space<vmem>>, %arg2: memref<1x10240x256xbf16, #tpu.memory_space<vmem>>, %arg3: memref<1x1x256xf32, #tpu.memory_space<vmem>>, %arg4: memref<1x256x2xf32, #tpu.memory_space<vmem>>, %arg5: memref<1x2xf32, #tpu.memory_space<vmem>>, %arg6: memref<2x2xf32, #tpu.memory_space<vmem>>, %arg7: memref<2x256xf32, #tpu.memory_space<vmem>>) attributes {dimension_semantics = [#tpu.dimension_semantics<arbitrary>], iteration_bounds = array<i64: 2>, scalar_prefetch = 0 : i64, scratch_operands = 1 : i64, tpu.core_type = #tpu.core_type<tc>, window_params = [{transform_indices = @transform_0, window_bounds = array<i64: 2, 10240>}, {transform_indices = @transform_1, window_bounds = array<i64: 1, 10240, 256>}, {pipeline_mode = #tpu.pipeline_mode<synchronous>, transform_indices = @transform_2, window_bounds = array<i64: 1, 1, 256>}, {pipeline_mode = #tpu.pipeline_mode<synchronous>, transform_indices = @transform_3, window_bounds = array<i64: 1, 256, 2>}, {pipeline_mode = #tpu.pipeline_mode<synchronous>, transform_indices = @transform_4, window_bounds = array<i64: 1, 2>}, {pipeline_mode = #tpu.pipeline_mode<synchronous>, transform_indices = @transform_5, window_bounds = array<i64: 2, 2>}]} {
    %c0_i32 = arith.constant 0 : i32
    %0 = arith.cmpi eq, %arg0, %c0_i32 : i32
    %1 = arith.extui %0 : i1 to i32
    %c0_i32_0 = arith.constant 0 : i32
    %2 = arith.cmpi ne, %1, %c0_i32_0 : i32
    scf.if %2 {
      %cst_10 = arith.constant 0.000000e+00 : f32
      %13 = vector.broadcast %cst_10 : f32 to vector<2x256xf32>
      %c0_11 = arith.constant 0 : index
      %c0_12 = arith.constant 0 : index
      %14 = vector.load %arg7[%c0_11, %c0_12] : memref<2x256xf32, #tpu.memory_space<vmem>>, vector<2x256xf32>
      tpu.vector_store %arg7[%c0_11, %c0_12], %13 {strides = array<i32>} : memref<2x256xf32, #tpu.memory_space<vmem>>, vector<2x256xf32>,
    } else {
    }
    %c0 = arith.constant 0 : index
    %c0_1 = arith.constant 0 : index
    %3 = vector.load %arg7[%c0, %c0_1] : memref<2x256xf32, #tpu.memory_space<vmem>>, vector<2x256xf32>
    %c0_2 = arith.constant 0 : index
    %c0_3 = arith.constant 0 : index
    %4 = vector.load %arg1[%c0_2, %c0_3] : memref<2x10240xbf16, #tpu.memory_space<vmem>>, vector<2x10240xbf16>
    %c0_4 = arith.constant 0 : index
    %c0_5 = arith.constant 0 : index
    %c0_6 = arith.constant 0 : index
    %5 = vector.load %arg2[%c0_4, %c0_5, %c0_6] : memref<1x10240x256xbf16, #tpu.memory_space<vmem>>, vector<1x10240x256xbf16>
    %6 = vector.shape_cast %5 : vector<1x10240x256xbf16> to vector<10240x256xbf16>
    %cst = arith.constant dense<0.000000e+00> : vector<2x256xf32>
    %7 = tpu.matmul %4, %6, %cst {dimension_numbers = #tpu.dot_dimension_numbers<[1], [0], [0], [1], [0, 0, 1, 1], [], []>} : vector<2x10240xbf16>, vector<10240x256xbf16>, vector<2x256xf32> -> vector<2x256xf32>
    %8 = arith.addf %3, %7 : vector<2x256xf32>
    %c0_7 = arith.constant 0 : index
    %c0_8 = arith.constant 0 : index
    %9 = vector.load %arg7[%c0_7, %c0_8] : memref<2x256xf32, #tpu.memory_space<vmem>>, vector<2x256xf32>
    tpu.vector_store %arg7[%c0_7, %c0_8], %8 {strides = array<i32>} : memref<2x256xf32, #tpu.memory_space<vmem>>, vector<2x256xf32>,
    %c1_i32 = arith.constant 1 : i32
    %10 = arith.cmpi eq, %arg0, %c1_i32 : i32
    %11 = arith.extui %10 : i1 to i32
    %c0_i32_9 = arith.constant 0 : i32
    %12 = arith.cmpi ne, %11, %c0_i32_9 : i32
    scf.if %12 {
      %c0_10 = arith.constant 0 : index
      %c0_11 = arith.constant 0 : index
      %13 = vector.load %arg7[%c0_10, %c0_11] : memref<2x256xf32, #tpu.memory_space<vmem>>, vector<2x256xf32>
      %c0_12 = arith.constant 0 : index
      %c0_13 = arith.constant 0 : index
      %c0_14 = arith.constant 0 : index
      %14 = vector.load %arg3[%c0_12, %c0_13, %c0_14] : memref<1x1x256xf32, #tpu.memory_space<vmem>>, vector<1x1x256xf32>
      %15 = vector.shape_cast %14 : vector<1x1x256xf32> to vector<1x256xf32>
      %16 = vector.broadcast %15 : vector<1x256xf32> to vector<2x256xf32>
      %17 = arith.addf %13, %16 : vector<2x256xf32>
      %cst_15 = arith.constant 0.000000e+00 : f32
      %18 = vector.broadcast %cst_15 : f32 to vector<2x256xf32>
      %19 = arith.maximumf %17, %18 : vector<2x256xf32>
      %c0_16 = arith.constant 0 : index
      %c0_17 = arith.constant 0 : index
      %c0_18 = arith.constant 0 : index
      %20 = vector.load %arg4[%c0_16, %c0_17, %c0_18] : memref<1x256x2xf32, #tpu.memory_space<vmem>>, vector<1x256x2xf32>
      %21 = vector.shape_cast %20 : vector<1x256x2xf32> to vector<256x2xf32>
      %cst_19 = arith.constant dense<0.000000e+00> : vector<2x2xf32>
      %22 = tpu.matmul %19, %21, %cst_19 {dimension_numbers = #tpu.dot_dimension_numbers<[1], [0], [0], [1], [0, 0, 1, 1], [], []>} : vector<2x256xf32>, vector<256x2xf32>, vector<2x2xf32> -> vector<2x2xf32>
      %c0_20 = arith.constant 0 : index
      %c0_21 = arith.constant 0 : index
      %23 = vector.load %arg5[%c0_20, %c0_21] : memref<1x2xf32, #tpu.memory_space<vmem>>, vector<1x2xf32>
      %24 = vector.broadcast %23 : vector<1x2xf32> to vector<2x2xf32>
      %25 = arith.addf %22, %24 : vector<2x2xf32>
      %cst_22 = arith.constant dense<0xFF800000> : vector<2xf32>
      %26 = vector.multi_reduction <maximumf>, %25, %cst_22 [1] : vector<2x2xf32> to vector<2xf32>
      %27 = vector.shape_cast %26 : vector<2xf32> to vector<2x1xf32>
      %28 = vector.broadcast %27 : vector<2x1xf32> to vector<2x2xf32>
      %29 = arith.subf %25, %28 : vector<2x2xf32>
      %30 = math.exp %29 : vector<2x2xf32>
      %cst_23 = arith.constant dense<0.000000e+00> : vector<2xf32>
      %31 = vector.multi_reduction <add>, %30, %cst_23 [1] : vector<2x2xf32> to vector<2xf32>
      %32 = vector.shape_cast %31 : vector<2xf32> to vector<2x1xf32>
      %33 = vector.broadcast %32 : vector<2x1xf32> to vector<2x2xf32>
      %34 = arith.divf %30, %33 : vector<2x2xf32>
      %c0_24 = arith.constant 0 : index
      %c0_25 = arith.constant 0 : index
      %35 = vector.load %arg6[%c0_24, %c0_25] : memref<2x2xf32, #tpu.memory_space<vmem>>, vector<2x2xf32>
      tpu.vector_store %arg6[%c0_24, %c0_25], %34 {strides = array<i32>} : memref<2x2xf32, #tpu.memory_space<vmem>>, vector<2x2xf32>,
    } else {
    }
    return
  }
  func.func @transform_0(%arg0: i32) -> (i32, i32) {
    %c0_i32 = arith.constant 0 : i32
    %c0_i32_0 = arith.constant 0 : i32
    return %c0_i32, %arg0 : i32, i32
  }
  func.func @transform_1(%arg0: i32) -> (i32, i32, i32) {
    %c0_i32 = arith.constant 0 : i32
    %c0_i32_0 = arith.constant 0 : i32
    %c0_i32_1 = arith.constant 0 : i32
    return %c0_i32, %arg0, %c0_i32_0 : i32, i32, i32
  }
  func.func @transform_2(%arg0: i32) -> (i32, i32, i32) {
    %c0_i32 = arith.constant 0 : i32
    %c0_i32_0 = arith.constant 0 : i32
    %c0_i32_1 = arith.constant 0 : i32
    %c0_i32_2 = arith.constant 0 : i32
    return %c0_i32, %c0_i32_0, %c0_i32_1 : i32, i32, i32
  }
  func.func @transform_3(%arg0: i32) -> (i32, i32, i32) {
    %c0_i32 = arith.constant 0 : i32
    %c0_i32_0 = arith.constant 0 : i32
    %c0_i32_1 = arith.constant 0 : i32
    %c0_i32_2 = arith.constant 0 : i32
    return %c0_i32, %c0_i32_0, %c0_i32_1 : i32, i32, i32
  }
  func.func @transform_4(%arg0: i32) -> (i32, i32) {
    %c0_i32 = arith.constant 0 : i32
    %c0_i32_0 = arith.constant 0 : i32
    %c0_i32_1 = arith.constant 0 : i32
    return %c0_i32, %c0_i32_0 : i32, i32
  }
  func.func @transform_5(%arg0: i32) -> (i32, i32) {
    %c0_i32 = arith.constant 0 : i32
    %c0_i32_0 = arith.constant 0 : i32
    %c0_i32_1 = arith.constant 0 : i32
    return %c0_i32, %c0_i32_0 : i32, i32
  }
}

</mosaic_0001>

<bundles_post_ra>
// kernel: shallow_cnn_forward.2
= control target key start
LH: loop header
LB: loop body
LE: loop exit
PB: predicated region body
PF: predicated region fallthrough
CT: control target
= control target key end

     0   :  { %s1633_s12 = smov 0   ;;  %s2124_s0 = inlined_call_operand.vmem [shape: f32[2,9,2560], index: 0, kind: input, shape index: {}]   ;;  %s2125_s1 = inlined_call_operand.vmem [shape: f32[32,9], index: 1, kind: input, shape index: {}]   ;;  %s2126_s2 = inlined_call_operand.vmem [shape: f32[32,1], index: 2, kind: input, shape index: {}]   ;;  %s2127_s3 = inlined_call_operand.vmem [shape: bf16[2,32,640], index: 3, kind: output, shape index: {}]  }
   0x1 LB: > { %s1434_s13 = sadd.s32 4294967295, %s1608_s12   ;;  %p1438_p0 = scmp.ge.s32.totalorder %s1608_s12, 1  ;;  %s1608_s12 = sphi %s1633_s12, %s13_s12  }
   0x2   : > { %p137_p1 = scmp.lt.s32.totalorder %s1608_s12, 3 }
   0x4   : > { %p138_p2 = pnand %p1438_p0, %p137_p1 }
   0x6   : > { %141 = sbr.rel (%p138_p2) target bundleno = 334 (0x14e), region = 32 }
   0xd   : > { %p161_p3 = scmp.lt.s32.totalorder %s1434_s13, 1  ;;  %v1610_v0 = vmov 0.0   ;;  %v1611_v1 = vmov 0   ;;  %v175_v2 = vld [vmem:[%s2126_s2] sm:$0xff]  ;;  %vm232_vm0 = vcmask 1040384   ;;  %v177_v3 = vld [vmem:[%s2126_s2 + $0x10] sm:$0xff] }
   0xe   : > { %357 = vmatprep.mubr.f32.mxu0 %v1610_v0  ;;  %446 = vmatprep.mubr.f32.mxu1 %v1610_v0  ;;  %v176_v4 = vld [vmem:[%s2126_s2 + $0x8] sm:$0xff]  ;;  %v178_v5 = vld [vmem:[%s2126_s2 + $0x18] sm:$0xff]  ;;  %vm1612_vm1 = vmmov 1   ;;  %v1678_v18 = vld [vmem:[%s2125_s1] sm:$0xff]  ;;  %vm219_vm3 = vcmask 72704  }
   0xf   : > { %s2167_s13 = smov (!%p161_p3, %s1434_s13), 1  ;;  %1600 = vset.pattern.permute.xlu0 %v1611_v1  ;;  %1601 = vset.pattern.permute.xlu1 %v1611_v1  ;;  %vm1663_vm2 = vmpackc.low %vm232_vm0, %vm1612_vm1  ;;  %v1713_v38 = vld [vmem:[%s2125_s1 + $0x8] sm:$0xff]  ;;  %v1731_v39 = vld [vmem:[%s2125_s1 + $0x10] sm:$0xff] }
  0x10   : > { %1245 = vperm.xlu0 %1600, %v175_v2   ;;  %s1587_s18 = smul.u32 320, %s2167_s13  ;;  %1255 = vperm.xlu1 %1601, %v177_v3   ;;  %v1742_v40 = vld [vmem:[%s2125_s1 + $0x18] sm:$0xff] }
  0x11   : > { %s1588_s7 = smul.u32 80, %s2167_s13 }
  0x12   : > { %s1661_s25 = scalar_lea.vmem %s2124_s0, %s1587_s18 }
  0x13   : > { %v180_v7 = vld [vmem:[%s1661_s25 + $0x8] sm:$0xff]  ;;  %v182_v9 = vld [vmem:[%s1661_s25 + $0x18] sm:$0xff]  ;;  %v179_v12 = vld [vmem:[%s1661_s25] sm:$0xff]  ;;  %s2051_s10 = scalar_lea.vmem %s2127_s3, %s1588_s7 }
  0x14   : > { %v200_v8 = vld [vmem:[%s1661_s25 + $0xa8] sm:$0x1]  ;;  %1250 = vperm.xlu0 %1600, %v176_v4   ;;  %v202_v11 = vld [vmem:[%s1661_s25 + $0xb8] sm:$0x1]  ;;  %v199_v13 = vld [vmem:[%s1661_s25 + $0xa0] sm:$0x1]  ;;  %1260 = vperm.xlu1 %1601, %v178_v5  }
  0x15   : > { %v1527_v10 = vpack.c.bf16 %v200_v8, %v180_v7  ;;  %v1533_v14 = vpack.c.bf16 %v202_v11, %v182_v9  ;;  %v1530_v15 = vpack.c.bf16 %v199_v13, %v179_v12  ;;  %v181_v16 = vld [vmem:[%s1661_s25 + $0x10] sm:$0xff]  ;;  %v184_v19 = vld [vmem:[%s1661_s25 + $0x28] sm:$0xff]  ;;  %v186_v22 = vld [vmem:[%s1661_s25 + $0x38] sm:$0xff] }
  0x16   : > { %v201_v17 = vld [vmem:[%s1661_s25 + $0xb0] sm:$0x1]  ;;  %v204_v21 = vld [vmem:[%s1661_s25 + $0xc8] sm:$0x1]  ;;  %v206_v23 = vld [vmem:[%s1661_s25 + $0xd8] sm:$0x1] }
  0x17   : > { %1529 = vmatprep.subr.msk.bf16.mxu0 %vm1663_vm2, %v1527_v10  ;;  %v1536_v20 = vpack.c.bf16 %v201_v17, %v181_v16  ;;  %1535 = vmatprep.subr.msk.bf16.mxu1 %vm1663_vm2, %v1533_v14  ;;  %v1539_v24 = vpack.c.bf16 %v204_v21, %v184_v19  ;;  %v1545_v25 = vpack.c.bf16 %v206_v23, %v186_v22  ;;  %v183_v26 = vld [vmem:[%s1661_s25 + $0x20] sm:$0xff]  ;;  %v185_v28 = vld [vmem:[%s1661_s25 + $0x30] sm:$0xff]  ;;  %v188_v31 = vld [vmem:[%s1661_s25 + $0x48] sm:$0xff] }
  0x18   : > { %1532 = vmatpush1.bf16.msk.msra.mxu0 %vm1663_vm2, %v1530_v15  ;;  %v203_v27 = vld [vmem:[%s1661_s25 + $0xc0] sm:$0x1]  ;;  %v205_v30 = vld [vmem:[%s1661_s25 + $0xd0] sm:$0x1]  ;;  %v208_v32 = vld [vmem:[%s1661_s25 + $0xe8] sm:$0x1] }
  0x19   : > { %1538 = vmatpush1.bf16.msk.msra.mxu1 %vm1663_vm2, %v1536_v20  ;;  %v1542_v29 = vpack.c.bf16 %v203_v27, %v183_v26  ;;  %1541 = vmatprep.subr.msk.bf16.mxu0 %vm1663_vm2, %v1539_v24  ;;  %v1548_v33 = vpack.c.bf16 %v205_v30, %v185_v28  ;;  %v1551_v34 = vpack.c.bf16 %v208_v32, %v188_v31  ;;  %v190_v35 = vld [vmem:[%s1661_s25 + $0x58] sm:$0xff]  ;;  %v187_v41 = vld [vmem:[%s1661_s25 + $0x40] sm:$0xff]  ;;  %v189_v43 = vld [vmem:[%s1661_s25 + $0x50] sm:$0xff] }
  0x1a   : > { %1547 = vmatprep.subr.msk.bf16.mxu1 %vm1663_vm2, %v1545_v25  ;;  %v210_v36 = vld [vmem:[%s1661_s25 + $0xf8] sm:$0x1]  ;;  %v207_v42 = vld [vmem:[%s1661_s25 + $0xe0] sm:$0x1]  ;;  %v209_v44 = vld [vmem:[%s1661_s25 + $0xf0] sm:$0x1] }
  0x1b   : > { %1443 = vmatmul.mubr.msk.f32.vlgmr.msra.gmra.mrb[0].mxu0 %vm219_vm3, %v1678_v18  ;;  %v1557_v37 = vpack.c.bf16 %v210_v36, %v190_v35  ;;  %v192_v45 = vld [vmem:[%s1661_s25 + $0x68] sm:$0xff]  ;;  %v1554_v47 = vpack.c.bf16 %v207_v42, %v187_v41  ;;  %v194_v48 = vld [vmem:[%s1661_s25 + $0x78] sm:$0xff]  ;;  %v1560_v50 = vpack.c.bf16 %v209_v44, %v189_v43  ;;  %v191_v53 = vld [vmem:[%s1661_s25 + $0x60] sm:$0xff] }
  0x1c   : > { %1449 = vmatmul.mubr.msk.f32.vlgmr.msra.gmra.mrb[0].mxu1 %vm219_vm3, %v1678_v18  ;;  %1544 = vmatpush1.bf16.msk.msra.mxu0 %vm1663_vm2, %v1542_v29  ;;  %v212_v46 = vld [vmem:[%s1661_s25 + $0x108] sm:$0x1]  ;;  %v214_v49 = vld [vmem:[%s1661_s25 + $0x118] sm:$0x1]  ;;  %v211_v54 = vld [vmem:[%s1661_s25 + $0x100] sm:$0x1] }
  0x1d   : > { %1550 = vmatpush1.bf16.msk.msra.mxu1 %vm1663_vm2, %v1548_v33  ;;  %363 = vmatprep.mubr.f32.mxu0 %v1610_v0  ;;  %v1563_v51 = vpack.c.bf16 %v212_v46, %v192_v45  ;;  %v1569_v52 = vpack.c.bf16 %v214_v49, %v194_v48  ;;  %v193_v55 = vld [vmem:[%s1661_s25 + $0x70] sm:$0xff]  ;;  %v196_v57 = vld [vmem:[%s1661_s25 + $0x88] sm:$0xff]  ;;  %v1566_v59 = vpack.c.bf16 %v211_v54, %v191_v53  ;;  %v198_v60 = vld [vmem:[%s1661_s25 + $0x98] sm:$0xff] }
  0x1e   : > { %452 = vmatprep.mubr.f32.mxu1 %v1610_v0  ;;  %1553 = vmatprep.subr.msk.bf16.mxu0 %vm1663_vm2, %v1551_v34  ;;  %v213_v56 = vld [vmem:[%s1661_s25 + $0x110] sm:$0x1]  ;;  %v216_v58 = vld [vmem:[%s1661_s25 + $0x128] sm:$0x1]  ;;  %v218_v61 = vld [vmem:[%s1661_s25 + $0x138] sm:$0x1] }
  0x1f   : > { %1444 = vmatmul.mubr.msk.f32.gmra.mrb[2].mxu0 %vm219_vm3, %v1713_v38  ;;  %1559 = vmatprep.subr.msk.bf16.mxu1 %vm1663_vm2, %v1557_v37  ;;  %v1572_v62 = vpack.c.bf16 %v213_v56, %v193_v55  ;;  %v1575_v63 = vpack.c.bf16 %v216_v58, %v196_v57  ;;  %v1581_v1 = vpack.c.bf16 %v218_v61, %v198_v60  ;;  %v195_v2 = vld [vmem:[%s1661_s25 + $0x80] sm:$0xff]  ;;  %v197_v4 = vld [vmem:[%s1661_s25 + $0x90] sm:$0xff] }
  0x20   : > { %1450 = vmatmul.mubr.msk.f32.gmra.mrb[2].mxu1 %vm219_vm3, %v1713_v38  ;;  %369 = vmatprep.mubr.f32.mxu0 %v1610_v0  ;;  %v215_v3 = vld [vmem:[%s1661_s25 + $0x120] sm:$0x1]  ;;  %v217_v5 = vld [vmem:[%s1661_s25 + $0x130] sm:$0x1] }
  0x21   : > { %458 = vmatprep.mubr.f32.mxu1 %v1610_v0  ;;  %v1578_v7 = vpack.c.bf16 %v215_v3, %v195_v2  ;;  %v1584_v8 = vpack.c.bf16 %v217_v5, %v197_v4 }
  0x23   : > { %1445 = vmatmul.mubr.msk.f32.gmra.mrb[4].mxu0 %vm219_vm3, %v1731_v39 }
  0x24   : > { %1451 = vmatmul.mubr.msk.f32.gmra.mrb[4].mxu1 %vm219_vm3, %v1731_v39  ;;  %375 = vmatprep.mubr.f32.mxu0 %v1610_v0 }
  0x25   : > { %464 = vmatprep.mubr.f32.mxu1 %v1610_v0 }
  0x27   : > { %1446 = vmatmul.mubr.msk.f32.gmra.mrb[6].mxu0 %vm219_vm3, %v1742_v40 }
  0x28   : > { %1452 = vmatmul.mubr.msk.f32.gmra.mrb[6].mxu1 %vm219_vm3, %v1742_v40  ;;  %535 = vmatprep.mubr.f32.mxu0 %v1610_v0 }
  0x29   : > { %624 = vmatprep.mubr.f32.mxu1 %v1610_v0 }
  0x2b   : > { %1455 = vmatmul.mubr.msk.f32.vlgmr.msra.gmra.mrb[8].mxu0 %vm219_vm3, %v1678_v18 }
  0x2c   : > { %1461 = vmatmul.mubr.msk.f32.vlgmr.msra.gmra.mrb[8].mxu1 %vm219_vm3, %v1678_v18  ;;  %1556 = vmatpush1.bf16.msk.msra.mxu0 %vm1663_vm2, %v1554_v47 }
  0x2d   : > { %1562 = vmatpush1.bf16.msk.msra.mxu1 %vm1663_vm2, %v1560_v50  ;;  %541 = vmatprep.mubr.f32.mxu0 %v1610_v0 }
  0x2e   : > { %630 = vmatprep.mubr.f32.mxu1 %v1610_v0  ;;  %1565 = vmatprep.subr.msk.bf16.mxu0 %vm1663_vm2, %v1563_v51 }
  0x2f   : > { %1456 = vmatmul.mubr.msk.f32.gmra.mrb[10].mxu0 %vm219_vm3, %v1713_v38  ;;  %1571 = vmatprep.subr.msk.bf16.mxu1 %vm1663_vm2, %v1569_v52 }
  0x30   : > { %1462 = vmatmul.mubr.msk.f32.gmra.mrb[10].mxu1 %vm219_vm3, %v1713_v38  ;;  %547 = vmatprep.mubr.f32.mxu0 %v1610_v0 }
  0x31   : > { %636 = vmatprep.mubr.f32.mxu1 %v1610_v0 }
  0x33   : > { %1457 = vmatmul.mubr.msk.f32.gmra.mrb[12].mxu0 %vm219_vm3, %v1731_v39 }
  0x34   : > { %1463 = vmatmul.mubr.msk.f32.gmra.mrb[12].mxu1 %vm219_vm3, %v1731_v39  ;;  %553 = vmatprep.mubr.f32.mxu0 %v1610_v0 }
  0x35   : > { %642 = vmatprep.mubr.f32.mxu1 %v1610_v0 }
  0x37   : > { %1458 = vmatmul.mubr.msk.f32.gmra.mrb[14].mxu0 %vm219_vm3, %v1742_v40 }
  0x38   : > { %1464 = vmatmul.mubr.msk.f32.gmra.mrb[14].mxu1 %vm219_vm3, %v1742_v40  ;;  %713 = vmatprep.mubr.f32.mxu0 %v1610_v0 }
  0x39   : > { %802 = vmatprep.mubr.f32.mxu1 %v1610_v0 }
  0x3b   : > { %1467 = vmatmul.mubr.msk.f32.vlgmr.msra.gmra.mrb[16].mxu0 %vm219_vm3, %v1678_v18 }
  0x3c   : > { %1473 = vmatmul.mubr.msk.f32.vlgmr.msra.gmra.mrb[16].mxu1 %vm219_vm3, %v1678_v18  ;;  %1568 = vmatpush1.bf16.msk.msra.mxu0 %vm1663_vm2, %v1566_v59 }
  0x3d   : > { %1574 = vmatpush1.bf16.msk.msra.mxu1 %vm1663_vm2, %v1572_v62  ;;  %719 = vmatprep.mubr.f32.mxu0 %v1610_v0 }
  0x3e   : > { %808 = vmatprep.mubr.f32.mxu1 %v1610_v0  ;;  %1577 = vmatprep.subr.msk.bf16.mxu0 %vm1663_vm2, %v1575_v63 }
  0x3f   : > { %1468 = vmatmul.mubr.msk.f32.gmra.mrb[18].mxu0 %vm219_vm3, %v1713_v38  ;;  %1583 = vmatprep.subr.msk.bf16.mxu1 %vm1663_vm2, %v1581_v1 }
  0x40   : > { %1474 = vmatmul.mubr.msk.f32.gmra.mrb[18].mxu1 %vm219_vm3, %v1713_v38  ;;  %725 = vmatprep.mubr.f32.mxu0 %v1610_v0 }
  0x41   : > { %814 = vmatprep.mubr.f32.mxu1 %v1610_v0 }
  0x43   : > { %1469 = vmatmul.mubr.msk.f32.gmra.mrb[20].mxu0 %vm219_vm3, %v1731_v39 }
  0x44   : > { %1475 = vmatmul.mubr.msk.f32.gmra.mrb[20].mxu1 %vm219_vm3, %v1731_v39  ;;  %731 = vmatprep.mubr.f32.mxu0 %v1610_v0 }
  0x45   : > { %820 = vmatprep.mubr.f32.mxu1 %v1610_v0 }
  0x47   : > { %1470 = vmatmul.mubr.msk.f32.gmra.mrb[22].mxu0 %vm219_vm3, %v1742_v40 }
  0x48   : > { %1476 = vmatmul.mubr.msk.f32.gmra.mrb[22].mxu1 %vm219_vm3, %v1742_v40  ;;  %891 = vmatprep.mubr.f32.mxu0 %v1610_v0 }
  0x49   : > { %980 = vmatprep.mubr.f32.mxu1 %v1610_v0 }
  0x4b   : > { %1479 = vmatmul.mubr.msk.f32.vlgmr.msra.gmra.mrb[24].mxu0 %vm219_vm3, %v1678_v18 }
  0x4c   : > { %1485 = vmatmul.mubr.msk.f32.vlgmr.msra.gmra.mrb[24].mxu1 %vm219_vm3, %v1678_v18  ;;  %1580 = vmatpush1.bf16.msk.msra.mxu0 %vm1663_vm2, %v1578_v7 }
  0x4d   : > { %1586 = vmatpush1.bf16.msk.msra.mxu1 %vm1663_vm2, %v1584_v8  ;;  %897 = vmatprep.mubr.f32.mxu0 %v1610_v0 }
  0x4e   : > { %986 = vmatprep.mubr.f32.mxu1 %v1610_v0 }
  0x4f   : > { %1480 = vmatmul.mubr.msk.f32.gmra.mrb[26].mxu0 %vm219_vm3, %v1713_v38 }
  0x50   : > { %1486 = vmatmul.mubr.msk.f32.gmra.mrb[26].mxu1 %vm219_vm3, %v1713_v38  ;;  %903 = vmatprep.mubr.f32.mxu0 %v1610_v0 }
  0x51   : > { %992 = vmatprep.mubr.f32.mxu1 %v1610_v0 }
  0x53   : > { %1481 = vmatmul.mubr.msk.f32.gmra.mrb[28].mxu0 %vm219_vm3, %v1731_v39 }
  0x54   : > { %1487 = vmatmul.mubr.msk.f32.gmra.mrb[28].mxu1 %vm219_vm3, %v1731_v39  ;;  %909 = vmatprep.mubr.f32.mxu0 %v1610_v0 }
  0x55   : > { %998 = vmatprep.mubr.f32.mxu1 %v1610_v0 }
  0x57   : > { %1482 = vmatmul.mubr.msk.f32.gmra.mrb[30].mxu0 %vm219_vm3, %v1742_v40 }
  0x58   : > { %1488 = vmatmul.mubr.msk.f32.gmra.mrb[30].mxu1 %vm219_vm3, %v1742_v40  ;;  %1069 = vmatprep.mubr.f32.mxu0 %v1610_v0 }
  0x59   : > { %1158 = vmatprep.mubr.f32.mxu1 %v1610_v0 }
  0x5b   : > { %1491 = vmatmul.mubr.msk.f32.vlgmr.msra.gmra.mrb[32].mxu0 %vm219_vm3, %v1678_v18 }
  0x5c   : > { %1497 = vmatmul.mubr.msk.f32.vlgmr.msra.gmra.mrb[32].mxu1 %vm219_vm3, %v1678_v18  ;;  %1075 = vmatprep.mubr.f32.mxu0 %v1610_v0 }
  0x5d   : > { %1164 = vmatprep.mubr.f32.mxu1 %v1610_v0 }
  0x5f   : > { %1492 = vmatmul.mubr.msk.f32.gmra.mrb[34].mxu0 %vm219_vm3, %v1713_v38 }
  0x60   : > { %1498 = vmatmul.mubr.msk.f32.gmra.mrb[34].mxu1 %vm219_vm3, %v1713_v38  ;;  %1081 = vmatprep.mubr.f32.mxu0 %v1610_v0 }
  0x61   : > { %1170 = vmatprep.mubr.f32.mxu1 %v1610_v0 }
  0x63   : > { %1493 = vmatmul.mubr.msk.f32.gmra.mrb[36].mxu0 %vm219_vm3, %v1731_v39 }
  0x64   : > { %1499 = vmatmul.mubr.msk.f32.gmra.mrb[36].mxu1 %vm219_vm3, %v1731_v39  ;;  %1087 = vmatprep.mubr.f32.mxu0 %v1610_v0 }
  0x65   : > { %1176 = vmatprep.mubr.f32.mxu1 %v1610_v0 }
  0x67   : > { %1494 = vmatmul.mubr.msk.f32.gmra.mrb[38].mxu0 %vm219_vm3, %v1742_v40 }
  0x68   : > { %1500 = vmatmul.mubr.msk.f32.gmra.mrb[38].mxu1 %vm219_vm3, %v1742_v40 }
  0x8f   : > { %v1246_v4 = vpop.permute.xlu0 %1245 }
  0x93   : > { %v2007_v29 = vpop.permute.xlu0 %1250 }
  0xee   : > { %v1885_v6 = vpop.f32.mrb[0].mxu0 }
  0xef   : > { %v1887_v9 = vpop.f32.mrb[0].mxu1  ;;  %v1889_v10 = vpop.f32.mrb[1].mxu0 }
  0xf0   : > { %v1891_v11 = vpop.f32.mrb[1].mxu1 }
  0xf2   : > { %v1893_v12 = vpop.f32.mrb[2].mxu0 }
  0xf3   : > { %v1895_v13 = vpop.f32.mrb[2].mxu1  ;;  %v1897_v14 = vpop.f32.mrb[3].mxu0 }
  0xf4   : > { %v1899_v0 = vpop.f32.mrb[3].mxu1 }
  0xf6   : > { %v1901_v15 = vpop.f32.mrb[4].mxu0 }
  0xf7   : > { %v1903_v16 = vpop.f32.mrb[4].mxu1  ;;  %v1905_v17 = vpop.f32.mrb[5].mxu0 }
  0xf8   : > { %v1907_v18 = vpop.f32.mrb[5].mxu1 }
  0xfa   : > { %v1909_v19 = vpop.f32.mrb[6].mxu0 }
  0xfb   : > { %v1911_v20 = vpop.f32.mrb[6].mxu1  ;;  %v1913_v21 = vpop.f32.mrb[7].mxu0 }
  0xfc   : > { %2136 = vst [vmem:[#allocation2_spill] sm:$0xff] %v1911_v20  ;;  %v1915_v22 = vpop.f32.mrb[7].mxu1 }
  0xfd   : > { %2137 = vst [vmem:[#allocation3_spill] sm:$0xff] %v1915_v22 }
  0xfe   : > { %v1917_v23 = vpop.f32.mrb[8].mxu0 }
  0xff   : > { %v1919_v24 = vpop.f32.mrb[8].mxu1  ;;  %v539_v25 = vpop.f32.mrb[9].mxu0 }
 0x100   : > { %v1183_v27 = vmax.f32 %v1885_v6, %v539_v25  ;;  %v1924_v28 = vpop.f32.mrb[9].mxu1 }
 0x102   : > { %v1928_v30 = vpop.f32.mrb[10].mxu0 }
 0x103   : > { %v1930_v31 = vpop.f32.mrb[10].mxu1  ;;  %v545_v32 = vpop.f32.mrb[11].mxu0 }
 0x104   : > { %v1188_v34 = vmax.f32 %v1893_v12, %v545_v32  ;;  %v1935_v35 = vpop.f32.mrb[11].mxu1 }
 0x106   : > { %v1939_v37 = vpop.f32.mrb[12].mxu0 }
 0x107   : > { %v1941_v38 = vpop.f32.mrb[12].mxu1  ;;  %v551_v39 = vpop.f32.mrb[13].mxu0 }
 0x108   : > { %v1193_v41 = vmax.f32 %v1901_v15, %v551_v39  ;;  %v1946_v42 = vpop.f32.mrb[13].mxu1 }
 0x10a   : > { %v1950_v44 = vpop.f32.mrb[14].mxu0 }
 0x10b   : > { %2138 = vst [vmem:[#allocation4_spill] sm:$0xff] %v1950_v44  ;;  %v1952_v45 = vpop.f32.mrb[14].mxu1  ;;  %v557_v46 = vpop.f32.mrb[15].mxu0 }
 0x10c   : > { %v1198_v48 = vmax.f32 %v1909_v19, %v557_v46  ;;  %v1957_v49 = vpop.f32.mrb[15].mxu1 }
 0x10d   : > { %2139 = vst [vmem:[#allocation5_spill] sm:$0xff] %v1957_v49 }
 0x10e   : > { %v1961_v51 = vpop.f32.mrb[16].mxu0 }
 0x10f   : > { %v804_v53 = vpop.f32.mrb[16].mxu1  ;;  %v1965_v54 = vpop.f32.mrb[17].mxu0 }
 0x110   : > { %v806_v56 = vpop.f32.mrb[17].mxu1 }
 0x112   : > { %v1969_v57 = vpop.f32.mrb[18].mxu0 }
 0x113   : > { %v810_v59 = vpop.f32.mrb[18].mxu1  ;;  %v1973_v60 = vpop.f32.mrb[19].mxu0 }
 0x114   : > { %v1977_v62 = vpop.f32.mrb[19].mxu1 }
 0x116   : > { %v1979_v63 = vpop.f32.mrb[20].mxu0 }
 0x117   : > { %v816_v2 = vpop.f32.mrb[20].mxu1  ;;  %v1983_v3 = vpop.f32.mrb[21].mxu0 }
 0x118   : > { %v1987_v5 = vpop.f32.mrb[21].mxu1 }
 0x11a   : > { %v1989_v7 = vpop.f32.mrb[22].mxu0 }
 0x11b   : > { %2140 = vst [vmem:[#allocation6_spill] sm:$0xff] %v1989_v7  ;;  %v822_v6 = vpop.f32.mrb[22].mxu1  ;;  %v1993_v12 = vpop.f32.mrb[23].mxu0 }
 0x11c   : > { %2141 = vst [vmem:[#allocation7_spill] sm:$0xff] %v1993_v12  ;;  %v1997_v19 = vpop.f32.mrb[23].mxu1 }
 0x11e   : > { %v893_v25 = vpop.f32.mrb[24].mxu0 }
 0x11f   : > { %v982_v32 = vpop.f32.mrb[24].mxu1  ;;  %v895_v39 = vpop.f32.mrb[25].mxu0 }
 0x120   : > { %v984_v46 = vpop.f32.mrb[25].mxu1 }
 0x121   : > { %v1203_v50 = vmax.f32 %v804_v53, %v984_v46  ;;  %v2011_v46 = vpop.permute.xlu1 %1255 }
 0x122   : > { %v899_v47 = vpop.f32.mrb[26].mxu0 }
 0x123   : > { %v1223_v43 = vmax.f32 %v1183_v27, %v1203_v50  ;;  %v1999_v1 = vpop.f32.mrb[26].mxu1  ;;  %v901_v40 = vpop.f32.mrb[27].mxu0 }
 0x124   : > { %v990_v8 = vpop.f32.mrb[27].mxu1 }
 0x125   : > { %v1208_v61 = vmax.f32 %v810_v59, %v990_v8  ;;  %v1263_v8 = vadd.f32 %v1246_v4, %v1223_v43  ;;  %v2143_v43 = vmax.f32 %v1889_v10, %v1919_v24  ;;  %v2146_v24 = vmax.f32 %v1917_v23, %v1965_v54 }
 0x126   : > { %v2001_v36 = vpop.f32.mrb[28].mxu0 }
 0x127   : > { %v1228_v58 = vmax.f32 %v1188_v34, %v1208_v61  ;;  %v2003_v33 = vpop.f32.mrb[28].mxu1  ;;  %v2005_v15 = vpop.f32.mrb[29].mxu0 }
 0x128   : > { %v996_v55 = vpop.f32.mrb[29].mxu1 }
 0x129   : > { %v1213_v52 = vmax.f32 %v816_v2, %v996_v55  ;;  %v2018_v61 = vadd.f32 %v2007_v29, %v1228_v58 }
 0x12a   : > { %v2009_v53 = vpop.f32.mrb[30].mxu0 }
 0x12b   : > { %v1233_v27 = vmax.f32 %v1193_v41, %v1213_v52  ;;  %v2013_v50 = vpop.f32.mrb[30].mxu1  ;;  %v2015_v26 = vpop.f32.mrb[31].mxu0  ;;  %v1288_v22 = vmax.f32 %v2018_v61, 0.0 }
 0x12c   : > { %2142 = vst [vmem:[#allocation8_spill] sm:$0xff] %v2013_v50  ;;  %v1002_v59 = vpop.f32.mrb[31].mxu1  ;;  %v2023_v52 = vpop.permute.xlu1 %1260 }
 0x12d   : > { %v1218_v34 = vmax.f32 %v822_v6, %v1002_v59  ;;  %v2021_v12 = vadd.f32 %v2011_v46, %v1233_v27  ;;  %v1283_v59 = vmax.f32 %v1263_v8, 0.0 }
 0x12e   : > { %v1071_v55 = vpop.f32.mrb[32].mxu0 }
 0x12f   : > { %v1238_v2 = vmax.f32 %v1198_v48, %v1218_v34  ;;  %v1204_v44 = vmax.f32 %v806_v56, %v1071_v55  ;;  %v1160_v49 = vpop.f32.mrb[32].mxu1  ;;  %v1073_v20 = vpop.f32.mrb[33].mxu0  ;;  %v2144_v48 = vmax.f32 %v1891_v11, %v1961_v51  ;;  %v2147_v55 = vmax.f32 %v1897_v14, %v1930_v31 }
 0x130   : > { %v1206_v41 = vmax.f32 %v895_v39, %v1160_v49  ;;  %v1205_v50 = vmax.f32 %v893_v25, %v1073_v20  ;;  %v1162_v7 = vpop.f32.mrb[33].mxu1  ;;  %v2145_v49 = vmax.f32 %v1887_v9, %v1924_v28  ;;  %v1293_v20 = vmax.f32 %v2021_v12, 0.0 }
 0x131   : > { %v1224_v6 = vmax.f32 %v2143_v43, %v1204_v44  ;;  %v1207_v58 = vmax.f32 %v982_v32, %v1162_v7  ;;  %v2038_v10 = vadd.f32 %v2023_v52, %v1238_v2 }
 0x132   : > { %v1226_v56 = vmax.f32 %v2144_v48, %v1206_v41  ;;  %v1225_v39 = vmax.f32 %v2145_v49, %v1205_v50  ;;  %v1077_v27 = vpop.f32.mrb[34].mxu0 }
 0x133   : > { %v1264_v25 = vadd.f32 %v1246_v4, %v1224_v6  ;;  %v1227_v44 = vmax.f32 %v2146_v24, %v1207_v58  ;;  %v1209_v7 = vmax.f32 %v1977_v62, %v1077_v27  ;;  %v1166_v32 = vpop.f32.mrb[34].mxu1  ;;  %v1079_v11 = vpop.f32.mrb[35].mxu0  ;;  %v2149_v62 = vmax.f32 %v1895_v13, %v1935_v35 }
 0x134   : > { %v1266_v51 = vadd.f32 %v1246_v4, %v1226_v56  ;;  %v1265_v8 = vadd.f32 %v1246_v4, %v1225_v39  ;;  %v1211_v34 = vmax.f32 %v901_v40, %v1166_v32  ;;  %v1210_v9 = vmax.f32 %v899_v47, %v1079_v11  ;;  %v1168_v28 = vpop.f32.mrb[35].mxu1 }
 0x135   : > { %v1284_v50 = vmax.f32 %v1264_v25, 0.0  ;;  %v1267_v61 = vadd.f32 %v1246_v4, %v1227_v44  ;;  %v1229_v2 = vmax.f32 %v2147_v55, %v1209_v7  ;;  %v1212_v41 = vmax.f32 %v1999_v1, %v1168_v28 }
 0x136   : > { %v1286_v23 = vmax.f32 %v1266_v51, 0.0  ;;  %v1285_v54 = vmax.f32 %v1265_v8, 0.0  ;;  %v2148_v40 = vmax.f32 %v1899_v0, %v1969_v57  ;;  %v1230_v4 = vmax.f32 %v2149_v62, %v1210_v9  ;;  %v1083_v14 = vpop.f32.mrb[36].mxu0 }
 0x137   : > { %v1515_v31 = vpack.c.bf16 %v1284_v50, %v1283_v59  ;;  %v1287_v1 = vmax.f32 %v1267_v61, 0.0  ;;  %v1269_v43 = vadd.f32 %v2007_v29, %v1229_v2  ;;  %v2150_v6 = vmax.f32 %v1928_v30, %v1973_v60  ;;  %v1172_v48 = vpop.f32.mrb[36].mxu1  ;;  %v1085_v56 = vpop.f32.mrb[37].mxu0 }
 0x138   : > { %v1231_v47 = vmax.f32 %v2148_v40, %v1211_v34  ;;  %v1516_v49 = vpack.c.bf16 %v1286_v23, %v1285_v54  ;;  %v1270_v57 = vadd.f32 %v2007_v29, %v1230_v4  ;;  %v1214_v13 = vmax.f32 %v1987_v5, %v1083_v14  ;;  %v1174_v35 = vpop.f32.mrb[37].mxu1  ;;  %v2156_v54 = vld [vmem:[#allocation3_spill] sm:$0xff]  ;;  %v2161_v14 = vld [vmem:[#allocation5_spill] sm:$0xff] }
 0x139   : > { %v1232_v58 = vmax.f32 %v2150_v6, %v1212_v41  ;;  %1367 = vst [vmem:[%s2051_s10] sm:$0xff] %v1515_v31  ;;  %v1517_v59 = vpack.c.bf16 %v1287_v1, %v1287_v1  ;;  %v1289_v39 = vmax.f32 %v1269_v43, 0.0  ;;  %v1216_v25 = vmax.f32 %v2005_v15, %v1172_v48  ;;  %v2163_v43 = vld [vmem:[#allocation4_spill] sm:$0xff]  ;;  %v2164_v6 = vld [vmem:[#allocation7_spill] sm:$0xff] }
 0x13a   : > { %v1271_v0 = vadd.f32 %v2007_v29, %v1231_v47  ;;  %1368 = vst [vmem:[%s2051_s10 + $0x8] sm:$0xff] %v1516_v49  ;;  %v1290_v60 = vmax.f32 %v1270_v57, 0.0  ;;  %v2151_v24 = vmax.f32 %v1905_v17, %v1941_v38  ;;  %v1215_v7 = vmax.f32 %v2001_v36, %v1085_v56  ;;  %v1089_v32 = vpop.f32.mrb[38].mxu0 }
 0x13b   : > { %v1272_v27 = vadd.f32 %v2007_v29, %v1232_v58  ;;  %1369 = vst [vmem:[%s2051_s10 + $0x10] sm:$0xf] %v1517_v59  ;;  %v1518_v5 = vpack.c.bf16 %v1289_v39, %v1288_v22  ;;  %v2152_v29 = vmax.f32 %v1907_v18, %v1979_v63  ;;  %v1217_v15 = vmax.f32 %v2003_v33, %v1174_v35  ;;  %v1178_v8 = vpop.f32.mrb[38].mxu1  ;;  %v1091_v34 = vpop.f32.mrb[39].mxu0 }
 0x13c   : > { %v1291_v30 = vmax.f32 %v1271_v0, 0.0  ;;  %v1234_v44 = vmax.f32 %v2151_v24, %v1214_v13  ;;  %v2153_v36 = vmax.f32 %v1903_v16, %v1946_v42  ;;  %v1219_v22 = vmax.f32 %v1997_v19, %v1089_v32  ;;  %v1180_v28 = vpop.f32.mrb[39].mxu1 }
 0x13d   : > { %v1292_v11 = vmax.f32 %v1272_v27, 0.0  ;;  %v1236_v51 = vmax.f32 %v2152_v29, %v1216_v25  ;;  %1370 = vst [vmem:[%s2051_s10 + $0x14] sm:$0xff] %v1518_v5  ;;  %v2154_v33 = vmax.f32 %v1939_v37, %v1983_v3  ;;  %v1221_v61 = vmax.f32 %v2015_v26, %v1178_v8  ;;  %v2157_v37 = vld [vmem:[#allocation6_spill] sm:$0xff]  ;;  %v2159_v26 = vld [vmem:[#allocation8_spill] sm:$0xff] }
 0x13e   : > { %v1519_v9 = vpack.c.bf16 %v1291_v30, %v1290_v60  ;;  %v1274_v17 = vadd.f32 %v2011_v46, %v1234_v44  ;;  %v1235_v38 = vmax.f32 %v2153_v36, %v1215_v7  ;;  %v2155_v16 = vmax.f32 %v1913_v21, %v1952_v45  ;;  %v2160_v45 = vld [vmem:[#allocation2_spill] sm:$0xff] }
 0x13f   : > { %v1520_v50 = vpack.c.bf16 %v1292_v11, %v1292_v11  ;;  %v1276_v18 = vadd.f32 %v2011_v46, %v1236_v51  ;;  %v1237_v63 = vmax.f32 %v2154_v33, %v1217_v15  ;;  %v1220_v19 = vmax.f32 %v2009_v53, %v1091_v34 }
 0x140   : > { %1371 = vst [vmem:[%s2051_s10 + $0x1c] sm:$0xff] %v1519_v9  ;;  %v1294_v55 = vmax.f32 %v1274_v17, 0.0  ;;  %v1275_v2 = vadd.f32 %v2011_v46, %v1235_v38  ;;  %v1239_v42 = vmax.f32 %v2155_v16, %v1219_v22  ;;  %v2158_v3 = vmax.f32 %v2156_v54, %v2157_v37 }
 0x141   : > { %1372 = vst [vmem:[%s2051_s10 + $0x24] sm:$0xf] %v1520_v50  ;;  %v1296_v41 = vmax.f32 %v1276_v18, 0.0  ;;  %v1277_v23 = vadd.f32 %v2011_v46, %v1237_v63  ;;  %v1222_v47 = vmax.f32 %v2159_v26, %v1180_v28  ;;  %v2162_v53 = vmax.f32 %v2160_v45, %v2161_v14 }
 0x142   : > { %v1241_v40 = vmax.f32 %v2158_v3, %v1221_v61  ;;  %v1521_v62 = vpack.c.bf16 %v1294_v55, %v1293_v20  ;;  %v1295_v4 = vmax.f32 %v1275_v2, 0.0  ;;  %v1279_v21 = vadd.f32 %v2023_v52, %v1239_v42 }
 0x143   : > { %v1240_v31 = vmax.f32 %v2162_v53, %v1220_v19  ;;  %v1297_v1 = vmax.f32 %v1277_v23, 0.0  ;;  %v2165_v58 = vmax.f32 %v2163_v43, %v2164_v6  ;;  %v1298_v12 = vmax.f32 %v2038_v10, 0.0 }
 0x144   : > { %v1281_v46 = vadd.f32 %v2023_v52, %v1241_v40  ;;  %1373 = vst [vmem:[%s2051_s10 + $0x28] sm:$0xff] %v1521_v62  ;;  %v1522_v20 = vpack.c.bf16 %v1296_v41, %v1295_v4  ;;  %v1299_v56 = vmax.f32 %v1279_v21, 0.0 }
 0x145   : > { %v1242_v48 = vmax.f32 %v2165_v58, %v1222_v47  ;;  %v1280_v49 = vadd.f32 %v2023_v52, %v1240_v31  ;;  %v1523_v0 = vpack.c.bf16 %v1297_v1, %v1297_v1 }
 0x146   : > { %v1301_v57 = vmax.f32 %v1281_v46, 0.0  ;;  %1374 = vst [vmem:[%s2051_s10 + $0x30] sm:$0xff] %v1522_v20  ;;  %v1524_v35 = vpack.c.bf16 %v1299_v56, %v1298_v12 }
 0x147   : > { %v1282_v13 = vadd.f32 %v2023_v52, %v1242_v48  ;;  %v1300_v59 = vmax.f32 %v1280_v49, 0.0  ;;  %1375 = vst [vmem:[%s2051_s10 + $0x38] sm:$0xf] %v1523_v0 }
 0x148   : > { %1376 = vst [vmem:[%s2051_s10 + $0x3c] sm:$0xff] %v1524_v35 }
 0x149   : > { %v1302_v39 = vmax.f32 %v1282_v13, 0.0  ;;  %v1525_v27 = vpack.c.bf16 %v1301_v57, %v1300_v59 }
 0x14b   : > { %v1526_v25 = vpack.c.bf16 %v1302_v39, %v1302_v39  ;;  %1377 = vst [vmem:[%s2051_s10 + $0x44] sm:$0xff] %v1525_v27 }
 0x14d   : > { %1378 = vst [vmem:[%s2051_s10 + $0x4c] sm:$0xf] %v1526_v25 }
 0x14e PF: > { %s13_s12 = sadd.s32 1, %s1608_s12  }
 0x14f   : > { %p10_p4 = scmp.ge.s32.totalorder %s13_s12, 4  }
 0x151   :  { %12 = sbr.rel (!%p10_p4) target bundleno = 1 (0x1), region = 62 }

// kernel: shallow_cnn_forward.3
= control target key start
LH: loop header
LB: loop body
LE: loop exit
PB: predicated region body
PF: predicated region fallthrough
CT: control target
= control target key end

     0   :  { %10 = vsyncpa [#allocation4], 0  ;;  %s13925_s18 = smov 0   ;;  %s15750_s0 = inlined_call_operand.vmem [shape: bf16[2,20480], index: 0, kind: input, shape index: {}]   ;;  %s15751_s1 = inlined_call_operand.vmem [shape: bf16[1,20480,256], index: 1, kind: input, shape index: {}]   ;;  %s15752_s2 = inlined_call_operand.vmem [shape: f32[1,1,256], index: 2, kind: input, shape index: {}]   ;;  %s15753_s3 = inlined_call_operand.vmem [shape: f32[1,256,2], index: 3, kind: input, shape index: {}]   ;;  %s15754_s4 = inlined_call_operand.vmem [shape: f32[1,2], index: 4, kind: input, shape index: {}]   ;;  %s15755_s5 = inlined_call_operand.hbm [shape: f32[2,2], index: 5, kind: output, shape index: {}]  }
   0x1 LB: > { %s13931_s19 = sadd.s32 4294967295, %s13889_s18   ;;  %p10381_p0 = scmp.ge.s32.totalorder %s13889_s18, 1  ;;  %s13889_s18 = sphi %s13925_s18, %s16_s18  }
   0x2   : > { %p195_p1 = scmp.lt.s32.totalorder %s13889_s18, 3 }
   0x4   : > { %p196_p2 = pnand %p10381_p0, %p195_p1 }
   0x5   : > { %s223_s20 = smul.u32 (!%p196_p2), 80, %s13931_s19  ;;  %p10384_p5 = scmp.ne.s32.totalorder (!%p196_p2), %s13931_s19, 0 }
   0x6   : > { %199 = sbr.rel (%p196_p2) target bundleno = 2099 (0x833), region = 40 }
   0x7   : > { %s228_s21 = smul.u32 (!%p196_p2), 1280, %s13931_s19  ;;  %p224_p3 = scmp.lt.s32.totalorder (!%p196_p2), %s223_s20, 159 }
   0x9   : > { %p229_p4 = scmp.lt.s32.totalorder (!%p196_p2), %s228_s21, 2559 }
   0xd   : > { %s15757_s20 = smov (!%p224_p3, %s223_s20), 159  ;;  %s15759_s21 = smov (!%p229_p4, %s228_s21), 2559 }
   0xe   : > { %s13940_s24 = scalar_lea.vmem %s15750_s0, %s15757_s20  ;;  %s11671_s25 = sshll.u32 %s15759_s21, 3  ;;  %v13891_v0 = vmov (!%p10384_p5), 0.0  }
   0xf   : > { %s13945_s28 = scalar_lea.vmem %s15751_s1, %s11671_s25  ;;  %238 = sbr.rel (%p10384_p5) target bundleno = 22 (0x16), region = 44  ;;  %239 = vst [vmem:[#allocation2] sm:$0xf] (!%p10384_p5), %v13891_v0 }
  0x16 PF: > { %v11911_v1 = vld [vmem:[%s13945_s28 + $0x4] ss:$8 sps:$4 sm:$0xff]   ;;  %v11915_v3 = vld [vmem:[%s13945_s28] ss:$8 sps:$4 sm:$0xff]   ;;  %v11917_v5 = vld [vmem:[%s13945_s28 + $0x14] ss:$8 sps:$4 sm:$0xff]   ;;  %v1545_v39 = vlaneseq }
  0x17   : > { %v11913_v2 = vld [vmem:[%s13945_s28 + $0x1404] ss:$8 sps:$4 sm:$0xff]   ;;  %8511 = vmatprep.subr.bf16.mxu1 %v11911_v1  ;;  %v11916_v4 = vld [vmem:[%s13945_s28 + $0x1400] ss:$8 sps:$4 sm:$0xff]   ;;  %v11919_v6 = vld [vmem:[%s13945_s28 + $0x1414] ss:$8 sps:$4 sm:$0xff]  }
  0x18   : > { %9331 = vmatprep.subr.bf16.mxu0 %v11913_v2  ;;  %8512 = vmatpush1.bf16.msra.mxu1 %v11915_v3  ;;  %v11921_v7 = vld [vmem:[%s13945_s28 + $0x10] ss:$8 sps:$4 sm:$0xff]   ;;  %v11923_v9 = vld [vmem:[%s13945_s28 + $0x24] ss:$8 sps:$4 sm:$0xff]   ;;  %v11927_v11 = vld [vmem:[%s13945_s28 + $0x20] ss:$8 sps:$4 sm:$0xff]  }
  0x19   : > { %9332 = vmatpush1.bf16.msra.mxu0 %v11916_v4  ;;  %8513 = vmatprep.subr.bf16.mxu1 %v11917_v5  ;;  %v11922_v8 = vld [vmem:[%s13945_s28 + $0x1410] ss:$8 sps:$4 sm:$0xff]   ;;  %v11925_v10 = vld [vmem:[%s13945_s28 + $0x1424] ss:$8 sps:$4 sm:$0xff]   ;;  %v11928_v12 = vld [vmem:[%s13945_s28 + $0x1420] ss:$8 sps:$4 sm:$0xff]  }
  0x1a   : > { %9333 = vmatprep.subr.bf16.mxu0 %v11919_v6  ;;  %v11929_v13 = vld [vmem:[%s13945_s28 + $0x34] ss:$8 sps:$4 sm:$0xff]   ;;  %v11933_v15 = vld [vmem:[%s13945_s28 + $0x30] ss:$8 sps:$4 sm:$0xff]   ;;  %v11935_v17 = vld [vmem:[%s13945_s28 + $0x44] ss:$8 sps:$4 sm:$0xff]  }
  0x1b   : > { %v11931_v14 = vld [vmem:[%s13945_s28 + $0x1434] ss:$8 sps:$4 sm:$0xff]   ;;  %v11934_v16 = vld [vmem:[%s13945_s28 + $0x1430] ss:$8 sps:$4 sm:$0xff]   ;;  %v11937_v18 = vld [vmem:[%s13945_s28 + $0x1444] ss:$8 sps:$4 sm:$0xff]  }
  0x1c   : > { %8514 = vmatpush1.bf16.msra.mxu1 %v11921_v7  ;;  %v11939_v19 = vld [vmem:[%s13945_s28 + $0x40] ss:$8 sps:$4 sm:$0xff]   ;;  %v11941_v21 = vld [vmem:[%s13945_s28 + $0x54] ss:$8 sps:$4 sm:$0xff]   ;;  %v11945_v23 = vld [vmem:[%s13945_s28 + $0x50] ss:$8 sps:$4 sm:$0xff]  }
  0x1d   : > { %9334 = vmatpush1.bf16.msra.mxu0 %v11922_v8  ;;  %8515 = vmatprep.subr.bf16.mxu1 %v11923_v9  ;;  %v11940_v20 = vld [vmem:[%s13945_s28 + $0x1440] ss:$8 sps:$4 sm:$0xff]   ;;  %v11943_v22 = vld [vmem:[%s13945_s28 + $0x1454] ss:$8 sps:$4 sm:$0xff]   ;;  %v11946_v24 = vld [vmem:[%s13945_s28 + $0x1450] ss:$8 sps:$4 sm:$0xff]  }
  0x1e   : > { %9335 = vmatprep.subr.bf16.mxu0 %v11925_v10  ;;  %v11947_v25 = vld [vmem:[%s13945_s28 + $0x64] ss:$8 sps:$4 sm:$0xff]   ;;  %v11951_v27 = vld [vmem:[%s13945_s28 + $0x60] ss:$8 sps:$4 sm:$0xff]   ;;  %v11953_v29 = vld [vmem:[%s13945_s28 + $0x74] ss:$8 sps:$4 sm:$0xff]  }
  0x1f   : > { %v11949_v26 = vld [vmem:[%s13945_s28 + $0x1464] ss:$8 sps:$4 sm:$0xff]   ;;  %v11952_v28 = vld [vmem:[%s13945_s28 + $0x1460] ss:$8 sps:$4 sm:$0xff]   ;;  %v11955_v30 = vld [vmem:[%s13945_s28 + $0x1474] ss:$8 sps:$4 sm:$0xff]  }
  0x20   : > { %8516 = vmatpush1.bf16.msra.mxu1 %v11927_v11  ;;  %v11957_v31 = vld [vmem:[%s13945_s28 + $0x70] ss:$8 sps:$4 sm:$0xff]   ;;  %v11959_v33 = vld [vmem:[%s13945_s28 + $0x84] ss:$8 sps:$4 sm:$0xff]   ;;  %v11963_v35 = vld [vmem:[%s13945_s28 + $0x80] ss:$8 sps:$4 sm:$0xff]  }
  0x21   : > { %9336 = vmatpush1.bf16.msra.mxu0 %v11928_v12  ;;  %8517 = vmatprep.subr.bf16.mxu1 %v11929_v13  ;;  %v11958_v32 = vld [vmem:[%s13945_s28 + $0x1470] ss:$8 sps:$4 sm:$0xff]   ;;  %v11961_v34 = vld [vmem:[%s13945_s28 + $0x1484] ss:$8 sps:$4 sm:$0xff]   ;;  %v11964_v36 = vld [vmem:[%s13945_s28 + $0x1480] ss:$8 sps:$4 sm:$0xff]  }
  0x22   : > { %9337 = vmatprep.subr.bf16.mxu0 %v11931_v14  ;;  %v13892_v37 = vmov 1966171168   ;;  %v11965_v40 = vld [vmem:[%s13945_s28 + $0x94] ss:$8 sps:$4 sm:$0xff]   ;;  %v11969_v42 = vld [vmem:[%s13945_s28 + $0x90] ss:$8 sps:$4 sm:$0xff]  }
  0x23   : > { %v1543_v38 = vunpack.c.l.s4 %v13892_v37  ;;  %v11967_v41 = vld [vmem:[%s13945_s28 + $0x1494] ss:$8 sps:$4 sm:$0xff]   ;;  %v13987_v44 = vshrl.u32 %v1545_v39, 7  ;;  %v11970_v45 = vld [vmem:[%s13945_s28 + $0x1490] ss:$8 sps:$4 sm:$0xff]   ;;  %v14000_v53 = vld [vmem:[%s13940_s24] sm:$0xff] }
  0x24   : > { %8518 = vmatpush1.bf16.msra.mxu1 %v11933_v15  ;;  %v11971_v46 = vld [vmem:[%s13945_s28 + $0xa4] ss:$8 sps:$4 sm:$0xff]   ;;  %v11975_v48 = vld [vmem:[%s13945_s28 + $0xa0] ss:$8 sps:$4 sm:$0xff]   ;;  %v11977_v51 = vld [vmem:[%s13945_s28 + $0xb4] ss:$8 sps:$4 sm:$0xff]  }
  0x25   : > { %9338 = vmatpush1.bf16.msra.mxu0 %v11934_v16  ;;  %8519 = vmatprep.subr.bf16.mxu1 %v11935_v17  ;;  %v1544_v43 = vunpack.c.0.s8 %v1543_v38  ;;  %v11973_v47 = vld [vmem:[%s13945_s28 + $0x14a4] ss:$8 sps:$4 sm:$0xff]   ;;  %v11976_v49 = vld [vmem:[%s13945_s28 + $0x14a0] ss:$8 sps:$4 sm:$0xff]   ;;  %v11979_v52 = vld [vmem:[%s13945_s28 + $0x14b4] ss:$8 sps:$4 sm:$0xff]  }
  0x26   : > { %9339 = vmatprep.subr.bf16.mxu0 %v11937_v18  ;;  %v11981_v54 = vld [vmem:[%s13945_s28 + $0xb0] ss:$8 sps:$4 sm:$0xff]   ;;  %v14007_v57 = vld [vmem:[%s13940_s24 + $0x28] sm:$0xff]  ;;  %v11989_v2 = vld [vmem:[%s13945_s28 + $0xd4] ss:$8 sps:$4 sm:$0xff]   ;;  %p11665_p6 = scmp.ne.s32.totalorder %s13931_s19, 1 }
  0x27   : > { %v13995_v50 = vsub.s32 %v1544_v43, %v13987_v44  ;;  %v11982_v56 = vld [vmem:[%s13945_s28 + $0x14b0] ss:$8 sps:$4 sm:$0xff]   ;;  %v11983_v58 = vld [vmem:[%s13945_s28 + $0xc4] ss:$8 sps:$4 sm:$0xff]   ;;  %v11987_v0 = vld [vmem:[%s13945_s28 + $0xc0] ss:$8 sps:$4 sm:$0xff]  }
  0x28   : > { %8520 = vmatpush1.bf16.msra.mxu1 %v11939_v19  ;;  %v11985_v59 = vld [vmem:[%s13945_s28 + $0x14c4] ss:$8 sps:$4 sm:$0xff]   ;;  %v11988_v1 = vld [vmem:[%s13945_s28 + $0x14c0] ss:$8 sps:$4 sm:$0xff]   ;;  %v11991_v3 = vld [vmem:[%s13945_s28 + $0x14d4] ss:$8 sps:$4 sm:$0xff]  }
  0x29   : > { %9340 = vmatpush1.bf16.msra.mxu0 %v11940_v20  ;;  %8521 = vmatprep.subr.bf16.mxu1 %v11941_v21  ;;  %v1548_v55 = vrot.slane %v14000_v53, %v13995_v50  ;;  %v1793_v61 = vrot.slane %v14007_v57, %v13995_v50  ;;  %v11993_v5 = vld [vmem:[%s13945_s28 + $0xd0] ss:$8 sps:$4 sm:$0xff]   ;;  %v11995_v7 = vld [vmem:[%s13945_s28 + $0xe4] ss:$8 sps:$4 sm:$0xff]   ;;  %v11999_v9 = vld [vmem:[%s13945_s28 + $0xe0] ss:$8 sps:$4 sm:$0xff]  }
  0x2a   : > { %9341 = vmatprep.subr.bf16.mxu0 %v11943_v22  ;;  %v11994_v6 = vld [vmem:[%s13945_s28 + $0x14d0] ss:$8 sps:$4 sm:$0xff]   ;;  %v11997_v8 = vld [vmem:[%s13945_s28 + $0x14e4] ss:$8 sps:$4 sm:$0xff]   ;;  %v12000_v10 = vld [vmem:[%s13945_s28 + $0x14e0] ss:$8 sps:$4 sm:$0xff]  }
  0x2b   : > { %v1556_v60 = vcombine.high %v1548_v55, %v1548_v55  ;;  %v1801_v63 = vcombine.high %v1793_v61, %v1793_v61  ;;  %v12001_v11 = vld [vmem:[%s13945_s28 + $0xf4] ss:$8 sps:$4 sm:$0xff]   ;;  %v12005_v13 = vld [vmem:[%s13945_s28 + $0xf0] ss:$8 sps:$4 sm:$0xff]   ;;  %v12010_v15 = vld [vmem:[%s13945_s28 + $0x104] ss:$8 sps:$4 sm:$0xff]   ;;  %v14032_v17 = vrot.slane %v1548_v55, %v13995_v50  ;;  %v14035_v18 = vrot.slane %v1793_v61, %v13995_v50 }
  0x2c   : > { %8522 = vmatpush1.bf16.msra.mxu1 %v11945_v23  ;;  %v12003_v12 = vld [vmem:[%s13945_s28 + $0x14f4] ss:$8 sps:$4 sm:$0xff]   ;;  %v12006_v14 = vld [vmem:[%s13945_s28 + $0x14f0] ss:$8 sps:$4 sm:$0xff]   ;;  %v12014_v16 = vld [vmem:[%s13945_s28 + $0x1504] ss:$8 sps:$4 sm:$0xff]  }
  0x2d   : > { %9342 = vmatpush1.bf16.msra.mxu0 %v11946_v24  ;;  %8523 = vmatprep.subr.bf16.mxu1 %v11947_v25  ;;  %v1578_v62 = vrot.slane %v1556_v60, %v13995_v50  ;;  %v1823_v4 = vrot.slane %v1801_v63, %v13995_v50  ;;  %v12008_v19 = vld [vmem:[%s13945_s28 + $0x100] ss:$8 sps:$4 sm:$0xff]   ;;  %v12017_v21 = vld [vmem:[%s13945_s28 + $0x114] ss:$8 sps:$4 sm:$0xff]   ;;  %v12015_v25 = vld [vmem:[%s13945_s28 + $0x110] ss:$8 sps:$4 sm:$0xff]  }
  0x2e   : > { %9343 = vmatprep.subr.bf16.mxu0 %v11949_v26  ;;  %v12012_v20 = vld [vmem:[%s13945_s28 + $0x1500] ss:$8 sps:$4 sm:$0xff]   ;;  %v12020_v22 = vld [vmem:[%s13945_s28 + $0x1514] ss:$8 sps:$4 sm:$0xff]   ;;  %v12018_v26 = vld [vmem:[%s13945_s28 + $0x1510] ss:$8 sps:$4 sm:$0xff]  }
  0x2f   : > { %8543 = vmatprep.mubr.bf16.mxu1 %v1578_v62  ;;  %9363 = vmatprep.mubr.bf16.mxu0 %v1823_v4  ;;  %v1588_v23 = vcombine.high %v1578_v62, %v1578_v62  ;;  %v1833_v24 = vcombine.high %v1823_v4, %v1823_v4  ;;  %v12033_v37 = vld [vmem:[%s13945_s28 + $0x140] ss:$8 sps:$4 sm:$0xff]   ;;  %v12041_v39 = vld [vmem:[%s13945_s28 + $0x154] ss:$8 sps:$4 sm:$0xff]   ;;  %v12047_v43 = vld [vmem:[%s13945_s28 + $0x164] ss:$8 sps:$4 sm:$0xff]  }
  0x30   : > { %8524 = vmatpush1.bf16.msra.mxu1 %v11951_v27  ;;  %v12023_v27 = vld [vmem:[%s13945_s28 + $0x124] ss:$8 sps:$4 sm:$0xff]   ;;  %v12036_v38 = vld [vmem:[%s13945_s28 + $0x1540] ss:$8 sps:$4 sm:$0xff]   ;;  %v12068_v60 = vld [vmem:[%s13945_s28 + $0x1594] ss:$8 sps:$4 sm:$0xff]  }
  0x31   : > { %9344 = vmatpush1.bf16.msra.mxu0 %v11952_v28  ;;  %8525 = vmatprep.subr.bf16.mxu1 %v11953_v29  ;;  %v12026_v28 = vld [vmem:[%s13945_s28 + $0x1524] ss:$8 sps:$4 sm:$0xff]   ;;  %v12021_v29 = vld [vmem:[%s13945_s28 + $0x120] ss:$8 sps:$4 sm:$0xff]   ;;  %v12063_v61 = vld [vmem:[%s13945_s28 + $0x190] ss:$8 sps:$4 sm:$0xff]  }
  0x32   : > { %9345 = vmatprep.subr.bf16.mxu0 %v11955_v30  ;;  %v12024_v30 = vld [vmem:[%s13945_s28 + $0x1520] ss:$8 sps:$4 sm:$0xff]   ;;  %v12062_v55 = vld [vmem:[%s13945_s28 + $0x1584] ss:$8 sps:$4 sm:$0xff]   ;;  %v12066_v62 = vld [vmem:[%s13945_s28 + $0x1590] ss:$8 sps:$4 sm:$0xff]  }
  0x33   : > { %v12071_v63 = vld [vmem:[%s13945_s28 + $0x1a4] ss:$8 sps:$4 sm:$0xff]   ;;  %v12080_v4 = vld [vmem:[%s13945_s28 + $0x15b4] ss:$8 sps:$4 sm:$0xff]   ;;  %vm10310_vm0 = vcmask (!%p11665_p6), 9216  }
  0x34   : > { %8526 = vmatpush1.bf16.msra.mxu1 %v11957_v31  ;;  %v12029_v31 = vld [vmem:[%s13945_s28 + $0x134] ss:$8 sps:$4 sm:$0xff]  }
  0x35   : > { %9346 = vmatpush1.bf16.msra.mxu0 %v11958_v32  ;;  %8527 = vmatprep.subr.bf16.mxu1 %v11959_v33  ;;  %v12032_v32 = vld [vmem:[%s13945_s28 + $0x1534] ss:$8 sps:$4 sm:$0xff]   ;;  %v12027_v33 = vld [vmem:[%s13945_s28 + $0x130] ss:$8 sps:$4 sm:$0xff]  }
  0x36   : > { %9347 = vmatprep.subr.bf16.mxu0 %v11961_v34  ;;  %v12030_v34 = vld [vmem:[%s13945_s28 + $0x1530] ss:$8 sps:$4 sm:$0xff]  }
  0x38   : > { %8528 = vmatpush1.bf16.msra.mxu1 %v11963_v35  ;;  %v12035_v35 = vld [vmem:[%s13945_s28 + $0x144] ss:$8 sps:$4 sm:$0xff]  }
  0x39   : > { %9348 = vmatpush1.bf16.msra.mxu0 %v11964_v36  ;;  %8529 = vmatprep.subr.bf16.mxu1 %v11965_v40  ;;  %v12038_v36 = vld [vmem:[%s13945_s28 + $0x1544] ss:$8 sps:$4 sm:$0xff]   ;;  %v12044_v40 = vld [vmem:[%s13945_s28 + $0x1554] ss:$8 sps:$4 sm:$0xff]  }
  0x3a   : > { %9349 = vmatprep.subr.bf16.mxu0 %v11967_v41  ;;  %v12039_v41 = vld [vmem:[%s13945_s28 + $0x150] ss:$8 sps:$4 sm:$0xff]  }
  0x3c   : > { %8530 = vmatpush1.bf16.msra.mxu1 %v11969_v42  ;;  %v12042_v42 = vld [vmem:[%s13945_s28 + $0x1550] ss:$8 sps:$4 sm:$0xff]  }
  0x3d   : > { %9350 = vmatpush1.bf16.msra.mxu0 %v11970_v45  ;;  %8531 = vmatprep.subr.bf16.mxu1 %v11971_v46  ;;  %v12050_v45 = vld [vmem:[%s13945_s28 + $0x1564] ss:$8 sps:$4 sm:$0xff]   ;;  %v12045_v46 = vld [vmem:[%s13945_s28 + $0x160] ss:$8 sps:$4 sm:$0xff]  }
  0x3e   : > { %9351 = vmatprep.subr.bf16.mxu0 %v11973_v47  ;;  %v12048_v47 = vld [vmem:[%s13945_s28 + $0x1560] ss:$8 sps:$4 sm:$0xff]  }
  0x40   : > { %8532 = vmatpush1.bf16.msra.mxu1 %v11975_v48  ;;  %v12053_v48 = vld [vmem:[%s13945_s28 + $0x174] ss:$8 sps:$4 sm:$0xff]  }
  0x41   : > { %9352 = vmatpush1.bf16.msra.mxu0 %v11976_v49  ;;  %8533 = vmatprep.subr.bf16.mxu1 %v11977_v51  ;;  %v12056_v49 = vld [vmem:[%s13945_s28 + $0x1574] ss:$8 sps:$4 sm:$0xff]   ;;  %v12051_v51 = vld [vmem:[%s13945_s28 + $0x170] ss:$8 sps:$4 sm:$0xff]  }
  0x42   : > { %9353 = vmatprep.subr.bf16.mxu0 %v11979_v52  ;;  %v12054_v52 = vld [vmem:[%s13945_s28 + $0x1570] ss:$8 sps:$4 sm:$0xff]  }
  0x44   : > { %8534 = vmatpush1.bf16.msra.mxu1 %v11981_v54  ;;  %v12059_v54 = vld [vmem:[%s13945_s28 + $0x184] ss:$8 sps:$4 sm:$0xff]  }
  0x45   : > { %9354 = vmatpush1.bf16.msra.mxu0 %v11982_v56  ;;  %8535 = vmatprep.subr.bf16.mxu1 %v11983_v58  ;;  %v12057_v56 = vld [vmem:[%s13945_s28 + $0x180] ss:$8 sps:$4 sm:$0xff]  }
  0x46   : > { %9355 = vmatprep.subr.bf16.mxu0 %v11985_v59  ;;  %v12060_v58 = vld [vmem:[%s13945_s28 + $0x1580] ss:$8 sps:$4 sm:$0xff]   ;;  %v12065_v59 = vld [vmem:[%s13945_s28 + $0x194] ss:$8 sps:$4 sm:$0xff]  }
  0x48   : > { %8536 = vmatpush1.bf16.msra.mxu1 %v11987_v0  ;;  %v12074_v0 = vld [vmem:[%s13945_s28 + $0x15a4] ss:$8 sps:$4 sm:$0xff]  }
  0x49   : > { %9356 = vmatpush1.bf16.msra.mxu0 %v11988_v1  ;;  %8537 = vmatprep.subr.bf16.mxu1 %v11989_v2  ;;  %v12069_v1 = vld [vmem:[%s13945_s28 + $0x1a0] ss:$8 sps:$4 sm:$0xff]  }
  0x4a   : > { %9357 = vmatprep.subr.bf16.mxu0 %v11991_v3  ;;  %v12072_v2 = vld [vmem:[%s13945_s28 + $0x15a0] ss:$8 sps:$4 sm:$0xff]   ;;  %v12077_v3 = vld [vmem:[%s13945_s28 + $0x1b4] ss:$8 sps:$4 sm:$0xff]  }
  0x4c   : > { %8538 = vmatpush1.bf16.msra.mxu1 %v11993_v5  ;;  %v12075_v5 = vld [vmem:[%s13945_s28 + $0x1b0] ss:$8 sps:$4 sm:$0xff]  }
  0x4d   : > { %9358 = vmatpush1.bf16.msra.mxu0 %v11994_v6  ;;  %8539 = vmatprep.subr.bf16.mxu1 %v11995_v7  ;;  %v12078_v6 = vld [vmem:[%s13945_s28 + $0x15b0] ss:$8 sps:$4 sm:$0xff]   ;;  %v12083_v7 = vld [vmem:[%s13945_s28 + $0x1c4] ss:$8 sps:$4 sm:$0xff]  }
  0x4e   : > { %9359 = vmatprep.subr.bf16.mxu0 %v11997_v8  ;;  %v12086_v8 = vld [vmem:[%s13945_s28 + $0x15c4] ss:$8 sps:$4 sm:$0xff]  }
  0x50   : > { %8540 = vmatpush1.bf16.msra.mxu1 %v11999_v9  ;;  %v12081_v9 = vld [vmem:[%s13945_s28 + $0x1c0] ss:$8 sps:$4 sm:$0xff]  }
  0x51   : > { %9360 = vmatpush1.bf16.msra.mxu0 %v12000_v10  ;;  %8541 = vmatprep.subr.bf16.mxu1 %v12001_v11  ;;  %v12084_v10 = vld [vmem:[%s13945_s28 + $0x15c0] ss:$8 sps:$4 sm:$0xff]   ;;  %v12089_v11 = vld [vmem:[%s13945_s28 + $0x1d4] ss:$8 sps:$4 sm:$0xff]  }
  0x52   : > { %9361 = vmatprep.subr.bf16.mxu0 %v12003_v12  ;;  %v12092_v12 = vld [vmem:[%s13945_s28 + $0x15d4] ss:$8 sps:$4 sm:$0xff]  }
  0x54   : > { %8542 = vmatpush1.bf16.msra.mxu1 %v12005_v13  ;;  %v12087_v13 = vld [vmem:[%s13945_s28 + $0x1d0] ss:$8 sps:$4 sm:$0xff]  }
  0x55   : > { %9362 = vmatpush1.bf16.msra.mxu0 %v12006_v14  ;;  %8552 = vmatprep.subr.bf16.mxu1 %v12010_v15  ;;  %v12090_v14 = vld [vmem:[%s13945_s28 + $0x15d0] ss:$8 sps:$4 sm:$0xff]   ;;  %v12095_v15 = vld [vmem:[%s13945_s28 + $0x1e4] ss:$8 sps:$4 sm:$0xff]  }
  0x56   : > { %9372 = vmatprep.subr.bf16.mxu0 %v12014_v16  ;;  %v12098_v16 = vld [vmem:[%s13945_s28 + $0x15e4] ss:$8 sps:$4 sm:$0xff]  }
  0x57   : > { %8544 = vmatmul.mubr.bf16.vlgmr.msra.gmra.mrb[0].mxu1 %v14032_v17 }
  0x58   : > { %9364 = vmatmul.mubr.bf16.vlgmr.msra.gmra.mrb[0].mxu0 %v14035_v18  ;;  %8553 = vmatpush1.bf16.msra.mxu1 %v12008_v19  ;;  %v1541_v19 = vcombine.high %v14000_v53, %v14000_v53  ;;  %v12099_v53 = vld [vmem:[%s13945_s28 + $0x1f0] ss:$8 sps:$4 sm:$0xff]  }
  0x59   : > { %9373 = vmatpush1.bf16.msra.mxu0 %v12012_v20  ;;  %8554 = vmatprep.subr.bf16.mxu1 %v12017_v21  ;;  %v1786_v20 = vcombine.high %v14007_v57, %v14007_v57  ;;  %v12093_v21 = vld [vmem:[%s13945_s28 + $0x1e0] ss:$8 sps:$4 sm:$0xff]   ;;  %v12102_v57 = vld [vmem:[%s13945_s28 + $0x15f0] ss:$8 sps:$4 sm:$0xff]  }
  0x5a   : > { %9374 = vmatprep.subr.bf16.mxu0 %v12020_v22  ;;  %8584 = vmatprep.mubr.bf16.mxu1 %v1588_v23  ;;  %v12096_v22 = vld [vmem:[%s13945_s28 + $0x15e0] ss:$8 sps:$4 sm:$0xff]   ;;  %v12101_v23 = vld [vmem:[%s13945_s28 + $0x1f4] ss:$8 sps:$4 sm:$0xff]  }
  0x5b   : > { %9404 = vmatprep.mubr.bf16.mxu0 %v1833_v24  ;;  %v12104_v24 = vld [vmem:[%s13945_s28 + $0x15f4] ss:$8 sps:$4 sm:$0xff]  }
  0x5c   : > { %8555 = vmatpush1.bf16.msra.mxu1 %v12015_v25  ;;  %v14104_v25 = vrot.slane %v1541_v19, %v13995_v50  ;;  %v12171_v19 = vld [vmem:[%s13945_s28 + $0x2b0] ss:$8 sps:$4 sm:$0xff]  }
  0x5d   : > { %9375 = vmatpush1.bf16.msra.mxu0 %v12018_v26  ;;  %8556 = vmatprep.subr.bf16.mxu1 %v12023_v27  ;;  %v14107_v26 = vrot.slane %v1786_v20, %v13995_v50  ;;  %v12107_v27 = vld [vmem:[%s13945_s28 + $0x204] ss:$8 sps:$4 sm:$0xff]   ;;  %v12174_v20 = vld [vmem:[%s13945_s28 + $0x16b0] ss:$8 sps:$4 sm:$0xff]  }
  0x5e   : > { %9376 = vmatprep.subr.bf16.mxu0 %v12026_v28  ;;  %v12110_v28 = vld [vmem:[%s13945_s28 + $0x1604] ss:$8 sps:$4 sm:$0xff]  }
  0x60   : > { %8557 = vmatpush1.bf16.msra.mxu1 %v12021_v29  ;;  %v1557_v29 = vcombine.high %v14104_v25, %v14104_v25 }
  0x61   : > { %9377 = vmatpush1.bf16.msra.mxu0 %v12024_v30  ;;  %8558 = vmatprep.subr.bf16.mxu1 %v12029_v31  ;;  %v1802_v30 = vcombine.high %v14107_v26, %v14107_v26  ;;  %v1586_v31 = vcombine.high %v14032_v17, %v14032_v17 }
  0x62   : > { %9378 = vmatprep.subr.bf16.mxu0 %v12032_v32  ;;  %v1831_v32 = vcombine.high %v14035_v18, %v14035_v18  ;;  %v12111_v18 = vld [vmem:[%s13945_s28 + $0x210] ss:$8 sps:$4 sm:$0xff]  }
  0x63   : > { %v14129_v17 = vrot.slane %v1802_v30, %v13995_v50  ;;  %v12194_v30 = vld [vmem:[%s13945_s28 + $0x16e4] ss:$8 sps:$4 sm:$0xff]  }
  0x64   : > { %8559 = vmatpush1.bf16.msra.mxu1 %v12027_v33  ;;  %v12105_v33 = vld [vmem:[%s13945_s28 + $0x200] ss:$8 sps:$4 sm:$0xff]  }
  0x65   : > { %9379 = vmatpush1.bf16.msra.mxu0 %v12030_v34  ;;  %8560 = vmatprep.subr.bf16.mxu1 %v12035_v35  ;;  %v12108_v34 = vld [vmem:[%s13945_s28 + $0x1600] ss:$8 sps:$4 sm:$0xff]   ;;  %v12113_v35 = vld [vmem:[%s13945_s28 + $0x214] ss:$8 sps:$4 sm:$0xff]  }
  0x66   : > { %9380 = vmatprep.subr.bf16.mxu0 %v12038_v36  ;;  %v12116_v36 = vld [vmem:[%s13945_s28 + $0x1614] ss:$8 sps:$4 sm:$0xff]  }
  0x68   : > { %8561 = vmatpush1.bf16.msra.mxu1 %v12033_v37  ;;  %v14126_v37 = vrot.slane %v1557_v29, %v13995_v50  ;;  %v12191_v29 = vld [vmem:[%s13945_s28 + $0x2e4] ss:$8 sps:$4 sm:$0xff]  }
  0x69   : > { %9381 = vmatpush1.bf16.msra.mxu0 %v12036_v38  ;;  %8562 = vmatprep.subr.bf16.mxu1 %v12041_v39  ;;  %v12114_v38 = vld [vmem:[%s13945_s28 + $0x1610] ss:$8 sps:$4 sm:$0xff]   ;;  %v12119_v39 = vld [vmem:[%s13945_s28 + $0x224] ss:$8 sps:$4 sm:$0xff]  }
  0x6a   : > { %9382 = vmatprep.subr.bf16.mxu0 %v12044_v40  ;;  %v12122_v40 = vld [vmem:[%s13945_s28 + $0x1624] ss:$8 sps:$4 sm:$0xff]  }
  0x6c   : > { %8563 = vmatpush1.bf16.msra.mxu1 %v12039_v41  ;;  %v12117_v41 = vld [vmem:[%s13945_s28 + $0x220] ss:$8 sps:$4 sm:$0xff]  }
  0x6d   : > { %9383 = vmatpush1.bf16.msra.mxu0 %v12042_v42  ;;  %8564 = vmatprep.subr.bf16.mxu1 %v12047_v43  ;;  %v12120_v42 = vld [vmem:[%s13945_s28 + $0x1620] ss:$8 sps:$4 sm:$0xff]   ;;  %v12125_v43 = vld [vmem:[%s13945_s28 + $0x234] ss:$8 sps:$4 sm:$0xff]  }
  0x6e   : > { %9384 = vmatprep.subr.bf16.mxu0 %v12050_v45  ;;  %v12128_v45 = vld [vmem:[%s13945_s28 + $0x1634] ss:$8 sps:$4 sm:$0xff]  }
  0x70   : > { %8565 = vmatpush1.bf16.msra.mxu1 %v12045_v46  ;;  %v12123_v46 = vld [vmem:[%s13945_s28 + $0x230] ss:$8 sps:$4 sm:$0xff]  }
  0x71   : > { %9385 = vmatpush1.bf16.msra.mxu0 %v12048_v47  ;;  %8566 = vmatprep.subr.bf16.mxu1 %v12053_v48  ;;  %v12126_v47 = vld [vmem:[%s13945_s28 + $0x1630] ss:$8 sps:$4 sm:$0xff]   ;;  %v12131_v48 = vld [vmem:[%s13945_s28 + $0x244] ss:$8 sps:$4 sm:$0xff]  }
  0x72   : > { %9386 = vmatprep.subr.bf16.mxu0 %v12056_v49  ;;  %v12134_v49 = vld [vmem:[%s13945_s28 + $0x1644] ss:$8 sps:$4 sm:$0xff]  }
  0x74   : > { %8567 = vmatpush1.bf16.msra.mxu1 %v12051_v51  ;;  %v12129_v51 = vld [vmem:[%s13945_s28 + $0x240] ss:$8 sps:$4 sm:$0xff]  }
  0x75   : > { %9387 = vmatpush1.bf16.msra.mxu0 %v12054_v52  ;;  %8568 = vmatprep.subr.bf16.mxu1 %v12059_v54  ;;  %v12132_v52 = vld [vmem:[%s13945_s28 + $0x1640] ss:$8 sps:$4 sm:$0xff]   ;;  %v12137_v54 = vld [vmem:[%s13945_s28 + $0x254] ss:$8 sps:$4 sm:$0xff]  }
  0x76   : > { %9388 = vmatprep.subr.bf16.mxu0 %v12062_v55  ;;  %v12140_v55 = vld [vmem:[%s13945_s28 + $0x1654] ss:$8 sps:$4 sm:$0xff]  }
  0x78   : > { %8569 = vmatpush1.bf16.msra.mxu1 %v12057_v56  ;;  %v12135_v56 = vld [vmem:[%s13945_s28 + $0x250] ss:$8 sps:$4 sm:$0xff]  }
  0x79   : > { %9389 = vmatpush1.bf16.msra.mxu0 %v12060_v58  ;;  %8570 = vmatprep.subr.bf16.mxu1 %v12065_v59  ;;  %v12138_v58 = vld [vmem:[%s13945_s28 + $0x1650] ss:$8 sps:$4 sm:$0xff]   ;;  %v12143_v59 = vld [vmem:[%s13945_s28 + $0x264] ss:$8 sps:$4 sm:$0xff]  }
  0x7a   : > { %9390 = vmatprep.subr.bf16.mxu0 %v12068_v60  ;;  %v12146_v60 = vld [vmem:[%s13945_s28 + $0x1664] ss:$8 sps:$4 sm:$0xff]  }
  0x7c   : > { %8571 = vmatpush1.bf16.msra.mxu1 %v12063_v61  ;;  %v12141_v61 = vld [vmem:[%s13945_s28 + $0x260] ss:$8 sps:$4 sm:$0xff]  }
  0x7d   : > { %9391 = vmatpush1.bf16.msra.mxu0 %v12066_v62  ;;  %8572 = vmatprep.subr.bf16.mxu1 %v12071_v63  ;;  %v12144_v62 = vld [vmem:[%s13945_s28 + $0x1660] ss:$8 sps:$4 sm:$0xff]   ;;  %v12149_v63 = vld [vmem:[%s13945_s28 + $0x274] ss:$8 sps:$4 sm:$0xff]  }
  0x7e   : > { %9392 = vmatprep.subr.bf16.mxu0 %v12074_v0  ;;  %v12152_v0 = vld [vmem:[%s13945_s28 + $0x1674] ss:$8 sps:$4 sm:$0xff]  }
  0x80   : > { %8573 = vmatpush1.bf16.msra.mxu1 %v12069_v1  ;;  %v12147_v1 = vld [vmem:[%s13945_s28 + $0x270] ss:$8 sps:$4 sm:$0xff]  }
  0x81   : > { %9393 = vmatpush1.bf16.msra.mxu0 %v12072_v2  ;;  %8574 = vmatprep.subr.bf16.mxu1 %v12077_v3  ;;  %v12150_v2 = vld [vmem:[%s13945_s28 + $0x1670] ss:$8 sps:$4 sm:$0xff]   ;;  %v12155_v3 = vld [vmem:[%s13945_s28 + $0x284] ss:$8 sps:$4 sm:$0xff]  }
  0x82   : > { %9394 = vmatprep.subr.bf16.mxu0 %v12080_v4  ;;  %v12158_v4 = vld [vmem:[%s13945_s28 + $0x1684] ss:$8 sps:$4 sm:$0xff]  }
  0x84   : > { %8575 = vmatpush1.bf16.msra.mxu1 %v12075_v5  ;;  %v12153_v5 = vld [vmem:[%s13945_s28 + $0x280] ss:$8 sps:$4 sm:$0xff]  }
  0x85   : > { %9395 = vmatpush1.bf16.msra.mxu0 %v12078_v6  ;;  %8576 = vmatprep.subr.bf16.mxu1 %v12083_v7  ;;  %v12156_v6 = vld [vmem:[%s13945_s28 + $0x1680] ss:$8 sps:$4 sm:$0xff]   ;;  %v12161_v7 = vld [vmem:[%s13945_s28 + $0x294] ss:$8 sps:$4 sm:$0xff]  }
  0x86   : > { %9396 = vmatprep.subr.bf16.mxu0 %v12086_v8  ;;  %v12164_v8 = vld [vmem:[%s13945_s28 + $0x1694] ss:$8 sps:$4 sm:$0xff]  }
  0x88   : > { %8577 = vmatpush1.bf16.msra.mxu1 %v12081_v9  ;;  %v12159_v9 = vld [vmem:[%s13945_s28 + $0x290] ss:$8 sps:$4 sm:$0xff]  }
  0x89   : > { %9397 = vmatpush1.bf16.msra.mxu0 %v12084_v10  ;;  %8578 = vmatprep.subr.bf16.mxu1 %v12089_v11  ;;  %v12162_v10 = vld [vmem:[%s13945_s28 + $0x1690] ss:$8 sps:$4 sm:$0xff]   ;;  %v12167_v11 = vld [vmem:[%s13945_s28 + $0x2a4] ss:$8 sps:$4 sm:$0xff]  }
  0x8a   : > { %9398 = vmatprep.subr.bf16.mxu0 %v12092_v12  ;;  %v12170_v12 = vld [vmem:[%s13945_s28 + $0x16a4] ss:$8 sps:$4 sm:$0xff]  }
  0x8c   : > { %8579 = vmatpush1.bf16.msra.mxu1 %v12087_v13  ;;  %v12165_v13 = vld [vmem:[%s13945_s28 + $0x2a0] ss:$8 sps:$4 sm:$0xff]  }
  0x8d   : > { %9399 = vmatpush1.bf16.msra.mxu0 %v12090_v14  ;;  %8580 = vmatprep.subr.bf16.mxu1 %v12095_v15  ;;  %v12168_v14 = vld [vmem:[%s13945_s28 + $0x16a0] ss:$8 sps:$4 sm:$0xff]   ;;  %v12173_v15 = vld [vmem:[%s13945_s28 + $0x2b4] ss:$8 sps:$4 sm:$0xff]  }
  0x8e   : > { %9400 = vmatprep.subr.bf16.mxu0 %v12098_v16  ;;  %v12176_v16 = vld [vmem:[%s13945_s28 + $0x16b4] ss:$8 sps:$4 sm:$0xff]  }
  0x90   : > { %8581 = vmatpush1.bf16.msra.mxu1 %v12093_v21  ;;  %v12179_v21 = vld [vmem:[%s13945_s28 + $0x2c4] ss:$8 sps:$4 sm:$0xff]  }
  0x91   : > { %9401 = vmatpush1.bf16.msra.mxu0 %v12096_v22  ;;  %8582 = vmatprep.subr.bf16.mxu1 %v12101_v23  ;;  %v12182_v22 = vld [vmem:[%s13945_s28 + $0x16c4] ss:$8 sps:$4 sm:$0xff]   ;;  %v12177_v23 = vld [vmem:[%s13945_s28 + $0x2c0] ss:$8 sps:$4 sm:$0xff]  }
  0x92   : > { %9402 = vmatprep.subr.bf16.mxu0 %v12104_v24  ;;  %v12180_v24 = vld [vmem:[%s13945_s28 + $0x16c0] ss:$8 sps:$4 sm:$0xff]  }
  0x94   : > { %8583 = vmatpush1.bf16.msra.mxu1 %v12099_v53  ;;  %v12185_v53 = vld [vmem:[%s13945_s28 + $0x2d4] ss:$8 sps:$4 sm:$0xff]  }
  0x95   : > { %9403 = vmatpush1.bf16.msra.mxu0 %v12102_v57  ;;  %8593 = vmatprep.subr.bf16.mxu1 %v12107_v27  ;;  %v12188_v57 = vld [vmem:[%s13945_s28 + $0x16d4] ss:$8 sps:$4 sm:$0xff]   ;;  %v12183_v27 = vld [vmem:[%s13945_s28 + $0x2d0] ss:$8 sps:$4 sm:$0xff]  }
  0x96   : > { %9413 = vmatprep.subr.bf16.mxu0 %v12110_v28  ;;  %v12186_v28 = vld [vmem:[%s13945_s28 + $0x16d0] ss:$8 sps:$4 sm:$0xff]  }
  0x97   : > { %8585 = vmatmul.mubr.bf16.vlgmr.msra.gmra.mrb[0].mxu1 %v1586_v31  ;;  %v12189_v31 = vld [vmem:[%s13945_s28 + $0x2e0] ss:$8 sps:$4 sm:$0xff]  }
  0x98   : > { %9405 = vmatmul.mubr.bf16.vlgmr.msra.gmra.mrb[0].mxu0 %v1831_v32  ;;  %8594 = vmatpush1.bf16.msra.mxu1 %v12105_v33  ;;  %v12192_v32 = vld [vmem:[%s13945_s28 + $0x16e0] ss:$8 sps:$4 sm:$0xff]   ;;  %v12197_v33 = vld [vmem:[%s13945_s28 + $0x2f4] ss:$8 sps:$4 sm:$0xff]  }
  0x99   : > { %9414 = vmatpush1.bf16.msra.mxu0 %v12108_v34  ;;  %8595 = vmatprep.subr.bf16.mxu1 %v12113_v35  ;;  %v12200_v34 = vld [vmem:[%s13945_s28 + $0x16f4] ss:$8 sps:$4 sm:$0xff]   ;;  %v12195_v35 = vld [vmem:[%s13945_s28 + $0x2f0] ss:$8 sps:$4 sm:$0xff]  }
  0x9a   : > { %9415 = vmatprep.subr.bf16.mxu0 %v12116_v36  ;;  %8625 = vmatprep.mubr.bf16.mxu1 %v14126_v37  ;;  %v12198_v36 = vld [vmem:[%s13945_s28 + $0x16f0] ss:$8 sps:$4 sm:$0xff]  }
  0x9b   : > { %9445 = vmatprep.mubr.bf16.mxu0 %v14129_v17 }
  0x9c   : > { %8596 = vmatpush1.bf16.msra.mxu1 %v12111_v18  ;;  %v12203_v18 = vld [vmem:[%s13945_s28 + $0x304] ss:$8 sps:$4 sm:$0xff]  }
  0x9d   : > { %9416 = vmatpush1.bf16.msra.mxu0 %v12114_v38  ;;  %8597 = vmatprep.subr.bf16.mxu1 %v12119_v39  ;;  %v12206_v38 = vld [vmem:[%s13945_s28 + $0x1704] ss:$8 sps:$4 sm:$0xff]   ;;  %v14195_v39 = vrot.slane %v14104_v25, %v13995_v50  ;;  %v1589_v25 = vcombine.high %v14126_v37, %v14126_v37 }
  0x9e   : > { %9417 = vmatprep.subr.bf16.mxu0 %v12122_v40  ;;  %v14199_v40 = vrot.slane %v14107_v26, %v13995_v50  ;;  %v12207_v26 = vld [vmem:[%s13945_s28 + $0x310] ss:$8 sps:$4 sm:$0xff]   ;;  %v12215_v37 = vld [vmem:[%s13945_s28 + $0x324] ss:$8 sps:$4 sm:$0xff]  }
  0xa0   : > { %8598 = vmatpush1.bf16.msra.mxu1 %v12117_v41  ;;  %v12201_v41 = vld [vmem:[%s13945_s28 + $0x300] ss:$8 sps:$4 sm:$0xff]  }
  0xa1   : > { %9418 = vmatpush1.bf16.msra.mxu0 %v12120_v42  ;;  %8599 = vmatprep.subr.bf16.mxu1 %v12125_v43  ;;  %v12204_v42 = vld [vmem:[%s13945_s28 + $0x1700] ss:$8 sps:$4 sm:$0xff]   ;;  %v12209_v43 = vld [vmem:[%s13945_s28 + $0x314] ss:$8 sps:$4 sm:$0xff]  }
  0xa2   : > { %9419 = vmatprep.subr.bf16.mxu0 %v12128_v45  ;;  %v12212_v45 = vld [vmem:[%s13945_s28 + $0x1714] ss:$8 sps:$4 sm:$0xff]  }
  0xa4   : > { %8600 = vmatpush1.bf16.msra.mxu1 %v12123_v46  ;;  %v1834_v46 = vcombine.high %v14129_v17, %v14129_v17  ;;  %v12213_v17 = vld [vmem:[%s13945_s28 + $0x320] ss:$8 sps:$4 sm:$0xff]  }
  0xa5   : > { %9420 = vmatpush1.bf16.msra.mxu0 %v12126_v47  ;;  %8601 = vmatprep.subr.bf16.mxu1 %v12131_v48  ;;  %v12210_v47 = vld [vmem:[%s13945_s28 + $0x1710] ss:$8 sps:$4 sm:$0xff]   ;;  %v12218_v48 = vld [vmem:[%s13945_s28 + $0x1724] ss:$8 sps:$4 sm:$0xff]  }
  0xa6   : > { %9421 = vmatprep.subr.bf16.mxu0 %v12134_v49  ;;  %v12216_v49 = vld [vmem:[%s13945_s28 + $0x1720] ss:$8 sps:$4 sm:$0xff]  }
  0xa8   : > { %8602 = vmatpush1.bf16.msra.mxu1 %v12129_v51  ;;  %v12221_v51 = vld [vmem:[%s13945_s28 + $0x334] ss:$8 sps:$4 sm:$0xff]  }
  0xa9   : > { %9422 = vmatpush1.bf16.msra.mxu0 %v12132_v52  ;;  %8603 = vmatprep.subr.bf16.mxu1 %v12137_v54  ;;  %v12224_v52 = vld [vmem:[%s13945_s28 + $0x1734] ss:$8 sps:$4 sm:$0xff]   ;;  %v12219_v54 = vld [vmem:[%s13945_s28 + $0x330] ss:$8 sps:$4 sm:$0xff]  }
  0xaa   : > { %9423 = vmatprep.subr.bf16.mxu0 %v12140_v55  ;;  %v12222_v55 = vld [vmem:[%s13945_s28 + $0x1730] ss:$8 sps:$4 sm:$0xff]  }
  0xac   : > { %8604 = vmatpush1.bf16.msra.mxu1 %v12135_v56  ;;  %v12227_v56 = vld [vmem:[%s13945_s28 + $0x344] ss:$8 sps:$4 sm:$0xff]  }
  0xad   : > { %9424 = vmatpush1.bf16.msra.mxu0 %v12138_v58  ;;  %8605 = vmatprep.subr.bf16.mxu1 %v12143_v59  ;;  %v12230_v58 = vld [vmem:[%s13945_s28 + $0x1744] ss:$8 sps:$4 sm:$0xff]   ;;  %v12225_v59 = vld [vmem:[%s13945_s28 + $0x340] ss:$8 sps:$4 sm:$0xff]  }
  0xae   : > { %9425 = vmatprep.subr.bf16.mxu0 %v12146_v60  ;;  %v12228_v60 = vld [vmem:[%s13945_s28 + $0x1740] ss:$8 sps:$4 sm:$0xff]  }
  0xb0   : > { %8606 = vmatpush1.bf16.msra.mxu1 %v12141_v61  ;;  %v12233_v61 = vld [vmem:[%s13945_s28 + $0x354] ss:$8 sps:$4 sm:$0xff]  }
  0xb1   : > { %9426 = vmatpush1.bf16.msra.mxu0 %v12144_v62  ;;  %8607 = vmatprep.subr.bf16.mxu1 %v12149_v63  ;;  %v12236_v62 = vld [vmem:[%s13945_s28 + $0x1754] ss:$8 sps:$4 sm:$0xff]   ;;  %v12231_v63 = vld [vmem:[%s13945_s28 + $0x350] ss:$8 sps:$4 sm:$0xff]  }
  0xb2   : > { %9427 = vmatprep.subr.bf16.mxu0 %v12152_v0  ;;  %v12234_v0 = vld [vmem:[%s13945_s28 + $0x1750] ss:$8 sps:$4 sm:$0xff]  }
  0xb4   : > { %8608 = vmatpush1.bf16.msra.mxu1 %v12147_v1  ;;  %v12239_v1 = vld [vmem:[%s13945_s28 + $0x364] ss:$8 sps:$4 sm:$0xff]  }
  0xb5   : > { %9428 = vmatpush1.bf16.msra.mxu0 %v12150_v2  ;;  %8609 = vmatprep.subr.bf16.mxu1 %v12155_v3  ;;  %v12242_v2 = vld [vmem:[%s13945_s28 + $0x1764] ss:$8 sps:$4 sm:$0xff]   ;;  %v12237_v3 = vld [vmem:[%s13945_s28 + $0x360] ss:$8 sps:$4 sm:$0xff]  }
  0xb6   : > { %9429 = vmatprep.subr.bf16.mxu0 %v12158_v4  ;;  %v12240_v4 = vld [vmem:[%s13945_s28 + $0x1760] ss:$8 sps:$4 sm:$0xff]  }
  0xb8   : > { %8610 = vmatpush1.bf16.msra.mxu1 %v12153_v5  ;;  %v12245_v5 = vld [vmem:[%s13945_s28 + $0x374] ss:$8 sps:$4 sm:$0xff]  }
  0xb9   : > { %9430 = vmatpush1.bf16.msra.mxu0 %v12156_v6  ;;  %8611 = vmatprep.subr.bf16.mxu1 %v12161_v7  ;;  %v12248_v6 = vld [vmem:[%s13945_s28 + $0x1774] ss:$8 sps:$4 sm:$0xff]   ;;  %v12243_v7 = vld [vmem:[%s13945_s28 + $0x370] ss:$8 sps:$4 sm:$0xff]  }
  0xba   : > { %9431 = vmatprep.subr.bf16.mxu0 %v12164_v8  ;;  %v12246_v8 = vld [vmem:[%s13945_s28 + $0x1770] ss:$8 sps:$4 sm:$0xff]  }
  0xbc   : > { %8612 = vmatpush1.bf16.msra.mxu1 %v12159_v9  ;;  %v12251_v9 = vld [vmem:[%s13945_s28 + $0x384] ss:$8 sps:$4 sm:$0xff]  }
  0xbd   : > { %9432 = vmatpush1.bf16.msra.mxu0 %v12162_v10  ;;  %8613 = vmatprep.subr.bf16.mxu1 %v12167_v11  ;;  %v12254_v10 = vld [vmem:[%s13945_s28 + $0x1784] ss:$8 sps:$4 sm:$0xff]   ;;  %v12249_v11 = vld [vmem:[%s13945_s28 + $0x380] ss:$8 sps:$4 sm:$0xff]  }
  0xbe   : > { %9433 = vmatprep.subr.bf16.mxu0 %v12170_v12  ;;  %v12252_v12 = vld [vmem:[%s13945_s28 + $0x1780] ss:$8 sps:$4 sm:$0xff]  }
  0xc0   : > { %8614 = vmatpush1.bf16.msra.mxu1 %v12165_v13  ;;  %v12257_v13 = vld [vmem:[%s13945_s28 + $0x394] ss:$8 sps:$4 sm:$0xff]  }
  0xc1   : > { %9434 = vmatpush1.bf16.msra.mxu0 %v12168_v14  ;;  %8615 = vmatprep.subr.bf16.mxu1 %v12173_v15  ;;  %v12260_v14 = vld [vmem:[%s13945_s28 + $0x1794] ss:$8 sps:$4 sm:$0xff]   ;;  %v12255_v15 = vld [vmem:[%s13945_s28 + $0x390] ss:$8 sps:$4 sm:$0xff]  }
  0xc2   : > { %9435 = vmatprep.subr.bf16.mxu0 %v12176_v16  ;;  %v12258_v16 = vld [vmem:[%s13945_s28 + $0x1790] ss:$8 sps:$4 sm:$0xff]  }
  0xc4   : > { %8616 = vmatpush1.bf16.msra.mxu1 %v12171_v19  ;;  %v12263_v19 = vld [vmem:[%s13945_s28 + $0x3a4] ss:$8 sps:$4 sm:$0xff]  }
  0xc5   : > { %9436 = vmatpush1.bf16.msra.mxu0 %v12174_v20  ;;  %8617 = vmatprep.subr.bf16.mxu1 %v12179_v21  ;;  %v12266_v20 = vld [vmem:[%s13945_s28 + $0x17a4] ss:$8 sps:$4 sm:$0xff]   ;;  %v12261_v21 = vld [vmem:[%s13945_s28 + $0x3a0] ss:$8 sps:$4 sm:$0xff]  }
  0xc6   : > { %9437 = vmatprep.subr.bf16.mxu0 %v12182_v22  ;;  %v12264_v22 = vld [vmem:[%s13945_s28 + $0x17a0] ss:$8 sps:$4 sm:$0xff]  }
  0xc8   : > { %8618 = vmatpush1.bf16.msra.mxu1 %v12177_v23  ;;  %v12269_v23 = vld [vmem:[%s13945_s28 + $0x3b4] ss:$8 sps:$4 sm:$0xff]  }
  0xc9   : > { %9438 = vmatpush1.bf16.msra.mxu0 %v12180_v24  ;;  %8619 = vmatprep.subr.bf16.mxu1 %v12185_v53  ;;  %v12272_v24 = vld [vmem:[%s13945_s28 + $0x17b4] ss:$8 sps:$4 sm:$0xff]   ;;  %v12267_v53 = vld [vmem:[%s13945_s28 + $0x3b0] ss:$8 sps:$4 sm:$0xff]  }
  0xca   : > { %9439 = vmatprep.subr.bf16.mxu0 %v12188_v57  ;;  %v12270_v57 = vld [vmem:[%s13945_s28 + $0x17b0] ss:$8 sps:$4 sm:$0xff]  }
  0xcc   : > { %8620 = vmatpush1.bf16.msra.mxu1 %v12183_v27  ;;  %v12275_v27 = vld [vmem:[%s13945_s28 + $0x3c4] ss:$8 sps:$4 sm:$0xff]  }
  0xcd   : > { %9440 = vmatpush1.bf16.msra.mxu0 %v12186_v28  ;;  %8621 = vmatprep.subr.bf16.mxu1 %v12191_v29  ;;  %v12278_v28 = vld [vmem:[%s13945_s28 + $0x17c4] ss:$8 sps:$4 sm:$0xff]   ;;  %v12273_v29 = vld [vmem:[%s13945_s28 + $0x3c0] ss:$8 sps:$4 sm:$0xff]  }
  0xce   : > { %9441 = vmatprep.subr.bf16.mxu0 %v12194_v30  ;;  %v12276_v30 = vld [vmem:[%s13945_s28 + $0x17c0] ss:$8 sps:$4 sm:$0xff]  }
  0xd0   : > { %8622 = vmatpush1.bf16.msra.mxu1 %v12189_v31  ;;  %v12281_v31 = vld [vmem:[%s13945_s28 + $0x3d4] ss:$8 sps:$4 sm:$0xff]  }
  0xd1   : > { %9442 = vmatpush1.bf16.msra.mxu0 %v12192_v32  ;;  %8623 = vmatprep.subr.bf16.mxu1 %v12197_v33  ;;  %v12284_v32 = vld [vmem:[%s13945_s28 + $0x17d4] ss:$8 sps:$4 sm:$0xff]   ;;  %v12279_v33 = vld [vmem:[%s13945_s28 + $0x3d0] ss:$8 sps:$4 sm:$0xff]  }
  0xd2   : > { %9443 = vmatprep.subr.bf16.mxu0 %v12200_v34  ;;  %v12282_v34 = vld [vmem:[%s13945_s28 + $0x17d0] ss:$8 sps:$4 sm:$0xff]  }
  0xd4   : > { %8624 = vmatpush1.bf16.msra.mxu1 %v12195_v35  ;;  %v12287_v35 = vld [vmem:[%s13945_s28 + $0x3e4] ss:$8 sps:$4 sm:$0xff]  }
  0xd5   : > { %9444 = vmatpush1.bf16.msra.mxu0 %v12198_v36  ;;  %8634 = vmatprep.subr.bf16.mxu1 %v12203_v18  ;;  %v12290_v36 = vld [vmem:[%s13945_s28 + $0x17e4] ss:$8 sps:$4 sm:$0xff]   ;;  %v12285_v18 = vld [vmem:[%s13945_s28 + $0x3e0] ss:$8 sps:$4 sm:$0xff]  }
  0xd6   : > { %9454 = vmatprep.subr.bf16.mxu0 %v12206_v38  ;;  %v12288_v38 = vld [vmem:[%s13945_s28 + $0x17e0] ss:$8 sps:$4 sm:$0xff]  }
  0xd7   : > { %8626 = vmatmul.mubr.bf16.vlgmr.msra.gmra.mrb[0].mxu1 %v14195_v39 }
  0xd8   : > { %9446 = vmatmul.mubr.bf16.vlgmr.msra.gmra.mrb[0].mxu0 %v14199_v40  ;;  %8635 = vmatpush1.bf16.msra.mxu1 %v12201_v41  ;;  %v14266_v41 = vld.sshfl [vmem:[%s13940_s24 + $0x8] sm:$0xff pattern:$0x75316420] }
  0xd9   : > { %9455 = vmatpush1.bf16.msra.mxu0 %v12204_v42  ;;  %8636 = vmatprep.subr.bf16.mxu1 %v12209_v43  ;;  %v14269_v42 = vld.sshfl [vmem:[%s13940_s24 + $0x30] sm:$0xff pattern:$0x75316420] }
  0xda   : > { %9456 = vmatprep.subr.bf16.mxu0 %v12212_v45  ;;  %8666 = vmatprep.mubr.bf16.mxu1 %v1589_v25  ;;  %v12293_v43 = vld [vmem:[%s13945_s28 + $0x3f4] ss:$8 sps:$4 sm:$0xff]   ;;  %v12291_v25 = vld [vmem:[%s13945_s28 + $0x3f0] ss:$8 sps:$4 sm:$0xff]  }
  0xdb   : > { %9486 = vmatprep.mubr.bf16.mxu0 %v1834_v46  ;;  %v12296_v45 = vld [vmem:[%s13945_s28 + $0x17f4] ss:$8 sps:$4 sm:$0xff]   ;;  %v12294_v46 = vld [vmem:[%s13945_s28 + $0x17f0] ss:$8 sps:$4 sm:$0xff]  }
  0xdc   : > { %8637 = vmatpush1.bf16.msra.mxu1 %v12207_v26  ;;  %v12299_v26 = vld [vmem:[%s13945_s28 + $0x404] ss:$8 sps:$4 sm:$0xff]  }
  0xdd   : > { %9457 = vmatpush1.bf16.msra.mxu0 %v12210_v47  ;;  %8638 = vmatprep.subr.bf16.mxu1 %v12215_v37  ;;  %v12302_v47 = vld [vmem:[%s13945_s28 + $0x1804] ss:$8 sps:$4 sm:$0xff]   ;;  %v1605_v37 = vcombine.high %v14266_v41, %v14266_v41 }
  0xde   : > { %9458 = vmatprep.subr.bf16.mxu0 %v12218_v48  ;;  %v1850_v48 = vcombine.high %v14269_v42, %v14269_v42 }
  0xe0   : > { %8639 = vmatpush1.bf16.msra.mxu1 %v12213_v17  ;;  %v12297_v17 = vld [vmem:[%s13945_s28 + $0x400] ss:$8 sps:$4 sm:$0xff]  }
  0xe1   : > { %9459 = vmatpush1.bf16.msra.mxu0 %v12216_v49  ;;  %8640 = vmatprep.subr.bf16.mxu1 %v12221_v51  ;;  %v12300_v49 = vld [vmem:[%s13945_s28 + $0x1800] ss:$8 sps:$4 sm:$0xff]   ;;  %v1587_v51 = vcombine.high %v14195_v39, %v14195_v39  ;;  %v12303_v39 = vld [vmem:[%s13945_s28 + $0x410] ss:$8 sps:$4 sm:$0xff]  }
  0xe2   : > { %9460 = vmatprep.subr.bf16.mxu0 %v12224_v52  ;;  %v1832_v52 = vcombine.high %v14199_v40, %v14199_v40  ;;  %v12306_v40 = vld [vmem:[%s13945_s28 + $0x1810] ss:$8 sps:$4 sm:$0xff]  }
  0xe4   : > { %8641 = vmatpush1.bf16.msra.mxu1 %v12219_v54  ;;  %v12305_v54 = vld [vmem:[%s13945_s28 + $0x414] ss:$8 sps:$4 sm:$0xff]  }
  0xe5   : > { %9461 = vmatpush1.bf16.msra.mxu0 %v12222_v55  ;;  %8642 = vmatprep.subr.bf16.mxu1 %v12227_v56  ;;  %v12308_v55 = vld [vmem:[%s13945_s28 + $0x1814] ss:$8 sps:$4 sm:$0xff]   ;;  %v14290_v56 = vrot.slane %v1605_v37, %v13995_v50  ;;  %v12383_v37 = vld [vmem:[%s13945_s28 + $0x4e4] ss:$8 sps:$4 sm:$0xff]  }
  0xe6   : > { %9462 = vmatprep.subr.bf16.mxu0 %v12230_v58  ;;  %v14293_v58 = vrot.slane %v1850_v48, %v13995_v50  ;;  %v12386_v48 = vld [vmem:[%s13945_s28 + $0x18e4] ss:$8 sps:$4 sm:$0xff]  }
  0xe8   : > { %8643 = vmatpush1.bf16.msra.mxu1 %v12225_v59  ;;  %v12311_v59 = vld [vmem:[%s13945_s28 + $0x424] ss:$8 sps:$4 sm:$0xff]  }
  0xe9   : > { %9463 = vmatpush1.bf16.msra.mxu0 %v12228_v60  ;;  %8644 = vmatprep.subr.bf16.mxu1 %v12233_v61  ;;  %v12314_v60 = vld [vmem:[%s13945_s28 + $0x1824] ss:$8 sps:$4 sm:$0xff]   ;;  %v12309_v61 = vld [vmem:[%s13945_s28 + $0x420] ss:$8 sps:$4 sm:$0xff]  }
  0xea   : > { %9464 = vmatprep.subr.bf16.mxu0 %v12236_v62  ;;  %v12312_v62 = vld [vmem:[%s13945_s28 + $0x1820] ss:$8 sps:$4 sm:$0xff]  }
  0xec   : > { %8645 = vmatpush1.bf16.msra.mxu1 %v12231_v63  ;;  %v12317_v63 = vld [vmem:[%s13945_s28 + $0x434] ss:$8 sps:$4 sm:$0xff]  }
  0xed   : > { %9465 = vmatpush1.bf16.msra.mxu0 %v12234_v0  ;;  %8646 = vmatprep.subr.bf16.mxu1 %v12239_v1  ;;  %v12320_v0 = vld [vmem:[%s13945_s28 + $0x1834] ss:$8 sps:$4 sm:$0xff]   ;;  %v12315_v1 = vld [vmem:[%s13945_s28 + $0x430] ss:$8 sps:$4 sm:$0xff]  }
  0xee   : > { %9466 = vmatprep.subr.bf16.mxu0 %v12242_v2  ;;  %v12318_v2 = vld [vmem:[%s13945_s28 + $0x1830] ss:$8 sps:$4 sm:$0xff]  }
  0xf0   : > { %8647 = vmatpush1.bf16.msra.mxu1 %v12237_v3  ;;  %v12323_v3 = vld [vmem:[%s13945_s28 + $0x444] ss:$8 sps:$4 sm:$0xff]  }
  0xf1   : > { %9467 = vmatpush1.bf16.msra.mxu0 %v12240_v4  ;;  %8648 = vmatprep.subr.bf16.mxu1 %v12245_v5  ;;  %v12326_v4 = vld [vmem:[%s13945_s28 + $0x1844] ss:$8 sps:$4 sm:$0xff]   ;;  %v12321_v5 = vld [vmem:[%s13945_s28 + $0x440] ss:$8 sps:$4 sm:$0xff]  }
  0xf2   : > { %9468 = vmatprep.subr.bf16.mxu0 %v12248_v6  ;;  %v12324_v6 = vld [vmem:[%s13945_s28 + $0x1840] ss:$8 sps:$4 sm:$0xff]  }
  0xf4   : > { %8649 = vmatpush1.bf16.msra.mxu1 %v12243_v7  ;;  %v12329_v7 = vld [vmem:[%s13945_s28 + $0x454] ss:$8 sps:$4 sm:$0xff]  }
  0xf5   : > { %9469 = vmatpush1.bf16.msra.mxu0 %v12246_v8  ;;  %8650 = vmatprep.subr.bf16.mxu1 %v12251_v9  ;;  %v12332_v8 = vld [vmem:[%s13945_s28 + $0x1854] ss:$8 sps:$4 sm:$0xff]   ;;  %v12327_v9 = vld [vmem:[%s13945_s28 + $0x450] ss:$8 sps:$4 sm:$0xff]  }
  0xf6   : > { %9470 = vmatprep.subr.bf16.mxu0 %v12254_v10  ;;  %v12330_v10 = vld [vmem:[%s13945_s28 + $0x1850] ss:$8 sps:$4 sm:$0xff]  }
  0xf8   : > { %8651 = vmatpush1.bf16.msra.mxu1 %v12249_v11  ;;  %v12335_v11 = vld [vmem:[%s13945_s28 + $0x464] ss:$8 sps:$4 sm:$0xff]  }
  0xf9   : > { %9471 = vmatpush1.bf16.msra.mxu0 %v12252_v12  ;;  %8652 = vmatprep.subr.bf16.mxu1 %v12257_v13  ;;  %v12338_v12 = vld [vmem:[%s13945_s28 + $0x1864] ss:$8 sps:$4 sm:$0xff]   ;;  %v12333_v13 = vld [vmem:[%s13945_s28 + $0x460] ss:$8 sps:$4 sm:$0xff]  }
  0xfa   : > { %9472 = vmatprep.subr.bf16.mxu0 %v12260_v14  ;;  %v12336_v14 = vld [vmem:[%s13945_s28 + $0x1860] ss:$8 sps:$4 sm:$0xff]  }
  0xfc   : > { %8653 = vmatpush1.bf16.msra.mxu1 %v12255_v15  ;;  %v12341_v15 = vld [vmem:[%s13945_s28 + $0x474] ss:$8 sps:$4 sm:$0xff]  }
  0xfd   : > { %9473 = vmatpush1.bf16.msra.mxu0 %v12258_v16  ;;  %8654 = vmatprep.subr.bf16.mxu1 %v12263_v19  ;;  %v12344_v16 = vld [vmem:[%s13945_s28 + $0x1874] ss:$8 sps:$4 sm:$0xff]   ;;  %v12339_v19 = vld [vmem:[%s13945_s28 + $0x470] ss:$8 sps:$4 sm:$0xff]  }
  0xfe   : > { %9474 = vmatprep.subr.bf16.mxu0 %v12266_v20  ;;  %v12342_v20 = vld [vmem:[%s13945_s28 + $0x1870] ss:$8 sps:$4 sm:$0xff]  }
 0x100   : > { %8655 = vmatpush1.bf16.msra.mxu1 %v12261_v21  ;;  %v12347_v21 = vld [vmem:[%s13945_s28 + $0x484] ss:$8 sps:$4 sm:$0xff]  }
 0x101   : > { %9475 = vmatpush1.bf16.msra.mxu0 %v12264_v22  ;;  %8656 = vmatprep.subr.bf16.mxu1 %v12269_v23  ;;  %v12350_v22 = vld [vmem:[%s13945_s28 + $0x1884] ss:$8 sps:$4 sm:$0xff]   ;;  %v12345_v23 = vld [vmem:[%s13945_s28 + $0x480] ss:$8 sps:$4 sm:$0xff]  }
 0x102   : > { %9476 = vmatprep.subr.bf16.mxu0 %v12272_v24  ;;  %v12348_v24 = vld [vmem:[%s13945_s28 + $0x1880] ss:$8 sps:$4 sm:$0xff]  }
 0x104   : > { %8657 = vmatpush1.bf16.msra.mxu1 %v12267_v53  ;;  %v12353_v53 = vld [vmem:[%s13945_s28 + $0x494] ss:$8 sps:$4 sm:$0xff]  }
 0x105   : > { %9477 = vmatpush1.bf16.msra.mxu0 %v12270_v57  ;;  %8658 = vmatprep.subr.bf16.mxu1 %v12275_v27  ;;  %v12356_v57 = vld [vmem:[%s13945_s28 + $0x1894] ss:$8 sps:$4 sm:$0xff]   ;;  %v12351_v27 = vld [vmem:[%s13945_s28 + $0x490] ss:$8 sps:$4 sm:$0xff]  }
 0x106   : > { %9478 = vmatprep.subr.bf16.mxu0 %v12278_v28  ;;  %v12354_v28 = vld [vmem:[%s13945_s28 + $0x1890] ss:$8 sps:$4 sm:$0xff]  }
 0x108   : > { %8659 = vmatpush1.bf16.msra.mxu1 %v12273_v29  ;;  %v12359_v29 = vld [vmem:[%s13945_s28 + $0x4a4] ss:$8 sps:$4 sm:$0xff]  }
 0x109   : > { %9479 = vmatpush1.bf16.msra.mxu0 %v12276_v30  ;;  %8660 = vmatprep.subr.bf16.mxu1 %v12281_v31  ;;  %v12362_v30 = vld [vmem:[%s13945_s28 + $0x18a4] ss:$8 sps:$4 sm:$0xff]   ;;  %v12357_v31 = vld [vmem:[%s13945_s28 + $0x4a0] ss:$8 sps:$4 sm:$0xff]  }
 0x10a   : > { %9480 = vmatprep.subr.bf16.mxu0 %v12284_v32  ;;  %v12360_v32 = vld [vmem:[%s13945_s28 + $0x18a0] ss:$8 sps:$4 sm:$0xff]  }
 0x10c   : > { %8661 = vmatpush1.bf16.msra.mxu1 %v12279_v33  ;;  %v12365_v33 = vld [vmem:[%s13945_s28 + $0x4b4] ss:$8 sps:$4 sm:$0xff]  }
 0x10d   : > { %9481 = vmatpush1.bf16.msra.mxu0 %v12282_v34  ;;  %8662 = vmatprep.subr.bf16.mxu1 %v12287_v35  ;;  %v12368_v34 = vld [vmem:[%s13945_s28 + $0x18b4] ss:$8 sps:$4 sm:$0xff]   ;;  %v12363_v35 = vld [vmem:[%s13945_s28 + $0x4b0] ss:$8 sps:$4 sm:$0xff]  }
 0x10e   : > { %9482 = vmatprep.subr.bf16.mxu0 %v12290_v36  ;;  %v12366_v36 = vld [vmem:[%s13945_s28 + $0x18b0] ss:$8 sps:$4 sm:$0xff]  }
 0x110   : > { %8663 = vmatpush1.bf16.msra.mxu1 %v12285_v18  ;;  %v12371_v18 = vld [vmem:[%s13945_s28 + $0x4c4] ss:$8 sps:$4 sm:$0xff]  }
 0x111   : > { %9483 = vmatpush1.bf16.msra.mxu0 %v12288_v38  ;;  %8664 = vmatprep.subr.bf16.mxu1 %v12293_v43  ;;  %v12374_v38 = vld [vmem:[%s13945_s28 + $0x18c4] ss:$8 sps:$4 sm:$0xff]   ;;  %v12369_v43 = vld [vmem:[%s13945_s28 + $0x4c0] ss:$8 sps:$4 sm:$0xff]  }
 0x112   : > { %9484 = vmatprep.subr.bf16.mxu0 %v12296_v45  ;;  %v12372_v45 = vld [vmem:[%s13945_s28 + $0x18c0] ss:$8 sps:$4 sm:$0xff]  }
 0x114   : > { %8665 = vmatpush1.bf16.msra.mxu1 %v12291_v25  ;;  %v12377_v25 = vld [vmem:[%s13945_s28 + $0x4d4] ss:$8 sps:$4 sm:$0xff]  }
 0x115   : > { %9485 = vmatpush1.bf16.msra.mxu0 %v12294_v46  ;;  %8675 = vmatprep.subr.bf16.mxu1 %v12299_v26  ;;  %v12380_v46 = vld [vmem:[%s13945_s28 + $0x18d4] ss:$8 sps:$4 sm:$0xff]   ;;  %v12375_v26 = vld [vmem:[%s13945_s28 + $0x4d0] ss:$8 sps:$4 sm:$0xff]  }
 0x116   : > { %9495 = vmatprep.subr.bf16.mxu0 %v12302_v47  ;;  %v12378_v47 = vld [vmem:[%s13945_s28 + $0x18d0] ss:$8 sps:$4 sm:$0xff]  }
 0x117   : > { %8667 = vmatmul.mubr.bf16.vlgmr.msra.gmra.mrb[0].mxu1 %v1587_v51  ;;  %v12389_v51 = vld [vmem:[%s13945_s28 + $0x4f4] ss:$8 sps:$4 sm:$0xff]  }
 0x118   : > { %9487 = vmatmul.mubr.bf16.vlgmr.msra.gmra.mrb[0].mxu0 %v1832_v52  ;;  %8676 = vmatpush1.bf16.msra.mxu1 %v12297_v17  ;;  %v12381_v17 = vld [vmem:[%s13945_s28 + $0x4e0] ss:$8 sps:$4 sm:$0xff]   ;;  %v12392_v52 = vld [vmem:[%s13945_s28 + $0x18f4] ss:$8 sps:$4 sm:$0xff]  }
 0x119   : > { %9496 = vmatpush1.bf16.msra.mxu0 %v12300_v49  ;;  %8677 = vmatprep.subr.bf16.mxu1 %v12305_v54  ;;  %v12384_v49 = vld [vmem:[%s13945_s28 + $0x18e0] ss:$8 sps:$4 sm:$0xff]   ;;  %v12387_v54 = vld [vmem:[%s13945_s28 + $0x4f0] ss:$8 sps:$4 sm:$0xff]  }
 0x11a   : > { %9497 = vmatprep.subr.bf16.mxu0 %v12308_v55  ;;  %8707 = vmatprep.mubr.bf16.mxu1 %v14290_v56  ;;  %v12390_v55 = vld [vmem:[%s13945_s28 + $0x18f0] ss:$8 sps:$4 sm:$0xff]  }
 0x11b   : > { %9527 = vmatprep.mubr.bf16.mxu0 %v14293_v58 }
 0x11c   : > { %8678 = vmatpush1.bf16.msra.mxu1 %v12303_v39  ;;  %v12395_v39 = vld [vmem:[%s13945_s28 + $0x504] ss:$8 sps:$4 sm:$0xff]  }
 0x11d   : > { %9498 = vmatpush1.bf16.msra.mxu0 %v12306_v40  ;;  %8679 = vmatprep.subr.bf16.mxu1 %v12311_v59  ;;  %v12398_v40 = vld [vmem:[%s13945_s28 + $0x1904] ss:$8 sps:$4 sm:$0xff]   ;;  %v14359_v59 = vrot.slane %v14266_v41, %v13995_v50  ;;  %v1637_v41 = vcombine.high %v14290_v56, %v14290_v56 }
 0x11e   : > { %9499 = vmatprep.subr.bf16.mxu0 %v12314_v60  ;;  %v14363_v60 = vrot.slane %v14269_v42, %v13995_v50  ;;  %v12399_v42 = vld [vmem:[%s13945_s28 + $0x510] ss:$8 sps:$4 sm:$0xff]   ;;  %v12407_v56 = vld [vmem:[%s13945_s28 + $0x524] ss:$8 sps:$4 sm:$0xff]  }
 0x120   : > { %8680 = vmatpush1.bf16.msra.mxu1 %v12309_v61  ;;  %v12393_v61 = vld [vmem:[%s13945_s28 + $0x500] ss:$8 sps:$4 sm:$0xff]  }
 0x121   : > { %9500 = vmatpush1.bf16.msra.mxu0 %v12312_v62  ;;  %8681 = vmatprep.subr.bf16.mxu1 %v12317_v63  ;;  %v12396_v62 = vld [vmem:[%s13945_s28 + $0x1900] ss:$8 sps:$4 sm:$0xff]   ;;  %v12401_v63 = vld [vmem:[%s13945_s28 + $0x514] ss:$8 sps:$4 sm:$0xff]  }
 0x122   : > { %9501 = vmatprep.subr.bf16.mxu0 %v12320_v0  ;;  %v12404_v0 = vld [vmem:[%s13945_s28 + $0x1914] ss:$8 sps:$4 sm:$0xff]  }
 0x124   : > { %8682 = vmatpush1.bf16.msra.mxu1 %v12315_v1  ;;  %v1882_v1 = vcombine.high %v14293_v58, %v14293_v58  ;;  %v12405_v58 = vld [vmem:[%s13945_s28 + $0x520] ss:$8 sps:$4 sm:$0xff]  }
 0x125   : > { %9502 = vmatpush1.bf16.msra.mxu0 %v12318_v2  ;;  %8683 = vmatprep.subr.bf16.mxu1 %v12323_v3  ;;  %v12402_v2 = vld [vmem:[%s13945_s28 + $0x1910] ss:$8 sps:$4 sm:$0xff]   ;;  %v12410_v3 = vld [vmem:[%s13945_s28 + $0x1924] ss:$8 sps:$4 sm:$0xff]  }
 0x126   : > { %9503 = vmatprep.subr.bf16.mxu0 %v12326_v4  ;;  %v12408_v4 = vld [vmem:[%s13945_s28 + $0x1920] ss:$8 sps:$4 sm:$0xff]  }
 0x128   : > { %8684 = vmatpush1.bf16.msra.mxu1 %v12321_v5  ;;  %v12413_v5 = vld [vmem:[%s13945_s28 + $0x534] ss:$8 sps:$4 sm:$0xff]  }
 0x129   : > { %9504 = vmatpush1.bf16.msra.mxu0 %v12324_v6  ;;  %8685 = vmatprep.subr.bf16.mxu1 %v12329_v7  ;;  %v12416_v6 = vld [vmem:[%s13945_s28 + $0x1934] ss:$8 sps:$4 sm:$0xff]   ;;  %v12411_v7 = vld [vmem:[%s13945_s28 + $0x530] ss:$8 sps:$4 sm:$0xff]  }
 0x12a   : > { %9505 = vmatprep.subr.bf16.mxu0 %v12332_v8  ;;  %v12414_v8 = vld [vmem:[%s13945_s28 + $0x1930] ss:$8 sps:$4 sm:$0xff]  }
 0x12c   : > { %8686 = vmatpush1.bf16.msra.mxu1 %v12327_v9  ;;  %v12419_v9 = vld [vmem:[%s13945_s28 + $0x544] ss:$8 sps:$4 sm:$0xff]  }
 0x12d   : > { %9506 = vmatpush1.bf16.msra.mxu0 %v12330_v10  ;;  %8687 = vmatprep.subr.bf16.mxu1 %v12335_v11  ;;  %v12422_v10 = vld [vmem:[%s13945_s28 + $0x1944] ss:$8 sps:$4 sm:$0xff]   ;;  %v12417_v11 = vld [vmem:[%s13945_s28 + $0x540] ss:$8 sps:$4 sm:$0xff]  }
 0x12e   : > { %9507 = vmatprep.subr.bf16.mxu0 %v12338_v12  ;;  %v12420_v12 = vld [vmem:[%s13945_s28 + $0x1940] ss:$8 sps:$4 sm:$0xff]  }
 0x130   : > { %8688 = vmatpush1.bf16.msra.mxu1 %v12333_v13  ;;  %v12425_v13 = vld [vmem:[%s13945_s28 + $0x554] ss:$8 sps:$4 sm:$0xff]  }
 0x131   : > { %9508 = vmatpush1.bf16.msra.mxu0 %v12336_v14  ;;  %8689 = vmatprep.subr.bf16.mxu1 %v12341_v15  ;;  %v12428_v14 = vld [vmem:[%s13945_s28 + $0x1954] ss:$8 sps:$4 sm:$0xff]   ;;  %v12423_v15 = vld [vmem:[%s13945_s28 + $0x550] ss:$8 sps:$4 sm:$0xff]  }
 0x132   : > { %9509 = vmatprep.subr.bf16.mxu0 %v12344_v16  ;;  %v12426_v16 = vld [vmem:[%s13945_s28 + $0x1950] ss:$8 sps:$4 sm:$0xff]  }
 0x134   : > { %8690 = vmatpush1.bf16.msra.mxu1 %v12339_v19  ;;  %v12431_v19 = vld [vmem:[%s13945_s28 + $0x564] ss:$8 sps:$4 sm:$0xff]  }
 0x135   : > { %9510 = vmatpush1.bf16.msra.mxu0 %v12342_v20  ;;  %8691 = vmatprep.subr.bf16.mxu1 %v12347_v21  ;;  %v12434_v20 = vld [vmem:[%s13945_s28 + $0x1964] ss:$8 sps:$4 sm:$0xff]   ;;  %v12429_v21 = vld [vmem:[%s13945_s28 + $0x560] ss:$8 sps:$4 sm:$0xff]  }
 0x136   : > { %9511 = vmatprep.subr.bf16.mxu0 %v12350_v22  ;;  %v12432_v22 = vld [vmem:[%s13945_s28 + $0x1960] ss:$8 sps:$4 sm:$0xff]  }
 0x138   : > { %8692 = vmatpush1.bf16.msra.mxu1 %v12345_v23  ;;  %v12437_v23 = vld [vmem:[%s13945_s28 + $0x574] ss:$8 sps:$4 sm:$0xff]  }
 0x139   : > { %9512 = vmatpush1.bf16.msra.mxu0 %v12348_v24  ;;  %8693 = vmatprep.subr.bf16.mxu1 %v12353_v53  ;;  %v12440_v24 = vld [vmem:[%s13945_s28 + $0x1974] ss:$8 sps:$4 sm:$0xff]   ;;  %v12435_v53 = vld [vmem:[%s13945_s28 + $0x570] ss:$8 sps:$4 sm:$0xff]  }
 0x13a   : > { %9513 = vmatprep.subr.bf16.mxu0 %v12356_v57  ;;  %v12438_v57 = vld [vmem:[%s13945_s28 + $0x1970] ss:$8 sps:$4 sm:$0xff]  }
 0x13c   : > { %8694 = vmatpush1.bf16.msra.mxu1 %v12351_v27  ;;  %v12443_v27 = vld [vmem:[%s13945_s28 + $0x584] ss:$8 sps:$4 sm:$0xff]  }
 0x13d   : > { %9514 = vmatpush1.bf16.msra.mxu0 %v12354_v28  ;;  %8695 = vmatprep.subr.bf16.mxu1 %v12359_v29  ;;  %v12446_v28 = vld [vmem:[%s13945_s28 + $0x1984] ss:$8 sps:$4 sm:$0xff]   ;;  %v12441_v29 = vld [vmem:[%s13945_s28 + $0x580] ss:$8 sps:$4 sm:$0xff]  }
 0x13e   : > { %9515 = vmatprep.subr.bf16.mxu0 %v12362_v30  ;;  %v12444_v30 = vld [vmem:[%s13945_s28 + $0x1980] ss:$8 sps:$4 sm:$0xff]  }
 0x140   : > { %8696 = vmatpush1.bf16.msra.mxu1 %v12357_v31  ;;  %v12449_v31 = vld [vmem:[%s13945_s28 + $0x594] ss:$8 sps:$4 sm:$0xff]  }
 0x141   : > { %9516 = vmatpush1.bf16.msra.mxu0 %v12360_v32  ;;  %8697 = vmatprep.subr.bf16.mxu1 %v12365_v33  ;;  %v12452_v32 = vld [vmem:[%s13945_s28 + $0x1994] ss:$8 sps:$4 sm:$0xff]   ;;  %v12447_v33 = vld [vmem:[%s13945_s28 + $0x590] ss:$8 sps:$4 sm:$0xff]  }
 0x142   : > { %9517 = vmatprep.subr.bf16.mxu0 %v12368_v34  ;;  %v12450_v34 = vld [vmem:[%s13945_s28 + $0x1990] ss:$8 sps:$4 sm:$0xff]  }
 0x144   : > { %8698 = vmatpush1.bf16.msra.mxu1 %v12363_v35  ;;  %v12455_v35 = vld [vmem:[%s13945_s28 + $0x5a4] ss:$8 sps:$4 sm:$0xff]  }
 0x145   : > { %9518 = vmatpush1.bf16.msra.mxu0 %v12366_v36  ;;  %8699 = vmatprep.subr.bf16.mxu1 %v12371_v18  ;;  %v12458_v36 = vld [vmem:[%s13945_s28 + $0x19a4] ss:$8 sps:$4 sm:$0xff]   ;;  %v12453_v18 = vld [vmem:[%s13945_s28 + $0x5a0] ss:$8 sps:$4 sm:$0xff]  }
 0x146   : > { %9519 = vmatprep.subr.bf16.mxu0 %v12374_v38  ;;  %v12456_v38 = vld [vmem:[%s13945_s28 + $0x19a0] ss:$8 sps:$4 sm:$0xff]  }
 0x148   : > { %8700 = vmatpush1.bf16.msra.mxu1 %v12369_v43  ;;  %v12461_v43 = vld [vmem:[%s13945_s28 + $0x5b4] ss:$8 sps:$4 sm:$0xff]  }
 0x149   : > { %9520 = vmatpush1.bf16.msra.mxu0 %v12372_v45  ;;  %8701 = vmatprep.subr.bf16.mxu1 %v12377_v25  ;;  %v12464_v45 = vld [vmem:[%s13945_s28 + $0x19b4] ss:$8 sps:$4 sm:$0xff]   ;;  %v12459_v25 = vld [vmem:[%s13945_s28 + $0x5b0] ss:$8 sps:$4 sm:$0xff]  }
 0x14a   : > { %9521 = vmatprep.subr.bf16.mxu0 %v12380_v46  ;;  %v12462_v46 = vld [vmem:[%s13945_s28 + $0x19b0] ss:$8 sps:$4 sm:$0xff]  }
 0x14c   : > { %8702 = vmatpush1.bf16.msra.mxu1 %v12375_v26  ;;  %v12467_v26 = vld [vmem:[%s13945_s28 + $0x5c4] ss:$8 sps:$4 sm:$0xff]  }
 0x14d   : > { %9522 = vmatpush1.bf16.msra.mxu0 %v12378_v47  ;;  %8703 = vmatprep.subr.bf16.mxu1 %v12383_v37  ;;  %v12470_v47 = vld [vmem:[%s13945_s28 + $0x19c4] ss:$8 sps:$4 sm:$0xff]   ;;  %v12465_v37 = vld [vmem:[%s13945_s28 + $0x5c0] ss:$8 sps:$4 sm:$0xff]  }
 0x14e   : > { %9523 = vmatprep.subr.bf16.mxu0 %v12386_v48  ;;  %v12468_v48 = vld [vmem:[%s13945_s28 + $0x19c0] ss:$8 sps:$4 sm:$0xff]  }
 0x150   : > { %8704 = vmatpush1.bf16.msra.mxu1 %v12381_v17  ;;  %v12473_v17 = vld [vmem:[%s13945_s28 + $0x5d4] ss:$8 sps:$4 sm:$0xff]  }
 0x151   : > { %9524 = vmatpush1.bf16.msra.mxu0 %v12384_v49  ;;  %8705 = vmatprep.subr.bf16.mxu1 %v12389_v51  ;;  %v12476_v49 = vld [vmem:[%s13945_s28 + $0x19d4] ss:$8 sps:$4 sm:$0xff]   ;;  %v12471_v51 = vld [vmem:[%s13945_s28 + $0x5d0] ss:$8 sps:$4 sm:$0xff]  }
 0x152   : > { %9525 = vmatprep.subr.bf16.mxu0 %v12392_v52  ;;  %v12474_v52 = vld [vmem:[%s13945_s28 + $0x19d0] ss:$8 sps:$4 sm:$0xff]  }
 0x154   : > { %8706 = vmatpush1.bf16.msra.mxu1 %v12387_v54  ;;  %v12479_v54 = vld [vmem:[%s13945_s28 + $0x5e4] ss:$8 sps:$4 sm:$0xff]  }
 0x155   : > { %9526 = vmatpush1.bf16.msra.mxu0 %v12390_v55  ;;  %8716 = vmatprep.subr.bf16.mxu1 %v12395_v39  ;;  %v12482_v55 = vld [vmem:[%s13945_s28 + $0x19e4] ss:$8 sps:$4 sm:$0xff]  }
 0x156   : > { %9536 = vmatprep.subr.bf16.mxu0 %v12398_v40  ;;  %v13841_v39 = vld [vmem:[%s13940_s24 + $0x8] sm:$0xff] }
 0x157   : > { %8708 = vmatmul.mubr.bf16.vlgmr.msra.gmra.mrb[0].mxu1 %v14359_v59  ;;  %v1590_v40 = vcombine.high %v13841_v39, %v13841_v39  ;;  %v12557_v39 = vld [vmem:[%s13945_s28 + $0x6b4] ss:$8 sps:$4 sm:$0xff]  }
 0x158   : > { %9528 = vmatmul.mubr.bf16.vlgmr.msra.gmra.mrb[0].mxu0 %v14363_v60  ;;  %8717 = vmatpush1.bf16.msra.mxu1 %v12393_v61  ;;  %v13842_v61 = vld [vmem:[%s13940_s24 + $0x30] sm:$0xff] }
 0x159   : > { %9537 = vmatpush1.bf16.msra.mxu0 %v12396_v62  ;;  %8718 = vmatprep.subr.bf16.mxu1 %v12401_v63  ;;  %v1835_v62 = vcombine.high %v13842_v61, %v13842_v61  ;;  %v12477_v63 = vld [vmem:[%s13945_s28 + $0x5e0] ss:$8 sps:$4 sm:$0xff]   ;;  %v12555_v61 = vld [vmem:[%s13945_s28 + $0x6b0] ss:$8 sps:$4 sm:$0xff]  }
 0x15a   : > { %9538 = vmatprep.subr.bf16.mxu0 %v12404_v0  ;;  %8748 = vmatprep.mubr.bf16.mxu1 %v1637_v41  ;;  %v12480_v0 = vld [vmem:[%s13945_s28 + $0x19e0] ss:$8 sps:$4 sm:$0xff]   ;;  %v12485_v41 = vld [vmem:[%s13945_s28 + $0x5f4] ss:$8 sps:$4 sm:$0xff]  }
 0x15b   : > { %9568 = vmatprep.mubr.bf16.mxu0 %v1882_v1  ;;  %v12488_v1 = vld [vmem:[%s13945_s28 + $0x19f4] ss:$8 sps:$4 sm:$0xff]  }
 0x15c   : > { %8719 = vmatpush1.bf16.msra.mxu1 %v12399_v42  ;;  %v14434_v42 = vrot.slane %v1590_v40, %v13995_v50  ;;  %v12560_v40 = vld [vmem:[%s13945_s28 + $0x1ab4] ss:$8 sps:$4 sm:$0xff]  }
 0x15d   : > { %9539 = vmatpush1.bf16.msra.mxu0 %v12402_v2  ;;  %8720 = vmatprep.subr.bf16.mxu1 %v12407_v56  ;;  %v14437_v2 = vrot.slane %v1835_v62, %v13995_v50  ;;  %v12483_v56 = vld [vmem:[%s13945_s28 + $0x5f0] ss:$8 sps:$4 sm:$0xff]  }
 0x15e   : > { %9540 = vmatprep.subr.bf16.mxu0 %v12410_v3  ;;  %v12486_v3 = vld [vmem:[%s13945_s28 + $0x19f0] ss:$8 sps:$4 sm:$0xff]  }
 0x15f   : > { %v12558_v62 = vld [vmem:[%s13945_s28 + $0x1ab0] ss:$8 sps:$4 sm:$0xff]  }
 0x160   : > { %8721 = vmatpush1.bf16.msra.mxu1 %v12405_v58  ;;  %v12491_v58 = vld [vmem:[%s13945_s28 + $0x604] ss:$8 sps:$4 sm:$0xff]  }
 0x161   : > { %9541 = vmatpush1.bf16.msra.mxu0 %v12408_v4  ;;  %8722 = vmatprep.subr.bf16.mxu1 %v12413_v5  ;;  %v12494_v4 = vld [vmem:[%s13945_s28 + $0x1a04] ss:$8 sps:$4 sm:$0xff]   ;;  %v1606_v5 = vcombine.high %v14434_v42, %v14434_v42 }
 0x162   : > { %9542 = vmatprep.subr.bf16.mxu0 %v12416_v6  ;;  %v1851_v6 = vcombine.high %v14437_v2, %v14437_v2 }
 0x164   : > { %8723 = vmatpush1.bf16.msra.mxu1 %v12411_v7  ;;  %v1635_v7 = vcombine.high %v14359_v59, %v14359_v59  ;;  %v14459_v59 = vrot.slane %v1851_v6, %v13995_v50  ;;  %v12578_v6 = vld [vmem:[%s13945_s28 + $0x1ae4] ss:$8 sps:$4 sm:$0xff]  }
 0x165   : > { %9543 = vmatpush1.bf16.msra.mxu0 %v12414_v8  ;;  %8724 = vmatprep.subr.bf16.mxu1 %v12419_v9  ;;  %v1880_v8 = vcombine.high %v14363_v60, %v14363_v60  ;;  %v12489_v9 = vld [vmem:[%s13945_s28 + $0x600] ss:$8 sps:$4 sm:$0xff]   ;;  %v12495_v60 = vld [vmem:[%s13945_s28 + $0x610] ss:$8 sps:$4 sm:$0xff]  }
 0x166   : > { %9544 = vmatprep.subr.bf16.mxu0 %v12422_v10  ;;  %v12492_v10 = vld [vmem:[%s13945_s28 + $0x1a00] ss:$8 sps:$4 sm:$0xff]  }
 0x168   : > { %8725 = vmatpush1.bf16.msra.mxu1 %v12417_v11  ;;  %v12497_v11 = vld [vmem:[%s13945_s28 + $0x614] ss:$8 sps:$4 sm:$0xff]  }
 0x169   : > { %9545 = vmatpush1.bf16.msra.mxu0 %v12420_v12  ;;  %8726 = vmatprep.subr.bf16.mxu1 %v12425_v13  ;;  %v12500_v12 = vld [vmem:[%s13945_s28 + $0x1a14] ss:$8 sps:$4 sm:$0xff]   ;;  %v14456_v13 = vrot.slane %v1606_v5, %v13995_v50  ;;  %v12575_v5 = vld [vmem:[%s13945_s28 + $0x6e4] ss:$8 sps:$4 sm:$0xff]  }
 0x16a   : > { %9546 = vmatprep.subr.bf16.mxu0 %v12428_v14  ;;  %v12498_v14 = vld [vmem:[%s13945_s28 + $0x1a10] ss:$8 sps:$4 sm:$0xff]  }
 0x16c   : > { %8727 = vmatpush1.bf16.msra.mxu1 %v12423_v15  ;;  %v12503_v15 = vld [vmem:[%s13945_s28 + $0x624] ss:$8 sps:$4 sm:$0xff]  }
 0x16d   : > { %9547 = vmatpush1.bf16.msra.mxu0 %v12426_v16  ;;  %8728 = vmatprep.subr.bf16.mxu1 %v12431_v19  ;;  %v12506_v16 = vld [vmem:[%s13945_s28 + $0x1a24] ss:$8 sps:$4 sm:$0xff]   ;;  %v12501_v19 = vld [vmem:[%s13945_s28 + $0x620] ss:$8 sps:$4 sm:$0xff]  }
 0x16e   : > { %9548 = vmatprep.subr.bf16.mxu0 %v12434_v20  ;;  %v12504_v20 = vld [vmem:[%s13945_s28 + $0x1a20] ss:$8 sps:$4 sm:$0xff]  }
 0x170   : > { %8729 = vmatpush1.bf16.msra.mxu1 %v12429_v21  ;;  %v12509_v21 = vld [vmem:[%s13945_s28 + $0x634] ss:$8 sps:$4 sm:$0xff]  }
 0x171   : > { %9549 = vmatpush1.bf16.msra.mxu0 %v12432_v22  ;;  %8730 = vmatprep.subr.bf16.mxu1 %v12437_v23  ;;  %v12512_v22 = vld [vmem:[%s13945_s28 + $0x1a34] ss:$8 sps:$4 sm:$0xff]   ;;  %v12507_v23 = vld [vmem:[%s13945_s28 + $0x630] ss:$8 sps:$4 sm:$0xff]  }
 0x172   : > { %9550 = vmatprep.subr.bf16.mxu0 %v12440_v24  ;;  %v12510_v24 = vld [vmem:[%s13945_s28 + $0x1a30] ss:$8 sps:$4 sm:$0xff]  }
 0x174   : > { %8731 = vmatpush1.bf16.msra.mxu1 %v12435_v53  ;;  %v12515_v53 = vld [vmem:[%s13945_s28 + $0x644] ss:$8 sps:$4 sm:$0xff]  }
 0x175   : > { %9551 = vmatpush1.bf16.msra.mxu0 %v12438_v57  ;;  %8732 = vmatprep.subr.bf16.mxu1 %v12443_v27  ;;  %v12518_v57 = vld [vmem:[%s13945_s28 + $0x1a44] ss:$8 sps:$4 sm:$0xff]   ;;  %v12513_v27 = vld [vmem:[%s13945_s28 + $0x640] ss:$8 sps:$4 sm:$0xff]  }
 0x176   : > { %9552 = vmatprep.subr.bf16.mxu0 %v12446_v28  ;;  %v12516_v28 = vld [vmem:[%s13945_s28 + $0x1a40] ss:$8 sps:$4 sm:$0xff]  }
 0x178   : > { %8733 = vmatpush1.bf16.msra.mxu1 %v12441_v29  ;;  %v12521_v29 = vld [vmem:[%s13945_s28 + $0x654] ss:$8 sps:$4 sm:$0xff]  }
 0x179   : > { %9553 = vmatpush1.bf16.msra.mxu0 %v12444_v30  ;;  %8734 = vmatprep.subr.bf16.mxu1 %v12449_v31  ;;  %v12524_v30 = vld [vmem:[%s13945_s28 + $0x1a54] ss:$8 sps:$4 sm:$0xff]   ;;  %v12519_v31 = vld [vmem:[%s13945_s28 + $0x650] ss:$8 sps:$4 sm:$0xff]  }
 0x17a   : > { %9554 = vmatprep.subr.bf16.mxu0 %v12452_v32  ;;  %v12522_v32 = vld [vmem:[%s13945_s28 + $0x1a50] ss:$8 sps:$4 sm:$0xff]  }
 0x17c   : > { %8735 = vmatpush1.bf16.msra.mxu1 %v12447_v33  ;;  %v12527_v33 = vld [vmem:[%s13945_s28 + $0x664] ss:$8 sps:$4 sm:$0xff]  }
 0x17d   : > { %9555 = vmatpush1.bf16.msra.mxu0 %v12450_v34  ;;  %8736 = vmatprep.subr.bf16.mxu1 %v12455_v35  ;;  %v12530_v34 = vld [vmem:[%s13945_s28 + $0x1a64] ss:$8 sps:$4 sm:$0xff]   ;;  %v12525_v35 = vld [vmem:[%s13945_s28 + $0x660] ss:$8 sps:$4 sm:$0xff]  }
 0x17e   : > { %9556 = vmatprep.subr.bf16.mxu0 %v12458_v36  ;;  %v12528_v36 = vld [vmem:[%s13945_s28 + $0x1a60] ss:$8 sps:$4 sm:$0xff]  }
 0x180   : > { %8737 = vmatpush1.bf16.msra.mxu1 %v12453_v18  ;;  %v12533_v18 = vld [vmem:[%s13945_s28 + $0x674] ss:$8 sps:$4 sm:$0xff]  }
 0x181   : > { %9557 = vmatpush1.bf16.msra.mxu0 %v12456_v38  ;;  %8738 = vmatprep.subr.bf16.mxu1 %v12461_v43  ;;  %v12536_v38 = vld [vmem:[%s13945_s28 + $0x1a74] ss:$8 sps:$4 sm:$0xff]   ;;  %v12531_v43 = vld [vmem:[%s13945_s28 + $0x670] ss:$8 sps:$4 sm:$0xff]  }
 0x182   : > { %9558 = vmatprep.subr.bf16.mxu0 %v12464_v45  ;;  %v12534_v45 = vld [vmem:[%s13945_s28 + $0x1a70] ss:$8 sps:$4 sm:$0xff]  }
 0x184   : > { %8739 = vmatpush1.bf16.msra.mxu1 %v12459_v25  ;;  %v12539_v25 = vld [vmem:[%s13945_s28 + $0x684] ss:$8 sps:$4 sm:$0xff]  }
 0x185   : > { %9559 = vmatpush1.bf16.msra.mxu0 %v12462_v46  ;;  %8740 = vmatprep.subr.bf16.mxu1 %v12467_v26  ;;  %v12542_v46 = vld [vmem:[%s13945_s28 + $0x1a84] ss:$8 sps:$4 sm:$0xff]   ;;  %v12537_v26 = vld [vmem:[%s13945_s28 + $0x680] ss:$8 sps:$4 sm:$0xff]  }
 0x186   : > { %9560 = vmatprep.subr.bf16.mxu0 %v12470_v47  ;;  %v12540_v47 = vld [vmem:[%s13945_s28 + $0x1a80] ss:$8 sps:$4 sm:$0xff]  }
 0x188   : > { %8741 = vmatpush1.bf16.msra.mxu1 %v12465_v37  ;;  %v12545_v37 = vld [vmem:[%s13945_s28 + $0x694] ss:$8 sps:$4 sm:$0xff]  }
 0x189   : > { %9561 = vmatpush1.bf16.msra.mxu0 %v12468_v48  ;;  %8742 = vmatprep.subr.bf16.mxu1 %v12473_v17  ;;  %v12548_v48 = vld [vmem:[%s13945_s28 + $0x1a94] ss:$8 sps:$4 sm:$0xff]   ;;  %v12543_v17 = vld [vmem:[%s13945_s28 + $0x690] ss:$8 sps:$4 sm:$0xff]  }
 0x18a   : > { %9562 = vmatprep.subr.bf16.mxu0 %v12476_v49  ;;  %v12546_v49 = vld [vmem:[%s13945_s28 + $0x1a90] ss:$8 sps:$4 sm:$0xff]  }
 0x18c   : > { %8743 = vmatpush1.bf16.msra.mxu1 %v12471_v51  ;;  %v12551_v51 = vld [vmem:[%s13945_s28 + $0x6a4] ss:$8 sps:$4 sm:$0xff]  }
 0x18d   : > { %9563 = vmatpush1.bf16.msra.mxu0 %v12474_v52  ;;  %8744 = vmatprep.subr.bf16.mxu1 %v12479_v54  ;;  %v12554_v52 = vld [vmem:[%s13945_s28 + $0x1aa4] ss:$8 sps:$4 sm:$0xff]   ;;  %v12549_v54 = vld [vmem:[%s13945_s28 + $0x6a0] ss:$8 sps:$4 sm:$0xff]  }
 0x18e   : > { %9564 = vmatprep.subr.bf16.mxu0 %v12482_v55  ;;  %v12552_v55 = vld [vmem:[%s13945_s28 + $0x1aa0] ss:$8 sps:$4 sm:$0xff]  }
 0x190   : > { %8745 = vmatpush1.bf16.msra.mxu1 %v12477_v63  ;;  %v12563_v63 = vld [vmem:[%s13945_s28 + $0x6c4] ss:$8 sps:$4 sm:$0xff]  }
 0x191   : > { %9565 = vmatpush1.bf16.msra.mxu0 %v12480_v0  ;;  %8746 = vmatprep.subr.bf16.mxu1 %v12485_v41  ;;  %v12566_v0 = vld [vmem:[%s13945_s28 + $0x1ac4] ss:$8 sps:$4 sm:$0xff]   ;;  %v12561_v41 = vld [vmem:[%s13945_s28 + $0x6c0] ss:$8 sps:$4 sm:$0xff]  }
 0x192   : > { %9566 = vmatprep.subr.bf16.mxu0 %v12488_v1  ;;  %v12564_v1 = vld [vmem:[%s13945_s28 + $0x1ac0] ss:$8 sps:$4 sm:$0xff]  }
 0x194   : > { %8747 = vmatpush1.bf16.msra.mxu1 %v12483_v56  ;;  %v12569_v56 = vld [vmem:[%s13945_s28 + $0x6d4] ss:$8 sps:$4 sm:$0xff]  }
 0x195   : > { %9567 = vmatpush1.bf16.msra.mxu0 %v12486_v3  ;;  %8757 = vmatprep.subr.bf16.mxu1 %v12491_v58  ;;  %v12572_v3 = vld [vmem:[%s13945_s28 + $0x1ad4] ss:$8 sps:$4 sm:$0xff]   ;;  %v12567_v58 = vld [vmem:[%s13945_s28 + $0x6d0] ss:$8 sps:$4 sm:$0xff]  }
 0x196   : > { %9577 = vmatprep.subr.bf16.mxu0 %v12494_v4  ;;  %v12570_v4 = vld [vmem:[%s13945_s28 + $0x1ad0] ss:$8 sps:$4 sm:$0xff]  }
 0x197   : > { %8749 = vmatmul.mubr.bf16.vlgmr.msra.gmra.mrb[0].mxu1 %v1635_v7  ;;  %v12573_v7 = vld [vmem:[%s13945_s28 + $0x6e0] ss:$8 sps:$4 sm:$0xff]  }
 0x198   : > { %9569 = vmatmul.mubr.bf16.vlgmr.msra.gmra.mrb[0].mxu0 %v1880_v8  ;;  %8758 = vmatpush1.bf16.msra.mxu1 %v12489_v9  ;;  %v12576_v8 = vld [vmem:[%s13945_s28 + $0x1ae0] ss:$8 sps:$4 sm:$0xff]   ;;  %v12581_v9 = vld [vmem:[%s13945_s28 + $0x6f4] ss:$8 sps:$4 sm:$0xff]  }
 0x199   : > { %9578 = vmatpush1.bf16.msra.mxu0 %v12492_v10  ;;  %8759 = vmatprep.subr.bf16.mxu1 %v12497_v11  ;;  %v12584_v10 = vld [vmem:[%s13945_s28 + $0x1af4] ss:$8 sps:$4 sm:$0xff]   ;;  %v12579_v11 = vld [vmem:[%s13945_s28 + $0x6f0] ss:$8 sps:$4 sm:$0xff]  }
 0x19a   : > { %9579 = vmatprep.subr.bf16.mxu0 %v12500_v12  ;;  %8789 = vmatprep.mubr.bf16.mxu1 %v14456_v13  ;;  %v12582_v12 = vld [vmem:[%s13945_s28 + $0x1af0] ss:$8 sps:$4 sm:$0xff]  }
 0x19b   : > { %9609 = vmatprep.mubr.bf16.mxu0 %v14459_v59 }
 0x19c   : > { %8760 = vmatpush1.bf16.msra.mxu1 %v12495_v60  ;;  %v12588_v60 = vld [vmem:[%s13945_s28 + $0x704] ss:$8 sps:$4 sm:$0xff]  }
 0x19d   : > { %9580 = vmatpush1.bf16.msra.mxu0 %v12498_v14  ;;  %8761 = vmatprep.subr.bf16.mxu1 %v12503_v15  ;;  %v12592_v14 = vld [vmem:[%s13945_s28 + $0x1b04] ss:$8 sps:$4 sm:$0xff]   ;;  %v14525_v15 = vrot.slane %v14434_v42, %v13995_v50  ;;  %v1638_v42 = vcombine.high %v14456_v13, %v14456_v13 }
 0x19e   : > { %9581 = vmatprep.subr.bf16.mxu0 %v12506_v16  ;;  %v14529_v16 = vrot.slane %v14437_v2, %v13995_v50  ;;  %v12593_v2 = vld [vmem:[%s13945_s28 + $0x710] ss:$8 sps:$4 sm:$0xff]   ;;  %v12601_v13 = vld [vmem:[%s13945_s28 + $0x724] ss:$8 sps:$4 sm:$0xff]  }
 0x1a0   : > { %8762 = vmatpush1.bf16.msra.mxu1 %v12501_v19  ;;  %v12586_v19 = vld [vmem:[%s13945_s28 + $0x700] ss:$8 sps:$4 sm:$0xff]  }
 0x1a1   : > { %9582 = vmatpush1.bf16.msra.mxu0 %v12504_v20  ;;  %8763 = vmatprep.subr.bf16.mxu1 %v12509_v21  ;;  %v12590_v20 = vld [vmem:[%s13945_s28 + $0x1b00] ss:$8 sps:$4 sm:$0xff]   ;;  %v12595_v21 = vld [vmem:[%s13945_s28 + $0x714] ss:$8 sps:$4 sm:$0xff]  }
 0x1a2   : > { %9583 = vmatprep.subr.bf16.mxu0 %v12512_v22  ;;  %v12598_v22 = vld [vmem:[%s13945_s28 + $0x1b14] ss:$8 sps:$4 sm:$0xff]  }
 0x1a4   : > { %8764 = vmatpush1.bf16.msra.mxu1 %v12507_v23  ;;  %v1883_v23 = vcombine.high %v14459_v59, %v14459_v59  ;;  %v12599_v59 = vld [vmem:[%s13945_s28 + $0x720] ss:$8 sps:$4 sm:$0xff]  }
 0x1a5   : > { %9584 = vmatpush1.bf16.msra.mxu0 %v12510_v24  ;;  %8765 = vmatprep.subr.bf16.mxu1 %v12515_v53  ;;  %v12596_v24 = vld [vmem:[%s13945_s28 + $0x1b10] ss:$8 sps:$4 sm:$0xff]   ;;  %v12604_v53 = vld [vmem:[%s13945_s28 + $0x1b24] ss:$8 sps:$4 sm:$0xff]  }
 0x1a6   : > { %9585 = vmatprep.subr.bf16.mxu0 %v12518_v57  ;;  %v12602_v57 = vld [vmem:[%s13945_s28 + $0x1b20] ss:$8 sps:$4 sm:$0xff]  }
 0x1a8   : > { %8766 = vmatpush1.bf16.msra.mxu1 %v12513_v27  ;;  %v12607_v27 = vld [vmem:[%s13945_s28 + $0x734] ss:$8 sps:$4 sm:$0xff]  }
 0x1a9   : > { %9586 = vmatpush1.bf16.msra.mxu0 %v12516_v28  ;;  %8767 = vmatprep.subr.bf16.mxu1 %v12521_v29  ;;  %v12610_v28 = vld [vmem:[%s13945_s28 + $0x1b34] ss:$8 sps:$4 sm:$0xff]   ;;  %v12605_v29 = vld [vmem:[%s13945_s28 + $0x730] ss:$8 sps:$4 sm:$0xff]  }
 0x1aa   : > { %9587 = vmatprep.subr.bf16.mxu0 %v12524_v30  ;;  %v12608_v30 = vld [vmem:[%s13945_s28 + $0x1b30] ss:$8 sps:$4 sm:$0xff]  }
 0x1ac   : > { %8768 = vmatpush1.bf16.msra.mxu1 %v12519_v31  ;;  %v12613_v31 = vld [vmem:[%s13945_s28 + $0x744] ss:$8 sps:$4 sm:$0xff]  }
 0x1ad   : > { %9588 = vmatpush1.bf16.msra.mxu0 %v12522_v32  ;;  %8769 = vmatprep.subr.bf16.mxu1 %v12527_v33  ;;  %v12616_v32 = vld [vmem:[%s13945_s28 + $0x1b44] ss:$8 sps:$4 sm:$0xff]   ;;  %v12611_v33 = vld [vmem:[%s13945_s28 + $0x740] ss:$8 sps:$4 sm:$0xff]  }
 0x1ae   : > { %9589 = vmatprep.subr.bf16.mxu0 %v12530_v34  ;;  %v12614_v34 = vld [vmem:[%s13945_s28 + $0x1b40] ss:$8 sps:$4 sm:$0xff]  }
 0x1b0   : > { %8770 = vmatpush1.bf16.msra.mxu1 %v12525_v35  ;;  %v12619_v35 = vld [vmem:[%s13945_s28 + $0x754] ss:$8 sps:$4 sm:$0xff]  }
 0x1b1   : > { %9590 = vmatpush1.bf16.msra.mxu0 %v12528_v36  ;;  %8771 = vmatprep.subr.bf16.mxu1 %v12533_v18  ;;  %v12622_v36 = vld [vmem:[%s13945_s28 + $0x1b54] ss:$8 sps:$4 sm:$0xff]   ;;  %v12617_v18 = vld [vmem:[%s13945_s28 + $0x750] ss:$8 sps:$4 sm:$0xff]  }
 0x1b2   : > { %9591 = vmatprep.subr.bf16.mxu0 %v12536_v38  ;;  %v12620_v38 = vld [vmem:[%s13945_s28 + $0x1b50] ss:$8 sps:$4 sm:$0xff]  }
 0x1b4   : > { %8772 = vmatpush1.bf16.msra.mxu1 %v12531_v43  ;;  %v12625_v43 = vld [vmem:[%s13945_s28 + $0x764] ss:$8 sps:$4 sm:$0xff]  }
 0x1b5   : > { %9592 = vmatpush1.bf16.msra.mxu0 %v12534_v45  ;;  %8773 = vmatprep.subr.bf16.mxu1 %v12539_v25  ;;  %v12628_v45 = vld [vmem:[%s13945_s28 + $0x1b64] ss:$8 sps:$4 sm:$0xff]   ;;  %v12623_v25 = vld [vmem:[%s13945_s28 + $0x760] ss:$8 sps:$4 sm:$0xff]  }
 0x1b6   : > { %9593 = vmatprep.subr.bf16.mxu0 %v12542_v46  ;;  %v12626_v46 = vld [vmem:[%s13945_s28 + $0x1b60] ss:$8 sps:$4 sm:$0xff]  }
 0x1b8   : > { %8774 = vmatpush1.bf16.msra.mxu1 %v12537_v26  ;;  %v12631_v26 = vld [vmem:[%s13945_s28 + $0x774] ss:$8 sps:$4 sm:$0xff]  }
 0x1b9   : > { %9594 = vmatpush1.bf16.msra.mxu0 %v12540_v47  ;;  %8775 = vmatprep.subr.bf16.mxu1 %v12545_v37  ;;  %v12634_v47 = vld [vmem:[%s13945_s28 + $0x1b74] ss:$8 sps:$4 sm:$0xff]   ;;  %v12629_v37 = vld [vmem:[%s13945_s28 + $0x770] ss:$8 sps:$4 sm:$0xff]  }
 0x1ba   : > { %9595 = vmatprep.subr.bf16.mxu0 %v12548_v48  ;;  %v12632_v48 = vld [vmem:[%s13945_s28 + $0x1b70] ss:$8 sps:$4 sm:$0xff]  }
 0x1bc   : > { %8776 = vmatpush1.bf16.msra.mxu1 %v12543_v17  ;;  %v12637_v17 = vld [vmem:[%s13945_s28 + $0x784] ss:$8 sps:$4 sm:$0xff]  }
 0x1bd   : > { %9596 = vmatpush1.bf16.msra.mxu0 %v12546_v49  ;;  %8777 = vmatprep.subr.bf16.mxu1 %v12551_v51  ;;  %v12640_v49 = vld [vmem:[%s13945_s28 + $0x1b84] ss:$8 sps:$4 sm:$0xff]   ;;  %v12635_v51 = vld [vmem:[%s13945_s28 + $0x780] ss:$8 sps:$4 sm:$0xff]  }
 0x1be   : > { %9597 = vmatprep.subr.bf16.mxu0 %v12554_v52  ;;  %v12638_v52 = vld [vmem:[%s13945_s28 + $0x1b80] ss:$8 sps:$4 sm:$0xff]  }
 0x1c0   : > { %8778 = vmatpush1.bf16.msra.mxu1 %v12549_v54  ;;  %v12643_v54 = vld [vmem:[%s13945_s28 + $0x794] ss:$8 sps:$4 sm:$0xff]  }
 0x1c1   : > { %9598 = vmatpush1.bf16.msra.mxu0 %v12552_v55  ;;  %8779 = vmatprep.subr.bf16.mxu1 %v12557_v39  ;;  %v12646_v55 = vld [vmem:[%s13945_s28 + $0x1b94] ss:$8 sps:$4 sm:$0xff]   ;;  %v12641_v39 = vld [vmem:[%s13945_s28 + $0x790] ss:$8 sps:$4 sm:$0xff]  }
 0x1c2   : > { %9599 = vmatprep.subr.bf16.mxu0 %v12560_v40  ;;  %v12644_v40 = vld [vmem:[%s13945_s28 + $0x1b90] ss:$8 sps:$4 sm:$0xff]  }
 0x1c4   : > { %8780 = vmatpush1.bf16.msra.mxu1 %v12555_v61  ;;  %v12649_v61 = vld [vmem:[%s13945_s28 + $0x7a4] ss:$8 sps:$4 sm:$0xff]  }
 0x1c5   : > { %9600 = vmatpush1.bf16.msra.mxu0 %v12558_v62  ;;  %8781 = vmatprep.subr.bf16.mxu1 %v12563_v63  ;;  %v12652_v62 = vld [vmem:[%s13945_s28 + $0x1ba4] ss:$8 sps:$4 sm:$0xff]   ;;  %v12647_v63 = vld [vmem:[%s13945_s28 + $0x7a0] ss:$8 sps:$4 sm:$0xff]  }
 0x1c6   : > { %9601 = vmatprep.subr.bf16.mxu0 %v12566_v0  ;;  %v12650_v0 = vld [vmem:[%s13945_s28 + $0x1ba0] ss:$8 sps:$4 sm:$0xff]  }
 0x1c8   : > { %8782 = vmatpush1.bf16.msra.mxu1 %v12561_v41  ;;  %v12655_v41 = vld [vmem:[%s13945_s28 + $0x7b4] ss:$8 sps:$4 sm:$0xff]  }
 0x1c9   : > { %9602 = vmatpush1.bf16.msra.mxu0 %v12564_v1  ;;  %8783 = vmatprep.subr.bf16.mxu1 %v12569_v56  ;;  %v12658_v1 = vld [vmem:[%s13945_s28 + $0x1bb4] ss:$8 sps:$4 sm:$0xff]   ;;  %v12653_v56 = vld [vmem:[%s13945_s28 + $0x7b0] ss:$8 sps:$4 sm:$0xff]  }
 0x1ca   : > { %9603 = vmatprep.subr.bf16.mxu0 %v12572_v3  ;;  %v12656_v3 = vld [vmem:[%s13945_s28 + $0x1bb0] ss:$8 sps:$4 sm:$0xff]  }
 0x1cc   : > { %8784 = vmatpush1.bf16.msra.mxu1 %v12567_v58  ;;  %v12661_v58 = vld [vmem:[%s13945_s28 + $0x7c4] ss:$8 sps:$4 sm:$0xff]  }
 0x1cd   : > { %9604 = vmatpush1.bf16.msra.mxu0 %v12570_v4  ;;  %8785 = vmatprep.subr.bf16.mxu1 %v12575_v5  ;;  %v12664_v4 = vld [vmem:[%s13945_s28 + $0x1bc4] ss:$8 sps:$4 sm:$0xff]   ;;  %v12659_v5 = vld [vmem:[%s13945_s28 + $0x7c0] ss:$8 sps:$4 sm:$0xff]  }
 0x1ce   : > { %9605 = vmatprep.subr.bf16.mxu0 %v12578_v6  ;;  %v12662_v6 = vld [vmem:[%s13945_s28 + $0x1bc0] ss:$8 sps:$4 sm:$0xff]  }
 0x1d0   : > { %8786 = vmatpush1.bf16.msra.mxu1 %v12573_v7  ;;  %v12667_v7 = vld [vmem:[%s13945_s28 + $0x7d4] ss:$8 sps:$4 sm:$0xff]  }
 0x1d1   : > { %9606 = vmatpush1.bf16.msra.mxu0 %v12576_v8  ;;  %8787 = vmatprep.subr.bf16.mxu1 %v12581_v9  ;;  %v12670_v8 = vld [vmem:[%s13945_s28 + $0x1bd4] ss:$8 sps:$4 sm:$0xff]   ;;  %v12665_v9 = vld [vmem:[%s13945_s28 + $0x7d0] ss:$8 sps:$4 sm:$0xff]  }
 0x1d2   : > { %9607 = vmatprep.subr.bf16.mxu0 %v12584_v10  ;;  %v12668_v10 = vld [vmem:[%s13945_s28 + $0x1bd0] ss:$8 sps:$4 sm:$0xff]  }
 0x1d4   : > { %8788 = vmatpush1.bf16.msra.mxu1 %v12579_v11  ;;  %v12673_v11 = vld [vmem:[%s13945_s28 + $0x7e4] ss:$8 sps:$4 sm:$0xff]  }
 0x1d5   : > { %9608 = vmatpush1.bf16.msra.mxu0 %v12582_v12  ;;  %8798 = vmatprep.subr.bf16.mxu1 %v12588_v60  ;;  %v12676_v12 = vld [vmem:[%s13945_s28 + $0x1be4] ss:$8 sps:$4 sm:$0xff]   ;;  %v14594_v60 = vld.sshfl [vmem:[%s13940_s24 + $0x10] sm:$0xff pattern:$0x75316420] }
 0x1d6   : > { %9618 = vmatprep.subr.bf16.mxu0 %v12592_v14  ;;  %v14597_v14 = vld.sshfl [vmem:[%s13940_s24 + $0x38] sm:$0xff pattern:$0x75316420] }
 0x1d7   : > { %8790 = vmatmul.mubr.bf16.vlgmr.msra.gmra.mrb[0].mxu1 %v14525_v15 }
 0x1d8   : > { %9610 = vmatmul.mubr.bf16.vlgmr.msra.gmra.mrb[0].mxu0 %v14529_v16  ;;  %8799 = vmatpush1.bf16.msra.mxu1 %v12586_v19  ;;  %v12671_v19 = vld [vmem:[%s13945_s28 + $0x7e0] ss:$8 sps:$4 sm:$0xff]  }
 0x1d9   : > { %9619 = vmatpush1.bf16.msra.mxu0 %v12590_v20  ;;  %8800 = vmatprep.subr.bf16.mxu1 %v12595_v21  ;;  %v12674_v20 = vld [vmem:[%s13945_s28 + $0x1be0] ss:$8 sps:$4 sm:$0xff]   ;;  %v12679_v21 = vld [vmem:[%s13945_s28 + $0x7f4] ss:$8 sps:$4 sm:$0xff]  }
 0x1da   : > { %9620 = vmatprep.subr.bf16.mxu0 %v12598_v22  ;;  %8830 = vmatprep.mubr.bf16.mxu1 %v1638_v42  ;;  %v12682_v22 = vld [vmem:[%s13945_s28 + $0x1bf4] ss:$8 sps:$4 sm:$0xff]   ;;  %v12677_v42 = vld [vmem:[%s13945_s28 + $0x7f0] ss:$8 sps:$4 sm:$0xff]  }
 0x1db   : > { %9650 = vmatprep.mubr.bf16.mxu0 %v1883_v23  ;;  %v12680_v23 = vld [vmem:[%s13945_s28 + $0x1bf0] ss:$8 sps:$4 sm:$0xff]  }
 0x1dc   : > { %8801 = vmatpush1.bf16.msra.mxu1 %v12593_v2  ;;  %v12685_v2 = vld [vmem:[%s13945_s28 + $0x804] ss:$8 sps:$4 sm:$0xff]  }
 0x1dd   : > { %9621 = vmatpush1.bf16.msra.mxu0 %v12596_v24  ;;  %8802 = vmatprep.subr.bf16.mxu1 %v12601_v13  ;;  %v12688_v24 = vld [vmem:[%s13945_s28 + $0x1c04] ss:$8 sps:$4 sm:$0xff]   ;;  %v1654_v13 = vcombine.high %v14594_v60, %v14594_v60 }
 0x1de   : > { %9622 = vmatprep.subr.bf16.mxu0 %v12604_v53  ;;  %v1899_v53 = vcombine.high %v14597_v14, %v14597_v14 }
 0x1e0   : > { %8803 = vmatpush1.bf16.msra.mxu1 %v12599_v59  ;;  %v1636_v59 = vcombine.high %v14525_v15, %v14525_v15  ;;  %v14623_v15 = vrot.slane %v1899_v53, %v13995_v50  ;;  %v12772_v53 = vld [vmem:[%s13945_s28 + $0x1ce4] ss:$8 sps:$4 sm:$0xff]  }
 0x1e1   : > { %9623 = vmatpush1.bf16.msra.mxu0 %v12602_v57  ;;  %8804 = vmatprep.subr.bf16.mxu1 %v12607_v27  ;;  %v1881_v57 = vcombine.high %v14529_v16, %v14529_v16  ;;  %v12683_v27 = vld [vmem:[%s13945_s28 + $0x800] ss:$8 sps:$4 sm:$0xff]   ;;  %v12689_v16 = vld [vmem:[%s13945_s28 + $0x810] ss:$8 sps:$4 sm:$0xff]  }
 0x1e2   : > { %9624 = vmatprep.subr.bf16.mxu0 %v12610_v28  ;;  %v12686_v28 = vld [vmem:[%s13945_s28 + $0x1c00] ss:$8 sps:$4 sm:$0xff]  }
 0x1e4   : > { %8805 = vmatpush1.bf16.msra.mxu1 %v12605_v29  ;;  %v12691_v29 = vld [vmem:[%s13945_s28 + $0x814] ss:$8 sps:$4 sm:$0xff]  }
 0x1e5   : > { %9625 = vmatpush1.bf16.msra.mxu0 %v12608_v30  ;;  %8806 = vmatprep.subr.bf16.mxu1 %v12613_v31  ;;  %v12694_v30 = vld [vmem:[%s13945_s28 + $0x1c14] ss:$8 sps:$4 sm:$0xff]   ;;  %v14620_v31 = vrot.slane %v1654_v13, %v13995_v50  ;;  %v12769_v13 = vld [vmem:[%s13945_s28 + $0x8e4] ss:$8 sps:$4 sm:$0xff]  }
 0x1e6   : > { %9626 = vmatprep.subr.bf16.mxu0 %v12616_v32  ;;  %v12692_v32 = vld [vmem:[%s13945_s28 + $0x1c10] ss:$8 sps:$4 sm:$0xff]  }
 0x1e8   : > { %8807 = vmatpush1.bf16.msra.mxu1 %v12611_v33  ;;  %v12697_v33 = vld [vmem:[%s13945_s28 + $0x824] ss:$8 sps:$4 sm:$0xff]  }
 0x1e9   : > { %9627 = vmatpush1.bf16.msra.mxu0 %v12614_v34  ;;  %8808 = vmatprep.subr.bf16.mxu1 %v12619_v35  ;;  %v12700_v34 = vld [vmem:[%s13945_s28 + $0x1c24] ss:$8 sps:$4 sm:$0xff]   ;;  %v12695_v35 = vld [vmem:[%s13945_s28 + $0x820] ss:$8 sps:$4 sm:$0xff]  }
 0x1ea   : > { %9628 = vmatprep.subr.bf16.mxu0 %v12622_v36  ;;  %v12698_v36 = vld [vmem:[%s13945_s28 + $0x1c20] ss:$8 sps:$4 sm:$0xff]  }
 0x1ec   : > { %8809 = vmatpush1.bf16.msra.mxu1 %v12617_v18  ;;  %v12703_v18 = vld [vmem:[%s13945_s28 + $0x834] ss:$8 sps:$4 sm:$0xff]  }
 0x1ed   : > { %9629 = vmatpush1.bf16.msra.mxu0 %v12620_v38  ;;  %8810 = vmatprep.subr.bf16.mxu1 %v12625_v43  ;;  %v12706_v38 = vld [vmem:[%s13945_s28 + $0x1c34] ss:$8 sps:$4 sm:$0xff]   ;;  %v12701_v43 = vld [vmem:[%s13945_s28 + $0x830] ss:$8 sps:$4 sm:$0xff]  }
 0x1ee   : > { %9630 = vmatprep.subr.bf16.mxu0 %v12628_v45  ;;  %v12704_v45 = vld [vmem:[%s13945_s28 + $0x1c30] ss:$8 sps:$4 sm:$0xff]  }
 0x1f0   : > { %8811 = vmatpush1.bf16.msra.mxu1 %v12623_v25  ;;  %v12709_v25 = vld [vmem:[%s13945_s28 + $0x844] ss:$8 sps:$4 sm:$0xff]  }
 0x1f1   : > { %9631 = vmatpush1.bf16.msra.mxu0 %v12626_v46  ;;  %8812 = vmatprep.subr.bf16.mxu1 %v12631_v26  ;;  %v12712_v46 = vld [vmem:[%s13945_s28 + $0x1c44] ss:$8 sps:$4 sm:$0xff]   ;;  %v12707_v26 = vld [vmem:[%s13945_s28 + $0x840] ss:$8 sps:$4 sm:$0xff]  }
 0x1f2   : > { %9632 = vmatprep.subr.bf16.mxu0 %v12634_v47  ;;  %v12710_v47 = vld [vmem:[%s13945_s28 + $0x1c40] ss:$8 sps:$4 sm:$0xff]  }
 0x1f4   : > { %8813 = vmatpush1.bf16.msra.mxu1 %v12629_v37  ;;  %v12715_v37 = vld [vmem:[%s13945_s28 + $0x854] ss:$8 sps:$4 sm:$0xff]  }
 0x1f5   : > { %9633 = vmatpush1.bf16.msra.mxu0 %v12632_v48  ;;  %8814 = vmatprep.subr.bf16.mxu1 %v12637_v17  ;;  %v12718_v48 = vld [vmem:[%s13945_s28 + $0x1c54] ss:$8 sps:$4 sm:$0xff]   ;;  %v12713_v17 = vld [vmem:[%s13945_s28 + $0x850] ss:$8 sps:$4 sm:$0xff]  }
 0x1f6   : > { %9634 = vmatprep.subr.bf16.mxu0 %v12640_v49  ;;  %v12716_v49 = vld [vmem:[%s13945_s28 + $0x1c50] ss:$8 sps:$4 sm:$0xff]  }
 0x1f8   : > { %8815 = vmatpush1.bf16.msra.mxu1 %v12635_v51  ;;  %v12721_v51 = vld [vmem:[%s13945_s28 + $0x864] ss:$8 sps:$4 sm:$0xff]  }
 0x1f9   : > { %9635 = vmatpush1.bf16.msra.mxu0 %v12638_v52  ;;  %8816 = vmatprep.subr.bf16.mxu1 %v12643_v54  ;;  %v12724_v52 = vld [vmem:[%s13945_s28 + $0x1c64] ss:$8 sps:$4 sm:$0xff]   ;;  %v12719_v54 = vld [vmem:[%s13945_s28 + $0x860] ss:$8 sps:$4 sm:$0xff]  }
 0x1fa   : > { %9636 = vmatprep.subr.bf16.mxu0 %v12646_v55  ;;  %v12722_v55 = vld [vmem:[%s13945_s28 + $0x1c60] ss:$8 sps:$4 sm:$0xff]  }
 0x1fc   : > { %8817 = vmatpush1.bf16.msra.mxu1 %v12641_v39  ;;  %v12727_v39 = vld [vmem:[%s13945_s28 + $0x874] ss:$8 sps:$4 sm:$0xff]  }
 0x1fd   : > { %9637 = vmatpush1.bf16.msra.mxu0 %v12644_v40  ;;  %8818 = vmatprep.subr.bf16.mxu1 %v12649_v61  ;;  %v12730_v40 = vld [vmem:[%s13945_s28 + $0x1c74] ss:$8 sps:$4 sm:$0xff]   ;;  %v12725_v61 = vld [vmem:[%s13945_s28 + $0x870] ss:$8 sps:$4 sm:$0xff]  }
 0x1fe   : > { %9638 = vmatprep.subr.bf16.mxu0 %v12652_v62  ;;  %v12728_v62 = vld [vmem:[%s13945_s28 + $0x1c70] ss:$8 sps:$4 sm:$0xff]  }
 0x200   : > { %8819 = vmatpush1.bf16.msra.mxu1 %v12647_v63  ;;  %v12733_v63 = vld [vmem:[%s13945_s28 + $0x884] ss:$8 sps:$4 sm:$0xff]  }
 0x201   : > { %9639 = vmatpush1.bf16.msra.mxu0 %v12650_v0  ;;  %8820 = vmatprep.subr.bf16.mxu1 %v12655_v41  ;;  %v12736_v0 = vld [vmem:[%s13945_s28 + $0x1c84] ss:$8 sps:$4 sm:$0xff]   ;;  %v12731_v41 = vld [vmem:[%s13945_s28 + $0x880] ss:$8 sps:$4 sm:$0xff]  }
 0x202   : > { %9640 = vmatprep.subr.bf16.mxu0 %v12658_v1  ;;  %v12734_v1 = vld [vmem:[%s13945_s28 + $0x1c80] ss:$8 sps:$4 sm:$0xff]  }
 0x204   : > { %8821 = vmatpush1.bf16.msra.mxu1 %v12653_v56  ;;  %v12739_v56 = vld [vmem:[%s13945_s28 + $0x894] ss:$8 sps:$4 sm:$0xff]  }
 0x205   : > { %9641 = vmatpush1.bf16.msra.mxu0 %v12656_v3  ;;  %8822 = vmatprep.subr.bf16.mxu1 %v12661_v58  ;;  %v12742_v3 = vld [vmem:[%s13945_s28 + $0x1c94] ss:$8 sps:$4 sm:$0xff]   ;;  %v12737_v58 = vld [vmem:[%s13945_s28 + $0x890] ss:$8 sps:$4 sm:$0xff]  }
 0x206   : > { %9642 = vmatprep.subr.bf16.mxu0 %v12664_v4  ;;  %v12740_v4 = vld [vmem:[%s13945_s28 + $0x1c90] ss:$8 sps:$4 sm:$0xff]  }
 0x208   : > { %8823 = vmatpush1.bf16.msra.mxu1 %v12659_v5  ;;  %v12745_v5 = vld [vmem:[%s13945_s28 + $0x8a4] ss:$8 sps:$4 sm:$0xff]  }
 0x209   : > { %9643 = vmatpush1.bf16.msra.mxu0 %v12662_v6  ;;  %8824 = vmatprep.subr.bf16.mxu1 %v12667_v7  ;;  %v12748_v6 = vld [vmem:[%s13945_s28 + $0x1ca4] ss:$8 sps:$4 sm:$0xff]   ;;  %v12743_v7 = vld [vmem:[%s13945_s28 + $0x8a0] ss:$8 sps:$4 sm:$0xff]  }
 0x20a   : > { %9644 = vmatprep.subr.bf16.mxu0 %v12670_v8  ;;  %v12746_v8 = vld [vmem:[%s13945_s28 + $0x1ca0] ss:$8 sps:$4 sm:$0xff]  }
 0x20c   : > { %8825 = vmatpush1.bf16.msra.mxu1 %v12665_v9  ;;  %v12751_v9 = vld [vmem:[%s13945_s28 + $0x8b4] ss:$8 sps:$4 sm:$0xff]  }
 0x20d   : > { %9645 = vmatpush1.bf16.msra.mxu0 %v12668_v10  ;;  %8826 = vmatprep.subr.bf16.mxu1 %v12673_v11  ;;  %v12754_v10 = vld [vmem:[%s13945_s28 + $0x1cb4] ss:$8 sps:$4 sm:$0xff]   ;;  %v12749_v11 = vld [vmem:[%s13945_s28 + $0x8b0] ss:$8 sps:$4 sm:$0xff]  }
 0x20e   : > { %9646 = vmatprep.subr.bf16.mxu0 %v12676_v12  ;;  %v12752_v12 = vld [vmem:[%s13945_s28 + $0x1cb0] ss:$8 sps:$4 sm:$0xff]  }
 0x210   : > { %8827 = vmatpush1.bf16.msra.mxu1 %v12671_v19  ;;  %v12757_v19 = vld [vmem:[%s13945_s28 + $0x8c4] ss:$8 sps:$4 sm:$0xff]  }
 0x211   : > { %9647 = vmatpush1.bf16.msra.mxu0 %v12674_v20  ;;  %8828 = vmatprep.subr.bf16.mxu1 %v12679_v21  ;;  %v12760_v20 = vld [vmem:[%s13945_s28 + $0x1cc4] ss:$8 sps:$4 sm:$0xff]   ;;  %v12755_v21 = vld [vmem:[%s13945_s28 + $0x8c0] ss:$8 sps:$4 sm:$0xff]  }
 0x212   : > { %9648 = vmatprep.subr.bf16.mxu0 %v12682_v22  ;;  %v12758_v22 = vld [vmem:[%s13945_s28 + $0x1cc0] ss:$8 sps:$4 sm:$0xff]  }
 0x214   : > { %8829 = vmatpush1.bf16.msra.mxu1 %v12677_v42  ;;  %v12763_v42 = vld [vmem:[%s13945_s28 + $0x8d4] ss:$8 sps:$4 sm:$0xff]  }
 0x215   : > { %9649 = vmatpush1.bf16.msra.mxu0 %v12680_v23  ;;  %8839 = vmatprep.subr.bf16.mxu1 %v12685_v2  ;;  %v12766_v23 = vld [vmem:[%s13945_s28 + $0x1cd4] ss:$8 sps:$4 sm:$0xff]   ;;  %v12761_v2 = vld [vmem:[%s13945_s28 + $0x8d0] ss:$8 sps:$4 sm:$0xff]  }
 0x216   : > { %9659 = vmatprep.subr.bf16.mxu0 %v12688_v24  ;;  %v12764_v24 = vld [vmem:[%s13945_s28 + $0x1cd0] ss:$8 sps:$4 sm:$0xff]  }
 0x217   : > { %8831 = vmatmul.mubr.bf16.vlgmr.msra.gmra.mrb[0].mxu1 %v1636_v59  ;;  %v12767_v59 = vld [vmem:[%s13945_s28 + $0x8e0] ss:$8 sps:$4 sm:$0xff]  }
 0x218   : > { %9651 = vmatmul.mubr.bf16.vlgmr.msra.gmra.mrb[0].mxu0 %v1881_v57  ;;  %8840 = vmatpush1.bf16.msra.mxu1 %v12683_v27  ;;  %v12770_v57 = vld [vmem:[%s13945_s28 + $0x1ce0] ss:$8 sps:$4 sm:$0xff]   ;;  %v12775_v27 = vld [vmem:[%s13945_s28 + $0x8f4] ss:$8 sps:$4 sm:$0xff]  }
 0x219   : > { %9660 = vmatpush1.bf16.msra.mxu0 %v12686_v28  ;;  %8841 = vmatprep.subr.bf16.mxu1 %v12691_v29  ;;  %v12778_v28 = vld [vmem:[%s13945_s28 + $0x1cf4] ss:$8 sps:$4 sm:$0xff]   ;;  %v12773_v29 = vld [vmem:[%s13945_s28 + $0x8f0] ss:$8 sps:$4 sm:$0xff]  }
 0x21a   : > { %9661 = vmatprep.subr.bf16.mxu0 %v12694_v30  ;;  %8871 = vmatprep.mubr.bf16.mxu1 %v14620_v31  ;;  %v12776_v30 = vld [vmem:[%s13945_s28 + $0x1cf0] ss:$8 sps:$4 sm:$0xff]  }
 0x21b   : > { %9691 = vmatprep.mubr.bf16.mxu0 %v14623_v15 }
 0x21c   : > { %8842 = vmatpush1.bf16.msra.mxu1 %v12689_v16  ;;  %v12781_v16 = vld [vmem:[%s13945_s28 + $0x904] ss:$8 sps:$4 sm:$0xff]  }
 0x21d   : > { %9662 = vmatpush1.bf16.msra.mxu0 %v12692_v32  ;;  %8843 = vmatprep.subr.bf16.mxu1 %v12697_v33  ;;  %v12784_v32 = vld [vmem:[%s13945_s28 + $0x1d04] ss:$8 sps:$4 sm:$0xff]   ;;  %v14689_v33 = vrot.slane %v14594_v60, %v13995_v50  ;;  %v1686_v60 = vcombine.high %v14620_v31, %v14620_v31 }
 0x21e   : > { %9663 = vmatprep.subr.bf16.mxu0 %v12700_v34  ;;  %v14693_v34 = vrot.slane %v14597_v14, %v13995_v50  ;;  %v12785_v14 = vld [vmem:[%s13945_s28 + $0x910] ss:$8 sps:$4 sm:$0xff]   ;;  %v12793_v31 = vld [vmem:[%s13945_s28 + $0x924] ss:$8 sps:$4 sm:$0xff]  }
 0x220   : > { %8844 = vmatpush1.bf16.msra.mxu1 %v12695_v35  ;;  %v12779_v35 = vld [vmem:[%s13945_s28 + $0x900] ss:$8 sps:$4 sm:$0xff]  }
 0x221   : > { %9664 = vmatpush1.bf16.msra.mxu0 %v12698_v36  ;;  %8845 = vmatprep.subr.bf16.mxu1 %v12703_v18  ;;  %v12782_v36 = vld [vmem:[%s13945_s28 + $0x1d00] ss:$8 sps:$4 sm:$0xff]   ;;  %v12787_v18 = vld [vmem:[%s13945_s28 + $0x914] ss:$8 sps:$4 sm:$0xff]  }
 0x222   : > { %9665 = vmatprep.subr.bf16.mxu0 %v12706_v38  ;;  %v12790_v38 = vld [vmem:[%s13945_s28 + $0x1d14] ss:$8 sps:$4 sm:$0xff]  }
 0x224   : > { %8846 = vmatpush1.bf16.msra.mxu1 %v12701_v43  ;;  %v1931_v43 = vcombine.high %v14623_v15, %v14623_v15  ;;  %v12791_v15 = vld [vmem:[%s13945_s28 + $0x920] ss:$8 sps:$4 sm:$0xff]  }
 0x225   : > { %9666 = vmatpush1.bf16.msra.mxu0 %v12704_v45  ;;  %8847 = vmatprep.subr.bf16.mxu1 %v12709_v25  ;;  %v12788_v45 = vld [vmem:[%s13945_s28 + $0x1d10] ss:$8 sps:$4 sm:$0xff]   ;;  %v12796_v25 = vld [vmem:[%s13945_s28 + $0x1d24] ss:$8 sps:$4 sm:$0xff]  }
 0x226   : > { %9667 = vmatprep.subr.bf16.mxu0 %v12712_v46  ;;  %v12794_v46 = vld [vmem:[%s13945_s28 + $0x1d20] ss:$8 sps:$4 sm:$0xff]  }
 0x228   : > { %8848 = vmatpush1.bf16.msra.mxu1 %v12707_v26  ;;  %v12799_v26 = vld [vmem:[%s13945_s28 + $0x934] ss:$8 sps:$4 sm:$0xff]  }
 0x229   : > { %9668 = vmatpush1.bf16.msra.mxu0 %v12710_v47  ;;  %8849 = vmatprep.subr.bf16.mxu1 %v12715_v37  ;;  %v12802_v47 = vld [vmem:[%s13945_s28 + $0x1d34] ss:$8 sps:$4 sm:$0xff]   ;;  %v12797_v37 = vld [vmem:[%s13945_s28 + $0x930] ss:$8 sps:$4 sm:$0xff]  }
 0x22a   : > { %9669 = vmatprep.subr.bf16.mxu0 %v12718_v48  ;;  %v12800_v48 = vld [vmem:[%s13945_s28 + $0x1d30] ss:$8 sps:$4 sm:$0xff]  }
 0x22c   : > { %8850 = vmatpush1.bf16.msra.mxu1 %v12713_v17  ;;  %v12805_v17 = vld [vmem:[%s13945_s28 + $0x944] ss:$8 sps:$4 sm:$0xff]  }
 0x22d   : > { %9670 = vmatpush1.bf16.msra.mxu0 %v12716_v49  ;;  %8851 = vmatprep.subr.bf16.mxu1 %v12721_v51  ;;  %v12808_v49 = vld [vmem:[%s13945_s28 + $0x1d44] ss:$8 sps:$4 sm:$0xff]   ;;  %v12803_v51 = vld [vmem:[%s13945_s28 + $0x940] ss:$8 sps:$4 sm:$0xff]  }
 0x22e   : > { %9671 = vmatprep.subr.bf16.mxu0 %v12724_v52  ;;  %v12806_v52 = vld [vmem:[%s13945_s28 + $0x1d40] ss:$8 sps:$4 sm:$0xff]  }
 0x230   : > { %8852 = vmatpush1.bf16.msra.mxu1 %v12719_v54  ;;  %v12811_v54 = vld [vmem:[%s13945_s28 + $0x954] ss:$8 sps:$4 sm:$0xff]  }
 0x231   : > { %9672 = vmatpush1.bf16.msra.mxu0 %v12722_v55  ;;  %8853 = vmatprep.subr.bf16.mxu1 %v12727_v39  ;;  %v12814_v55 = vld [vmem:[%s13945_s28 + $0x1d54] ss:$8 sps:$4 sm:$0xff]   ;;  %v12809_v39 = vld [vmem:[%s13945_s28 + $0x950] ss:$8 sps:$4 sm:$0xff]  }
 0x232   : > { %9673 = vmatprep.subr.bf16.mxu0 %v12730_v40  ;;  %v12812_v40 = vld [vmem:[%s13945_s28 + $0x1d50] ss:$8 sps:$4 sm:$0xff]  }
 0x234   : > { %8854 = vmatpush1.bf16.msra.mxu1 %v12725_v61  ;;  %v12817_v61 = vld [vmem:[%s13945_s28 + $0x964] ss:$8 sps:$4 sm:$0xff]  }
 0x235   : > { %9674 = vmatpush1.bf16.msra.mxu0 %v12728_v62  ;;  %8855 = vmatprep.subr.bf16.mxu1 %v12733_v63  ;;  %v12820_v62 = vld [vmem:[%s13945_s28 + $0x1d64] ss:$8 sps:$4 sm:$0xff]   ;;  %v12815_v63 = vld [vmem:[%s13945_s28 + $0x960] ss:$8 sps:$4 sm:$0xff]  }
 0x236   : > { %9675 = vmatprep.subr.bf16.mxu0 %v12736_v0  ;;  %v12818_v0 = vld [vmem:[%s13945_s28 + $0x1d60] ss:$8 sps:$4 sm:$0xff]  }
 0x238   : > { %8856 = vmatpush1.bf16.msra.mxu1 %v12731_v41  ;;  %v12823_v41 = vld [vmem:[%s13945_s28 + $0x974] ss:$8 sps:$4 sm:$0xff]  }
 0x239   : > { %9676 = vmatpush1.bf16.msra.mxu0 %v12734_v1  ;;  %8857 = vmatprep.subr.bf16.mxu1 %v12739_v56  ;;  %v12826_v1 = vld [vmem:[%s13945_s28 + $0x1d74] ss:$8 sps:$4 sm:$0xff]   ;;  %v12821_v56 = vld [vmem:[%s13945_s28 + $0x970] ss:$8 sps:$4 sm:$0xff]  }
 0x23a   : > { %9677 = vmatprep.subr.bf16.mxu0 %v12742_v3  ;;  %v12824_v3 = vld [vmem:[%s13945_s28 + $0x1d70] ss:$8 sps:$4 sm:$0xff]  }
 0x23c   : > { %8858 = vmatpush1.bf16.msra.mxu1 %v12737_v58  ;;  %v12829_v58 = vld [vmem:[%s13945_s28 + $0x984] ss:$8 sps:$4 sm:$0xff]  }
 0x23d   : > { %9678 = vmatpush1.bf16.msra.mxu0 %v12740_v4  ;;  %8859 = vmatprep.subr.bf16.mxu1 %v12745_v5  ;;  %v12832_v4 = vld [vmem:[%s13945_s28 + $0x1d84] ss:$8 sps:$4 sm:$0xff]   ;;  %v12827_v5 = vld [vmem:[%s13945_s28 + $0x980] ss:$8 sps:$4 sm:$0xff]  }
 0x23e   : > { %9679 = vmatprep.subr.bf16.mxu0 %v12748_v6  ;;  %v12830_v6 = vld [vmem:[%s13945_s28 + $0x1d80] ss:$8 sps:$4 sm:$0xff]  }
 0x240   : > { %8860 = vmatpush1.bf16.msra.mxu1 %v12743_v7  ;;  %v12835_v7 = vld [vmem:[%s13945_s28 + $0x994] ss:$8 sps:$4 sm:$0xff]  }
 0x241   : > { %9680 = vmatpush1.bf16.msra.mxu0 %v12746_v8  ;;  %8861 = vmatprep.subr.bf16.mxu1 %v12751_v9  ;;  %v12838_v8 = vld [vmem:[%s13945_s28 + $0x1d94] ss:$8 sps:$4 sm:$0xff]   ;;  %v12833_v9 = vld [vmem:[%s13945_s28 + $0x990] ss:$8 sps:$4 sm:$0xff]  }
 0x242   : > { %9681 = vmatprep.subr.bf16.mxu0 %v12754_v10  ;;  %v12836_v10 = vld [vmem:[%s13945_s28 + $0x1d90] ss:$8 sps:$4 sm:$0xff]  }
 0x244   : > { %8862 = vmatpush1.bf16.msra.mxu1 %v12749_v11  ;;  %v12841_v11 = vld [vmem:[%s13945_s28 + $0x9a4] ss:$8 sps:$4 sm:$0xff]  }
 0x245   : > { %9682 = vmatpush1.bf16.msra.mxu0 %v12752_v12  ;;  %8863 = vmatprep.subr.bf16.mxu1 %v12757_v19  ;;  %v12844_v12 = vld [vmem:[%s13945_s28 + $0x1da4] ss:$8 sps:$4 sm:$0xff]   ;;  %v12839_v19 = vld [vmem:[%s13945_s28 + $0x9a0] ss:$8 sps:$4 sm:$0xff]  }
 0x246   : > { %9683 = vmatprep.subr.bf16.mxu0 %v12760_v20  ;;  %v12842_v20 = vld [vmem:[%s13945_s28 + $0x1da0] ss:$8 sps:$4 sm:$0xff]  }
 0x248   : > { %8864 = vmatpush1.bf16.msra.mxu1 %v12755_v21  ;;  %v12847_v21 = vld [vmem:[%s13945_s28 + $0x9b4] ss:$8 sps:$4 sm:$0xff]  }
 0x249   : > { %9684 = vmatpush1.bf16.msra.mxu0 %v12758_v22  ;;  %8865 = vmatprep.subr.bf16.mxu1 %v12763_v42  ;;  %v12850_v22 = vld [vmem:[%s13945_s28 + $0x1db4] ss:$8 sps:$4 sm:$0xff]   ;;  %v12845_v42 = vld [vmem:[%s13945_s28 + $0x9b0] ss:$8 sps:$4 sm:$0xff]  }
 0x24a   : > { %9685 = vmatprep.subr.bf16.mxu0 %v12766_v23  ;;  %v12848_v23 = vld [vmem:[%s13945_s28 + $0x1db0] ss:$8 sps:$4 sm:$0xff]  }
 0x24c   : > { %8866 = vmatpush1.bf16.msra.mxu1 %v12761_v2  ;;  %v12853_v2 = vld [vmem:[%s13945_s28 + $0x9c4] ss:$8 sps:$4 sm:$0xff]  }
 0x24d   : > { %9686 = vmatpush1.bf16.msra.mxu0 %v12764_v24  ;;  %8867 = vmatprep.subr.bf16.mxu1 %v12769_v13  ;;  %v12856_v24 = vld [vmem:[%s13945_s28 + $0x1dc4] ss:$8 sps:$4 sm:$0xff]   ;;  %v12851_v13 = vld [vmem:[%s13945_s28 + $0x9c0] ss:$8 sps:$4 sm:$0xff]  }
 0x24e   : > { %9687 = vmatprep.subr.bf16.mxu0 %v12772_v53  ;;  %v12854_v53 = vld [vmem:[%s13945_s28 + $0x1dc0] ss:$8 sps:$4 sm:$0xff]  }
 0x250   : > { %8868 = vmatpush1.bf16.msra.mxu1 %v12767_v59  ;;  %v12859_v59 = vld [vmem:[%s13945_s28 + $0x9d4] ss:$8 sps:$4 sm:$0xff]  }
 0x251   : > { %9688 = vmatpush1.bf16.msra.mxu0 %v12770_v57  ;;  %8869 = vmatprep.subr.bf16.mxu1 %v12775_v27  ;;  %v12862_v57 = vld [vmem:[%s13945_s28 + $0x1dd4] ss:$8 sps:$4 sm:$0xff]   ;;  %v12857_v27 = vld [vmem:[%s13945_s28 + $0x9d0] ss:$8 sps:$4 sm:$0xff]  }
 0x252   : > { %9689 = vmatprep.subr.bf16.mxu0 %v12778_v28  ;;  %v12860_v28 = vld [vmem:[%s13945_s28 + $0x1dd0] ss:$8 sps:$4 sm:$0xff]  }
 0x254   : > { %8870 = vmatpush1.bf16.msra.mxu1 %v12773_v29  ;;  %v12865_v29 = vld [vmem:[%s13945_s28 + $0x9e4] ss:$8 sps:$4 sm:$0xff]  }
 0x255   : > { %9690 = vmatpush1.bf16.msra.mxu0 %v12776_v30  ;;  %8880 = vmatprep.subr.bf16.mxu1 %v12781_v16  ;;  %v12868_v30 = vld [vmem:[%s13945_s28 + $0x1de4] ss:$8 sps:$4 sm:$0xff]   ;;  %v13843_v16 = vld [vmem:[%s13940_s24 + $0x10] sm:$0xff] }
 0x256   : > { %9700 = vmatprep.subr.bf16.mxu0 %v12784_v32  ;;  %v1639_v32 = vcombine.high %v13843_v16, %v13843_v16  ;;  %v12943_v16 = vld [vmem:[%s13945_s28 + $0xab4] ss:$8 sps:$4 sm:$0xff]  }
 0x257   : > { %8872 = vmatmul.mubr.bf16.vlgmr.msra.gmra.mrb[0].mxu1 %v14689_v33 }
 0x258   : > { %9692 = vmatmul.mubr.bf16.vlgmr.msra.gmra.mrb[0].mxu0 %v14693_v34  ;;  %8881 = vmatpush1.bf16.msra.mxu1 %v12779_v35  ;;  %v13844_v35 = vld [vmem:[%s13940_s24 + $0x38] sm:$0xff] }
 0x259   : > { %9701 = vmatpush1.bf16.msra.mxu0 %v12782_v36  ;;  %8882 = vmatprep.subr.bf16.mxu1 %v12787_v18  ;;  %v1884_v36 = vcombine.high %v13844_v35, %v13844_v35  ;;  %v12863_v18 = vld [vmem:[%s13945_s28 + $0x9e0] ss:$8 sps:$4 sm:$0xff]   ;;  %v12941_v35 = vld [vmem:[%s13945_s28 + $0xab0] ss:$8 sps:$4 sm:$0xff]  }
 0x25a   : > { %9702 = vmatprep.subr.bf16.mxu0 %v12790_v38  ;;  %8912 = vmatprep.mubr.bf16.mxu1 %v1686_v60  ;;  %v12866_v38 = vld [vmem:[%s13945_s28 + $0x1de0] ss:$8 sps:$4 sm:$0xff]   ;;  %v12871_v60 = vld [vmem:[%s13945_s28 + $0x9f4] ss:$8 sps:$4 sm:$0xff]  }
 0x25b   : > { %9732 = vmatprep.mubr.bf16.mxu0 %v1931_v43  ;;  %v12874_v43 = vld [vmem:[%s13945_s28 + $0x1df4] ss:$8 sps:$4 sm:$0xff]  }
 0x25c   : > { %8883 = vmatpush1.bf16.msra.mxu1 %v12785_v14  ;;  %v14764_v14 = vrot.slane %v1639_v32, %v13995_v50  ;;  %v12946_v32 = vld [vmem:[%s13945_s28 + $0x1eb4] ss:$8 sps:$4 sm:$0xff]  }
 0x25d   : > { %9703 = vmatpush1.bf16.msra.mxu0 %v12788_v45  ;;  %8884 = vmatprep.subr.bf16.mxu1 %v12793_v31  ;;  %v14767_v45 = vrot.slane %v1884_v36, %v13995_v50  ;;  %v12869_v31 = vld [vmem:[%s13945_s28 + $0x9f0] ss:$8 sps:$4 sm:$0xff]  }
 0x25e   : > { %9704 = vmatprep.subr.bf16.mxu0 %v12796_v25  ;;  %v12872_v25 = vld [vmem:[%s13945_s28 + $0x1df0] ss:$8 sps:$4 sm:$0xff]  }
 0x25f   : > { %v12944_v36 = vld [vmem:[%s13945_s28 + $0x1eb0] ss:$8 sps:$4 sm:$0xff]  }
 0x260   : > { %8885 = vmatpush1.bf16.msra.mxu1 %v12791_v15  ;;  %v12877_v15 = vld [vmem:[%s13945_s28 + $0xa04] ss:$8 sps:$4 sm:$0xff]  }
 0x261   : > { %9705 = vmatpush1.bf16.msra.mxu0 %v12794_v46  ;;  %8886 = vmatprep.subr.bf16.mxu1 %v12799_v26  ;;  %v12880_v46 = vld [vmem:[%s13945_s28 + $0x1e04] ss:$8 sps:$4 sm:$0xff]   ;;  %v1655_v26 = vcombine.high %v14764_v14, %v14764_v14 }
 0x262   : > { %9706 = vmatprep.subr.bf16.mxu0 %v12802_v47  ;;  %v1900_v47 = vcombine.high %v14767_v45, %v14767_v45 }
 0x264   : > { %8887 = vmatpush1.bf16.msra.mxu1 %v12797_v37  ;;  %v1684_v37 = vcombine.high %v14689_v33, %v14689_v33  ;;  %v14789_v33 = vrot.slane %v1900_v47, %v13995_v50  ;;  %v12964_v47 = vld [vmem:[%s13945_s28 + $0x1ee4] ss:$8 sps:$4 sm:$0xff]  }
 0x265   : > { %9707 = vmatpush1.bf16.msra.mxu0 %v12800_v48  ;;  %8888 = vmatprep.subr.bf16.mxu1 %v12805_v17  ;;  %v1929_v48 = vcombine.high %v14693_v34, %v14693_v34  ;;  %v12875_v17 = vld [vmem:[%s13945_s28 + $0xa00] ss:$8 sps:$4 sm:$0xff]   ;;  %v12881_v34 = vld [vmem:[%s13945_s28 + $0xa10] ss:$8 sps:$4 sm:$0xff]  }
 0x266   : > { %9708 = vmatprep.subr.bf16.mxu0 %v12808_v49  ;;  %v12878_v49 = vld [vmem:[%s13945_s28 + $0x1e00] ss:$8 sps:$4 sm:$0xff]  }
 0x268   : > { %8889 = vmatpush1.bf16.msra.mxu1 %v12803_v51  ;;  %v12883_v51 = vld [vmem:[%s13945_s28 + $0xa14] ss:$8 sps:$4 sm:$0xff]  }
 0x269   : > { %9709 = vmatpush1.bf16.msra.mxu0 %v12806_v52  ;;  %8890 = vmatprep.subr.bf16.mxu1 %v12811_v54  ;;  %v12886_v52 = vld [vmem:[%s13945_s28 + $0x1e14] ss:$8 sps:$4 sm:$0xff]   ;;  %v14786_v54 = vrot.slane %v1655_v26, %v13995_v50  ;;  %v12961_v26 = vld [vmem:[%s13945_s28 + $0xae4] ss:$8 sps:$4 sm:$0xff]  }
 0x26a   : > { %9710 = vmatprep.subr.bf16.mxu0 %v12814_v55  ;;  %v12884_v55 = vld [vmem:[%s13945_s28 + $0x1e10] ss:$8 sps:$4 sm:$0xff]  }
 0x26c   : > { %8891 = vmatpush1.bf16.msra.mxu1 %v12809_v39  ;;  %v12889_v39 = vld [vmem:[%s13945_s28 + $0xa24] ss:$8 sps:$4 sm:$0xff]  }
 0x26d   : > { %9711 = vmatpush1.bf16.msra.mxu0 %v12812_v40  ;;  %8892 = vmatprep.subr.bf16.mxu1 %v12817_v61  ;;  %v12892_v40 = vld [vmem:[%s13945_s28 + $0x1e24] ss:$8 sps:$4 sm:$0xff]   ;;  %v12887_v61 = vld [vmem:[%s13945_s28 + $0xa20] ss:$8 sps:$4 sm:$0xff]  }
 0x26e   : > { %9712 = vmatprep.subr.bf16.mxu0 %v12820_v62  ;;  %v12890_v62 = vld [vmem:[%s13945_s28 + $0x1e20] ss:$8 sps:$4 sm:$0xff]  }
 0x270   : > { %8893 = vmatpush1.bf16.msra.mxu1 %v12815_v63  ;;  %v12895_v63 = vld [vmem:[%s13945_s28 + $0xa34] ss:$8 sps:$4 sm:$0xff]  }
 0x271   : > { %9713 = vmatpush1.bf16.msra.mxu0 %v12818_v0  ;;  %8894 = vmatprep.subr.bf16.mxu1 %v12823_v41  ;;  %v12898_v0 = vld [vmem:[%s13945_s28 + $0x1e34] ss:$8 sps:$4 sm:$0xff]   ;;  %v12893_v41 = vld [vmem:[%s13945_s28 + $0xa30] ss:$8 sps:$4 sm:$0xff]  }
 0x272   : > { %9714 = vmatprep.subr.bf16.mxu0 %v12826_v1  ;;  %v12896_v1 = vld [vmem:[%s13945_s28 + $0x1e30] ss:$8 sps:$4 sm:$0xff]  }
 0x274   : > { %8895 = vmatpush1.bf16.msra.mxu1 %v12821_v56  ;;  %v12901_v56 = vld [vmem:[%s13945_s28 + $0xa44] ss:$8 sps:$4 sm:$0xff]  }
 0x275   : > { %9715 = vmatpush1.bf16.msra.mxu0 %v12824_v3  ;;  %8896 = vmatprep.subr.bf16.mxu1 %v12829_v58  ;;  %v12904_v3 = vld [vmem:[%s13945_s28 + $0x1e44] ss:$8 sps:$4 sm:$0xff]   ;;  %v12899_v58 = vld [vmem:[%s13945_s28 + $0xa40] ss:$8 sps:$4 sm:$0xff]  }
 0x276   : > { %9716 = vmatprep.subr.bf16.mxu0 %v12832_v4  ;;  %v12902_v4 = vld [vmem:[%s13945_s28 + $0x1e40] ss:$8 sps:$4 sm:$0xff]  }
 0x278   : > { %8897 = vmatpush1.bf16.msra.mxu1 %v12827_v5  ;;  %v12907_v5 = vld [vmem:[%s13945_s28 + $0xa54] ss:$8 sps:$4 sm:$0xff]  }
 0x279   : > { %9717 = vmatpush1.bf16.msra.mxu0 %v12830_v6  ;;  %8898 = vmatprep.subr.bf16.mxu1 %v12835_v7  ;;  %v12910_v6 = vld [vmem:[%s13945_s28 + $0x1e54] ss:$8 sps:$4 sm:$0xff]   ;;  %v12905_v7 = vld [vmem:[%s13945_s28 + $0xa50] ss:$8 sps:$4 sm:$0xff]  }
 0x27a   : > { %9718 = vmatprep.subr.bf16.mxu0 %v12838_v8  ;;  %v12908_v8 = vld [vmem:[%s13945_s28 + $0x1e50] ss:$8 sps:$4 sm:$0xff]  }
 0x27c   : > { %8899 = vmatpush1.bf16.msra.mxu1 %v12833_v9  ;;  %v12913_v9 = vld [vmem:[%s13945_s28 + $0xa64] ss:$8 sps:$4 sm:$0xff]  }
 0x27d   : > { %9719 = vmatpush1.bf16.msra.mxu0 %v12836_v10  ;;  %8900 = vmatprep.subr.bf16.mxu1 %v12841_v11  ;;  %v12916_v10 = vld [vmem:[%s13945_s28 + $0x1e64] ss:$8 sps:$4 sm:$0xff]   ;;  %v12911_v11 = vld [vmem:[%s13945_s28 + $0xa60] ss:$8 sps:$4 sm:$0xff]  }
 0x27e   : > { %9720 = vmatprep.subr.bf16.mxu0 %v12844_v12  ;;  %v12914_v12 = vld [vmem:[%s13945_s28 + $0x1e60] ss:$8 sps:$4 sm:$0xff]  }
 0x280   : > { %8901 = vmatpush1.bf16.msra.mxu1 %v12839_v19  ;;  %v12919_v19 = vld [vmem:[%s13945_s28 + $0xa74] ss:$8 sps:$4 sm:$0xff]  }
 0x281   : > { %9721 = vmatpush1.bf16.msra.mxu0 %v12842_v20  ;;  %8902 = vmatprep.subr.bf16.mxu1 %v12847_v21  ;;  %v12922_v20 = vld [vmem:[%s13945_s28 + $0x1e74] ss:$8 sps:$4 sm:$0xff]   ;;  %v12917_v21 = vld [vmem:[%s13945_s28 + $0xa70] ss:$8 sps:$4 sm:$0xff]  }
 0x282   : > { %9722 = vmatprep.subr.bf16.mxu0 %v12850_v22  ;;  %v12920_v22 = vld [vmem:[%s13945_s28 + $0x1e70] ss:$8 sps:$4 sm:$0xff]  }
 0x284   : > { %8903 = vmatpush1.bf16.msra.mxu1 %v12845_v42  ;;  %v12925_v42 = vld [vmem:[%s13945_s28 + $0xa84] ss:$8 sps:$4 sm:$0xff]  }
 0x285   : > { %9723 = vmatpush1.bf16.msra.mxu0 %v12848_v23  ;;  %8904 = vmatprep.subr.bf16.mxu1 %v12853_v2  ;;  %v12928_v23 = vld [vmem:[%s13945_s28 + $0x1e84] ss:$8 sps:$4 sm:$0xff]   ;;  %v12923_v2 = vld [vmem:[%s13945_s28 + $0xa80] ss:$8 sps:$4 sm:$0xff]  }
 0x286   : > { %9724 = vmatprep.subr.bf16.mxu0 %v12856_v24  ;;  %v12926_v24 = vld [vmem:[%s13945_s28 + $0x1e80] ss:$8 sps:$4 sm:$0xff]  }
 0x288   : > { %8905 = vmatpush1.bf16.msra.mxu1 %v12851_v13  ;;  %v12931_v13 = vld [vmem:[%s13945_s28 + $0xa94] ss:$8 sps:$4 sm:$0xff]  }
 0x289   : > { %9725 = vmatpush1.bf16.msra.mxu0 %v12854_v53  ;;  %8906 = vmatprep.subr.bf16.mxu1 %v12859_v59  ;;  %v12934_v53 = vld [vmem:[%s13945_s28 + $0x1e94] ss:$8 sps:$4 sm:$0xff]   ;;  %v12929_v59 = vld [vmem:[%s13945_s28 + $0xa90] ss:$8 sps:$4 sm:$0xff]  }
 0x28a   : > { %9726 = vmatprep.subr.bf16.mxu0 %v12862_v57  ;;  %v12932_v57 = vld [vmem:[%s13945_s28 + $0x1e90] ss:$8 sps:$4 sm:$0xff]  }
 0x28c   : > { %8907 = vmatpush1.bf16.msra.mxu1 %v12857_v27  ;;  %v12937_v27 = vld [vmem:[%s13945_s28 + $0xaa4] ss:$8 sps:$4 sm:$0xff]  }
 0x28d   : > { %9727 = vmatpush1.bf16.msra.mxu0 %v12860_v28  ;;  %8908 = vmatprep.subr.bf16.mxu1 %v12865_v29  ;;  %v12940_v28 = vld [vmem:[%s13945_s28 + $0x1ea4] ss:$8 sps:$4 sm:$0xff]   ;;  %v12935_v29 = vld [vmem:[%s13945_s28 + $0xaa0] ss:$8 sps:$4 sm:$0xff]  }
 0x28e   : > { %9728 = vmatprep.subr.bf16.mxu0 %v12868_v30  ;;  %v12938_v30 = vld [vmem:[%s13945_s28 + $0x1ea0] ss:$8 sps:$4 sm:$0xff]  }
 0x290   : > { %8909 = vmatpush1.bf16.msra.mxu1 %v12863_v18  ;;  %v12949_v18 = vld [vmem:[%s13945_s28 + $0xac4] ss:$8 sps:$4 sm:$0xff]  }
 0x291   : > { %9729 = vmatpush1.bf16.msra.mxu0 %v12866_v38  ;;  %8910 = vmatprep.subr.bf16.mxu1 %v12871_v60  ;;  %v12952_v38 = vld [vmem:[%s13945_s28 + $0x1ec4] ss:$8 sps:$4 sm:$0xff]   ;;  %v12947_v60 = vld [vmem:[%s13945_s28 + $0xac0] ss:$8 sps:$4 sm:$0xff]  }
 0x292   : > { %9730 = vmatprep.subr.bf16.mxu0 %v12874_v43  ;;  %v12950_v43 = vld [vmem:[%s13945_s28 + $0x1ec0] ss:$8 sps:$4 sm:$0xff]  }
 0x294   : > { %8911 = vmatpush1.bf16.msra.mxu1 %v12869_v31  ;;  %v12955_v31 = vld [vmem:[%s13945_s28 + $0xad4] ss:$8 sps:$4 sm:$0xff]  }
 0x295   : > { %9731 = vmatpush1.bf16.msra.mxu0 %v12872_v25  ;;  %8921 = vmatprep.subr.bf16.mxu1 %v12877_v15  ;;  %v12958_v25 = vld [vmem:[%s13945_s28 + $0x1ed4] ss:$8 sps:$4 sm:$0xff]   ;;  %v12953_v15 = vld [vmem:[%s13945_s28 + $0xad0] ss:$8 sps:$4 sm:$0xff]  }
 0x296   : > { %9741 = vmatprep.subr.bf16.mxu0 %v12880_v46  ;;  %v12956_v46 = vld [vmem:[%s13945_s28 + $0x1ed0] ss:$8 sps:$4 sm:$0xff]  }
 0x297   : > { %8913 = vmatmul.mubr.bf16.vlgmr.msra.gmra.mrb[0].mxu1 %v1684_v37  ;;  %v12959_v37 = vld [vmem:[%s13945_s28 + $0xae0] ss:$8 sps:$4 sm:$0xff]  }
 0x298   : > { %9733 = vmatmul.mubr.bf16.vlgmr.msra.gmra.mrb[0].mxu0 %v1929_v48  ;;  %8922 = vmatpush1.bf16.msra.mxu1 %v12875_v17  ;;  %v12962_v48 = vld [vmem:[%s13945_s28 + $0x1ee0] ss:$8 sps:$4 sm:$0xff]   ;;  %v12967_v17 = vld [vmem:[%s13945_s28 + $0xaf4] ss:$8 sps:$4 sm:$0xff]  }
 0x299   : > { %9742 = vmatpush1.bf16.msra.mxu0 %v12878_v49  ;;  %8923 = vmatprep.subr.bf16.mxu1 %v12883_v51  ;;  %v12970_v49 = vld [vmem:[%s13945_s28 + $0x1ef4] ss:$8 sps:$4 sm:$0xff]   ;;  %v12965_v51 = vld [vmem:[%s13945_s28 + $0xaf0] ss:$8 sps:$4 sm:$0xff]  }
 0x29a   : > { %9743 = vmatprep.subr.bf16.mxu0 %v12886_v52  ;;  %8953 = vmatprep.mubr.bf16.mxu1 %v14786_v54  ;;  %v12968_v52 = vld [vmem:[%s13945_s28 + $0x1ef0] ss:$8 sps:$4 sm:$0xff]  }
 0x29b   : > { %9773 = vmatprep.mubr.bf16.mxu0 %v14789_v33 }
 0x29c   : > { %8924 = vmatpush1.bf16.msra.mxu1 %v12881_v34  ;;  %v12974_v34 = vld [vmem:[%s13945_s28 + $0xb04] ss:$8 sps:$4 sm:$0xff]  }
 0x29d   : > { %9744 = vmatpush1.bf16.msra.mxu0 %v12884_v55  ;;  %8925 = vmatprep.subr.bf16.mxu1 %v12889_v39  ;;  %v12978_v55 = vld [vmem:[%s13945_s28 + $0x1f04] ss:$8 sps:$4 sm:$0xff]   ;;  %v14855_v39 = vrot.slane %v14764_v14, %v13995_v50  ;;  %v1687_v14 = vcombine.high %v14786_v54, %v14786_v54 }
 0x29e   : > { %9745 = vmatprep.subr.bf16.mxu0 %v12892_v40  ;;  %v14859_v40 = vrot.slane %v14767_v45, %v13995_v50  ;;  %v12979_v45 = vld [vmem:[%s13945_s28 + $0xb10] ss:$8 sps:$4 sm:$0xff]   ;;  %v12987_v54 = vld [vmem:[%s13945_s28 + $0xb24] ss:$8 sps:$4 sm:$0xff]  }
 0x2a0   : > { %8926 = vmatpush1.bf16.msra.mxu1 %v12887_v61  ;;  %v12972_v61 = vld [vmem:[%s13945_s28 + $0xb00] ss:$8 sps:$4 sm:$0xff]  }
 0x2a1   : > { %9746 = vmatpush1.bf16.msra.mxu0 %v12890_v62  ;;  %8927 = vmatprep.subr.bf16.mxu1 %v12895_v63  ;;  %v12976_v62 = vld [vmem:[%s13945_s28 + $0x1f00] ss:$8 sps:$4 sm:$0xff]   ;;  %v12981_v63 = vld [vmem:[%s13945_s28 + $0xb14] ss:$8 sps:$4 sm:$0xff]  }
 0x2a2   : > { %9747 = vmatprep.subr.bf16.mxu0 %v12898_v0  ;;  %v12984_v0 = vld [vmem:[%s13945_s28 + $0x1f14] ss:$8 sps:$4 sm:$0xff]  }
 0x2a4   : > { %8928 = vmatpush1.bf16.msra.mxu1 %v12893_v41  ;;  %v1932_v41 = vcombine.high %v14789_v33, %v14789_v33  ;;  %v12985_v33 = vld [vmem:[%s13945_s28 + $0xb20] ss:$8 sps:$4 sm:$0xff]  }
 0x2a5   : > { %9748 = vmatpush1.bf16.msra.mxu0 %v12896_v1  ;;  %8929 = vmatprep.subr.bf16.mxu1 %v12901_v56  ;;  %v12982_v1 = vld [vmem:[%s13945_s28 + $0x1f10] ss:$8 sps:$4 sm:$0xff]   ;;  %v12990_v56 = vld [vmem:[%s13945_s28 + $0x1f24] ss:$8 sps:$4 sm:$0xff]  }
 0x2a6   : > { %9749 = vmatprep.subr.bf16.mxu0 %v12904_v3  ;;  %v12988_v3 = vld [vmem:[%s13945_s28 + $0x1f20] ss:$8 sps:$4 sm:$0xff]  }
 0x2a8   : > { %8930 = vmatpush1.bf16.msra.mxu1 %v12899_v58  ;;  %v12993_v58 = vld [vmem:[%s13945_s28 + $0xb34] ss:$8 sps:$4 sm:$0xff]  }
 0x2a9   : > { %9750 = vmatpush1.bf16.msra.mxu0 %v12902_v4  ;;  %8931 = vmatprep.subr.bf16.mxu1 %v12907_v5  ;;  %v12996_v4 = vld [vmem:[%s13945_s28 + $0x1f34] ss:$8 sps:$4 sm:$0xff]   ;;  %v12991_v5 = vld [vmem:[%s13945_s28 + $0xb30] ss:$8 sps:$4 sm:$0xff]  }
 0x2aa   : > { %9751 = vmatprep.subr.bf16.mxu0 %v12910_v6  ;;  %v12994_v6 = vld [vmem:[%s13945_s28 + $0x1f30] ss:$8 sps:$4 sm:$0xff]  }
 0x2ac   : > { %8932 = vmatpush1.bf16.msra.mxu1 %v12905_v7  ;;  %v12999_v7 = vld [vmem:[%s13945_s28 + $0xb44] ss:$8 sps:$4 sm:$0xff]  }
 0x2ad   : > { %9752 = vmatpush1.bf16.msra.mxu0 %v12908_v8  ;;  %8933 = vmatprep.subr.bf16.mxu1 %v12913_v9  ;;  %v13002_v8 = vld [vmem:[%s13945_s28 + $0x1f44] ss:$8 sps:$4 sm:$0xff]   ;;  %v12997_v9 = vld [vmem:[%s13945_s28 + $0xb40] ss:$8 sps:$4 sm:$0xff]  }
 0x2ae   : > { %9753 = vmatprep.subr.bf16.mxu0 %v12916_v10  ;;  %v13000_v10 = vld [vmem:[%s13945_s28 + $0x1f40] ss:$8 sps:$4 sm:$0xff]  }
 0x2b0   : > { %8934 = vmatpush1.bf16.msra.mxu1 %v12911_v11  ;;  %v13005_v11 = vld [vmem:[%s13945_s28 + $0xb54] ss:$8 sps:$4 sm:$0xff]  }
 0x2b1   : > { %9754 = vmatpush1.bf16.msra.mxu0 %v12914_v12  ;;  %8935 = vmatprep.subr.bf16.mxu1 %v12919_v19  ;;  %v13008_v12 = vld [vmem:[%s13945_s28 + $0x1f54] ss:$8 sps:$4 sm:$0xff]   ;;  %v13003_v19 = vld [vmem:[%s13945_s28 + $0xb50] ss:$8 sps:$4 sm:$0xff]  }
 0x2b2   : > { %9755 = vmatprep.subr.bf16.mxu0 %v12922_v20  ;;  %v13006_v20 = vld [vmem:[%s13945_s28 + $0x1f50] ss:$8 sps:$4 sm:$0xff]  }
 0x2b4   : > { %8936 = vmatpush1.bf16.msra.mxu1 %v12917_v21  ;;  %v13011_v21 = vld [vmem:[%s13945_s28 + $0xb64] ss:$8 sps:$4 sm:$0xff]  }
 0x2b5   : > { %9756 = vmatpush1.bf16.msra.mxu0 %v12920_v22  ;;  %8937 = vmatprep.subr.bf16.mxu1 %v12925_v42  ;;  %v13014_v22 = vld [vmem:[%s13945_s28 + $0x1f64] ss:$8 sps:$4 sm:$0xff]   ;;  %v13009_v42 = vld [vmem:[%s13945_s28 + $0xb60] ss:$8 sps:$4 sm:$0xff]  }
 0x2b6   : > { %9757 = vmatprep.subr.bf16.mxu0 %v12928_v23  ;;  %v13012_v23 = vld [vmem:[%s13945_s28 + $0x1f60] ss:$8 sps:$4 sm:$0xff]  }
 0x2b8   : > { %8938 = vmatpush1.bf16.msra.mxu1 %v12923_v2  ;;  %v13017_v2 = vld [vmem:[%s13945_s28 + $0xb74] ss:$8 sps:$4 sm:$0xff]  }
 0x2b9   : > { %9758 = vmatpush1.bf16.msra.mxu0 %v12926_v24  ;;  %8939 = vmatprep.subr.bf16.mxu1 %v12931_v13  ;;  %v13020_v24 = vld [vmem:[%s13945_s28 + $0x1f74] ss:$8 sps:$4 sm:$0xff]   ;;  %v13015_v13 = vld [vmem:[%s13945_s28 + $0xb70] ss:$8 sps:$4 sm:$0xff]  }
 0x2ba   : > { %9759 = vmatprep.subr.bf16.mxu0 %v12934_v53  ;;  %v13018_v53 = vld [vmem:[%s13945_s28 + $0x1f70] ss:$8 sps:$4 sm:$0xff]  }
 0x2bc   : > { %8940 = vmatpush1.bf16.msra.mxu1 %v12929_v59  ;;  %v13023_v59 = vld [vmem:[%s13945_s28 + $0xb84] ss:$8 sps:$4 sm:$0xff]  }
 0x2bd   : > { %9760 = vmatpush1.bf16.msra.mxu0 %v12932_v57  ;;  %8941 = vmatprep.subr.bf16.mxu1 %v12937_v27  ;;  %v13026_v57 = vld [vmem:[%s13945_s28 + $0x1f84] ss:$8 sps:$4 sm:$0xff]   ;;  %v13021_v27 = vld [vmem:[%s13945_s28 + $0xb80] ss:$8 sps:$4 sm:$0xff]  }
 0x2be   : > { %9761 = vmatprep.subr.bf16.mxu0 %v12940_v28  ;;  %v13024_v28 = vld [vmem:[%s13945_s28 + $0x1f80] ss:$8 sps:$4 sm:$0xff]  }
 0x2c0   : > { %8942 = vmatpush1.bf16.msra.mxu1 %v12935_v29  ;;  %v13029_v29 = vld [vmem:[%s13945_s28 + $0xb94] ss:$8 sps:$4 sm:$0xff]  }
 0x2c1   : > { %9762 = vmatpush1.bf16.msra.mxu0 %v12938_v30  ;;  %8943 = vmatprep.subr.bf16.mxu1 %v12943_v16  ;;  %v13032_v30 = vld [vmem:[%s13945_s28 + $0x1f94] ss:$8 sps:$4 sm:$0xff]   ;;  %v13027_v16 = vld [vmem:[%s13945_s28 + $0xb90] ss:$8 sps:$4 sm:$0xff]  }
 0x2c2   : > { %9763 = vmatprep.subr.bf16.mxu0 %v12946_v32  ;;  %v13030_v32 = vld [vmem:[%s13945_s28 + $0x1f90] ss:$8 sps:$4 sm:$0xff]  }
 0x2c4   : > { %8944 = vmatpush1.bf16.msra.mxu1 %v12941_v35  ;;  %v13035_v35 = vld [vmem:[%s13945_s28 + $0xba4] ss:$8 sps:$4 sm:$0xff]  }
 0x2c5   : > { %9764 = vmatpush1.bf16.msra.mxu0 %v12944_v36  ;;  %8945 = vmatprep.subr.bf16.mxu1 %v12949_v18  ;;  %v13038_v36 = vld [vmem:[%s13945_s28 + $0x1fa4] ss:$8 sps:$4 sm:$0xff]   ;;  %v13033_v18 = vld [vmem:[%s13945_s28 + $0xba0] ss:$8 sps:$4 sm:$0xff]  }
 0x2c6   : > { %9765 = vmatprep.subr.bf16.mxu0 %v12952_v38  ;;  %v13036_v38 = vld [vmem:[%s13945_s28 + $0x1fa0] ss:$8 sps:$4 sm:$0xff]  }
 0x2c8   : > { %8946 = vmatpush1.bf16.msra.mxu1 %v12947_v60  ;;  %v13041_v60 = vld [vmem:[%s13945_s28 + $0xbb4] ss:$8 sps:$4 sm:$0xff]  }
 0x2c9   : > { %9766 = vmatpush1.bf16.msra.mxu0 %v12950_v43  ;;  %8947 = vmatprep.subr.bf16.mxu1 %v12955_v31  ;;  %v13044_v43 = vld [vmem:[%s13945_s28 + $0x1fb4] ss:$8 sps:$4 sm:$0xff]   ;;  %v13039_v31 = vld [vmem:[%s13945_s28 + $0xbb0] ss:$8 sps:$4 sm:$0xff]  }
 0x2ca   : > { %9767 = vmatprep.subr.bf16.mxu0 %v12958_v25  ;;  %v13042_v25 = vld [vmem:[%s13945_s28 + $0x1fb0] ss:$8 sps:$4 sm:$0xff]  }
 0x2cc   : > { %8948 = vmatpush1.bf16.msra.mxu1 %v12953_v15  ;;  %v13047_v15 = vld [vmem:[%s13945_s28 + $0xbc4] ss:$8 sps:$4 sm:$0xff]  }
 0x2cd   : > { %9768 = vmatpush1.bf16.msra.mxu0 %v12956_v46  ;;  %8949 = vmatprep.subr.bf16.mxu1 %v12961_v26  ;;  %v13050_v46 = vld [vmem:[%s13945_s28 + $0x1fc4] ss:$8 sps:$4 sm:$0xff]   ;;  %v13045_v26 = vld [vmem:[%s13945_s28 + $0xbc0] ss:$8 sps:$4 sm:$0xff]  }
 0x2ce   : > { %9769 = vmatprep.subr.bf16.mxu0 %v12964_v47  ;;  %v13048_v47 = vld [vmem:[%s13945_s28 + $0x1fc0] ss:$8 sps:$4 sm:$0xff]  }
 0x2d0   : > { %8950 = vmatpush1.bf16.msra.mxu1 %v12959_v37  ;;  %v13053_v37 = vld [vmem:[%s13945_s28 + $0xbd4] ss:$8 sps:$4 sm:$0xff]  }
 0x2d1   : > { %9770 = vmatpush1.bf16.msra.mxu0 %v12962_v48  ;;  %8951 = vmatprep.subr.bf16.mxu1 %v12967_v17  ;;  %v13056_v48 = vld [vmem:[%s13945_s28 + $0x1fd4] ss:$8 sps:$4 sm:$0xff]   ;;  %v13051_v17 = vld [vmem:[%s13945_s28 + $0xbd0] ss:$8 sps:$4 sm:$0xff]  }
 0x2d2   : > { %9771 = vmatprep.subr.bf16.mxu0 %v12970_v49  ;;  %v13054_v49 = vld [vmem:[%s13945_s28 + $0x1fd0] ss:$8 sps:$4 sm:$0xff]  }
 0x2d4   : > { %8952 = vmatpush1.bf16.msra.mxu1 %v12965_v51  ;;  %v13059_v51 = vld [vmem:[%s13945_s28 + $0xbe4] ss:$8 sps:$4 sm:$0xff]  }
 0x2d5   : > { %9772 = vmatpush1.bf16.msra.mxu0 %v12968_v52  ;;  %8962 = vmatprep.subr.bf16.mxu1 %v12974_v34  ;;  %v13062_v52 = vld [vmem:[%s13945_s28 + $0x1fe4] ss:$8 sps:$4 sm:$0xff]   ;;  %v14924_v34 = vld [vmem:[%s13940_s24 + $0x18] sm:$0xff] }
 0x2d6   : > { %9782 = vmatprep.subr.bf16.mxu0 %v12978_v55  ;;  %v14927_v55 = vld [vmem:[%s13940_s24 + $0x40] sm:$0xff] }
 0x2d7   : > { %8954 = vmatmul.mubr.bf16.vlgmr.msra.gmra.mrb[0].mxu1 %v14855_v39 }
 0x2d8   : > { %9774 = vmatmul.mubr.bf16.vlgmr.msra.gmra.mrb[0].mxu0 %v14859_v40  ;;  %8963 = vmatpush1.bf16.msra.mxu1 %v12972_v61  ;;  %v13057_v61 = vld [vmem:[%s13945_s28 + $0xbe0] ss:$8 sps:$4 sm:$0xff]  }
 0x2d9   : > { %9783 = vmatpush1.bf16.msra.mxu0 %v12976_v62  ;;  %8964 = vmatprep.subr.bf16.mxu1 %v12981_v63  ;;  %v13060_v62 = vld [vmem:[%s13945_s28 + $0x1fe0] ss:$8 sps:$4 sm:$0xff]   ;;  %v13065_v63 = vld [vmem:[%s13945_s28 + $0xbf4] ss:$8 sps:$4 sm:$0xff]  }
 0x2da   : > { %9784 = vmatprep.subr.bf16.mxu0 %v12984_v0  ;;  %8994 = vmatprep.mubr.bf16.mxu1 %v1687_v14  ;;  %v13068_v0 = vld [vmem:[%s13945_s28 + $0x1ff4] ss:$8 sps:$4 sm:$0xff]   ;;  %v14935_v14 = vrot.slane %v14924_v34, %v13995_v50 }
 0x2db   : > { %9814 = vmatprep.mubr.bf16.mxu0 %v1932_v41  ;;  %v14939_v41 = vrot.slane %v14927_v55, %v13995_v50 }
 0x2dc   : > { %8965 = vmatpush1.bf16.msra.mxu1 %v12979_v45  ;;  %v13063_v45 = vld [vmem:[%s13945_s28 + $0xbf0] ss:$8 sps:$4 sm:$0xff]  }
 0x2dd   : > { %9785 = vmatpush1.bf16.msra.mxu0 %v12982_v1  ;;  %8966 = vmatprep.subr.bf16.mxu1 %v12987_v54  ;;  %v13066_v1 = vld [vmem:[%s13945_s28 + $0x1ff0] ss:$8 sps:$4 sm:$0xff]   ;;  %v13071_v54 = vld [vmem:[%s13945_s28 + $0xc04] ss:$8 sps:$4 sm:$0xff]  }
 0x2de   : > { %9786 = vmatprep.subr.bf16.mxu0 %v12990_v56  ;;  %v13074_v56 = vld [vmem:[%s13945_s28 + $0x2004] ss:$8 sps:$4 sm:$0xff]  }
 0x2e0   : > { %8967 = vmatpush1.bf16.msra.mxu1 %v12985_v33  ;;  %v1703_v33 = vcombine.high %v14935_v14, %v14935_v14 }
 0x2e1   : > { %9787 = vmatpush1.bf16.msra.mxu0 %v12988_v3  ;;  %8968 = vmatprep.subr.bf16.mxu1 %v12993_v58  ;;  %v1948_v3 = vcombine.high %v14939_v41, %v14939_v41  ;;  %v1685_v58 = vcombine.high %v14855_v39, %v14855_v39 }
 0x2e2   : > { %9788 = vmatprep.subr.bf16.mxu0 %v12996_v4  ;;  %v1930_v4 = vcombine.high %v14859_v40, %v14859_v40  ;;  %v13075_v40 = vld [vmem:[%s13945_s28 + $0xc10] ss:$8 sps:$4 sm:$0xff]  }
 0x2e3   : > { %v14961_v39 = vrot.slane %v1948_v3, %v13995_v50  ;;  %v13150_v3 = vld [vmem:[%s13945_s28 + $0x20d0] ss:$8 sps:$4 sm:$0xff]  }
 0x2e4   : > { %8969 = vmatpush1.bf16.msra.mxu1 %v12991_v5  ;;  %v13069_v5 = vld [vmem:[%s13945_s28 + $0xc00] ss:$8 sps:$4 sm:$0xff]  }
 0x2e5   : > { %9789 = vmatpush1.bf16.msra.mxu0 %v12994_v6  ;;  %8970 = vmatprep.subr.bf16.mxu1 %v12999_v7  ;;  %v13072_v6 = vld [vmem:[%s13945_s28 + $0x2000] ss:$8 sps:$4 sm:$0xff]   ;;  %v13077_v7 = vld [vmem:[%s13945_s28 + $0xc14] ss:$8 sps:$4 sm:$0xff]  }
 0x2e6   : > { %9790 = vmatprep.subr.bf16.mxu0 %v13002_v8  ;;  %v13080_v8 = vld [vmem:[%s13945_s28 + $0x2014] ss:$8 sps:$4 sm:$0xff]  }
 0x2e8   : > { %8971 = vmatpush1.bf16.msra.mxu1 %v12997_v9  ;;  %v14958_v9 = vrot.slane %v1703_v33, %v13995_v50  ;;  %v13147_v33 = vld [vmem:[%s13945_s28 + $0xcd0] ss:$8 sps:$4 sm:$0xff]  }
 0x2e9   : > { %9791 = vmatpush1.bf16.msra.mxu0 %v13000_v10  ;;  %8972 = vmatprep.subr.bf16.mxu1 %v13005_v11  ;;  %v13078_v10 = vld [vmem:[%s13945_s28 + $0x2010] ss:$8 sps:$4 sm:$0xff]   ;;  %v13083_v11 = vld [vmem:[%s13945_s28 + $0xc24] ss:$8 sps:$4 sm:$0xff]  }
 0x2ea   : > { %9792 = vmatprep.subr.bf16.mxu0 %v13008_v12  ;;  %v13086_v12 = vld [vmem:[%s13945_s28 + $0x2024] ss:$8 sps:$4 sm:$0xff]  }
 0x2ec   : > { %8973 = vmatpush1.bf16.msra.mxu1 %v13003_v19  ;;  %v13081_v19 = vld [vmem:[%s13945_s28 + $0xc20] ss:$8 sps:$4 sm:$0xff]  }
 0x2ed   : > { %9793 = vmatpush1.bf16.msra.mxu0 %v13006_v20  ;;  %8974 = vmatprep.subr.bf16.mxu1 %v13011_v21  ;;  %v13084_v20 = vld [vmem:[%s13945_s28 + $0x2020] ss:$8 sps:$4 sm:$0xff]   ;;  %v13089_v21 = vld [vmem:[%s13945_s28 + $0xc34] ss:$8 sps:$4 sm:$0xff]  }
 0x2ee   : > { %9794 = vmatprep.subr.bf16.mxu0 %v13014_v22  ;;  %v13092_v22 = vld [vmem:[%s13945_s28 + $0x2034] ss:$8 sps:$4 sm:$0xff]  }
 0x2f0   : > { %8975 = vmatpush1.bf16.msra.mxu1 %v13009_v42  ;;  %v13087_v42 = vld [vmem:[%s13945_s28 + $0xc30] ss:$8 sps:$4 sm:$0xff]  }
 0x2f1   : > { %9795 = vmatpush1.bf16.msra.mxu0 %v13012_v23  ;;  %8976 = vmatprep.subr.bf16.mxu1 %v13017_v2  ;;  %v13090_v23 = vld [vmem:[%s13945_s28 + $0x2030] ss:$8 sps:$4 sm:$0xff]   ;;  %v13095_v2 = vld [vmem:[%s13945_s28 + $0xc44] ss:$8 sps:$4 sm:$0xff]  }
 0x2f2   : > { %9796 = vmatprep.subr.bf16.mxu0 %v13020_v24  ;;  %v13098_v24 = vld [vmem:[%s13945_s28 + $0x2044] ss:$8 sps:$4 sm:$0xff]  }
 0x2f4   : > { %8977 = vmatpush1.bf16.msra.mxu1 %v13015_v13  ;;  %v13093_v13 = vld [vmem:[%s13945_s28 + $0xc40] ss:$8 sps:$4 sm:$0xff]  }
 0x2f5   : > { %9797 = vmatpush1.bf16.msra.mxu0 %v13018_v53  ;;  %8978 = vmatprep.subr.bf16.mxu1 %v13023_v59  ;;  %v13096_v53 = vld [vmem:[%s13945_s28 + $0x2040] ss:$8 sps:$4 sm:$0xff]   ;;  %v13101_v59 = vld [vmem:[%s13945_s28 + $0xc54] ss:$8 sps:$4 sm:$0xff]  }
 0x2f6   : > { %9798 = vmatprep.subr.bf16.mxu0 %v13026_v57  ;;  %v13104_v57 = vld [vmem:[%s13945_s28 + $0x2054] ss:$8 sps:$4 sm:$0xff]  }
 0x2f8   : > { %8979 = vmatpush1.bf16.msra.mxu1 %v13021_v27  ;;  %v13099_v27 = vld [vmem:[%s13945_s28 + $0xc50] ss:$8 sps:$4 sm:$0xff]  }
 0x2f9   : > { %9799 = vmatpush1.bf16.msra.mxu0 %v13024_v28  ;;  %8980 = vmatprep.subr.bf16.mxu1 %v13029_v29  ;;  %v13102_v28 = vld [vmem:[%s13945_s28 + $0x2050] ss:$8 sps:$4 sm:$0xff]   ;;  %v13107_v29 = vld [vmem:[%s13945_s28 + $0xc64] ss:$8 sps:$4 sm:$0xff]  }
 0x2fa   : > { %9800 = vmatprep.subr.bf16.mxu0 %v13032_v30  ;;  %v13110_v30 = vld [vmem:[%s13945_s28 + $0x2064] ss:$8 sps:$4 sm:$0xff]  }
 0x2fc   : > { %8981 = vmatpush1.bf16.msra.mxu1 %v13027_v16  ;;  %v13105_v16 = vld [vmem:[%s13945_s28 + $0xc60] ss:$8 sps:$4 sm:$0xff]  }
 0x2fd   : > { %9801 = vmatpush1.bf16.msra.mxu0 %v13030_v32  ;;  %8982 = vmatprep.subr.bf16.mxu1 %v13035_v35  ;;  %v13108_v32 = vld [vmem:[%s13945_s28 + $0x2060] ss:$8 sps:$4 sm:$0xff]   ;;  %v13113_v35 = vld [vmem:[%s13945_s28 + $0xc74] ss:$8 sps:$4 sm:$0xff]  }
 0x2fe   : > { %9802 = vmatprep.subr.bf16.mxu0 %v13038_v36  ;;  %v13116_v36 = vld [vmem:[%s13945_s28 + $0x2074] ss:$8 sps:$4 sm:$0xff]  }
 0x300   : > { %8983 = vmatpush1.bf16.msra.mxu1 %v13033_v18  ;;  %v13111_v18 = vld [vmem:[%s13945_s28 + $0xc70] ss:$8 sps:$4 sm:$0xff]  }
 0x301   : > { %9803 = vmatpush1.bf16.msra.mxu0 %v13036_v38  ;;  %8984 = vmatprep.subr.bf16.mxu1 %v13041_v60  ;;  %v13114_v38 = vld [vmem:[%s13945_s28 + $0x2070] ss:$8 sps:$4 sm:$0xff]   ;;  %v13119_v60 = vld [vmem:[%s13945_s28 + $0xc84] ss:$8 sps:$4 sm:$0xff]  }
 0x302   : > { %9804 = vmatprep.subr.bf16.mxu0 %v13044_v43  ;;  %v13122_v43 = vld [vmem:[%s13945_s28 + $0x2084] ss:$8 sps:$4 sm:$0xff]  }
 0x304   : > { %8985 = vmatpush1.bf16.msra.mxu1 %v13039_v31  ;;  %v13117_v31 = vld [vmem:[%s13945_s28 + $0xc80] ss:$8 sps:$4 sm:$0xff]  }
 0x305   : > { %9805 = vmatpush1.bf16.msra.mxu0 %v13042_v25  ;;  %8986 = vmatprep.subr.bf16.mxu1 %v13047_v15  ;;  %v13120_v25 = vld [vmem:[%s13945_s28 + $0x2080] ss:$8 sps:$4 sm:$0xff]   ;;  %v13125_v15 = vld [vmem:[%s13945_s28 + $0xc94] ss:$8 sps:$4 sm:$0xff]  }
 0x306   : > { %9806 = vmatprep.subr.bf16.mxu0 %v13050_v46  ;;  %v13128_v46 = vld [vmem:[%s13945_s28 + $0x2094] ss:$8 sps:$4 sm:$0xff]  }
 0x308   : > { %8987 = vmatpush1.bf16.msra.mxu1 %v13045_v26  ;;  %v13123_v26 = vld [vmem:[%s13945_s28 + $0xc90] ss:$8 sps:$4 sm:$0xff]  }
 0x309   : > { %9807 = vmatpush1.bf16.msra.mxu0 %v13048_v47  ;;  %8988 = vmatprep.subr.bf16.mxu1 %v13053_v37  ;;  %v13126_v47 = vld [vmem:[%s13945_s28 + $0x2090] ss:$8 sps:$4 sm:$0xff]   ;;  %v13131_v37 = vld [vmem:[%s13945_s28 + $0xca4] ss:$8 sps:$4 sm:$0xff]  }
 0x30a   : > { %9808 = vmatprep.subr.bf16.mxu0 %v13056_v48  ;;  %v13134_v48 = vld [vmem:[%s13945_s28 + $0x20a4] ss:$8 sps:$4 sm:$0xff]  }
 0x30c   : > { %8989 = vmatpush1.bf16.msra.mxu1 %v13051_v17  ;;  %v13129_v17 = vld [vmem:[%s13945_s28 + $0xca0] ss:$8 sps:$4 sm:$0xff]  }
 0x30d   : > { %9809 = vmatpush1.bf16.msra.mxu0 %v13054_v49  ;;  %8990 = vmatprep.subr.bf16.mxu1 %v13059_v51  ;;  %v13132_v49 = vld [vmem:[%s13945_s28 + $0x20a0] ss:$8 sps:$4 sm:$0xff]   ;;  %v13137_v51 = vld [vmem:[%s13945_s28 + $0xcb4] ss:$8 sps:$4 sm:$0xff]  }
 0x30e   : > { %9810 = vmatprep.subr.bf16.mxu0 %v13062_v52  ;;  %v13140_v52 = vld [vmem:[%s13945_s28 + $0x20b4] ss:$8 sps:$4 sm:$0xff]  }
 0x310   : > { %8991 = vmatpush1.bf16.msra.mxu1 %v13057_v61  ;;  %v13135_v61 = vld [vmem:[%s13945_s28 + $0xcb0] ss:$8 sps:$4 sm:$0xff]  }
 0x311   : > { %9811 = vmatpush1.bf16.msra.mxu0 %v13060_v62  ;;  %8992 = vmatprep.subr.bf16.mxu1 %v13065_v63  ;;  %v13138_v62 = vld [vmem:[%s13945_s28 + $0x20b0] ss:$8 sps:$4 sm:$0xff]   ;;  %v13143_v63 = vld [vmem:[%s13945_s28 + $0xcc4] ss:$8 sps:$4 sm:$0xff]  }
 0x312   : > { %9812 = vmatprep.subr.bf16.mxu0 %v13068_v0  ;;  %v13146_v0 = vld [vmem:[%s13945_s28 + $0x20c4] ss:$8 sps:$4 sm:$0xff]  }
 0x314   : > { %8993 = vmatpush1.bf16.msra.mxu1 %v13063_v45  ;;  %v13141_v45 = vld [vmem:[%s13945_s28 + $0xcc0] ss:$8 sps:$4 sm:$0xff]  }
 0x315   : > { %9813 = vmatpush1.bf16.msra.mxu0 %v13066_v1  ;;  %9003 = vmatprep.subr.bf16.mxu1 %v13071_v54  ;;  %v13144_v1 = vld [vmem:[%s13945_s28 + $0x20c0] ss:$8 sps:$4 sm:$0xff]   ;;  %v13149_v54 = vld [vmem:[%s13945_s28 + $0xcd4] ss:$8 sps:$4 sm:$0xff]  }
 0x316   : > { %9823 = vmatprep.subr.bf16.mxu0 %v13074_v56  ;;  %v13152_v56 = vld [vmem:[%s13945_s28 + $0x20d4] ss:$8 sps:$4 sm:$0xff]  }
 0x317   : > { %8995 = vmatmul.mubr.bf16.vlgmr.msra.gmra.mrb[0].mxu1 %v1685_v58  ;;  %v13155_v58 = vld [vmem:[%s13945_s28 + $0xce4] ss:$8 sps:$4 sm:$0xff]  }
 0x318   : > { %9815 = vmatmul.mubr.bf16.vlgmr.msra.gmra.mrb[0].mxu0 %v1930_v4  ;;  %9004 = vmatpush1.bf16.msra.mxu1 %v13069_v5  ;;  %v13158_v4 = vld [vmem:[%s13945_s28 + $0x20e4] ss:$8 sps:$4 sm:$0xff]   ;;  %v13153_v5 = vld [vmem:[%s13945_s28 + $0xce0] ss:$8 sps:$4 sm:$0xff]  }
 0x319   : > { %9824 = vmatpush1.bf16.msra.mxu0 %v13072_v6  ;;  %9005 = vmatprep.subr.bf16.mxu1 %v13077_v7  ;;  %v13156_v6 = vld [vmem:[%s13945_s28 + $0x20e0] ss:$8 sps:$4 sm:$0xff]   ;;  %v13161_v7 = vld [vmem:[%s13945_s28 + $0xcf4] ss:$8 sps:$4 sm:$0xff]  }
 0x31a   : > { %9825 = vmatprep.subr.bf16.mxu0 %v13080_v8  ;;  %9035 = vmatprep.mubr.bf16.mxu1 %v14958_v9  ;;  %v13164_v8 = vld [vmem:[%s13945_s28 + $0x20f4] ss:$8 sps:$4 sm:$0xff]  }
 0x31b   : > { %9855 = vmatprep.mubr.bf16.mxu0 %v14961_v39 }
 0x31c   : > { %9006 = vmatpush1.bf16.msra.mxu1 %v13075_v40  ;;  %v13159_v40 = vld [vmem:[%s13945_s28 + $0xcf0] ss:$8 sps:$4 sm:$0xff]  }
 0x31d   : > { %9826 = vmatpush1.bf16.msra.mxu0 %v13078_v10  ;;  %9007 = vmatprep.subr.bf16.mxu1 %v13083_v11  ;;  %v13162_v10 = vld [vmem:[%s13945_s28 + $0x20f0] ss:$8 sps:$4 sm:$0xff]   ;;  %v13167_v11 = vld [vmem:[%s13945_s28 + $0xd04] ss:$8 sps:$4 sm:$0xff]  }
 0x31e   : > { %9827 = vmatprep.subr.bf16.mxu0 %v13086_v12  ;;  %v13170_v12 = vld [vmem:[%s13945_s28 + $0x2104] ss:$8 sps:$4 sm:$0xff]  }
 0x320   : > { %9008 = vmatpush1.bf16.msra.mxu1 %v13081_v19  ;;  %v15027_v19 = vrot.slane %v14935_v14, %v13995_v50  ;;  %v1735_v14 = vcombine.high %v14958_v9, %v14958_v9  ;;  %v13179_v9 = vld [vmem:[%s13945_s28 + $0xd24] ss:$8 sps:$4 sm:$0xff]  }
 0x321   : > { %9828 = vmatpush1.bf16.msra.mxu0 %v13084_v20  ;;  %9009 = vmatprep.subr.bf16.mxu1 %v13089_v21  ;;  %v15031_v20 = vrot.slane %v14939_v41, %v13995_v50  ;;  %v13165_v21 = vld [vmem:[%s13945_s28 + $0xd00] ss:$8 sps:$4 sm:$0xff]   ;;  %v13171_v41 = vld [vmem:[%s13945_s28 + $0xd10] ss:$8 sps:$4 sm:$0xff]  }
 0x322   : > { %9829 = vmatprep.subr.bf16.mxu0 %v13092_v22  ;;  %v13168_v22 = vld [vmem:[%s13945_s28 + $0x2100] ss:$8 sps:$4 sm:$0xff]  }
 0x324   : > { %9010 = vmatpush1.bf16.msra.mxu1 %v13087_v42  ;;  %v13173_v42 = vld [vmem:[%s13945_s28 + $0xd14] ss:$8 sps:$4 sm:$0xff]  }
 0x325   : > { %9830 = vmatpush1.bf16.msra.mxu0 %v13090_v23  ;;  %9011 = vmatprep.subr.bf16.mxu1 %v13095_v2  ;;  %v13176_v23 = vld [vmem:[%s13945_s28 + $0x2114] ss:$8 sps:$4 sm:$0xff]   ;;  %v1980_v2 = vcombine.high %v14961_v39, %v14961_v39  ;;  %v13177_v39 = vld [vmem:[%s13945_s28 + $0xd20] ss:$8 sps:$4 sm:$0xff]  }
 0x326   : > { %9831 = vmatprep.subr.bf16.mxu0 %v13098_v24  ;;  %v13174_v24 = vld [vmem:[%s13945_s28 + $0x2110] ss:$8 sps:$4 sm:$0xff]  }
 0x328   : > { %9012 = vmatpush1.bf16.msra.mxu1 %v13093_v13  ;;  %v13182_v13 = vld [vmem:[%s13945_s28 + $0x2124] ss:$8 sps:$4 sm:$0xff]  }
 0x329   : > { %9832 = vmatpush1.bf16.msra.mxu0 %v13096_v53  ;;  %9013 = vmatprep.subr.bf16.mxu1 %v13101_v59  ;;  %v13180_v53 = vld [vmem:[%s13945_s28 + $0x2120] ss:$8 sps:$4 sm:$0xff]   ;;  %v13185_v59 = vld [vmem:[%s13945_s28 + $0xd34] ss:$8 sps:$4 sm:$0xff]  }
 0x32a   : > { %9833 = vmatprep.subr.bf16.mxu0 %v13104_v57  ;;  %v13188_v57 = vld [vmem:[%s13945_s28 + $0x2134] ss:$8 sps:$4 sm:$0xff]  }
 0x32c   : > { %9014 = vmatpush1.bf16.msra.mxu1 %v13099_v27  ;;  %v13183_v27 = vld [vmem:[%s13945_s28 + $0xd30] ss:$8 sps:$4 sm:$0xff]  }
 0x32d   : > { %9834 = vmatpush1.bf16.msra.mxu0 %v13102_v28  ;;  %9015 = vmatprep.subr.bf16.mxu1 %v13107_v29  ;;  %v13186_v28 = vld [vmem:[%s13945_s28 + $0x2130] ss:$8 sps:$4 sm:$0xff]   ;;  %v13191_v29 = vld [vmem:[%s13945_s28 + $0xd44] ss:$8 sps:$4 sm:$0xff]  }
 0x32e   : > { %9835 = vmatprep.subr.bf16.mxu0 %v13110_v30  ;;  %v13194_v30 = vld [vmem:[%s13945_s28 + $0x2144] ss:$8 sps:$4 sm:$0xff]  }
 0x330   : > { %9016 = vmatpush1.bf16.msra.mxu1 %v13105_v16  ;;  %v13189_v16 = vld [vmem:[%s13945_s28 + $0xd40] ss:$8 sps:$4 sm:$0xff]  }
 0x331   : > { %9836 = vmatpush1.bf16.msra.mxu0 %v13108_v32  ;;  %9017 = vmatprep.subr.bf16.mxu1 %v13113_v35  ;;  %v13192_v32 = vld [vmem:[%s13945_s28 + $0x2140] ss:$8 sps:$4 sm:$0xff]   ;;  %v13197_v35 = vld [vmem:[%s13945_s28 + $0xd54] ss:$8 sps:$4 sm:$0xff]  }
 0x332   : > { %9837 = vmatprep.subr.bf16.mxu0 %v13116_v36  ;;  %v13200_v36 = vld [vmem:[%s13945_s28 + $0x2154] ss:$8 sps:$4 sm:$0xff]  }
 0x334   : > { %9018 = vmatpush1.bf16.msra.mxu1 %v13111_v18  ;;  %v13195_v18 = vld [vmem:[%s13945_s28 + $0xd50] ss:$8 sps:$4 sm:$0xff]  }
 0x335   : > { %9838 = vmatpush1.bf16.msra.mxu0 %v13114_v38  ;;  %9019 = vmatprep.subr.bf16.mxu1 %v13119_v60  ;;  %v13198_v38 = vld [vmem:[%s13945_s28 + $0x2150] ss:$8 sps:$4 sm:$0xff]   ;;  %v13203_v60 = vld [vmem:[%s13945_s28 + $0xd64] ss:$8 sps:$4 sm:$0xff]  }
 0x336   : > { %9839 = vmatprep.subr.bf16.mxu0 %v13122_v43  ;;  %v13206_v43 = vld [vmem:[%s13945_s28 + $0x2164] ss:$8 sps:$4 sm:$0xff]  }
 0x338   : > { %9020 = vmatpush1.bf16.msra.mxu1 %v13117_v31  ;;  %v13201_v31 = vld [vmem:[%s13945_s28 + $0xd60] ss:$8 sps:$4 sm:$0xff]  }
 0x339   : > { %9840 = vmatpush1.bf16.msra.mxu0 %v13120_v25  ;;  %9021 = vmatprep.subr.bf16.mxu1 %v13125_v15  ;;  %v13204_v25 = vld [vmem:[%s13945_s28 + $0x2160] ss:$8 sps:$4 sm:$0xff]   ;;  %v13209_v15 = vld [vmem:[%s13945_s28 + $0xd74] ss:$8 sps:$4 sm:$0xff]  }
 0x33a   : > { %9841 = vmatprep.subr.bf16.mxu0 %v13128_v46  ;;  %v13212_v46 = vld [vmem:[%s13945_s28 + $0x2174] ss:$8 sps:$4 sm:$0xff]  }
 0x33c   : > { %9022 = vmatpush1.bf16.msra.mxu1 %v13123_v26  ;;  %v13207_v26 = vld [vmem:[%s13945_s28 + $0xd70] ss:$8 sps:$4 sm:$0xff]  }
 0x33d   : > { %9842 = vmatpush1.bf16.msra.mxu0 %v13126_v47  ;;  %9023 = vmatprep.subr.bf16.mxu1 %v13131_v37  ;;  %v13210_v47 = vld [vmem:[%s13945_s28 + $0x2170] ss:$8 sps:$4 sm:$0xff]   ;;  %v13215_v37 = vld [vmem:[%s13945_s28 + $0xd84] ss:$8 sps:$4 sm:$0xff]  }
 0x33e   : > { %9843 = vmatprep.subr.bf16.mxu0 %v13134_v48  ;;  %v13218_v48 = vld [vmem:[%s13945_s28 + $0x2184] ss:$8 sps:$4 sm:$0xff]  }
 0x340   : > { %9024 = vmatpush1.bf16.msra.mxu1 %v13129_v17  ;;  %v13213_v17 = vld [vmem:[%s13945_s28 + $0xd80] ss:$8 sps:$4 sm:$0xff]  }
 0x341   : > { %9844 = vmatpush1.bf16.msra.mxu0 %v13132_v49  ;;  %9025 = vmatprep.subr.bf16.mxu1 %v13137_v51  ;;  %v13216_v49 = vld [vmem:[%s13945_s28 + $0x2180] ss:$8 sps:$4 sm:$0xff]   ;;  %v13221_v51 = vld [vmem:[%s13945_s28 + $0xd94] ss:$8 sps:$4 sm:$0xff]  }
 0x342   : > { %9845 = vmatprep.subr.bf16.mxu0 %v13140_v52  ;;  %v13224_v52 = vld [vmem:[%s13945_s28 + $0x2194] ss:$8 sps:$4 sm:$0xff]  }
 0x344   : > { %9026 = vmatpush1.bf16.msra.mxu1 %v13135_v61  ;;  %v13219_v61 = vld [vmem:[%s13945_s28 + $0xd90] ss:$8 sps:$4 sm:$0xff]  }
 0x345   : > { %9846 = vmatpush1.bf16.msra.mxu0 %v13138_v62  ;;  %9027 = vmatprep.subr.bf16.mxu1 %v13143_v63  ;;  %v13222_v62 = vld [vmem:[%s13945_s28 + $0x2190] ss:$8 sps:$4 sm:$0xff]   ;;  %v13227_v63 = vld [vmem:[%s13945_s28 + $0xda4] ss:$8 sps:$4 sm:$0xff]  }
 0x346   : > { %9847 = vmatprep.subr.bf16.mxu0 %v13146_v0  ;;  %v13230_v0 = vld [vmem:[%s13945_s28 + $0x21a4] ss:$8 sps:$4 sm:$0xff]  }
 0x348   : > { %9028 = vmatpush1.bf16.msra.mxu1 %v13141_v45  ;;  %v13225_v45 = vld [vmem:[%s13945_s28 + $0xda0] ss:$8 sps:$4 sm:$0xff]  }
 0x349   : > { %9848 = vmatpush1.bf16.msra.mxu0 %v13144_v1  ;;  %9029 = vmatprep.subr.bf16.mxu1 %v13149_v54  ;;  %v13228_v1 = vld [vmem:[%s13945_s28 + $0x21a0] ss:$8 sps:$4 sm:$0xff]   ;;  %v13233_v54 = vld [vmem:[%s13945_s28 + $0xdb4] ss:$8 sps:$4 sm:$0xff]  }
 0x34a   : > { %9849 = vmatprep.subr.bf16.mxu0 %v13152_v56  ;;  %v13236_v56 = vld [vmem:[%s13945_s28 + $0x21b4] ss:$8 sps:$4 sm:$0xff]  }
 0x34c   : > { %9030 = vmatpush1.bf16.msra.mxu1 %v13147_v33  ;;  %v13231_v33 = vld [vmem:[%s13945_s28 + $0xdb0] ss:$8 sps:$4 sm:$0xff]  }
 0x34d   : > { %9850 = vmatpush1.bf16.msra.mxu0 %v13150_v3  ;;  %9031 = vmatprep.subr.bf16.mxu1 %v13155_v58  ;;  %v13234_v3 = vld [vmem:[%s13945_s28 + $0x21b0] ss:$8 sps:$4 sm:$0xff]   ;;  %v13239_v58 = vld [vmem:[%s13945_s28 + $0xdc4] ss:$8 sps:$4 sm:$0xff]  }
 0x34e   : > { %9851 = vmatprep.subr.bf16.mxu0 %v13158_v4  ;;  %v13242_v4 = vld [vmem:[%s13945_s28 + $0x21c4] ss:$8 sps:$4 sm:$0xff]  }
 0x350   : > { %9032 = vmatpush1.bf16.msra.mxu1 %v13153_v5  ;;  %v13237_v5 = vld [vmem:[%s13945_s28 + $0xdc0] ss:$8 sps:$4 sm:$0xff]  }
 0x351   : > { %9852 = vmatpush1.bf16.msra.mxu0 %v13156_v6  ;;  %9033 = vmatprep.subr.bf16.mxu1 %v13161_v7  ;;  %v13240_v6 = vld [vmem:[%s13945_s28 + $0x21c0] ss:$8 sps:$4 sm:$0xff]   ;;  %v13245_v7 = vld [vmem:[%s13945_s28 + $0xdd4] ss:$8 sps:$4 sm:$0xff]  }
 0x352   : > { %9853 = vmatprep.subr.bf16.mxu0 %v13164_v8  ;;  %v13248_v8 = vld [vmem:[%s13945_s28 + $0x21d4] ss:$8 sps:$4 sm:$0xff]  }
 0x354   : > { %9034 = vmatpush1.bf16.msra.mxu1 %v13159_v40  ;;  %v13243_v40 = vld [vmem:[%s13945_s28 + $0xdd0] ss:$8 sps:$4 sm:$0xff]  }
 0x355   : > { %9854 = vmatpush1.bf16.msra.mxu0 %v13162_v10  ;;  %9044 = vmatprep.subr.bf16.mxu1 %v13167_v11  ;;  %v13246_v10 = vld [vmem:[%s13945_s28 + $0x21d0] ss:$8 sps:$4 sm:$0xff]   ;;  %v13251_v11 = vld [vmem:[%s13945_s28 + $0xde4] ss:$8 sps:$4 sm:$0xff]  }
 0x356   : > { %9864 = vmatprep.subr.bf16.mxu0 %v13170_v12  ;;  %v13254_v12 = vld [vmem:[%s13945_s28 + $0x21e4] ss:$8 sps:$4 sm:$0xff]  }
 0x357   : > { %9036 = vmatmul.mubr.bf16.vlgmr.msra.gmra.mrb[0].mxu1 %v15027_v19 }
 0x358   : > { %9856 = vmatmul.mubr.bf16.vlgmr.msra.gmra.mrb[0].mxu0 %v15031_v20  ;;  %9045 = vmatpush1.bf16.msra.mxu1 %v13165_v21  ;;  %v1688_v21 = vcombine.high %v14924_v34, %v14924_v34  ;;  %v13255_v34 = vld [vmem:[%s13945_s28 + $0xdf0] ss:$8 sps:$4 sm:$0xff]  }
 0x359   : > { %9865 = vmatpush1.bf16.msra.mxu0 %v13168_v22  ;;  %9046 = vmatprep.subr.bf16.mxu1 %v13173_v42  ;;  %v1933_v22 = vcombine.high %v14927_v55, %v14927_v55  ;;  %v13249_v42 = vld [vmem:[%s13945_s28 + $0xde0] ss:$8 sps:$4 sm:$0xff]   ;;  %v13258_v55 = vld [vmem:[%s13945_s28 + $0x21f0] ss:$8 sps:$4 sm:$0xff]  }
 0x35a   : > { %9866 = vmatprep.subr.bf16.mxu0 %v13176_v23  ;;  %9076 = vmatprep.mubr.bf16.mxu1 %v1735_v14  ;;  %v13252_v23 = vld [vmem:[%s13945_s28 + $0x21e0] ss:$8 sps:$4 sm:$0xff]   ;;  %v13257_v14 = vld [vmem:[%s13945_s28 + $0xdf4] ss:$8 sps:$4 sm:$0xff]  }
 0x35b   : > { %9896 = vmatprep.mubr.bf16.mxu0 %v1980_v2  ;;  %v13260_v2 = vld [vmem:[%s13945_s28 + $0x21f4] ss:$8 sps:$4 sm:$0xff]  }
 0x35c   : > { %9047 = vmatpush1.bf16.msra.mxu1 %v13171_v41  ;;  %v15104_v41 = vrot.slane %v1688_v21, %v13995_v50  ;;  %v13327_v21 = vld [vmem:[%s13945_s28 + $0xeb0] ss:$8 sps:$4 sm:$0xff]  }
 0x35d   : > { %9867 = vmatpush1.bf16.msra.mxu0 %v13174_v24  ;;  %9048 = vmatprep.subr.bf16.mxu1 %v13179_v9  ;;  %v15107_v24 = vrot.slane %v1933_v22, %v13995_v50  ;;  %v13263_v9 = vld [vmem:[%s13945_s28 + $0xe04] ss:$8 sps:$4 sm:$0xff]   ;;  %v13330_v22 = vld [vmem:[%s13945_s28 + $0x22b0] ss:$8 sps:$4 sm:$0xff]  }
 0x35e   : > { %9868 = vmatprep.subr.bf16.mxu0 %v13182_v13  ;;  %v13266_v13 = vld [vmem:[%s13945_s28 + $0x2204] ss:$8 sps:$4 sm:$0xff]  }
 0x360   : > { %9049 = vmatpush1.bf16.msra.mxu1 %v13177_v39  ;;  %v1704_v39 = vcombine.high %v15104_v41, %v15104_v41 }
 0x361   : > { %9869 = vmatpush1.bf16.msra.mxu0 %v13180_v53  ;;  %9050 = vmatprep.subr.bf16.mxu1 %v13185_v59  ;;  %v1949_v53 = vcombine.high %v15107_v24, %v15107_v24  ;;  %v1733_v59 = vcombine.high %v15027_v19, %v15027_v19 }
 0x362   : > { %9870 = vmatprep.subr.bf16.mxu0 %v13188_v57  ;;  %v1978_v57 = vcombine.high %v15031_v20, %v15031_v20  ;;  %v13267_v20 = vld [vmem:[%s13945_s28 + $0xe10] ss:$8 sps:$4 sm:$0xff]  }
 0x363   : > { %v15129_v19 = vrot.slane %v1949_v53, %v13995_v50  ;;  %v13350_v53 = vld [vmem:[%s13945_s28 + $0x22e4] ss:$8 sps:$4 sm:$0xff]  }
 0x364   : > { %9051 = vmatpush1.bf16.msra.mxu1 %v13183_v27  ;;  %v13261_v27 = vld [vmem:[%s13945_s28 + $0xe00] ss:$8 sps:$4 sm:$0xff]  }
 0x365   : > { %9871 = vmatpush1.bf16.msra.mxu0 %v13186_v28  ;;  %9052 = vmatprep.subr.bf16.mxu1 %v13191_v29  ;;  %v13264_v28 = vld [vmem:[%s13945_s28 + $0x2200] ss:$8 sps:$4 sm:$0xff]   ;;  %v13269_v29 = vld [vmem:[%s13945_s28 + $0xe14] ss:$8 sps:$4 sm:$0xff]  }
 0x366   : > { %9872 = vmatprep.subr.bf16.mxu0 %v13194_v30  ;;  %v13272_v30 = vld [vmem:[%s13945_s28 + $0x2214] ss:$8 sps:$4 sm:$0xff]  }
 0x368   : > { %9053 = vmatpush1.bf16.msra.mxu1 %v13189_v16  ;;  %v15126_v16 = vrot.slane %v1704_v39, %v13995_v50  ;;  %v13347_v39 = vld [vmem:[%s13945_s28 + $0xee4] ss:$8 sps:$4 sm:$0xff]  }
 0x369   : > { %9873 = vmatpush1.bf16.msra.mxu0 %v13192_v32  ;;  %9054 = vmatprep.subr.bf16.mxu1 %v13197_v35  ;;  %v13270_v32 = vld [vmem:[%s13945_s28 + $0x2210] ss:$8 sps:$4 sm:$0xff]   ;;  %v13275_v35 = vld [vmem:[%s13945_s28 + $0xe24] ss:$8 sps:$4 sm:$0xff]  }
 0x36a   : > { %9874 = vmatprep.subr.bf16.mxu0 %v13200_v36  ;;  %v13278_v36 = vld [vmem:[%s13945_s28 + $0x2224] ss:$8 sps:$4 sm:$0xff]  }
 0x36c   : > { %9055 = vmatpush1.bf16.msra.mxu1 %v13195_v18  ;;  %v13273_v18 = vld [vmem:[%s13945_s28 + $0xe20] ss:$8 sps:$4 sm:$0xff]  }
 0x36d   : > { %9875 = vmatpush1.bf16.msra.mxu0 %v13198_v38  ;;  %9056 = vmatprep.subr.bf16.mxu1 %v13203_v60  ;;  %v13276_v38 = vld [vmem:[%s13945_s28 + $0x2220] ss:$8 sps:$4 sm:$0xff]   ;;  %v13281_v60 = vld [vmem:[%s13945_s28 + $0xe34] ss:$8 sps:$4 sm:$0xff]  }
 0x36e   : > { %9876 = vmatprep.subr.bf16.mxu0 %v13206_v43  ;;  %v13284_v43 = vld [vmem:[%s13945_s28 + $0x2234] ss:$8 sps:$4 sm:$0xff]  }
 0x370   : > { %9057 = vmatpush1.bf16.msra.mxu1 %v13201_v31  ;;  %v13279_v31 = vld [vmem:[%s13945_s28 + $0xe30] ss:$8 sps:$4 sm:$0xff]  }
 0x371   : > { %9877 = vmatpush1.bf16.msra.mxu0 %v13204_v25  ;;  %9058 = vmatprep.subr.bf16.mxu1 %v13209_v15  ;;  %v13282_v25 = vld [vmem:[%s13945_s28 + $0x2230] ss:$8 sps:$4 sm:$0xff]   ;;  %v13287_v15 = vld [vmem:[%s13945_s28 + $0xe44] ss:$8 sps:$4 sm:$0xff]  }
 0x372   : > { %9878 = vmatprep.subr.bf16.mxu0 %v13212_v46  ;;  %v13290_v46 = vld [vmem:[%s13945_s28 + $0x2244] ss:$8 sps:$4 sm:$0xff]  }
 0x374   : > { %9059 = vmatpush1.bf16.msra.mxu1 %v13207_v26  ;;  %v13285_v26 = vld [vmem:[%s13945_s28 + $0xe40] ss:$8 sps:$4 sm:$0xff]  }
 0x375   : > { %9879 = vmatpush1.bf16.msra.mxu0 %v13210_v47  ;;  %9060 = vmatprep.subr.bf16.mxu1 %v13215_v37  ;;  %v13288_v47 = vld [vmem:[%s13945_s28 + $0x2240] ss:$8 sps:$4 sm:$0xff]   ;;  %v13293_v37 = vld [vmem:[%s13945_s28 + $0xe54] ss:$8 sps:$4 sm:$0xff]  }
 0x376   : > { %9880 = vmatprep.subr.bf16.mxu0 %v13218_v48  ;;  %v13296_v48 = vld [vmem:[%s13945_s28 + $0x2254] ss:$8 sps:$4 sm:$0xff]  }
 0x378   : > { %9061 = vmatpush1.bf16.msra.mxu1 %v13213_v17  ;;  %v13291_v17 = vld [vmem:[%s13945_s28 + $0xe50] ss:$8 sps:$4 sm:$0xff]  }
 0x379   : > { %9881 = vmatpush1.bf16.msra.mxu0 %v13216_v49  ;;  %9062 = vmatprep.subr.bf16.mxu1 %v13221_v51  ;;  %v13294_v49 = vld [vmem:[%s13945_s28 + $0x2250] ss:$8 sps:$4 sm:$0xff]   ;;  %v13299_v51 = vld [vmem:[%s13945_s28 + $0xe64] ss:$8 sps:$4 sm:$0xff]  }
 0x37a   : > { %9882 = vmatprep.subr.bf16.mxu0 %v13224_v52  ;;  %v13302_v52 = vld [vmem:[%s13945_s28 + $0x2264] ss:$8 sps:$4 sm:$0xff]  }
 0x37c   : > { %9063 = vmatpush1.bf16.msra.mxu1 %v13219_v61  ;;  %v13297_v61 = vld [vmem:[%s13945_s28 + $0xe60] ss:$8 sps:$4 sm:$0xff]  }
 0x37d   : > { %9883 = vmatpush1.bf16.msra.mxu0 %v13222_v62  ;;  %9064 = vmatprep.subr.bf16.mxu1 %v13227_v63  ;;  %v13300_v62 = vld [vmem:[%s13945_s28 + $0x2260] ss:$8 sps:$4 sm:$0xff]   ;;  %v13305_v63 = vld [vmem:[%s13945_s28 + $0xe74] ss:$8 sps:$4 sm:$0xff]  }
 0x37e   : > { %9884 = vmatprep.subr.bf16.mxu0 %v13230_v0  ;;  %v13308_v0 = vld [vmem:[%s13945_s28 + $0x2274] ss:$8 sps:$4 sm:$0xff]  }
 0x380   : > { %9065 = vmatpush1.bf16.msra.mxu1 %v13225_v45  ;;  %v13303_v45 = vld [vmem:[%s13945_s28 + $0xe70] ss:$8 sps:$4 sm:$0xff]  }
 0x381   : > { %9885 = vmatpush1.bf16.msra.mxu0 %v13228_v1  ;;  %9066 = vmatprep.subr.bf16.mxu1 %v13233_v54  ;;  %v13306_v1 = vld [vmem:[%s13945_s28 + $0x2270] ss:$8 sps:$4 sm:$0xff]   ;;  %v13311_v54 = vld [vmem:[%s13945_s28 + $0xe84] ss:$8 sps:$4 sm:$0xff]  }
 0x382   : > { %9886 = vmatprep.subr.bf16.mxu0 %v13236_v56  ;;  %v13314_v56 = vld [vmem:[%s13945_s28 + $0x2284] ss:$8 sps:$4 sm:$0xff]  }
 0x384   : > { %9067 = vmatpush1.bf16.msra.mxu1 %v13231_v33  ;;  %v13309_v33 = vld [vmem:[%s13945_s28 + $0xe80] ss:$8 sps:$4 sm:$0xff]  }
 0x385   : > { %9887 = vmatpush1.bf16.msra.mxu0 %v13234_v3  ;;  %9068 = vmatprep.subr.bf16.mxu1 %v13239_v58  ;;  %v13312_v3 = vld [vmem:[%s13945_s28 + $0x2280] ss:$8 sps:$4 sm:$0xff]   ;;  %v13317_v58 = vld [vmem:[%s13945_s28 + $0xe94] ss:$8 sps:$4 sm:$0xff]  }
 0x386   : > { %9888 = vmatprep.subr.bf16.mxu0 %v13242_v4  ;;  %v13320_v4 = vld [vmem:[%s13945_s28 + $0x2294] ss:$8 sps:$4 sm:$0xff]  }
 0x388   : > { %9069 = vmatpush1.bf16.msra.mxu1 %v13237_v5  ;;  %v13315_v5 = vld [vmem:[%s13945_s28 + $0xe90] ss:$8 sps:$4 sm:$0xff]  }
 0x389   : > { %9889 = vmatpush1.bf16.msra.mxu0 %v13240_v6  ;;  %9070 = vmatprep.subr.bf16.mxu1 %v13245_v7  ;;  %v13318_v6 = vld [vmem:[%s13945_s28 + $0x2290] ss:$8 sps:$4 sm:$0xff]   ;;  %v13323_v7 = vld [vmem:[%s13945_s28 + $0xea4] ss:$8 sps:$4 sm:$0xff]  }
 0x38a   : > { %9890 = vmatprep.subr.bf16.mxu0 %v13248_v8  ;;  %v13326_v8 = vld [vmem:[%s13945_s28 + $0x22a4] ss:$8 sps:$4 sm:$0xff]  }
 0x38c   : > { %9071 = vmatpush1.bf16.msra.mxu1 %v13243_v40  ;;  %v13321_v40 = vld [vmem:[%s13945_s28 + $0xea0] ss:$8 sps:$4 sm:$0xff]  }
 0x38d   : > { %9891 = vmatpush1.bf16.msra.mxu0 %v13246_v10  ;;  %9072 = vmatprep.subr.bf16.mxu1 %v13251_v11  ;;  %v13324_v10 = vld [vmem:[%s13945_s28 + $0x22a0] ss:$8 sps:$4 sm:$0xff]   ;;  %v13329_v11 = vld [vmem:[%s13945_s28 + $0xeb4] ss:$8 sps:$4 sm:$0xff]  }
 0x38e   : > { %9892 = vmatprep.subr.bf16.mxu0 %v13254_v12  ;;  %v13332_v12 = vld [vmem:[%s13945_s28 + $0x22b4] ss:$8 sps:$4 sm:$0xff]  }
 0x390   : > { %9073 = vmatpush1.bf16.msra.mxu1 %v13249_v42  ;;  %v13335_v42 = vld [vmem:[%s13945_s28 + $0xec4] ss:$8 sps:$4 sm:$0xff]  }
 0x391   : > { %9893 = vmatpush1.bf16.msra.mxu0 %v13252_v23  ;;  %9074 = vmatprep.subr.bf16.mxu1 %v13257_v14  ;;  %v13338_v23 = vld [vmem:[%s13945_s28 + $0x22c4] ss:$8 sps:$4 sm:$0xff]   ;;  %v13333_v14 = vld [vmem:[%s13945_s28 + $0xec0] ss:$8 sps:$4 sm:$0xff]  }
 0x392   : > { %9894 = vmatprep.subr.bf16.mxu0 %v13260_v2  ;;  %v13336_v2 = vld [vmem:[%s13945_s28 + $0x22c0] ss:$8 sps:$4 sm:$0xff]  }
 0x394   : > { %9075 = vmatpush1.bf16.msra.mxu1 %v13255_v34  ;;  %v13341_v34 = vld [vmem:[%s13945_s28 + $0xed4] ss:$8 sps:$4 sm:$0xff]  }
 0x395   : > { %9895 = vmatpush1.bf16.msra.mxu0 %v13258_v55  ;;  %9085 = vmatprep.subr.bf16.mxu1 %v13263_v9  ;;  %v13344_v55 = vld [vmem:[%s13945_s28 + $0x22d4] ss:$8 sps:$4 sm:$0xff]   ;;  %v13339_v9 = vld [vmem:[%s13945_s28 + $0xed0] ss:$8 sps:$4 sm:$0xff]  }
 0x396   : > { %9905 = vmatprep.subr.bf16.mxu0 %v13266_v13  ;;  %v13342_v13 = vld [vmem:[%s13945_s28 + $0x22d0] ss:$8 sps:$4 sm:$0xff]  }
 0x397   : > { %9077 = vmatmul.mubr.bf16.vlgmr.msra.gmra.mrb[0].mxu1 %v1733_v59  ;;  %v13345_v59 = vld [vmem:[%s13945_s28 + $0xee0] ss:$8 sps:$4 sm:$0xff]  }
 0x398   : > { %9897 = vmatmul.mubr.bf16.vlgmr.msra.gmra.mrb[0].mxu0 %v1978_v57  ;;  %9086 = vmatpush1.bf16.msra.mxu1 %v13261_v27  ;;  %v13348_v57 = vld [vmem:[%s13945_s28 + $0x22e0] ss:$8 sps:$4 sm:$0xff]   ;;  %v13353_v27 = vld [vmem:[%s13945_s28 + $0xef4] ss:$8 sps:$4 sm:$0xff]  }
 0x399   : > { %9906 = vmatpush1.bf16.msra.mxu0 %v13264_v28  ;;  %9087 = vmatprep.subr.bf16.mxu1 %v13269_v29  ;;  %v13356_v28 = vld [vmem:[%s13945_s28 + $0x22f4] ss:$8 sps:$4 sm:$0xff]   ;;  %v13351_v29 = vld [vmem:[%s13945_s28 + $0xef0] ss:$8 sps:$4 sm:$0xff]  }
 0x39a   : > { %9907 = vmatprep.subr.bf16.mxu0 %v13272_v30  ;;  %9117 = vmatprep.mubr.bf16.mxu1 %v15126_v16  ;;  %v13354_v30 = vld [vmem:[%s13945_s28 + $0x22f0] ss:$8 sps:$4 sm:$0xff]  }
 0x39b   : > { %9937 = vmatprep.mubr.bf16.mxu0 %v15129_v19 }
 0x39c   : > { %9088 = vmatpush1.bf16.msra.mxu1 %v13267_v20  ;;  %v13360_v20 = vld [vmem:[%s13945_s28 + $0xf04] ss:$8 sps:$4 sm:$0xff]  }
 0x39d   : > { %9908 = vmatpush1.bf16.msra.mxu0 %v13270_v32  ;;  %9089 = vmatprep.subr.bf16.mxu1 %v13275_v35  ;;  %v13364_v32 = vld [vmem:[%s13945_s28 + $0x2304] ss:$8 sps:$4 sm:$0xff]   ;;  %v15195_v35 = vrot.slane %v15104_v41, %v13995_v50  ;;  %v1736_v41 = vcombine.high %v15126_v16, %v15126_v16 }
 0x39e   : > { %9909 = vmatprep.subr.bf16.mxu0 %v13278_v36  ;;  %v15199_v36 = vrot.slane %v15107_v24, %v13995_v50  ;;  %v13365_v24 = vld [vmem:[%s13945_s28 + $0xf10] ss:$8 sps:$4 sm:$0xff]   ;;  %v13373_v16 = vld [vmem:[%s13945_s28 + $0xf24] ss:$8 sps:$4 sm:$0xff]  }
 0x3a0   : > { %9090 = vmatpush1.bf16.msra.mxu1 %v13273_v18  ;;  %v13358_v18 = vld [vmem:[%s13945_s28 + $0xf00] ss:$8 sps:$4 sm:$0xff]  }
 0x3a1   : > { %9910 = vmatpush1.bf16.msra.mxu0 %v13276_v38  ;;  %9091 = vmatprep.subr.bf16.mxu1 %v13281_v60  ;;  %v13362_v38 = vld [vmem:[%s13945_s28 + $0x2300] ss:$8 sps:$4 sm:$0xff]   ;;  %v13367_v60 = vld [vmem:[%s13945_s28 + $0xf14] ss:$8 sps:$4 sm:$0xff]  }
 0x3a2   : > { %9911 = vmatprep.subr.bf16.mxu0 %v13284_v43  ;;  %v13370_v43 = vld [vmem:[%s13945_s28 + $0x2314] ss:$8 sps:$4 sm:$0xff]  }
 0x3a4   : > { %9092 = vmatpush1.bf16.msra.mxu1 %v13279_v31  ;;  %v1981_v31 = vcombine.high %v15129_v19, %v15129_v19  ;;  %v13371_v19 = vld [vmem:[%s13945_s28 + $0xf20] ss:$8 sps:$4 sm:$0xff]  }
 0x3a5   : > { %9912 = vmatpush1.bf16.msra.mxu0 %v13282_v25  ;;  %9093 = vmatprep.subr.bf16.mxu1 %v13287_v15  ;;  %v13368_v25 = vld [vmem:[%s13945_s28 + $0x2310] ss:$8 sps:$4 sm:$0xff]   ;;  %v13376_v15 = vld [vmem:[%s13945_s28 + $0x2324] ss:$8 sps:$4 sm:$0xff]  }
 0x3a6   : > { %9913 = vmatprep.subr.bf16.mxu0 %v13290_v46  ;;  %v13374_v46 = vld [vmem:[%s13945_s28 + $0x2320] ss:$8 sps:$4 sm:$0xff]  }
 0x3a8   : > { %9094 = vmatpush1.bf16.msra.mxu1 %v13285_v26  ;;  %v13379_v26 = vld [vmem:[%s13945_s28 + $0xf34] ss:$8 sps:$4 sm:$0xff]  }
 0x3a9   : > { %9914 = vmatpush1.bf16.msra.mxu0 %v13288_v47  ;;  %9095 = vmatprep.subr.bf16.mxu1 %v13293_v37  ;;  %v13382_v47 = vld [vmem:[%s13945_s28 + $0x2334] ss:$8 sps:$4 sm:$0xff]   ;;  %v13377_v37 = vld [vmem:[%s13945_s28 + $0xf30] ss:$8 sps:$4 sm:$0xff]  }
 0x3aa   : > { %9915 = vmatprep.subr.bf16.mxu0 %v13296_v48  ;;  %v13380_v48 = vld [vmem:[%s13945_s28 + $0x2330] ss:$8 sps:$4 sm:$0xff]  }
 0x3ac   : > { %9096 = vmatpush1.bf16.msra.mxu1 %v13291_v17  ;;  %v13385_v17 = vld [vmem:[%s13945_s28 + $0xf44] ss:$8 sps:$4 sm:$0xff]  }
 0x3ad   : > { %9916 = vmatpush1.bf16.msra.mxu0 %v13294_v49  ;;  %9097 = vmatprep.subr.bf16.mxu1 %v13299_v51  ;;  %v13388_v49 = vld [vmem:[%s13945_s28 + $0x2344] ss:$8 sps:$4 sm:$0xff]   ;;  %v13383_v51 = vld [vmem:[%s13945_s28 + $0xf40] ss:$8 sps:$4 sm:$0xff]  }
 0x3ae   : > { %9917 = vmatprep.subr.bf16.mxu0 %v13302_v52  ;;  %v13386_v52 = vld [vmem:[%s13945_s28 + $0x2340] ss:$8 sps:$4 sm:$0xff]  }
 0x3b0   : > { %9098 = vmatpush1.bf16.msra.mxu1 %v13297_v61  ;;  %v13391_v61 = vld [vmem:[%s13945_s28 + $0xf54] ss:$8 sps:$4 sm:$0xff]  }
 0x3b1   : > { %9918 = vmatpush1.bf16.msra.mxu0 %v13300_v62  ;;  %9099 = vmatprep.subr.bf16.mxu1 %v13305_v63  ;;  %v13394_v62 = vld [vmem:[%s13945_s28 + $0x2354] ss:$8 sps:$4 sm:$0xff]   ;;  %v13389_v63 = vld [vmem:[%s13945_s28 + $0xf50] ss:$8 sps:$4 sm:$0xff]  }
 0x3b2   : > { %9919 = vmatprep.subr.bf16.mxu0 %v13308_v0  ;;  %v13392_v0 = vld [vmem:[%s13945_s28 + $0x2350] ss:$8 sps:$4 sm:$0xff]  }
 0x3b4   : > { %9100 = vmatpush1.bf16.msra.mxu1 %v13303_v45  ;;  %v13397_v45 = vld [vmem:[%s13945_s28 + $0xf64] ss:$8 sps:$4 sm:$0xff]  }
 0x3b5   : > { %9920 = vmatpush1.bf16.msra.mxu0 %v13306_v1  ;;  %9101 = vmatprep.subr.bf16.mxu1 %v13311_v54  ;;  %v13400_v1 = vld [vmem:[%s13945_s28 + $0x2364] ss:$8 sps:$4 sm:$0xff]   ;;  %v13395_v54 = vld [vmem:[%s13945_s28 + $0xf60] ss:$8 sps:$4 sm:$0xff]  }
 0x3b6   : > { %9921 = vmatprep.subr.bf16.mxu0 %v13314_v56  ;;  %v13398_v56 = vld [vmem:[%s13945_s28 + $0x2360] ss:$8 sps:$4 sm:$0xff]  }
 0x3b8   : > { %9102 = vmatpush1.bf16.msra.mxu1 %v13309_v33  ;;  %v13403_v33 = vld [vmem:[%s13945_s28 + $0xf74] ss:$8 sps:$4 sm:$0xff]  }
 0x3b9   : > { %9922 = vmatpush1.bf16.msra.mxu0 %v13312_v3  ;;  %9103 = vmatprep.subr.bf16.mxu1 %v13317_v58  ;;  %v13406_v3 = vld [vmem:[%s13945_s28 + $0x2374] ss:$8 sps:$4 sm:$0xff]   ;;  %v13401_v58 = vld [vmem:[%s13945_s28 + $0xf70] ss:$8 sps:$4 sm:$0xff]  }
 0x3ba   : > { %9923 = vmatprep.subr.bf16.mxu0 %v13320_v4  ;;  %v13404_v4 = vld [vmem:[%s13945_s28 + $0x2370] ss:$8 sps:$4 sm:$0xff]  }
 0x3bc   : > { %9104 = vmatpush1.bf16.msra.mxu1 %v13315_v5  ;;  %v13409_v5 = vld [vmem:[%s13945_s28 + $0xf84] ss:$8 sps:$4 sm:$0xff]  }
 0x3bd   : > { %9924 = vmatpush1.bf16.msra.mxu0 %v13318_v6  ;;  %9105 = vmatprep.subr.bf16.mxu1 %v13323_v7  ;;  %v13412_v6 = vld [vmem:[%s13945_s28 + $0x2384] ss:$8 sps:$4 sm:$0xff]   ;;  %v13407_v7 = vld [vmem:[%s13945_s28 + $0xf80] ss:$8 sps:$4 sm:$0xff]  }
 0x3be   : > { %9925 = vmatprep.subr.bf16.mxu0 %v13326_v8  ;;  %v13410_v8 = vld [vmem:[%s13945_s28 + $0x2380] ss:$8 sps:$4 sm:$0xff]  }
 0x3c0   : > { %9106 = vmatpush1.bf16.msra.mxu1 %v13321_v40  ;;  %v13415_v40 = vld [vmem:[%s13945_s28 + $0xf94] ss:$8 sps:$4 sm:$0xff]  }
 0x3c1   : > { %9926 = vmatpush1.bf16.msra.mxu0 %v13324_v10  ;;  %9107 = vmatprep.subr.bf16.mxu1 %v13329_v11  ;;  %v13418_v10 = vld [vmem:[%s13945_s28 + $0x2394] ss:$8 sps:$4 sm:$0xff]   ;;  %v13413_v11 = vld [vmem:[%s13945_s28 + $0xf90] ss:$8 sps:$4 sm:$0xff]  }
 0x3c2   : > { %9927 = vmatprep.subr.bf16.mxu0 %v13332_v12  ;;  %v13416_v12 = vld [vmem:[%s13945_s28 + $0x2390] ss:$8 sps:$4 sm:$0xff]  }
 0x3c4   : > { %9108 = vmatpush1.bf16.msra.mxu1 %v13327_v21  ;;  %v13421_v21 = vld [vmem:[%s13945_s28 + $0xfa4] ss:$8 sps:$4 sm:$0xff]  }
 0x3c5   : > { %9928 = vmatpush1.bf16.msra.mxu0 %v13330_v22  ;;  %9109 = vmatprep.subr.bf16.mxu1 %v13335_v42  ;;  %v13424_v22 = vld [vmem:[%s13945_s28 + $0x23a4] ss:$8 sps:$4 sm:$0xff]   ;;  %v13419_v42 = vld [vmem:[%s13945_s28 + $0xfa0] ss:$8 sps:$4 sm:$0xff]  }
 0x3c6   : > { %9929 = vmatprep.subr.bf16.mxu0 %v13338_v23  ;;  %v13422_v23 = vld [vmem:[%s13945_s28 + $0x23a0] ss:$8 sps:$4 sm:$0xff]  }
 0x3c8   : > { %9110 = vmatpush1.bf16.msra.mxu1 %v13333_v14  ;;  %v13427_v14 = vld [vmem:[%s13945_s28 + $0xfb4] ss:$8 sps:$4 sm:$0xff]  }
 0x3c9   : > { %9930 = vmatpush1.bf16.msra.mxu0 %v13336_v2  ;;  %9111 = vmatprep.subr.bf16.mxu1 %v13341_v34  ;;  %v13430_v2 = vld [vmem:[%s13945_s28 + $0x23b4] ss:$8 sps:$4 sm:$0xff]   ;;  %v13425_v34 = vld [vmem:[%s13945_s28 + $0xfb0] ss:$8 sps:$4 sm:$0xff]  }
 0x3ca   : > { %9931 = vmatprep.subr.bf16.mxu0 %v13344_v55  ;;  %v13428_v55 = vld [vmem:[%s13945_s28 + $0x23b0] ss:$8 sps:$4 sm:$0xff]  }
 0x3cc   : > { %9112 = vmatpush1.bf16.msra.mxu1 %v13339_v9  ;;  %v13433_v9 = vld [vmem:[%s13945_s28 + $0xfc4] ss:$8 sps:$4 sm:$0xff]  }
 0x3cd   : > { %9932 = vmatpush1.bf16.msra.mxu0 %v13342_v13  ;;  %9113 = vmatprep.subr.bf16.mxu1 %v13347_v39  ;;  %v13436_v13 = vld [vmem:[%s13945_s28 + $0x23c4] ss:$8 sps:$4 sm:$0xff]   ;;  %v13431_v39 = vld [vmem:[%s13945_s28 + $0xfc0] ss:$8 sps:$4 sm:$0xff]  }
 0x3ce   : > { %9933 = vmatprep.subr.bf16.mxu0 %v13350_v53  ;;  %v13434_v53 = vld [vmem:[%s13945_s28 + $0x23c0] ss:$8 sps:$4 sm:$0xff]  }
 0x3d0   : > { %9114 = vmatpush1.bf16.msra.mxu1 %v13345_v59  ;;  %v13439_v59 = vld [vmem:[%s13945_s28 + $0xfd4] ss:$8 sps:$4 sm:$0xff]  }
 0x3d1   : > { %9934 = vmatpush1.bf16.msra.mxu0 %v13348_v57  ;;  %9115 = vmatprep.subr.bf16.mxu1 %v13353_v27  ;;  %v13442_v57 = vld [vmem:[%s13945_s28 + $0x23d4] ss:$8 sps:$4 sm:$0xff]   ;;  %v13437_v27 = vld [vmem:[%s13945_s28 + $0xfd0] ss:$8 sps:$4 sm:$0xff]  }
 0x3d2   : > { %9935 = vmatprep.subr.bf16.mxu0 %v13356_v28  ;;  %v13440_v28 = vld [vmem:[%s13945_s28 + $0x23d0] ss:$8 sps:$4 sm:$0xff]  }
 0x3d4   : > { %9116 = vmatpush1.bf16.msra.mxu1 %v13351_v29  ;;  %v13445_v29 = vld [vmem:[%s13945_s28 + $0xfe4] ss:$8 sps:$4 sm:$0xff]  }
 0x3d5   : > { %9936 = vmatpush1.bf16.msra.mxu0 %v13354_v30  ;;  %9126 = vmatprep.subr.bf16.mxu1 %v13360_v20  ;;  %v13448_v30 = vld [vmem:[%s13945_s28 + $0x23e4] ss:$8 sps:$4 sm:$0xff]  }
 0x3d6   : > { %9946 = vmatprep.subr.bf16.mxu0 %v13364_v32  ;;  %v15264_v20 = vld [vmem:[%s13940_s24 + $0x20] sm:$0xff]  ;;  %v15267_v32 = vld [vmem:[%s13940_s24 + $0x48] sm:$0xff] }
 0x3d7   : > { %9118 = vmatmul.mubr.bf16.vlgmr.msra.gmra.mrb[0].mxu1 %v15195_v35 }
 0x3d8   : > { %9938 = vmatmul.mubr.bf16.vlgmr.msra.gmra.mrb[0].mxu0 %v15199_v36  ;;  %9127 = vmatpush1.bf16.msra.mxu1 %v13358_v18  ;;  %v13443_v18 = vld [vmem:[%s13945_s28 + $0xfe0] ss:$8 sps:$4 sm:$0xff]  }
 0x3d9   : > { %9947 = vmatpush1.bf16.msra.mxu0 %v13362_v38  ;;  %9128 = vmatprep.subr.bf16.mxu1 %v13367_v60  ;;  %v13446_v38 = vld [vmem:[%s13945_s28 + $0x23e0] ss:$8 sps:$4 sm:$0xff]   ;;  %v13451_v60 = vld [vmem:[%s13945_s28 + $0xff4] ss:$8 sps:$4 sm:$0xff]  }
 0x3da   : > { %9948 = vmatprep.subr.bf16.mxu0 %v13370_v43  ;;  %9158 = vmatprep.mubr.bf16.mxu1 %v1736_v41  ;;  %v13454_v43 = vld [vmem:[%s13945_s28 + $0x23f4] ss:$8 sps:$4 sm:$0xff]   ;;  %v15275_v41 = vrot.slane %v15264_v20, %v13995_v50 }
 0x3db   : > { %9978 = vmatprep.mubr.bf16.mxu0 %v1981_v31  ;;  %v15279_v31 = vrot.slane %v15267_v32, %v13995_v50 }
 0x3dc   : > { %9129 = vmatpush1.bf16.msra.mxu1 %v13365_v24  ;;  %v13449_v24 = vld [vmem:[%s13945_s28 + $0xff0] ss:$8 sps:$4 sm:$0xff]  }
 0x3dd   : > { %9949 = vmatpush1.bf16.msra.mxu0 %v13368_v25  ;;  %9130 = vmatprep.subr.bf16.mxu1 %v13373_v16  ;;  %v13452_v25 = vld [vmem:[%s13945_s28 + $0x23f0] ss:$8 sps:$4 sm:$0xff]   ;;  %v13457_v16 = vld [vmem:[%s13945_s28 + $0x1004] ss:$8 sps:$4 sm:$0xff]  }
 0x3de   : > { %9950 = vmatprep.subr.bf16.mxu0 %v13376_v15  ;;  %v13460_v15 = vld [vmem:[%s13945_s28 + $0x2404] ss:$8 sps:$4 sm:$0xff]  }
 0x3e0   : > { %9131 = vmatpush1.bf16.msra.mxu1 %v13371_v19  ;;  %v1752_v19 = vcombine.high %v15275_v41, %v15275_v41 }
 0x3e1   : > { %9951 = vmatpush1.bf16.msra.mxu0 %v13374_v46  ;;  %9132 = vmatprep.subr.bf16.mxu1 %v13379_v26  ;;  %v1997_v46 = vcombine.high %v15279_v31, %v15279_v31  ;;  %v1734_v26 = vcombine.high %v15195_v35, %v15195_v35 }
 0x3e2   : > { %9952 = vmatprep.subr.bf16.mxu0 %v13382_v47  ;;  %v1979_v47 = vcombine.high %v15199_v36, %v15199_v36  ;;  %v13461_v36 = vld [vmem:[%s13945_s28 + $0x1010] ss:$8 sps:$4 sm:$0xff]  }
 0x3e3   : > { %v15301_v35 = vrot.slane %v1997_v46, %v13995_v50  ;;  %v13536_v46 = vld [vmem:[%s13945_s28 + $0x24d0] ss:$8 sps:$4 sm:$0xff]  }
 0x3e4   : > { %9133 = vmatpush1.bf16.msra.mxu1 %v13377_v37  ;;  %v13455_v37 = vld [vmem:[%s13945_s28 + $0x1000] ss:$8 sps:$4 sm:$0xff]  }
 0x3e5   : > { %9953 = vmatpush1.bf16.msra.mxu0 %v13380_v48  ;;  %9134 = vmatprep.subr.bf16.mxu1 %v13385_v17  ;;  %v13458_v48 = vld [vmem:[%s13945_s28 + $0x2400] ss:$8 sps:$4 sm:$0xff]   ;;  %v13463_v17 = vld [vmem:[%s13945_s28 + $0x1014] ss:$8 sps:$4 sm:$0xff]  }
 0x3e6   : > { %9954 = vmatprep.subr.bf16.mxu0 %v13388_v49  ;;  %v13466_v49 = vld [vmem:[%s13945_s28 + $0x2414] ss:$8 sps:$4 sm:$0xff]  }
 0x3e8   : > { %9135 = vmatpush1.bf16.msra.mxu1 %v13383_v51  ;;  %v15298_v51 = vrot.slane %v1752_v19, %v13995_v50  ;;  %v13533_v19 = vld [vmem:[%s13945_s28 + $0x10d0] ss:$8 sps:$4 sm:$0xff]  }
 0x3e9   : > { %9955 = vmatpush1.bf16.msra.mxu0 %v13386_v52  ;;  %9136 = vmatprep.subr.bf16.mxu1 %v13391_v61  ;;  %v13464_v52 = vld [vmem:[%s13945_s28 + $0x2410] ss:$8 sps:$4 sm:$0xff]   ;;  %v13469_v61 = vld [vmem:[%s13945_s28 + $0x1024] ss:$8 sps:$4 sm:$0xff]  }
 0x3ea   : > { %9956 = vmatprep.subr.bf16.mxu0 %v13394_v62  ;;  %v13472_v62 = vld [vmem:[%s13945_s28 + $0x2424] ss:$8 sps:$4 sm:$0xff]  }
 0x3ec   : > { %9137 = vmatpush1.bf16.msra.mxu1 %v13389_v63  ;;  %v13467_v63 = vld [vmem:[%s13945_s28 + $0x1020] ss:$8 sps:$4 sm:$0xff]  }
 0x3ed   : > { %9957 = vmatpush1.bf16.msra.mxu0 %v13392_v0  ;;  %9138 = vmatprep.subr.bf16.mxu1 %v13397_v45  ;;  %v13470_v0 = vld [vmem:[%s13945_s28 + $0x2420] ss:$8 sps:$4 sm:$0xff]   ;;  %v13475_v45 = vld [vmem:[%s13945_s28 + $0x1034] ss:$8 sps:$4 sm:$0xff]  }
 0x3ee   : > { %9958 = vmatprep.subr.bf16.mxu0 %v13400_v1  ;;  %v13478_v1 = vld [vmem:[%s13945_s28 + $0x2434] ss:$8 sps:$4 sm:$0xff]  }
 0x3f0   : > { %9139 = vmatpush1.bf16.msra.mxu1 %v13395_v54  ;;  %v13473_v54 = vld [vmem:[%s13945_s28 + $0x1030] ss:$8 sps:$4 sm:$0xff]  }
 0x3f1   : > { %9959 = vmatpush1.bf16.msra.mxu0 %v13398_v56  ;;  %9140 = vmatprep.subr.bf16.mxu1 %v13403_v33  ;;  %v13476_v56 = vld [vmem:[%s13945_s28 + $0x2430] ss:$8 sps:$4 sm:$0xff]   ;;  %v13481_v33 = vld [vmem:[%s13945_s28 + $0x1044] ss:$8 sps:$4 sm:$0xff]  }
 0x3f2   : > { %9960 = vmatprep.subr.bf16.mxu0 %v13406_v3  ;;  %v13484_v3 = vld [vmem:[%s13945_s28 + $0x2444] ss:$8 sps:$4 sm:$0xff]  }
 0x3f4   : > { %9141 = vmatpush1.bf16.msra.mxu1 %v13401_v58  ;;  %v13479_v58 = vld [vmem:[%s13945_s28 + $0x1040] ss:$8 sps:$4 sm:$0xff]  }
 0x3f5   : > { %9961 = vmatpush1.bf16.msra.mxu0 %v13404_v4  ;;  %9142 = vmatprep.subr.bf16.mxu1 %v13409_v5  ;;  %v13482_v4 = vld [vmem:[%s13945_s28 + $0x2440] ss:$8 sps:$4 sm:$0xff]   ;;  %v13487_v5 = vld [vmem:[%s13945_s28 + $0x1054] ss:$8 sps:$4 sm:$0xff]  }
 0x3f6   : > { %9962 = vmatprep.subr.bf16.mxu0 %v13412_v6  ;;  %v13490_v6 = vld [vmem:[%s13945_s28 + $0x2454] ss:$8 sps:$4 sm:$0xff]  }
 0x3f8   : > { %9143 = vmatpush1.bf16.msra.mxu1 %v13407_v7  ;;  %v13485_v7 = vld [vmem:[%s13945_s28 + $0x1050] ss:$8 sps:$4 sm:$0xff]  }
 0x3f9   : > { %9963 = vmatpush1.bf16.msra.mxu0 %v13410_v8  ;;  %9144 = vmatprep.subr.bf16.mxu1 %v13415_v40  ;;  %v13488_v8 = vld [vmem:[%s13945_s28 + $0x2450] ss:$8 sps:$4 sm:$0xff]   ;;  %v13493_v40 = vld [vmem:[%s13945_s28 + $0x1064] ss:$8 sps:$4 sm:$0xff]  }
 0x3fa   : > { %9964 = vmatprep.subr.bf16.mxu0 %v13418_v10  ;;  %v13496_v10 = vld [vmem:[%s13945_s28 + $0x2464] ss:$8 sps:$4 sm:$0xff]  }
 0x3fc   : > { %9145 = vmatpush1.bf16.msra.mxu1 %v13413_v11  ;;  %v13491_v11 = vld [vmem:[%s13945_s28 + $0x1060] ss:$8 sps:$4 sm:$0xff]  }
 0x3fd   : > { %9965 = vmatpush1.bf16.msra.mxu0 %v13416_v12  ;;  %9146 = vmatprep.subr.bf16.mxu1 %v13421_v21  ;;  %v13494_v12 = vld [vmem:[%s13945_s28 + $0x2460] ss:$8 sps:$4 sm:$0xff]   ;;  %v13499_v21 = vld [vmem:[%s13945_s28 + $0x1074] ss:$8 sps:$4 sm:$0xff]  }
 0x3fe   : > { %9966 = vmatprep.subr.bf16.mxu0 %v13424_v22  ;;  %v13502_v22 = vld [vmem:[%s13945_s28 + $0x2474] ss:$8 sps:$4 sm:$0xff]  }
 0x400   : > { %9147 = vmatpush1.bf16.msra.mxu1 %v13419_v42  ;;  %v13497_v42 = vld [vmem:[%s13945_s28 + $0x1070] ss:$8 sps:$4 sm:$0xff]  }
 0x401   : > { %9967 = vmatpush1.bf16.msra.mxu0 %v13422_v23  ;;  %9148 = vmatprep.subr.bf16.mxu1 %v13427_v14  ;;  %v13500_v23 = vld [vmem:[%s13945_s28 + $0x2470] ss:$8 sps:$4 sm:$0xff]   ;;  %v13505_v14 = vld [vmem:[%s13945_s28 + $0x1084] ss:$8 sps:$4 sm:$0xff]  }
 0x402   : > { %9968 = vmatprep.subr.bf16.mxu0 %v13430_v2  ;;  %v13508_v2 = vld [vmem:[%s13945_s28 + $0x2484] ss:$8 sps:$4 sm:$0xff]  }
 0x404   : > { %9149 = vmatpush1.bf16.msra.mxu1 %v13425_v34  ;;  %v13503_v34 = vld [vmem:[%s13945_s28 + $0x1080] ss:$8 sps:$4 sm:$0xff]  }
 0x405   : > { %9969 = vmatpush1.bf16.msra.mxu0 %v13428_v55  ;;  %9150 = vmatprep.subr.bf16.mxu1 %v13433_v9  ;;  %v13506_v55 = vld [vmem:[%s13945_s28 + $0x2480] ss:$8 sps:$4 sm:$0xff]   ;;  %v13511_v9 = vld [vmem:[%s13945_s28 + $0x1094] ss:$8 sps:$4 sm:$0xff]  }
 0x406   : > { %9970 = vmatprep.subr.bf16.mxu0 %v13436_v13  ;;  %v13514_v13 = vld [vmem:[%s13945_s28 + $0x2494] ss:$8 sps:$4 sm:$0xff]  }
 0x408   : > { %9151 = vmatpush1.bf16.msra.mxu1 %v13431_v39  ;;  %v13509_v39 = vld [vmem:[%s13945_s28 + $0x1090] ss:$8 sps:$4 sm:$0xff]  }
 0x409   : > { %9971 = vmatpush1.bf16.msra.mxu0 %v13434_v53  ;;  %9152 = vmatprep.subr.bf16.mxu1 %v13439_v59  ;;  %v13512_v53 = vld [vmem:[%s13945_s28 + $0x2490] ss:$8 sps:$4 sm:$0xff]   ;;  %v13517_v59 = vld [vmem:[%s13945_s28 + $0x10a4] ss:$8 sps:$4 sm:$0xff]  }
 0x40a   : > { %9972 = vmatprep.subr.bf16.mxu0 %v13442_v57  ;;  %v13520_v57 = vld [vmem:[%s13945_s28 + $0x24a4] ss:$8 sps:$4 sm:$0xff]  }
 0x40c   : > { %9153 = vmatpush1.bf16.msra.mxu1 %v13437_v27  ;;  %v13515_v27 = vld [vmem:[%s13945_s28 + $0x10a0] ss:$8 sps:$4 sm:$0xff]  }
 0x40d   : > { %9973 = vmatpush1.bf16.msra.mxu0 %v13440_v28  ;;  %9154 = vmatprep.subr.bf16.mxu1 %v13445_v29  ;;  %v13518_v28 = vld [vmem:[%s13945_s28 + $0x24a0] ss:$8 sps:$4 sm:$0xff]   ;;  %v13523_v29 = vld [vmem:[%s13945_s28 + $0x10b4] ss:$8 sps:$4 sm:$0xff]  }
 0x40e   : > { %9974 = vmatprep.subr.bf16.mxu0 %v13448_v30  ;;  %v13526_v30 = vld [vmem:[%s13945_s28 + $0x24b4] ss:$8 sps:$4 sm:$0xff]  }
 0x410   : > { %9155 = vmatpush1.bf16.msra.mxu1 %v13443_v18  ;;  %v13521_v18 = vld [vmem:[%s13945_s28 + $0x10b0] ss:$8 sps:$4 sm:$0xff]  }
 0x411   : > { %9975 = vmatpush1.bf16.msra.mxu0 %v13446_v38  ;;  %9156 = vmatprep.subr.bf16.mxu1 %v13451_v60  ;;  %v13524_v38 = vld [vmem:[%s13945_s28 + $0x24b0] ss:$8 sps:$4 sm:$0xff]   ;;  %v13529_v60 = vld [vmem:[%s13945_s28 + $0x10c4] ss:$8 sps:$4 sm:$0xff]  }
 0x412   : > { %9976 = vmatprep.subr.bf16.mxu0 %v13454_v43  ;;  %v13532_v43 = vld [vmem:[%s13945_s28 + $0x24c4] ss:$8 sps:$4 sm:$0xff]  }
 0x414   : > { %9157 = vmatpush1.bf16.msra.mxu1 %v13449_v24  ;;  %v13527_v24 = vld [vmem:[%s13945_s28 + $0x10c0] ss:$8 sps:$4 sm:$0xff]  }
 0x415   : > { %9977 = vmatpush1.bf16.msra.mxu0 %v13452_v25  ;;  %9167 = vmatprep.subr.bf16.mxu1 %v13457_v16  ;;  %v13530_v25 = vld [vmem:[%s13945_s28 + $0x24c0] ss:$8 sps:$4 sm:$0xff]   ;;  %v13535_v16 = vld [vmem:[%s13945_s28 + $0x10d4] ss:$8 sps:$4 sm:$0xff]  }
 0x416   : > { %9987 = vmatprep.subr.bf16.mxu0 %v13460_v15  ;;  %v13538_v15 = vld [vmem:[%s13945_s28 + $0x24d4] ss:$8 sps:$4 sm:$0xff]  }
 0x417   : > { %9159 = vmatmul.mubr.bf16.vlgmr.msra.gmra.mrb[0].mxu1 %v1734_v26  ;;  %v13541_v26 = vld [vmem:[%s13945_s28 + $0x10e4] ss:$8 sps:$4 sm:$0xff]  }
 0x418   : > { %9979 = vmatmul.mubr.bf16.vlgmr.msra.gmra.mrb[0].mxu0 %v1979_v47  ;;  %9168 = vmatpush1.bf16.msra.mxu1 %v13455_v37  ;;  %v13544_v47 = vld [vmem:[%s13945_s28 + $0x24e4] ss:$8 sps:$4 sm:$0xff]   ;;  %v13539_v37 = vld [vmem:[%s13945_s28 + $0x10e0] ss:$8 sps:$4 sm:$0xff]  }
 0x419   : > { %9988 = vmatpush1.bf16.msra.mxu0 %v13458_v48  ;;  %9169 = vmatprep.subr.bf16.mxu1 %v13463_v17  ;;  %v13542_v48 = vld [vmem:[%s13945_s28 + $0x24e0] ss:$8 sps:$4 sm:$0xff]   ;;  %v13547_v17 = vld [vmem:[%s13945_s28 + $0x10f4] ss:$8 sps:$4 sm:$0xff]  }
 0x41a   : > { %9989 = vmatprep.subr.bf16.mxu0 %v13466_v49  ;;  %9199 = vmatprep.mubr.bf16.mxu1 %v15298_v51  ;;  %v13550_v49 = vld [vmem:[%s13945_s28 + $0x24f4] ss:$8 sps:$4 sm:$0xff]  }
 0x41b   : > { %10019 = vmatprep.mubr.bf16.mxu0 %v15301_v35 }
 0x41c   : > { %9170 = vmatpush1.bf16.msra.mxu1 %v13461_v36  ;;  %v13545_v36 = vld [vmem:[%s13945_s28 + $0x10f0] ss:$8 sps:$4 sm:$0xff]  }
 0x41d   : > { %9990 = vmatpush1.bf16.msra.mxu0 %v13464_v52  ;;  %9171 = vmatprep.subr.bf16.mxu1 %v13469_v61  ;;  %v13548_v52 = vld [vmem:[%s13945_s28 + $0x24f0] ss:$8 sps:$4 sm:$0xff]   ;;  %v13553_v61 = vld [vmem:[%s13945_s28 + $0x1104] ss:$8 sps:$4 sm:$0xff]  }
 0x41e   : > { %9991 = vmatprep.subr.bf16.mxu0 %v13472_v62  ;;  %v13556_v62 = vld [vmem:[%s13945_s28 + $0x2504] ss:$8 sps:$4 sm:$0xff]  }
 0x420   : > { %9172 = vmatpush1.bf16.msra.mxu1 %v13467_v63  ;;  %v15367_v63 = vrot.slane %v15275_v41, %v13995_v50  ;;  %v1784_v41 = vcombine.high %v15298_v51, %v15298_v51  ;;  %v13565_v51 = vld [vmem:[%s13945_s28 + $0x1124] ss:$8 sps:$4 sm:$0xff]  }
 0x421   : > { %9992 = vmatpush1.bf16.msra.mxu0 %v13470_v0  ;;  %9173 = vmatprep.subr.bf16.mxu1 %v13475_v45  ;;  %v15371_v0 = vrot.slane %v15279_v31, %v13995_v50  ;;  %v13551_v45 = vld [vmem:[%s13945_s28 + $0x1100] ss:$8 sps:$4 sm:$0xff]   ;;  %v13557_v31 = vld [vmem:[%s13945_s28 + $0x1110] ss:$8 sps:$4 sm:$0xff]  }
 0x422   : > { %9993 = vmatprep.subr.bf16.mxu0 %v13478_v1  ;;  %v13554_v1 = vld [vmem:[%s13945_s28 + $0x2500] ss:$8 sps:$4 sm:$0xff]  }
 0x424   : > { %9174 = vmatpush1.bf16.msra.mxu1 %v13473_v54  ;;  %v13559_v54 = vld [vmem:[%s13945_s28 + $0x1114] ss:$8 sps:$4 sm:$0xff]  }
 0x425   : > { %9994 = vmatpush1.bf16.msra.mxu0 %v13476_v56  ;;  %9175 = vmatprep.subr.bf16.mxu1 %v13481_v33  ;;  %v13562_v56 = vld [vmem:[%s13945_s28 + $0x2514] ss:$8 sps:$4 sm:$0xff]   ;;  %v2029_v33 = vcombine.high %v15301_v35, %v15301_v35  ;;  %v13563_v35 = vld [vmem:[%s13945_s28 + $0x1120] ss:$8 sps:$4 sm:$0xff]  }
 0x426   : > { %9995 = vmatprep.subr.bf16.mxu0 %v13484_v3  ;;  %v13560_v3 = vld [vmem:[%s13945_s28 + $0x2510] ss:$8 sps:$4 sm:$0xff]  }
 0x428   : > { %9176 = vmatpush1.bf16.msra.mxu1 %v13479_v58  ;;  %v13568_v58 = vld [vmem:[%s13945_s28 + $0x2524] ss:$8 sps:$4 sm:$0xff]  }
 0x429   : > { %9996 = vmatpush1.bf16.msra.mxu0 %v13482_v4  ;;  %9177 = vmatprep.subr.bf16.mxu1 %v13487_v5  ;;  %v13566_v4 = vld [vmem:[%s13945_s28 + $0x2520] ss:$8 sps:$4 sm:$0xff]   ;;  %v13571_v5 = vld [vmem:[%s13945_s28 + $0x1134] ss:$8 sps:$4 sm:$0xff]  }
 0x42a   : > { %9997 = vmatprep.subr.bf16.mxu0 %v13490_v6  ;;  %v13574_v6 = vld [vmem:[%s13945_s28 + $0x2534] ss:$8 sps:$4 sm:$0xff]  }
 0x42c   : > { %9178 = vmatpush1.bf16.msra.mxu1 %v13485_v7  ;;  %v13569_v7 = vld [vmem:[%s13945_s28 + $0x1130] ss:$8 sps:$4 sm:$0xff]  }
 0x42d   : > { %9998 = vmatpush1.bf16.msra.mxu0 %v13488_v8  ;;  %9179 = vmatprep.subr.bf16.mxu1 %v13493_v40  ;;  %v13572_v8 = vld [vmem:[%s13945_s28 + $0x2530] ss:$8 sps:$4 sm:$0xff]   ;;  %v13577_v40 = vld [vmem:[%s13945_s28 + $0x1144] ss:$8 sps:$4 sm:$0xff]  }
 0x42e   : > { %9999 = vmatprep.subr.bf16.mxu0 %v13496_v10  ;;  %v13580_v10 = vld [vmem:[%s13945_s28 + $0x2544] ss:$8 sps:$4 sm:$0xff]  }
 0x430   : > { %9180 = vmatpush1.bf16.msra.mxu1 %v13491_v11  ;;  %v13575_v11 = vld [vmem:[%s13945_s28 + $0x1140] ss:$8 sps:$4 sm:$0xff]  }
 0x431   : > { %10000 = vmatpush1.bf16.msra.mxu0 %v13494_v12  ;;  %9181 = vmatprep.subr.bf16.mxu1 %v13499_v21  ;;  %v13578_v12 = vld [vmem:[%s13945_s28 + $0x2540] ss:$8 sps:$4 sm:$0xff]   ;;  %v13583_v21 = vld [vmem:[%s13945_s28 + $0x1154] ss:$8 sps:$4 sm:$0xff]  }
 0x432   : > { %10001 = vmatprep.subr.bf16.mxu0 %v13502_v22  ;;  %v13586_v22 = vld [vmem:[%s13945_s28 + $0x2554] ss:$8 sps:$4 sm:$0xff]  }
 0x434   : > { %9182 = vmatpush1.bf16.msra.mxu1 %v13497_v42  ;;  %v13581_v42 = vld [vmem:[%s13945_s28 + $0x1150] ss:$8 sps:$4 sm:$0xff]  }
 0x435   : > { %10002 = vmatpush1.bf16.msra.mxu0 %v13500_v23  ;;  %9183 = vmatprep.subr.bf16.mxu1 %v13505_v14  ;;  %v13584_v23 = vld [vmem:[%s13945_s28 + $0x2550] ss:$8 sps:$4 sm:$0xff]   ;;  %v13589_v14 = vld [vmem:[%s13945_s28 + $0x1164] ss:$8 sps:$4 sm:$0xff]  }
 0x436   : > { %10003 = vmatprep.subr.bf16.mxu0 %v13508_v2  ;;  %v13592_v2 = vld [vmem:[%s13945_s28 + $0x2564] ss:$8 sps:$4 sm:$0xff]  }
 0x438   : > { %9184 = vmatpush1.bf16.msra.mxu1 %v13503_v34  ;;  %v13587_v34 = vld [vmem:[%s13945_s28 + $0x1160] ss:$8 sps:$4 sm:$0xff]  }
 0x439   : > { %10004 = vmatpush1.bf16.msra.mxu0 %v13506_v55  ;;  %9185 = vmatprep.subr.bf16.mxu1 %v13511_v9  ;;  %v13590_v55 = vld [vmem:[%s13945_s28 + $0x2560] ss:$8 sps:$4 sm:$0xff]   ;;  %v13595_v9 = vld [vmem:[%s13945_s28 + $0x1174] ss:$8 sps:$4 sm:$0xff]  }
 0x43a   : > { %10005 = vmatprep.subr.bf16.mxu0 %v13514_v13  ;;  %v13598_v13 = vld [vmem:[%s13945_s28 + $0x2574] ss:$8 sps:$4 sm:$0xff]  }
 0x43c   : > { %9186 = vmatpush1.bf16.msra.mxu1 %v13509_v39  ;;  %v13593_v39 = vld [vmem:[%s13945_s28 + $0x1170] ss:$8 sps:$4 sm:$0xff]  }
 0x43d   : > { %10006 = vmatpush1.bf16.msra.mxu0 %v13512_v53  ;;  %9187 = vmatprep.subr.bf16.mxu1 %v13517_v59  ;;  %v13596_v53 = vld [vmem:[%s13945_s28 + $0x2570] ss:$8 sps:$4 sm:$0xff]   ;;  %v13601_v59 = vld [vmem:[%s13945_s28 + $0x1184] ss:$8 sps:$4 sm:$0xff]  }
 0x43e   : > { %10007 = vmatprep.subr.bf16.mxu0 %v13520_v57  ;;  %v13604_v57 = vld [vmem:[%s13945_s28 + $0x2584] ss:$8 sps:$4 sm:$0xff]  }
 0x440   : > { %9188 = vmatpush1.bf16.msra.mxu1 %v13515_v27  ;;  %v13599_v27 = vld [vmem:[%s13945_s28 + $0x1180] ss:$8 sps:$4 sm:$0xff]  }
 0x441   : > { %10008 = vmatpush1.bf16.msra.mxu0 %v13518_v28  ;;  %9189 = vmatprep.subr.bf16.mxu1 %v13523_v29  ;;  %v13602_v28 = vld [vmem:[%s13945_s28 + $0x2580] ss:$8 sps:$4 sm:$0xff]   ;;  %v13607_v29 = vld [vmem:[%s13945_s28 + $0x1194] ss:$8 sps:$4 sm:$0xff]  }
 0x442   : > { %10009 = vmatprep.subr.bf16.mxu0 %v13526_v30  ;;  %v13610_v30 = vld [vmem:[%s13945_s28 + $0x2594] ss:$8 sps:$4 sm:$0xff]  }
 0x444   : > { %9190 = vmatpush1.bf16.msra.mxu1 %v13521_v18  ;;  %v13605_v18 = vld [vmem:[%s13945_s28 + $0x1190] ss:$8 sps:$4 sm:$0xff]  }
 0x445   : > { %10010 = vmatpush1.bf16.msra.mxu0 %v13524_v38  ;;  %9191 = vmatprep.subr.bf16.mxu1 %v13529_v60  ;;  %v13608_v38 = vld [vmem:[%s13945_s28 + $0x2590] ss:$8 sps:$4 sm:$0xff]   ;;  %v13613_v60 = vld [vmem:[%s13945_s28 + $0x11a4] ss:$8 sps:$4 sm:$0xff]  }
 0x446   : > { %10011 = vmatprep.subr.bf16.mxu0 %v13532_v43  ;;  %v13616_v43 = vld [vmem:[%s13945_s28 + $0x25a4] ss:$8 sps:$4 sm:$0xff]  }
 0x448   : > { %9192 = vmatpush1.bf16.msra.mxu1 %v13527_v24  ;;  %v13611_v24 = vld [vmem:[%s13945_s28 + $0x11a0] ss:$8 sps:$4 sm:$0xff]  }
 0x449   : > { %10012 = vmatpush1.bf16.msra.mxu0 %v13530_v25  ;;  %9193 = vmatprep.subr.bf16.mxu1 %v13535_v16  ;;  %v13614_v25 = vld [vmem:[%s13945_s28 + $0x25a0] ss:$8 sps:$4 sm:$0xff]   ;;  %v13619_v16 = vld [vmem:[%s13945_s28 + $0x11b4] ss:$8 sps:$4 sm:$0xff]  }
 0x44a   : > { %10013 = vmatprep.subr.bf16.mxu0 %v13538_v15  ;;  %v13622_v15 = vld [vmem:[%s13945_s28 + $0x25b4] ss:$8 sps:$4 sm:$0xff]  }
 0x44c   : > { %9194 = vmatpush1.bf16.msra.mxu1 %v13533_v19  ;;  %v13617_v19 = vld [vmem:[%s13945_s28 + $0x11b0] ss:$8 sps:$4 sm:$0xff]  }
 0x44d   : > { %10014 = vmatpush1.bf16.msra.mxu0 %v13536_v46  ;;  %9195 = vmatprep.subr.bf16.mxu1 %v13541_v26  ;;  %v13620_v46 = vld [vmem:[%s13945_s28 + $0x25b0] ss:$8 sps:$4 sm:$0xff]   ;;  %v13625_v26 = vld [vmem:[%s13945_s28 + $0x11c4] ss:$8 sps:$4 sm:$0xff]  }
 0x44e   : > { %10015 = vmatprep.subr.bf16.mxu0 %v13544_v47  ;;  %v13628_v47 = vld [vmem:[%s13945_s28 + $0x25c4] ss:$8 sps:$4 sm:$0xff]  }
 0x450   : > { %9196 = vmatpush1.bf16.msra.mxu1 %v13539_v37  ;;  %v13623_v37 = vld [vmem:[%s13945_s28 + $0x11c0] ss:$8 sps:$4 sm:$0xff]  }
 0x451   : > { %10016 = vmatpush1.bf16.msra.mxu0 %v13542_v48  ;;  %9197 = vmatprep.subr.bf16.mxu1 %v13547_v17  ;;  %v13626_v48 = vld [vmem:[%s13945_s28 + $0x25c0] ss:$8 sps:$4 sm:$0xff]   ;;  %v13631_v17 = vld [vmem:[%s13945_s28 + $0x11d4] ss:$8 sps:$4 sm:$0xff]  }
 0x452   : > { %10017 = vmatprep.subr.bf16.mxu0 %v13550_v49  ;;  %v13634_v49 = vld [vmem:[%s13945_s28 + $0x25d4] ss:$8 sps:$4 sm:$0xff]  }
 0x454   : > { %9198 = vmatpush1.bf16.msra.mxu1 %v13545_v36  ;;  %v13629_v36 = vld [vmem:[%s13945_s28 + $0x11d0] ss:$8 sps:$4 sm:$0xff]  }
 0x455   : > { %10018 = vmatpush1.bf16.msra.mxu0 %v13548_v52  ;;  %9208 = vmatprep.subr.bf16.mxu1 %v13553_v61  ;;  %v13632_v52 = vld [vmem:[%s13945_s28 + $0x25d0] ss:$8 sps:$4 sm:$0xff]   ;;  %v13637_v61 = vld [vmem:[%s13945_s28 + $0x11e4] ss:$8 sps:$4 sm:$0xff]  }
 0x456   : > { %10028 = vmatprep.subr.bf16.mxu0 %v13556_v62  ;;  %v13640_v62 = vld [vmem:[%s13945_s28 + $0x25e4] ss:$8 sps:$4 sm:$0xff]  }
 0x457   : > { %9200 = vmatmul.mubr.bf16.vlgmr.msra.gmra.mrb[0].mxu1 %v15367_v63 }
 0x458   : > { %10020 = vmatmul.mubr.bf16.vlgmr.msra.gmra.mrb[0].mxu0 %v15371_v0  ;;  %9209 = vmatpush1.bf16.msra.mxu1 %v13551_v45  ;;  %v1737_v45 = vcombine.high %v15264_v20, %v15264_v20  ;;  %v13641_v20 = vld [vmem:[%s13945_s28 + $0x11f0] ss:$8 sps:$4 sm:$0xff]  }
 0x459   : > { %10029 = vmatpush1.bf16.msra.mxu0 %v13554_v1  ;;  %9210 = vmatprep.subr.bf16.mxu1 %v13559_v54  ;;  %v1982_v1 = vcombine.high %v15267_v32, %v15267_v32  ;;  %v13635_v54 = vld [vmem:[%s13945_s28 + $0x11e0] ss:$8 sps:$4 sm:$0xff]   ;;  %v13644_v32 = vld [vmem:[%s13945_s28 + $0x25f0] ss:$8 sps:$4 sm:$0xff]  }
 0x45a   : > { %10030 = vmatprep.subr.bf16.mxu0 %v13562_v56  ;;  %9240 = vmatprep.mubr.bf16.mxu1 %v1784_v41  ;;  %v13638_v56 = vld [vmem:[%s13945_s28 + $0x25e0] ss:$8 sps:$4 sm:$0xff]   ;;  %v13643_v41 = vld [vmem:[%s13945_s28 + $0x11f4] ss:$8 sps:$4 sm:$0xff]  }
 0x45b   : > { %10060 = vmatprep.mubr.bf16.mxu0 %v2029_v33  ;;  %v13646_v33 = vld [vmem:[%s13945_s28 + $0x25f4] ss:$8 sps:$4 sm:$0xff]  }
 0x45c   : > { %9211 = vmatpush1.bf16.msra.mxu1 %v13557_v31  ;;  %v15444_v31 = vrot.slane %v1737_v45, %v13995_v50  ;;  %v13713_v45 = vld [vmem:[%s13945_s28 + $0x12b0] ss:$8 sps:$4 sm:$0xff]  }
 0x45d   : > { %10031 = vmatpush1.bf16.msra.mxu0 %v13560_v3  ;;  %9212 = vmatprep.subr.bf16.mxu1 %v13565_v51  ;;  %v15447_v3 = vrot.slane %v1982_v1, %v13995_v50  ;;  %v13649_v51 = vld [vmem:[%s13945_s28 + $0x1204] ss:$8 sps:$4 sm:$0xff]   ;;  %v13716_v1 = vld [vmem:[%s13945_s28 + $0x26b0] ss:$8 sps:$4 sm:$0xff]  }
 0x45e   : > { %10032 = vmatprep.subr.bf16.mxu0 %v13568_v58  ;;  %v13652_v58 = vld [vmem:[%s13945_s28 + $0x2604] ss:$8 sps:$4 sm:$0xff]  }
 0x460   : > { %9213 = vmatpush1.bf16.msra.mxu1 %v13563_v35  ;;  %v1753_v35 = vcombine.high %v15444_v31, %v15444_v31 }
 0x461   : > { %10033 = vmatpush1.bf16.msra.mxu0 %v13566_v4  ;;  %9214 = vmatprep.subr.bf16.mxu1 %v13571_v5  ;;  %v1998_v4 = vcombine.high %v15447_v3, %v15447_v3  ;;  %v1782_v5 = vcombine.high %v15367_v63, %v15367_v63 }
 0x462   : > { %10034 = vmatprep.subr.bf16.mxu0 %v13574_v6  ;;  %v2027_v6 = vcombine.high %v15371_v0, %v15371_v0  ;;  %v13653_v0 = vld [vmem:[%s13945_s28 + $0x1210] ss:$8 sps:$4 sm:$0xff]  }
 0x463   : > { %v15469_v63 = vrot.slane %v1998_v4, %v13995_v50  ;;  %v13736_v4 = vld [vmem:[%s13945_s28 + $0x26e4] ss:$8 sps:$4 sm:$0xff]  }
 0x464   : > { %9215 = vmatpush1.bf16.msra.mxu1 %v13569_v7  ;;  %v13647_v7 = vld [vmem:[%s13945_s28 + $0x1200] ss:$8 sps:$4 sm:$0xff]  }
 0x465   : > { %10035 = vmatpush1.bf16.msra.mxu0 %v13572_v8  ;;  %9216 = vmatprep.subr.bf16.mxu1 %v13577_v40  ;;  %v13650_v8 = vld [vmem:[%s13945_s28 + $0x2600] ss:$8 sps:$4 sm:$0xff]   ;;  %v13655_v40 = vld [vmem:[%s13945_s28 + $0x1214] ss:$8 sps:$4 sm:$0xff]  }
 0x466   : > { %10036 = vmatprep.subr.bf16.mxu0 %v13580_v10  ;;  %v13658_v10 = vld [vmem:[%s13945_s28 + $0x2614] ss:$8 sps:$4 sm:$0xff]  }
 0x468   : > { %9217 = vmatpush1.bf16.msra.mxu1 %v13575_v11  ;;  %v15466_v11 = vrot.slane %v1753_v35, %v13995_v50  ;;  %v13733_v35 = vld [vmem:[%s13945_s28 + $0x12e4] ss:$8 sps:$4 sm:$0xff]  }
 0x469   : > { %10037 = vmatpush1.bf16.msra.mxu0 %v13578_v12  ;;  %9218 = vmatprep.subr.bf16.mxu1 %v13583_v21  ;;  %v13656_v12 = vld [vmem:[%s13945_s28 + $0x2610] ss:$8 sps:$4 sm:$0xff]   ;;  %v13661_v21 = vld [vmem:[%s13945_s28 + $0x1224] ss:$8 sps:$4 sm:$0xff]  }
 0x46a   : > { %10038 = vmatprep.subr.bf16.mxu0 %v13586_v22  ;;  %v13664_v22 = vld [vmem:[%s13945_s28 + $0x2624] ss:$8 sps:$4 sm:$0xff]  }
 0x46c   : > { %9219 = vmatpush1.bf16.msra.mxu1 %v13581_v42  ;;  %v13659_v42 = vld [vmem:[%s13945_s28 + $0x1220] ss:$8 sps:$4 sm:$0xff]  }
 0x46d   : > { %10039 = vmatpush1.bf16.msra.mxu0 %v13584_v23  ;;  %9220 = vmatprep.subr.bf16.mxu1 %v13589_v14  ;;  %v13662_v23 = vld [vmem:[%s13945_s28 + $0x2620] ss:$8 sps:$4 sm:$0xff]   ;;  %v13667_v14 = vld [vmem:[%s13945_s28 + $0x1234] ss:$8 sps:$4 sm:$0xff]  }
 0x46e   : > { %10040 = vmatprep.subr.bf16.mxu0 %v13592_v2  ;;  %v13670_v2 = vld [vmem:[%s13945_s28 + $0x2634] ss:$8 sps:$4 sm:$0xff]  }
 0x470   : > { %9221 = vmatpush1.bf16.msra.mxu1 %v13587_v34  ;;  %v13665_v34 = vld [vmem:[%s13945_s28 + $0x1230] ss:$8 sps:$4 sm:$0xff]  }
 0x471   : > { %10041 = vmatpush1.bf16.msra.mxu0 %v13590_v55  ;;  %9222 = vmatprep.subr.bf16.mxu1 %v13595_v9  ;;  %v13668_v55 = vld [vmem:[%s13945_s28 + $0x2630] ss:$8 sps:$4 sm:$0xff]   ;;  %v13673_v9 = vld [vmem:[%s13945_s28 + $0x1244] ss:$8 sps:$4 sm:$0xff]  }
 0x472   : > { %10042 = vmatprep.subr.bf16.mxu0 %v13598_v13  ;;  %v13676_v13 = vld [vmem:[%s13945_s28 + $0x2644] ss:$8 sps:$4 sm:$0xff]  }
 0x474   : > { %9223 = vmatpush1.bf16.msra.mxu1 %v13593_v39  ;;  %v13671_v39 = vld [vmem:[%s13945_s28 + $0x1240] ss:$8 sps:$4 sm:$0xff]  }
 0x475   : > { %10043 = vmatpush1.bf16.msra.mxu0 %v13596_v53  ;;  %9224 = vmatprep.subr.bf16.mxu1 %v13601_v59  ;;  %v13674_v53 = vld [vmem:[%s13945_s28 + $0x2640] ss:$8 sps:$4 sm:$0xff]   ;;  %v13679_v59 = vld [vmem:[%s13945_s28 + $0x1254] ss:$8 sps:$4 sm:$0xff]  }
 0x476   : > { %10044 = vmatprep.subr.bf16.mxu0 %v13604_v57  ;;  %v13682_v57 = vld [vmem:[%s13945_s28 + $0x2654] ss:$8 sps:$4 sm:$0xff]  }
 0x478   : > { %9225 = vmatpush1.bf16.msra.mxu1 %v13599_v27  ;;  %v13677_v27 = vld [vmem:[%s13945_s28 + $0x1250] ss:$8 sps:$4 sm:$0xff]  }
 0x479   : > { %10045 = vmatpush1.bf16.msra.mxu0 %v13602_v28  ;;  %9226 = vmatprep.subr.bf16.mxu1 %v13607_v29  ;;  %v13680_v28 = vld [vmem:[%s13945_s28 + $0x2650] ss:$8 sps:$4 sm:$0xff]   ;;  %v13685_v29 = vld [vmem:[%s13945_s28 + $0x1264] ss:$8 sps:$4 sm:$0xff]  }
 0x47a   : > { %10046 = vmatprep.subr.bf16.mxu0 %v13610_v30  ;;  %v13688_v30 = vld [vmem:[%s13945_s28 + $0x2664] ss:$8 sps:$4 sm:$0xff]  }
 0x47c   : > { %9227 = vmatpush1.bf16.msra.mxu1 %v13605_v18  ;;  %v13683_v18 = vld [vmem:[%s13945_s28 + $0x1260] ss:$8 sps:$4 sm:$0xff]  }
 0x47d   : > { %10047 = vmatpush1.bf16.msra.mxu0 %v13608_v38  ;;  %9228 = vmatprep.subr.bf16.mxu1 %v13613_v60  ;;  %v13686_v38 = vld [vmem:[%s13945_s28 + $0x2660] ss:$8 sps:$4 sm:$0xff]   ;;  %v13691_v60 = vld [vmem:[%s13945_s28 + $0x1274] ss:$8 sps:$4 sm:$0xff]  }
 0x47e   : > { %10048 = vmatprep.subr.bf16.mxu0 %v13616_v43  ;;  %v13694_v43 = vld [vmem:[%s13945_s28 + $0x2674] ss:$8 sps:$4 sm:$0xff]  }
 0x480   : > { %9229 = vmatpush1.bf16.msra.mxu1 %v13611_v24  ;;  %v13689_v24 = vld [vmem:[%s13945_s28 + $0x1270] ss:$8 sps:$4 sm:$0xff]  }
 0x481   : > { %10049 = vmatpush1.bf16.msra.mxu0 %v13614_v25  ;;  %9230 = vmatprep.subr.bf16.mxu1 %v13619_v16  ;;  %v13692_v25 = vld [vmem:[%s13945_s28 + $0x2670] ss:$8 sps:$4 sm:$0xff]   ;;  %v13697_v16 = vld [vmem:[%s13945_s28 + $0x1284] ss:$8 sps:$4 sm:$0xff]  }
 0x482   : > { %10050 = vmatprep.subr.bf16.mxu0 %v13622_v15  ;;  %v13700_v15 = vld [vmem:[%s13945_s28 + $0x2684] ss:$8 sps:$4 sm:$0xff]  }
 0x484   : > { %9231 = vmatpush1.bf16.msra.mxu1 %v13617_v19  ;;  %v13695_v19 = vld [vmem:[%s13945_s28 + $0x1280] ss:$8 sps:$4 sm:$0xff]  }
 0x485   : > { %10051 = vmatpush1.bf16.msra.mxu0 %v13620_v46  ;;  %9232 = vmatprep.subr.bf16.mxu1 %v13625_v26  ;;  %v13698_v46 = vld [vmem:[%s13945_s28 + $0x2680] ss:$8 sps:$4 sm:$0xff]   ;;  %v13703_v26 = vld [vmem:[%s13945_s28 + $0x1294] ss:$8 sps:$4 sm:$0xff]  }
 0x486   : > { %10052 = vmatprep.subr.bf16.mxu0 %v13628_v47  ;;  %v13706_v47 = vld [vmem:[%s13945_s28 + $0x2694] ss:$8 sps:$4 sm:$0xff]  }
 0x488   : > { %9233 = vmatpush1.bf16.msra.mxu1 %v13623_v37  ;;  %v13701_v37 = vld [vmem:[%s13945_s28 + $0x1290] ss:$8 sps:$4 sm:$0xff]  }
 0x489   : > { %10053 = vmatpush1.bf16.msra.mxu0 %v13626_v48  ;;  %9234 = vmatprep.subr.bf16.mxu1 %v13631_v17  ;;  %v13704_v48 = vld [vmem:[%s13945_s28 + $0x2690] ss:$8 sps:$4 sm:$0xff]   ;;  %v13709_v17 = vld [vmem:[%s13945_s28 + $0x12a4] ss:$8 sps:$4 sm:$0xff]  }
 0x48a   : > { %10054 = vmatprep.subr.bf16.mxu0 %v13634_v49  ;;  %v13712_v49 = vld [vmem:[%s13945_s28 + $0x26a4] ss:$8 sps:$4 sm:$0xff]  }
 0x48c   : > { %9235 = vmatpush1.bf16.msra.mxu1 %v13629_v36  ;;  %v13707_v36 = vld [vmem:[%s13945_s28 + $0x12a0] ss:$8 sps:$4 sm:$0xff]  }
 0x48d   : > { %10055 = vmatpush1.bf16.msra.mxu0 %v13632_v52  ;;  %9236 = vmatprep.subr.bf16.mxu1 %v13637_v61  ;;  %v13710_v52 = vld [vmem:[%s13945_s28 + $0x26a0] ss:$8 sps:$4 sm:$0xff]   ;;  %v13715_v61 = vld [vmem:[%s13945_s28 + $0x12b4] ss:$8 sps:$4 sm:$0xff]  }
 0x48e   : > { %10056 = vmatprep.subr.bf16.mxu0 %v13640_v62  ;;  %v13718_v62 = vld [vmem:[%s13945_s28 + $0x26b4] ss:$8 sps:$4 sm:$0xff]  }
 0x490   : > { %9237 = vmatpush1.bf16.msra.mxu1 %v13635_v54  ;;  %v13721_v54 = vld [vmem:[%s13945_s28 + $0x12c4] ss:$8 sps:$4 sm:$0xff]  }
 0x491   : > { %10057 = vmatpush1.bf16.msra.mxu0 %v13638_v56  ;;  %9238 = vmatprep.subr.bf16.mxu1 %v13643_v41  ;;  %v13724_v56 = vld [vmem:[%s13945_s28 + $0x26c4] ss:$8 sps:$4 sm:$0xff]   ;;  %v13719_v41 = vld [vmem:[%s13945_s28 + $0x12c0] ss:$8 sps:$4 sm:$0xff]  }
 0x492   : > { %10058 = vmatprep.subr.bf16.mxu0 %v13646_v33  ;;  %v13722_v33 = vld [vmem:[%s13945_s28 + $0x26c0] ss:$8 sps:$4 sm:$0xff]  }
 0x494   : > { %9239 = vmatpush1.bf16.msra.mxu1 %v13641_v20  ;;  %v13727_v20 = vld [vmem:[%s13945_s28 + $0x12d4] ss:$8 sps:$4 sm:$0xff]  }
 0x495   : > { %10059 = vmatpush1.bf16.msra.mxu0 %v13644_v32  ;;  %9249 = vmatprep.subr.bf16.mxu1 %v13649_v51  ;;  %v13730_v32 = vld [vmem:[%s13945_s28 + $0x26d4] ss:$8 sps:$4 sm:$0xff]   ;;  %v13725_v51 = vld [vmem:[%s13945_s28 + $0x12d0] ss:$8 sps:$4 sm:$0xff]  }
 0x496   : > { %10069 = vmatprep.subr.bf16.mxu0 %v13652_v58  ;;  %v13728_v58 = vld [vmem:[%s13945_s28 + $0x26d0] ss:$8 sps:$4 sm:$0xff]  }
 0x497   : > { %9241 = vmatmul.mubr.bf16.vlgmr.msra.gmra.mrb[0].mxu1 %v1782_v5  ;;  %v13731_v5 = vld [vmem:[%s13945_s28 + $0x12e0] ss:$8 sps:$4 sm:$0xff]  }
 0x498   : > { %10061 = vmatmul.mubr.bf16.vlgmr.msra.gmra.mrb[0].mxu0 %v2027_v6  ;;  %9250 = vmatpush1.bf16.msra.mxu1 %v13647_v7  ;;  %v13734_v6 = vld [vmem:[%s13945_s28 + $0x26e0] ss:$8 sps:$4 sm:$0xff]   ;;  %v13739_v7 = vld [vmem:[%s13945_s28 + $0x12f4] ss:$8 sps:$4 sm:$0xff]  }
 0x499   : > { %10070 = vmatpush1.bf16.msra.mxu0 %v13650_v8  ;;  %9251 = vmatprep.subr.bf16.mxu1 %v13655_v40  ;;  %v13742_v8 = vld [vmem:[%s13945_s28 + $0x26f4] ss:$8 sps:$4 sm:$0xff]   ;;  %v13737_v40 = vld [vmem:[%s13945_s28 + $0x12f0] ss:$8 sps:$4 sm:$0xff]  }
 0x49a   : > { %10071 = vmatprep.subr.bf16.mxu0 %v13658_v10  ;;  %9281 = vmatprep.mubr.bf16.mxu1 %v15466_v11  ;;  %v13740_v10 = vld [vmem:[%s13945_s28 + $0x26f0] ss:$8 sps:$4 sm:$0xff]  }
 0x49b   : > { %10101 = vmatprep.mubr.bf16.mxu0 %v15469_v63 }
 0x49c   : > { %9252 = vmatpush1.bf16.msra.mxu1 %v13653_v0  ;;  %v13746_v0 = vld [vmem:[%s13945_s28 + $0x1304] ss:$8 sps:$4 sm:$0xff]  }
 0x49d   : > { %10072 = vmatpush1.bf16.msra.mxu0 %v13656_v12  ;;  %9253 = vmatprep.subr.bf16.mxu1 %v13661_v21  ;;  %v13750_v12 = vld [vmem:[%s13945_s28 + $0x2704] ss:$8 sps:$4 sm:$0xff]   ;;  %v15535_v21 = vrot.slane %v15444_v31, %v13995_v50  ;;  %v1785_v31 = vcombine.high %v15466_v11, %v15466_v11 }
 0x49e   : > { %10073 = vmatprep.subr.bf16.mxu0 %v13664_v22  ;;  %v15539_v22 = vrot.slane %v15447_v3, %v13995_v50  ;;  %v13751_v50 = vld [vmem:[%s13945_s28 + $0x1310] ss:$8 sps:$4 sm:$0xff]   ;;  %v13759_v11 = vld [vmem:[%s13945_s28 + $0x1324] ss:$8 sps:$4 sm:$0xff]  }
 0x49f   : > { %v13754_v3 = vld [vmem:[%s13945_s28 + $0x2710] ss:$8 sps:$4 sm:$0xff]  }
 0x4a0   : > { %9254 = vmatpush1.bf16.msra.mxu1 %v13659_v42  ;;  %v13744_v42 = vld [vmem:[%s13945_s28 + $0x1300] ss:$8 sps:$4 sm:$0xff]  }
 0x4a1   : > { %10074 = vmatpush1.bf16.msra.mxu0 %v13662_v23  ;;  %9255 = vmatprep.subr.bf16.mxu1 %v13667_v14  ;;  %v13748_v23 = vld [vmem:[%s13945_s28 + $0x2700] ss:$8 sps:$4 sm:$0xff]   ;;  %v13753_v14 = vld [vmem:[%s13945_s28 + $0x1314] ss:$8 sps:$4 sm:$0xff]  }
 0x4a2   : > { %10075 = vmatprep.subr.bf16.mxu0 %v13670_v2  ;;  %v13756_v2 = vld [vmem:[%s13945_s28 + $0x2714] ss:$8 sps:$4 sm:$0xff]  }
 0x4a4   : > { %9256 = vmatpush1.bf16.msra.mxu1 %v13665_v34  ;;  %v2030_v34 = vcombine.high %v15469_v63, %v15469_v63  ;;  %v13757_v63 = vld [vmem:[%s13945_s28 + $0x1320] ss:$8 sps:$4 sm:$0xff]  }
 0x4a5   : > { %10076 = vmatpush1.bf16.msra.mxu0 %v13668_v55  ;;  %9257 = vmatprep.subr.bf16.mxu1 %v13673_v9  ;;  %v13762_v55 = vld [vmem:[%s13945_s28 + $0x2724] ss:$8 sps:$4 sm:$0xff]   ;;  %v13760_v9 = vld [vmem:[%s13945_s28 + $0x2720] ss:$8 sps:$4 sm:$0xff]  }
 0x4a6   : > { %10077 = vmatprep.subr.bf16.mxu0 %v13676_v13  ;;  %v13765_v13 = vld [vmem:[%s13945_s28 + $0x1334] ss:$8 sps:$4 sm:$0xff]  }
 0x4a8   : > { %9258 = vmatpush1.bf16.msra.mxu1 %v13671_v39  ;;  %v13768_v39 = vld [vmem:[%s13945_s28 + $0x2734] ss:$8 sps:$4 sm:$0xff]  }
 0x4a9   : > { %10078 = vmatpush1.bf16.msra.mxu0 %v13674_v53  ;;  %9259 = vmatprep.subr.bf16.mxu1 %v13679_v59  ;;  %v13763_v53 = vld [vmem:[%s13945_s28 + $0x1330] ss:$8 sps:$4 sm:$0xff]  }
 0x4aa   : > { %10079 = vmatprep.subr.bf16.mxu0 %v13682_v57  ;;  %v13766_v59 = vld [vmem:[%s13945_s28 + $0x2730] ss:$8 sps:$4 sm:$0xff]   ;;  %v13771_v57 = vld [vmem:[%s13945_s28 + $0x1344] ss:$8 sps:$4 sm:$0xff]  }
 0x4ac   : > { %9260 = vmatpush1.bf16.msra.mxu1 %v13677_v27  ;;  %v13774_v27 = vld [vmem:[%s13945_s28 + $0x2744] ss:$8 sps:$4 sm:$0xff]  }
 0x4ad   : > { %10080 = vmatpush1.bf16.msra.mxu0 %v13680_v28  ;;  %9261 = vmatprep.subr.bf16.mxu1 %v13685_v29  ;;  %v13769_v28 = vld [vmem:[%s13945_s28 + $0x1340] ss:$8 sps:$4 sm:$0xff]  }
 0x4ae   : > { %10081 = vmatprep.subr.bf16.mxu0 %v13688_v30  ;;  %v13772_v29 = vld [vmem:[%s13945_s28 + $0x2740] ss:$8 sps:$4 sm:$0xff]   ;;  %v13777_v30 = vld [vmem:[%s13945_s28 + $0x1354] ss:$8 sps:$4 sm:$0xff]  }
 0x4b0   : > { %9262 = vmatpush1.bf16.msra.mxu1 %v13683_v18  ;;  %v13780_v18 = vld [vmem:[%s13945_s28 + $0x2754] ss:$8 sps:$4 sm:$0xff]  }
 0x4b1   : > { %10082 = vmatpush1.bf16.msra.mxu0 %v13686_v38  ;;  %9263 = vmatprep.subr.bf16.mxu1 %v13691_v60  ;;  %v13775_v38 = vld [vmem:[%s13945_s28 + $0x1350] ss:$8 sps:$4 sm:$0xff]  }
 0x4b2   : > { %10083 = vmatprep.subr.bf16.mxu0 %v13694_v43  ;;  %v13778_v60 = vld [vmem:[%s13945_s28 + $0x2750] ss:$8 sps:$4 sm:$0xff]   ;;  %v13783_v43 = vld [vmem:[%s13945_s28 + $0x1364] ss:$8 sps:$4 sm:$0xff]  }
 0x4b4   : > { %9264 = vmatpush1.bf16.msra.mxu1 %v13689_v24  ;;  %v13786_v24 = vld [vmem:[%s13945_s28 + $0x2764] ss:$8 sps:$4 sm:$0xff]  }
 0x4b5   : > { %10084 = vmatpush1.bf16.msra.mxu0 %v13692_v25  ;;  %9265 = vmatprep.subr.bf16.mxu1 %v13697_v16  ;;  %v13781_v25 = vld [vmem:[%s13945_s28 + $0x1360] ss:$8 sps:$4 sm:$0xff]  }
 0x4b6   : > { %10085 = vmatprep.subr.bf16.mxu0 %v13700_v15  ;;  %v13784_v16 = vld [vmem:[%s13945_s28 + $0x2760] ss:$8 sps:$4 sm:$0xff]   ;;  %v13789_v15 = vld [vmem:[%s13945_s28 + $0x1374] ss:$8 sps:$4 sm:$0xff]  }
 0x4b8   : > { %9266 = vmatpush1.bf16.msra.mxu1 %v13695_v19  ;;  %v13792_v19 = vld [vmem:[%s13945_s28 + $0x2774] ss:$8 sps:$4 sm:$0xff]  }
 0x4b9   : > { %10086 = vmatpush1.bf16.msra.mxu0 %v13698_v46  ;;  %9267 = vmatprep.subr.bf16.mxu1 %v13703_v26  ;;  %v13787_v46 = vld [vmem:[%s13945_s28 + $0x1370] ss:$8 sps:$4 sm:$0xff]  }
 0x4ba   : > { %10087 = vmatprep.subr.bf16.mxu0 %v13706_v47  ;;  %v13790_v26 = vld [vmem:[%s13945_s28 + $0x2770] ss:$8 sps:$4 sm:$0xff]   ;;  %v13795_v47 = vld [vmem:[%s13945_s28 + $0x1384] ss:$8 sps:$4 sm:$0xff]  }
 0x4bc   : > { %9268 = vmatpush1.bf16.msra.mxu1 %v13701_v37  ;;  %v13798_v37 = vld [vmem:[%s13945_s28 + $0x2784] ss:$8 sps:$4 sm:$0xff]  }
 0x4bd   : > { %10088 = vmatpush1.bf16.msra.mxu0 %v13704_v48  ;;  %9269 = vmatprep.subr.bf16.mxu1 %v13709_v17  ;;  %v13793_v48 = vld [vmem:[%s13945_s28 + $0x1380] ss:$8 sps:$4 sm:$0xff]  }
 0x4be   : > { %10089 = vmatprep.subr.bf16.mxu0 %v13712_v49  ;;  %v13796_v17 = vld [vmem:[%s13945_s28 + $0x2780] ss:$8 sps:$4 sm:$0xff]   ;;  %v13801_v49 = vld [vmem:[%s13945_s28 + $0x1394] ss:$8 sps:$4 sm:$0xff]  }
 0x4c0   : > { %9270 = vmatpush1.bf16.msra.mxu1 %v13707_v36  ;;  %v13804_v36 = vld [vmem:[%s13945_s28 + $0x2794] ss:$8 sps:$4 sm:$0xff]  }
 0x4c1   : > { %10090 = vmatpush1.bf16.msra.mxu0 %v13710_v52  ;;  %9271 = vmatprep.subr.bf16.mxu1 %v13715_v61  ;;  %v13799_v52 = vld [vmem:[%s13945_s28 + $0x1390] ss:$8 sps:$4 sm:$0xff]  }
 0x4c2   : > { %10091 = vmatprep.subr.bf16.mxu0 %v13718_v62  ;;  %v13802_v61 = vld [vmem:[%s13945_s28 + $0x2790] ss:$8 sps:$4 sm:$0xff]   ;;  %v13807_v62 = vld [vmem:[%s13945_s28 + $0x13a4] ss:$8 sps:$4 sm:$0xff]  }
 0x4c4   : > { %9272 = vmatpush1.bf16.msra.mxu1 %v13713_v45  ;;  %v13810_v45 = vld [vmem:[%s13945_s28 + $0x27a4] ss:$8 sps:$4 sm:$0xff]  }
 0x4c5   : > { %10092 = vmatpush1.bf16.msra.mxu0 %v13716_v1  ;;  %9273 = vmatprep.subr.bf16.mxu1 %v13721_v54  ;;  %v13805_v1 = vld [vmem:[%s13945_s28 + $0x13a0] ss:$8 sps:$4 sm:$0xff]  }
 0x4c6   : > { %10093 = vmatprep.subr.bf16.mxu0 %v13724_v56  ;;  %v13808_v54 = vld [vmem:[%s13945_s28 + $0x27a0] ss:$8 sps:$4 sm:$0xff]   ;;  %v13813_v56 = vld [vmem:[%s13945_s28 + $0x13b4] ss:$8 sps:$4 sm:$0xff]  }
 0x4c8   : > { %9274 = vmatpush1.bf16.msra.mxu1 %v13719_v41  ;;  %v13816_v41 = vld [vmem:[%s13945_s28 + $0x27b4] ss:$8 sps:$4 sm:$0xff]  }
 0x4c9   : > { %10094 = vmatpush1.bf16.msra.mxu0 %v13722_v33  ;;  %9275 = vmatprep.subr.bf16.mxu1 %v13727_v20  ;;  %v13811_v33 = vld [vmem:[%s13945_s28 + $0x13b0] ss:$8 sps:$4 sm:$0xff]  }
 0x4ca   : > { %10095 = vmatprep.subr.bf16.mxu0 %v13730_v32  ;;  %v13814_v20 = vld [vmem:[%s13945_s28 + $0x27b0] ss:$8 sps:$4 sm:$0xff]   ;;  %v13819_v32 = vld [vmem:[%s13945_s28 + $0x13c4] ss:$8 sps:$4 sm:$0xff]  }
 0x4cc   : > { %9276 = vmatpush1.bf16.msra.mxu1 %v13725_v51  ;;  %v13822_v51 = vld [vmem:[%s13945_s28 + $0x27c4] ss:$8 sps:$4 sm:$0xff]  }
 0x4cd   : > { %10096 = vmatpush1.bf16.msra.mxu0 %v13728_v58  ;;  %9277 = vmatprep.subr.bf16.mxu1 %v13733_v35  ;;  %v13817_v58 = vld [vmem:[%s13945_s28 + $0x13c0] ss:$8 sps:$4 sm:$0xff]  }
 0x4ce   : > { %10097 = vmatprep.subr.bf16.mxu0 %v13736_v4  ;;  %v13820_v35 = vld [vmem:[%s13945_s28 + $0x27c0] ss:$8 sps:$4 sm:$0xff]   ;;  %v13825_v4 = vld [vmem:[%s13945_s28 + $0x13d4] ss:$8 sps:$4 sm:$0xff]  }
 0x4d0   : > { %9278 = vmatpush1.bf16.msra.mxu1 %v13731_v5  ;;  %v13828_v5 = vld [vmem:[%s13945_s28 + $0x27d4] ss:$8 sps:$4 sm:$0xff]  }
 0x4d1   : > { %10098 = vmatpush1.bf16.msra.mxu0 %v13734_v6  ;;  %9279 = vmatprep.subr.bf16.mxu1 %v13739_v7  ;;  %v13823_v6 = vld [vmem:[%s13945_s28 + $0x13d0] ss:$8 sps:$4 sm:$0xff]  }
 0x4d2   : > { %10099 = vmatprep.subr.bf16.mxu0 %v13742_v8  ;;  %v13826_v7 = vld [vmem:[%s13945_s28 + $0x27d0] ss:$8 sps:$4 sm:$0xff]   ;;  %v13831_v8 = vld [vmem:[%s13945_s28 + $0x13e4] ss:$8 sps:$4 sm:$0xff]  }
 0x4d4   : > { %9280 = vmatpush1.bf16.msra.mxu1 %v13737_v40  ;;  %v13834_v40 = vld [vmem:[%s13945_s28 + $0x27e4] ss:$8 sps:$4 sm:$0xff]  }
 0x4d5   : > { %10100 = vmatpush1.bf16.msra.mxu0 %v13740_v10  ;;  %9290 = vmatprep.subr.bf16.mxu1 %v13746_v0  ;;  %v13829_v10 = vld [vmem:[%s13945_s28 + $0x13e0] ss:$8 sps:$4 sm:$0xff]  }
 0x4d6   : > { %10110 = vmatprep.subr.bf16.mxu0 %v13750_v12  ;;  %v13832_v0 = vld [vmem:[%s13945_s28 + $0x27e0] ss:$8 sps:$4 sm:$0xff]   ;;  %v13837_v12 = vld [vmem:[%s13945_s28 + $0x13f4] ss:$8 sps:$4 sm:$0xff]  }
 0x4d7   : > { %9282 = vmatmul.mubr.bf16.vlgmr.msra.gmra.mrb[0].mxu1 %v15535_v21 }
 0x4d8   : > { %10102 = vmatmul.mubr.bf16.vlgmr.msra.gmra.mrb[0].mxu0 %v15539_v22  ;;  %9291 = vmatpush1.bf16.msra.mxu1 %v13744_v42  ;;  %v13840_v42 = vld [vmem:[%s13945_s28 + $0x27f4] ss:$8 sps:$4 sm:$0xff]  }
 0x4d9   : > { %10111 = vmatpush1.bf16.msra.mxu0 %v13748_v23  ;;  %9292 = vmatprep.subr.bf16.mxu1 %v13753_v14  ;;  %v13835_v23 = vld [vmem:[%s13945_s28 + $0x13f0] ss:$8 sps:$4 sm:$0xff]  }
 0x4da   : > { %10112 = vmatprep.subr.bf16.mxu0 %v13756_v2  ;;  %9322 = vmatprep.mubr.bf16.mxu1 %v1785_v31  ;;  %v13838_v14 = vld [vmem:[%s13945_s28 + $0x27f0] ss:$8 sps:$4 sm:$0xff]   ;;  %v1783_v2 = vcombine.high %v15535_v21, %v15535_v21  ;;  %v2028_v31 = vcombine.high %v15539_v22, %v15539_v22 }
 0x4db   : > { %10142 = vmatprep.mubr.bf16.mxu0 %v2030_v34  ;;  %v13893_v34 = vmov 1983009808  }
 0x4dc   : > { %9293 = vmatpush1.bf16.msra.mxu1 %v13751_v50  ;;  %v10155_v50 = vunpack.c.l.s4 %v13893_v34 }
 0x4dd   : > { %10113 = vmatpush1.bf16.msra.mxu0 %v13754_v3  ;;  %9294 = vmatprep.subr.bf16.mxu1 %v13759_v11 }
 0x4de   : > { %10114 = vmatprep.subr.bf16.mxu0 %v13762_v55  ;;  %v10156_v3 = vunpack.c.0.s8 %v10155_v50 }
 0x4e0   : > { %9295 = vmatpush1.bf16.msra.mxu1 %v13757_v63 }
 0x4e1   : > { %10115 = vmatpush1.bf16.msra.mxu0 %v13760_v9  ;;  %9296 = vmatprep.subr.bf16.mxu1 %v13765_v13 }
 0x4e2   : > { %10116 = vmatprep.subr.bf16.mxu0 %v13768_v39 }
 0x4e4   : > { %9297 = vmatpush1.bf16.msra.mxu1 %v13763_v53  ;;  %v15614_v53 = vsub.s32 %v10156_v3, %v13987_v44 }
 0x4e5   : > { %10117 = vmatpush1.bf16.msra.mxu0 %v13766_v59  ;;  %9298 = vmatprep.subr.bf16.mxu1 %v13771_v57 }
 0x4e6   : > { %10118 = vmatprep.subr.bf16.mxu0 %v13774_v27 }
 0x4e8   : > { %9299 = vmatpush1.bf16.msra.mxu1 %v13769_v28  ;;  %v240_v28 = vld [vmem:[#allocation2] sm:$0xf] }
 0x4e9   : > { %10119 = vmatpush1.bf16.msra.mxu0 %v13772_v29  ;;  %9300 = vmatprep.subr.bf16.mxu1 %v13777_v30 }
 0x4ea   : > { %10120 = vmatprep.subr.bf16.mxu0 %v13780_v18  ;;  %v10206_v18 = vld [vmem:[%s15753_s3 + $0x80] sm:$0xff] (!%p11665_p6) }
 0x4ec   : > { %9301 = vmatpush1.bf16.msra.mxu1 %v13775_v38  ;;  %v10207_v38 = vld [vmem:[%s15753_s3 + $0x88] sm:$0xff] (!%p11665_p6) }
 0x4ed   : > { %10121 = vmatpush1.bf16.msra.mxu0 %v13778_v60  ;;  %9302 = vmatprep.subr.bf16.mxu1 %v13783_v43  ;;  %v10190_v60 = vld [vmem:[%s15753_s3] sm:$0xff] (!%p11665_p6)  ;;  %v11707_v43 = vpack.c.bf16 (!%p11665_p6), %v10207_v38, %v10206_v18 }
 0x4ee   : > { %10122 = vmatprep.subr.bf16.mxu0 %v13786_v24  ;;  %v10191_v24 = vld [vmem:[%s15753_s3 + $0x8] sm:$0xff] (!%p11665_p6) }
 0x4f0   : > { %9303 = vmatpush1.bf16.msra.mxu1 %v13781_v25  ;;  %v10208_v25 = vld [vmem:[%s15753_s3 + $0x90] sm:$0xff] (!%p11665_p6) }
 0x4f1   : > { %10123 = vmatpush1.bf16.msra.mxu0 %v13784_v16  ;;  %9304 = vmatprep.subr.bf16.mxu1 %v13789_v15  ;;  %v10209_v16 = vld [vmem:[%s15753_s3 + $0x98] sm:$0xff] (!%p11665_p6)  ;;  %v11709_v15 = vpack.c.bf16 (!%p11665_p6), %v10191_v24, %v10190_v60 }
 0x4f2   : > { %10124 = vmatprep.subr.bf16.mxu0 %v13792_v19  ;;  %v11711_v19 = vpack.c.bf16 (!%p11665_p6), %v10209_v16, %v10208_v25 }
 0x4f4   : > { %9305 = vmatpush1.bf16.msra.mxu1 %v13787_v46  ;;  %v10192_v46 = vld [vmem:[%s15753_s3 + $0x10] sm:$0xff] (!%p11665_p6) }
 0x4f5   : > { %10125 = vmatpush1.bf16.msra.mxu0 %v13790_v26  ;;  %9306 = vmatprep.subr.bf16.mxu1 %v13795_v47  ;;  %v10193_v26 = vld [vmem:[%s15753_s3 + $0x18] sm:$0xff] (!%p11665_p6)  ;;  %v10210_v47 = vld [vmem:[%s15753_s3 + $0xa0] sm:$0xff] (!%p11665_p6) }
 0x4f6   : > { %10126 = vmatprep.subr.bf16.mxu0 %v13798_v37  ;;  %v10211_v37 = vld [vmem:[%s15753_s3 + $0xa8] sm:$0xff] (!%p11665_p6) }
 0x4f8   : > { %9307 = vmatpush1.bf16.msra.mxu1 %v13793_v48  ;;  %v11713_v48 = vpack.c.bf16 (!%p11665_p6), %v10193_v26, %v10192_v46 }
 0x4f9   : > { %10127 = vmatpush1.bf16.msra.mxu0 %v13796_v17  ;;  %9308 = vmatprep.subr.bf16.mxu1 %v13801_v49  ;;  %v11715_v17 = vpack.c.bf16 (!%p11665_p6), %v10211_v37, %v10210_v47  ;;  %v10194_v49 = vld [vmem:[%s15753_s3 + $0x20] sm:$0xff] (!%p11665_p6) }
 0x4fa   : > { %10128 = vmatprep.subr.bf16.mxu0 %v13804_v36  ;;  %v10195_v36 = vld [vmem:[%s15753_s3 + $0x28] sm:$0xff] (!%p11665_p6) }
 0x4fc   : > { %9309 = vmatpush1.bf16.msra.mxu1 %v13799_v52  ;;  %v10212_v52 = vld [vmem:[%s15753_s3 + $0xb0] sm:$0xff] (!%p11665_p6) }
 0x4fd   : > { %10129 = vmatpush1.bf16.msra.mxu0 %v13802_v61  ;;  %9310 = vmatprep.subr.bf16.mxu1 %v13807_v62  ;;  %v10213_v61 = vld [vmem:[%s15753_s3 + $0xb8] sm:$0xff] (!%p11665_p6)  ;;  %v11717_v62 = vpack.c.bf16 (!%p11665_p6), %v10195_v36, %v10194_v49 }
 0x4fe   : > { %10130 = vmatprep.subr.bf16.mxu0 %v13810_v45  ;;  %v10173_v45 = vsub.s32 (!%p11665_p6), 0, %v13987_v44 }
 0x500   : > { %9311 = vmatpush1.bf16.msra.mxu1 %v13805_v1  ;;  %v10177_v1 = vsub.s32 (!%p11665_p6), 1, %v13987_v44  ;;  %v10169_v44 = vld [vmem:[%s15752_s2] sm:$0x3] (!%p11665_p6) }
 0x501   : > { %10131 = vmatpush1.bf16.msra.mxu0 %v13808_v54  ;;  %9312 = vmatprep.subr.bf16.mxu1 %v13813_v56  ;;  %v11719_v54 = vpack.c.bf16 (!%p11665_p6), %v10213_v61, %v10212_v52  ;;  %v10196_v56 = vld [vmem:[%s15753_s3 + $0x30] sm:$0xff] (!%p11665_p6) }
 0x502   : > { %10132 = vmatprep.subr.bf16.mxu0 %v13816_v41  ;;  %v10197_v41 = vld [vmem:[%s15753_s3 + $0x38] sm:$0xff] (!%p11665_p6) }
 0x504   : > { %9313 = vmatpush1.bf16.msra.mxu1 %v13811_v33  ;;  %v10214_v33 = vld [vmem:[%s15753_s3 + $0xc0] sm:$0xff] (!%p11665_p6) }
 0x505   : > { %10133 = vmatpush1.bf16.msra.mxu0 %v13814_v20  ;;  %9314 = vmatprep.subr.bf16.mxu1 %v13819_v32  ;;  %v10215_v20 = vld [vmem:[%s15753_s3 + $0xc8] sm:$0xff] (!%p11665_p6)  ;;  %v11721_v32 = vpack.c.bf16 (!%p11665_p6), %v10197_v41, %v10196_v56 }
 0x506   : > { %10134 = vmatprep.subr.bf16.mxu0 %v13822_v51  ;;  %v10174_v51 = vrot.slane (!%p11665_p6), %v10169_v44, %v10173_v45 }
 0x508   : > { %9315 = vmatpush1.bf16.msra.mxu1 %v13817_v58  ;;  %v10178_v58 = vrot.slane (!%p11665_p6), %v10169_v44, %v10177_v1 }
 0x509   : > { %10135 = vmatpush1.bf16.msra.mxu0 %v13820_v35  ;;  %9316 = vmatprep.subr.bf16.mxu1 %v13825_v4  ;;  %v11723_v35 = vpack.c.bf16 (!%p11665_p6), %v10215_v20, %v10214_v33  ;;  %v10198_v4 = vld [vmem:[%s15753_s3 + $0x40] sm:$0xff] (!%p11665_p6) }
 0x50a   : > { %10136 = vmatprep.subr.bf16.mxu0 %v13828_v5  ;;  %v10199_v5 = vld [vmem:[%s15753_s3 + $0x48] sm:$0xff] (!%p11665_p6) }
 0x50c   : > { %9317 = vmatpush1.bf16.msra.mxu1 %v13823_v6  ;;  %v10216_v6 = vld [vmem:[%s15753_s3 + $0xd0] sm:$0xff] (!%p11665_p6) }
 0x50d   : > { %10137 = vmatpush1.bf16.msra.mxu0 %v13826_v7  ;;  %9318 = vmatprep.subr.bf16.mxu1 %v13831_v8  ;;  %v10217_v7 = vld [vmem:[%s15753_s3 + $0xd8] sm:$0xff] (!%p11665_p6)  ;;  %v10179_v8 = vcombine.low (!%p11665_p6), %v10174_v51, %v10178_v58 }
 0x50e   : > { %10138 = vmatprep.subr.bf16.mxu0 %v13834_v40 }
 0x510   : > { %9319 = vmatpush1.bf16.msra.mxu1 %v13829_v10  ;;  %v11725_v10 = vpack.c.bf16 (!%p11665_p6), %v10199_v5, %v10198_v4 }
 0x511   : > { %10139 = vmatpush1.bf16.msra.mxu0 %v13832_v0  ;;  %9320 = vmatprep.subr.bf16.mxu1 %v13837_v12  ;;  %v10186_v0 = vrot.slane (!%p11665_p6), %v10179_v8, %v15614_v53  ;;  %v11727_v12 = vpack.c.bf16 (!%p11665_p6), %v10217_v7, %v10216_v6 }
 0x512   : > { %10140 = vmatprep.subr.bf16.mxu0 %v13840_v42  ;;  %v10200_v42 = vld [vmem:[%s15753_s3 + $0x50] sm:$0xff] (!%p11665_p6) }
 0x514   : > { %9321 = vmatpush1.bf16.msra.mxu1 %v13835_v23  ;;  %v10201_v23 = vld [vmem:[%s15753_s3 + $0x58] sm:$0xff] (!%p11665_p6) }
 0x515   : > { %10141 = vmatpush1.bf16.msra.mxu0 %v13838_v14  ;;  %v10218_v14 = vld [vmem:[%s15753_s3 + $0xe0] sm:$0xff] (!%p11665_p6)  ;;  %v11729_v34 = vpack.c.bf16 (!%p11665_p6), %v10201_v23, %v10200_v42 }
 0x516   : > { %11708 = vmatprep.subr.bf16.mxu0 (!%p11665_p6), %v11707_v43 }
 0x517   : > { %9323 = vmatmul.mubr.bf16.vlgmr.msra.gmra.mrb[0].mxu1 %v1783_v2  ;;  %v10219_v2 = vld [vmem:[%s15753_s3 + $0xe8] sm:$0xff] (!%p11665_p6) }
 0x518   : > { %10143 = vmatmul.mubr.bf16.vlgmr.msra.gmra.mrb[0].mxu0 %v2028_v31  ;;  %v11731_v3 = vpack.c.bf16 (!%p11665_p6), %v10219_v2, %v10218_v14 }
 0x519   : > { %11710 = vmatpush3.bf16.msra.mxu0 (!%p11665_p6), %v11709_v15 }
 0x51a   : > { %11712 = vmatprep.subr.bf16.mxu0 (!%p11665_p6), %v11711_v19 }
 0x51d   : > { %11714 = vmatpush3.bf16.msra.mxu0 (!%p11665_p6), %v11713_v48 }
 0x51e   : > { %11716 = vmatprep.subr.bf16.mxu0 (!%p11665_p6), %v11715_v17 }
 0x521   : > { %11718 = vmatpush3.bf16.msra.mxu0 (!%p11665_p6), %v11717_v62 }
 0x522   : > { %11720 = vmatprep.subr.bf16.mxu0 (!%p11665_p6), %v11719_v54 }
 0x525   : > { %11722 = vmatpush3.bf16.msra.mxu0 (!%p11665_p6), %v11721_v32 }
 0x526   : > { %11724 = vmatprep.subr.bf16.mxu0 (!%p11665_p6), %v11723_v35 }
 0x529   : > { %11726 = vmatpush3.bf16.msra.mxu0 (!%p11665_p6), %v11725_v10 }
 0x52a   : > { %11728 = vmatprep.subr.bf16.mxu0 (!%p11665_p6), %v11727_v12 }
 0x52d   : > { %11730 = vmatpush3.bf16.msra.mxu0 (!%p11665_p6), %v11729_v34 }
 0x52e   : > { %11732 = vmatprep.subr.bf16.mxu0 (!%p11665_p6), %v11731_v3 }
 0x5ea   : > { %v9324_v11 = vpop.f32.mrb[0].mxu1 }
 0x5eb   : > { %v10144_v55 = vpop.f32.mrb[0].mxu0  ;;  %v9326_v9 = vpop.f32.mrb[1].mxu1 }
 0x5ec   : > { %v11739_v63 = vadd.f32 %v10144_v55, %v9324_v11  ;;  %v10146_v13 = vpop.f32.mrb[1].mxu0  ;;  %v9328_v21 = vpop.f32.mrb[2].mxu1  ;;  %v10202_v11 = vld [vmem:[%s15753_s3 + $0x60] sm:$0xff] (!%p11665_p6)  ;;  %v10203_v55 = vld [vmem:[%s15753_s3 + $0x68] sm:$0xff] (!%p11665_p6) }
 0x5ed   : > { %v11740_v39 = vadd.f32 %v10146_v13, %v9326_v9  ;;  %v10148_v59 = vpop.f32.mrb[2].mxu0  ;;  %v9329_v57 = vpop.f32.mrb[3].mxu1  ;;  %v10221_v9 = vld [vmem:[%s15753_s3 + $0xf8] sm:$0xff] (!%p11665_p6) }
 0x5ee   : > { %v10149_v22 = vpop.f32.mrb[3].mxu0  ;;  %v10204_v57 = vld [vmem:[%s15753_s3 + $0x70] sm:$0xff] (!%p11665_p6) }
 0x5ef   : > { %v10153_v27 = vcombine.low %v11739_v63, %v11740_v39  ;;  %10167 = sbr.rel (%p11665_p6) target bundleno = 2074 (0x81a), region = 48  ;;  %v10220_v63 = vld [vmem:[%s15753_s3 + $0xf0] sm:$0xff] (!%p11665_p6)  ;;  %v11733_v39 = vpack.c.bf16 (!%p11665_p6), %v10203_v55, %v10202_v11  ;;  %v10205_v22 = vld [vmem:[%s15753_s3 + $0x78] sm:$0xff] (!%p11665_p6) }
 0x5f0   : > { %v11735_v59 = vpack.c.bf16 (!%p11665_p6), %v10221_v9, %v10220_v63 }
 0x5f1   : > { %v10160_v29 = vrot.slane %v10153_v27, %v15614_v53  ;;  %11734 = vmatpush3.bf16.msra.mxu0 (!%p11665_p6), %v11733_v39  ;;  %v11737_v27 = vpack.c.bf16 (!%p11665_p6), %v10205_v22, %v10204_v57 }
 0x5f2   : > { %11736 = vmatprep.subr.bf16.mxu0 (!%p11665_p6), %v11735_v59 }
 0x5f3   : > { %v10162_v30 = vadd.f32 %v10160_v29, %v240_v28  ;;  %v11666_v29 = vld [vmem:[%s15754_s4] ss:$0 sm:$0xff] (!%p11665_p6) }
 0x5f5   : > { %10163 = vst [vmem:[#allocation2] sm:$0xf] %v10162_v30  ;;  %11738 = vmatpush3.bf16.msra.mxu0 (!%p11665_p6), %v11737_v27 }
 0x5fc   : > { %v10168_v40 = vld [vmem:[#allocation2] sm:$0xf] }
 0x5fd   : > { %v10188_v31 = vadd.f32 %v10186_v0, %v10168_v40 }
 0x5ff   : > { %v10189_v50 = vmax.f32 %v10188_v31, 0.0 }
 0x601   : > { %v10236_v13 = vrot.slane %v10189_v50, %v15614_v53 }
 0x603   : > { %v10237_v21 = vcombine.high %v10236_v13, %v10236_v13 }
 0x605   : > { %10304 = vmatprep.mubr.f32.mxu0 %v10237_v21 }
 0x606   : > { %10305 = vmatmul.mubr.f32.vlgmr.msra.gmra.mrb[0].mxu0 %v10236_v13 }
 0x6d9   : > { %v11704_v53 = vpop.f32.mrb[0].mxu0 }
 0x6da   : > { %v11705_v28 = vpop.f32.mrb[1].mxu0 }
 0x6db   : > { %v11706_v30 = vadd.f32 %v11705_v28, %v11704_v53 }
 0x6dd   : > { %v10307_v18 = vadd.f32 %v11706_v30, %v11666_v29 }
 0x6df   : > { %v10311_v38 = vsel %vm10310_vm0, %v10307_v18, -inf }
 0x6e0   : > { %10312 = vmax.xlane.f32.xlu0 %v10311_v38 }
 0x76d   : > { %v10313_v60 = vpop.xlane.xlu0 %10312 }
 0x76e   : > { %v10314_v43 = vsub.f32 %v10307_v18, %v10313_v60 }
 0x770   : > { %v10315_v24 = vmul.f32 1.442695, %v10314_v43 }
 0x772   : > { %13845 = vpow2.f32 %v10315_v24 }
 0x77c   : > { %v13846_v25 = vpop.eup %13845 }
 0x77d   : > { %v10317_v16 = vsel %vm10310_vm0, %v13846_v25, 0.0 }
 0x77e   : > { %10318 = vadd.xlane.f32.xlu0 %v10317_v16 }
 0x80b   : > { %v10319_v15 = vpop.xlane.xlu0 %10318 }
 0x80c   : > { %13847 = vrcp.f32 %v10319_v15 }
 0x816   : > { %v13848_v19 = vpop.eup %13847 }
 0x817   : > { %v10321_v46 = vmul.f32 %v13848_v19, %v13846_v25 }
 0x819   : > { %10322 = vst.msk [vmem:[#allocation3] sm:$0x3] %vm10310_vm0, %v10321_v46 }
 0x81a PF: > { %p11897_p7 = scmp.eq.s32.totalorder %s13931_s19, 1  ;;  %s13894_s28 = smov [#allocation3]  }
 0x81b   : > { %s10330_s29 = sshll.u32 %s13894_s28, 4  ;;  %s10331_s29 = int_to_ptr.vmem [resolvable:$true] %s10330_s29 }
 0x81c   : > { %s13853_s30 = scalar_lea.vmem %s10331_s29, 32  ;;  %p13860_p11 = scmp.lt.s32.totalorder %s10331_s29, %s10331_s29 }
 0x81d   : > { %p13854_p8 = scmp.ne.s32.totalorder %s10331_s29, %s13853_s30  ;;  %p13861_p12 = scmp.lt.s32.totalorder %s13853_s30, %s13853_s30 }
 0x81f   : > { %p13855_p9 = pnand %p13854_p8, %p11897_p7  ;;  %p13862_p13 = por %p13861_p12, %p13860_p11 }
 0x821   : > { %p13856_p10 = pneg %p13855_p9 }
 0x823   : > { %p13863_p0 = pnand %p13862_p13, %p13856_p10 }
 0x825   : > { %13866 = shalt.err (!%p13863_p0)
}
 0x826   : > { %s13867_s8 = scalar_lea.hbm %s15755_s5, 32 }
 0x827   : > { %p13868_p1 = scmp.ne.s32.totalorder %s15755_s5, %s13867_s8  ;;  %p13873_p4 = scmp.lt.u32.totalorder %s13867_s8, %s15755_s5 }
 0x829   : > { %p13869_p2 = pnand %p13868_p1, %p11897_p7 }
 0x82b   : > { %p13870_p3 = pneg %p13869_p2 }
 0x82d   : > { %p13875_p5 = pnand %p13873_p4, %p13870_p3 }
 0x82f   : > { %13878 = shalt.err (!%p13875_p5)
}
 0x830   : > { %11894 = dma.vmem_to_hbm [thread:$0]  (%p11897_p7), %s10331_s29, 32, %s15755_s5, [#allocation4]  }
 0x831   : > { %13884 = dma.done.wait (%p11897_p7), [#allocation4], 32  }
 0x832   : > { %13886 = vsyncadd (%p11897_p7), [#allocation4], 4294967264 }
 0x833 PF: > { %s16_s18 = sadd.s32 1, %s13889_s18  }
 0x834   : > { %p13_p6 = scmp.ge.s32.totalorder %s16_s18, 4  }
 0x836   :  { %15 = sbr.rel (!%p13_p6) target bundleno = 1 (0x1), region = 78 }
 0x83d   :  { %10343 = vsyncpa [#allocation4], 1 }
 0x83e   :  { %10345 = vsyncpa [#allocation4 + $0x1], 1 }

</bundles_post_ra>
